<compile_context>
chip_gen: v7x
topology: tpu7x:2x2x1
jax: 0.10.0
libtpu: 0.0.40
codegen_flags: <defaults>
</compile_context>

<pallas_src>
import functools

import jax
import jax.numpy as jnp
from jax.experimental import pallas as pl
from jax.experimental.pallas import tpu as pltpu

_BN_EPS = 1e-5
_CPAD = 128            # lane-dense channel padding (every channel dim lives on 128 lanes)
_K1 = 12               # conv1 kernel (stride 2, 'valid')
_K2 = 5                # conv2 kernel (stride 1, padding 2)
_P2 = 2
_OH, _OW = 9, 9        # conv1/conv2 output spatial: (28-12)//2 + 1 = 9
_OWP = 16              # output width padded to a multiple of 8 sublanes -> aligned rows only
_PH, _PW = 4, 4        # pooled spatial (floor(9/2))
_ROWS_I = _OH * _OWP   # 144 padded conv-output rows per image
# per-image padded-input slab rows for conv2: (OH + 2*P2) * OWP = 208, rounded up past the
# largest shifted-window read (start 4*16+4=68, length 144 -> 212) to a multiple of 16.
_SLAB = 224


# ------------------------------ fused forward kernel ------------------------------
def _convnet_kernel(n, a1_ref, w1_ref, b1_ref, g1_ref, be1_ref,
                    w2_ref, b2_ref, g2_ref, be2_ref, wfc_ref, bfc_ref,
                    o_ref, h1pad_ref, h2_ref):
    f32 = jnp.float32
    rows = n * _ROWS_I                 # padded conv-output rows, all images (N*144)
    cnt = float(n * _OH * _OW)         # valid rows -> BN batch-stat normalizer (N*81)

    # Row-validity masks for the width padding (_OW -> _OWP).  The (1, rows) form doubles
    # as the ones-vector that routes the BN column sums / sums-of-squares through the MXU.
    mask_all = ((jax.lax.broadcasted_iota(jnp.int32, (1, rows), 1) % _OWP) < _OW).astype(f32)
    mask_img = ((jax.lax.broadcasted_iota(jnp.int32, (1, _ROWS_I), 1) % _OWP) < _OW).astype(f32)
    valid_col = (jax.lax.broadcasted_iota(jnp.int32, (rows, 1), 0) % _OWP) < _OW

    def bn_relu(acc, s1, s2, gamma, beta):
        # train-mode BatchNorm2d: biased batch stats over the valid N*OH*OW rows
        mean = s1 / cnt
        var = jnp.maximum(s2 / cnt - mean * mean, 0.0)
        return jnp.maximum((acc - mean) * (gamma * jax.lax.rsqrt(var + _BN_EPS)) + beta, 0.0)

    # ---- layer1: Conv2d(1,25,k=12,s=2,'valid') as one im2col matmul + BN(25) + ReLU ----
    acc1 = jnp.dot(a1_ref[...], w1_ref[...], preferred_element_type=f32) + b1_ref[...]
    s1 = jnp.dot(mask_all, acc1, preferred_element_type=f32)          # masked column sums (MXU)
    s2 = jnp.dot(mask_all, acc1 * acc1, preferred_element_type=f32)
    h1 = bn_relu(acc1, s1, s2, g1_ref[...], be1_ref[...])
    h1 = jnp.where(valid_col, h1, 0.0)   # pad-width rows double as conv2's zero padding

    # Scatter h1 into the per-image spatially padded slab (conv2 padding=2):
    # slab row (oh+2)*OWP + (ow+2) == h1 row + 2*OWP + 2 -> one shifted contiguous store.
    h1pad_ref[...] = jnp.zeros_like(h1pad_ref)
    for img in range(n):
        h1pad_ref[img, pl.ds(_P2 * _OWP + _P2, _ROWS_I), :] = (
            h1[img * _ROWS_I:(img + 1) * _ROWS_I, :])

    # ---- layer2: Conv2d(25,64,k=5,p=2) as 25 shifted-window matmuls per image ----
    acc2 = []
    for img in range(n):
        a = jnp.zeros((_ROWS_I, _CPAD), f32)
        for ky in range(_K2):
            for kx in range(_K2):
                win = h1pad_ref[img, pl.ds(ky * _OWP + kx, _ROWS_I), :]     # (144, 128)
                a = a + jnp.dot(win, w2_ref[ky * _K2 + kx], preferred_element_type=f32)
        acc2.append(a + b2_ref[...])

    # BN(64) batch statistics over both images (single pass: sum & sum-of-squares via MXU)
    sum_a = acc2[0]
    sum_sq = acc2[0] * acc2[0]
    for a in acc2[1:]:
        sum_a = sum_a + a
        sum_sq = sum_sq + a * a
    s1 = jnp.dot(mask_img, sum_a, preferred_element_type=f32)
    s2 = jnp.dot(mask_img, sum_sq, preferred_element_type=f32)
    for img in range(n):
        h2_ref[img, :, :] = bn_relu(acc2[img], s1, s2, g2_ref[...], be2_ref[...])

    # ---- MaxPool2d(2,2) fused into the folded (Linear(4,1024) o fc) matmul ----
    accf = jnp.zeros((n, _CPAD), f32)
    for ph in range(_PH):
        for pw in range(_PW):
            r0 = (2 * ph) * _OWP + 2 * pw
            r1 = r0 + _OWP
            pooled = jnp.maximum(
                jnp.maximum(h2_ref[:, r0, :], h2_ref[:, r0 + 1, :]),
                jnp.maximum(h2_ref[:, r1, :], h2_ref[:, r1 + 1, :]))        # (N, 128)
            accf = accf + jnp.dot(pooled, wfc_ref[ph * _PW + pw],
                                  preferred_element_type=f32)
    o_ref[...] = accf + bfc_ref[...]


# ------------------------------ wrapper-side glue ------------------------------
def _im2col_conv1(x):
    """NCHW (N,1,28,28) -> (N*OH*OWP, 144) patch matrix, column order (ky, kx).

    Conv-output width is zero-padded 9 -> 16 so every row group in the kernel is
    sublane-aligned; pad rows are zero patches, masked out of BN stats, never read back.
    """
    n = x.shape[0]
    img = x[:, 0]                                      # Cin == 1
    cols = [img[:, ky:ky + 2 * _OH - 1:2, kx:kx + 2 * _OW - 1:2]
            for ky in range(_K1) for kx in range(_K1)]
    p = jnp.stack(cols, axis=-1)                       # (N, 9, 9, 144)
    p = jnp.pad(p, ((0, 0), (0, 0), (0, _OWP - _OW), (0, 0)))   # (N, 9, 16, 144)
    return p.reshape(n * _ROWS_I, _K1 * _K1)


def init_params(key, num_classes=10):
    """Raw parameters in the original torch shapes."""
    ks = jax.random.split(key, 12)
    p = {}
    p["w1"] = jax.random.normal(ks[0], (25, 1, 12, 12), jnp.float32) * 0.08
    p["b1"] = jax.random.normal(ks[1], (25,), jnp.float32) * 0.01
    p["gamma1"] = 1.0 + 0.1 * jax.random.normal(ks[2], (25,), jnp.float32)
    p["beta1"] = 0.1 * jax.random.normal(ks[3], (25,), jnp.float32)
    p["w2"] = jax.random.normal(ks[4], (64, 25, 5, 5), jnp.float32) * 0.04
    p["b2"] = jax.random.normal(ks[5], (64,), jnp.float32) * 0.01
    p["gamma2"] = 1.0 + 0.1 * jax.random.normal(ks[6], (64,), jnp.float32)
    p["beta2"] = 0.1 * jax.random.normal(ks[7], (64,), jnp.float32)
    p["w3"] = jax.random.normal(ks[8], (1024, 4), jnp.float32) * 0.5        # nn.Linear(4, 1024)
    p["b3"] = jax.random.normal(ks[9], (1024,), jnp.float32) * 0.01
    p["wfc"] = jax.random.normal(ks[10], (num_classes, 64 * 4 * 1024), jnp.float32) * 0.002
    p["bfc"] = jax.random.normal(ks[11], (num_classes,), jnp.float32) * 0.01
    return p


def prep_params(p, num_classes=10):
    """One-time weight prep: kernel column order, lane-dense 128 padding, fc folding."""
    pp = {}

    def vec(v):
        return jnp.pad(v, (0, _CPAD - v.shape[0])).reshape(1, _CPAD)

    # conv1: (25,1,12,12)=(cout,cin,ky,kx) -> (ky,kx,cin,cout) -> (144,25) -> (144,128)
    w1 = p["w1"].transpose(2, 3, 1, 0).reshape(_K1 * _K1 * 1, 25)
    pp["w1"] = jnp.pad(w1, ((0, 0), (0, _CPAD - 25)))
    pp["b1"], pp["gamma1"], pp["beta1"] = vec(p["b1"]), vec(p["gamma1"]), vec(p["beta1"])

    # conv2: (64,25,5,5) -> (ky,kx,cin,cout)=(5,5,25,64) -> pad -> (25 taps, 128, 128)
    w2 = p["w2"].transpose(2, 3, 1, 0)
    w2 = jnp.pad(w2, ((0, 0), (0, 0), (0, _CPAD - 25), (0, _CPAD - 64)))
    pp["w2"] = w2.reshape(_K2 * _K2, _CPAD, _CPAD)
    pp["b2"], pp["gamma2"], pp["beta2"] = vec(p["b2"]), vec(p["gamma2"]), vec(p["beta2"])

    # Fold Linear(4,1024) into fc (exact, both layers are linear).
    # fc weight (C, 64*4*1024) viewed as (c, ch, h, j); torch Linear: y = x @ w3.T + b3.
    wfc_r = p["wfc"].reshape(num_classes, 64, 4, 1024)
    w_eff = jnp.einsum("cahj,jw->cahw", wfc_r, p["w3"])              # (C, 64, 4, 4)
    b_eff = jnp.einsum("cahj,j->c", wfc_r, p["b3"]) + p["bfc"]       # (C,)
    # per pooled position (h, w): a (ch, c) tap matrix, ch and c padded to 128 lanes
    w_eff = w_eff.transpose(2, 3, 1, 0)                              # (4, 4, 64, C)
    w_eff = jnp.pad(w_eff, ((0, 0), (0, 0), (0, _CPAD - 64), (0, _CPAD - num_classes)))
    pp["w_fc"] = w_eff.reshape(_PH * _PW, _CPAD, _CPAD)              # (16, 128, 128)
    pp["b_fc"] = vec(b_eff)
    return pp


@functools.partial(jax.jit, static_argnames=("num_classes",))
def convnet_forward(x, pp, num_classes=10):
    n = x.shape[0]
    a1 = _im2col_conv1(x)        # the only wrapper-side XLA op (one pass over the input)
    out = pl.pallas_call(
        functools.partial(_convnet_kernel, n),
        out_shape=jax.ShapeDtypeStruct((n, _CPAD), jnp.float32),
        in_specs=[pl.BlockSpec(memory_space=pltpu.MemorySpace.VMEM)] * 11,
        out_specs=pl.BlockSpec(memory_space=pltpu.MemorySpace.VMEM),
        scratch_shapes=[
            pltpu.VMEM((n, _SLAB, _CPAD), jnp.float32),     # spatially padded h1 (conv2 input)
            pltpu.VMEM((n, _ROWS_I, _CPAD), jnp.float32),   # h2 (pool / fc input)
        ],
        # ~3.5 MB total residency: fits the scoped-VMEM default on v5e/v6e/v7x; set an
        # explicit limit with headroom anyway (v7x has 64 MiB physical / 32 MiB scoped).
        compiler_params=pltpu.CompilerParams(vmem_limit_bytes=32 * 1024 * 1024),
    )(a1, pp["w1"], pp["b1"], pp["gamma1"], pp["beta1"],
      pp["w2"], pp["b2"], pp["gamma2"], pp["beta2"],
      pp["w_fc"], pp["b_fc"])
    return out[:, :num_classes]


if __name__ == "__main__":
    key = jax.random.PRNGKey(0)
    k_x, k_p = jax.random.split(key)
    x = jax.random.normal(k_x, (2, 1, 28, 28), jnp.float32)   # NCHW
    params = init_params(k_p, num_classes=10)
    prepped = prep_params(params, num_classes=10)             # one-time weight prep / fc fold
    out = convnet_forward(x, prepped, num_classes=10)
    out = jax.block_until_ready(out)
    assert out.shape == (2, 10), out.shape
    assert bool(jnp.all(jnp.isfinite(out)))
    print("KERNEL_OK")
</pallas_src>

<mosaic_0001>
module attributes {stable_mosaic.version = 11 : i64} {
  func.func @_convnet_kernel(%arg0: memref<288x144xf32, #tpu.memory_space<vmem>>, %arg1: memref<144x128xf32, #tpu.memory_space<vmem>>, %arg2: memref<1x128xf32, #tpu.memory_space<vmem>>, %arg3: memref<1x128xf32, #tpu.memory_space<vmem>>, %arg4: memref<1x128xf32, #tpu.memory_space<vmem>>, %arg5: memref<25x128x128xf32, #tpu.memory_space<vmem>>, %arg6: memref<1x128xf32, #tpu.memory_space<vmem>>, %arg7: memref<1x128xf32, #tpu.memory_space<vmem>>, %arg8: memref<1x128xf32, #tpu.memory_space<vmem>>, %arg9: memref<16x128x128xf32, #tpu.memory_space<vmem>>, %arg10: memref<1x128xf32, #tpu.memory_space<vmem>>, %arg11: memref<2x128xf32, #tpu.memory_space<vmem>>, %arg12: memref<2x224x128xf32, #tpu.memory_space<vmem>>, %arg13: memref<2x144x128xf32, #tpu.memory_space<vmem>>) attributes {dimension_semantics = [], scalar_prefetch = 0 : i64, scratch_operands = 2 : i64, tpu.core_type = #tpu.core_type<tc>} {
    %0 = tpu.iota {dimensions = array<i32: 1>} : vector<1x288xi32>
    %c16_i32 = arith.constant 16 : i32
    %c0_i32 = arith.constant 0 : i32
    %1 = arith.cmpi eq, %c16_i32, %c0_i32 : i32
    %c1_i32 = arith.constant 1 : i32
    %2 = arith.select %1, %c1_i32, %c16_i32 : i32
    %3 = vector.broadcast %2 : i32 to vector<1x288xi32>
    %4 = arith.remsi %0, %3 : vector<1x288xi32>
    %c0_i32_0 = arith.constant 0 : i32
    %5 = vector.broadcast %c0_i32_0 : i32 to vector<1x288xi32>
    %6 = arith.cmpi ne, %4, %5 : vector<1x288xi32>
    %c0_i32_1 = arith.constant 0 : i32
    %7 = vector.broadcast %c0_i32_1 : i32 to vector<1x288xi32>
    %8 = arith.cmpi slt, %4, %7 : vector<1x288xi32>
    %c0_i32_2 = arith.constant 0 : i32
    %9 = arith.cmpi slt, %2, %c0_i32_2 : i32
    %10 = vector.broadcast %9 : i1 to vector<1x288xi1>
    %11 = vector.broadcast %10 : vector<1x288xi1> to vector<1x288xi1>
    %12 = arith.xori %8, %11 : vector<1x288xi1>
    %13 = arith.andi %12, %6 : vector<1x288xi1>
    %14 = vector.broadcast %2 : i32 to vector<1x288xi32>
    %15 = arith.addi %4, %14 : vector<1x288xi32>
    %16 = arith.select %13, %15, %4 : vector<1x288xi1>, vector<1x288xi32>
    %c9_i32 = arith.constant 9 : i32
    %17 = vector.broadcast %c9_i32 : i32 to vector<1x288xi32>
    %18 = arith.cmpi slt, %16, %17 : vector<1x288xi32>
    %19 = arith.extui %18 : vector<1x288xi1> to vector<1x288xi32>
    %20 = arith.sitofp %19 : vector<1x288xi32> to vector<1x288xf32>
    %21 = tpu.iota {dimensions = array<i32: 1>} : vector<1x144xi32>
    %c16_i32_3 = arith.constant 16 : i32
    %c0_i32_4 = arith.constant 0 : i32
    %22 = arith.cmpi eq, %c16_i32_3, %c0_i32_4 : i32
    %c1_i32_5 = arith.constant 1 : i32
    %23 = arith.select %22, %c1_i32_5, %c16_i32_3 : i32
    %24 = vector.broadcast %23 : i32 to vector<1x144xi32>
    %25 = arith.remsi %21, %24 : vector<1x144xi32>
    %c0_i32_6 = arith.constant 0 : i32
    %26 = vector.broadcast %c0_i32_6 : i32 to vector<1x144xi32>
    %27 = arith.cmpi ne, %25, %26 : vector<1x144xi32>
    %c0_i32_7 = arith.constant 0 : i32
    %28 = vector.broadcast %c0_i32_7 : i32 to vector<1x144xi32>
    %29 = arith.cmpi slt, %25, %28 : vector<1x144xi32>
    %c0_i32_8 = arith.constant 0 : i32
    %30 = arith.cmpi slt, %23, %c0_i32_8 : i32
    %31 = vector.broadcast %30 : i1 to vector<1x144xi1>
    %32 = vector.broadcast %31 : vector<1x144xi1> to vector<1x144xi1>
    %33 = arith.xori %29, %32 : vector<1x144xi1>
    %34 = arith.andi %33, %27 : vector<1x144xi1>
    %35 = vector.broadcast %23 : i32 to vector<1x144xi32>
    %36 = arith.addi %25, %35 : vector<1x144xi32>
    %37 = arith.select %34, %36, %25 : vector<1x144xi1>, vector<1x144xi32>
    %c9_i32_9 = arith.constant 9 : i32
    %38 = vector.broadcast %c9_i32_9 : i32 to vector<1x144xi32>
    %39 = arith.cmpi slt, %37, %38 : vector<1x144xi32>
    %40 = arith.extui %39 : vector<1x144xi1> to vector<1x144xi32>
    %41 = arith.sitofp %40 : vector<1x144xi32> to vector<1x144xf32>
    %42 = tpu.iota {dimensions = array<i32: 0>} : vector<288x1xi32>
    %c16_i32_10 = arith.constant 16 : i32
    %c0_i32_11 = arith.constant 0 : i32
    %43 = arith.cmpi eq, %c16_i32_10, %c0_i32_11 : i32
    %c1_i32_12 = arith.constant 1 : i32
    %44 = arith.select %43, %c1_i32_12, %c16_i32_10 : i32
    %45 = vector.broadcast %44 : i32 to vector<288x1xi32>
    %46 = arith.remsi %42, %45 : vector<288x1xi32>
    %c0_i32_13 = arith.constant 0 : i32
    %47 = vector.broadcast %c0_i32_13 : i32 to vector<288x1xi32>
    %48 = arith.cmpi ne, %46, %47 : vector<288x1xi32>
    %c0_i32_14 = arith.constant 0 : i32
    %49 = vector.broadcast %c0_i32_14 : i32 to vector<288x1xi32>
    %50 = arith.cmpi slt, %46, %49 : vector<288x1xi32>
    %c0_i32_15 = arith.constant 0 : i32
    %51 = arith.cmpi slt, %44, %c0_i32_15 : i32
    %52 = vector.broadcast %51 : i1 to vector<288x1xi1>
    %53 = vector.broadcast %52 : vector<288x1xi1> to vector<288x1xi1>
    %54 = arith.xori %50, %53 : vector<288x1xi1>
    %55 = arith.andi %54, %48 : vector<288x1xi1>
    %56 = vector.broadcast %44 : i32 to vector<288x1xi32>
    %57 = arith.addi %46, %56 : vector<288x1xi32>
    %58 = arith.select %55, %57, %46 : vector<288x1xi1>, vector<288x1xi32>
    %c9_i32_16 = arith.constant 9 : i32
    %59 = vector.broadcast %c9_i32_16 : i32 to vector<288x1xi32>
    %60 = arith.cmpi slt, %58, %59 : vector<288x1xi32>
    %c0 = arith.constant 0 : index
    %c0_17 = arith.constant 0 : index
    %61 = vector.load %arg0[%c0, %c0_17] : memref<288x144xf32, #tpu.memory_space<vmem>>, vector<288x144xf32>
    %c0_18 = arith.constant 0 : index
    %c0_19 = arith.constant 0 : index
    %62 = vector.load %arg1[%c0_18, %c0_19] : memref<144x128xf32, #tpu.memory_space<vmem>>, vector<144x128xf32>
    %cst = arith.constant dense<0.000000e+00> : vector<288x128xf32>
    %63 = tpu.matmul %61, %62, %cst {dimension_numbers = #tpu.dot_dimension_numbers<[1], [0], [0], [1], [0, 0, 1, 1], [], []>} : vector<288x144xf32>, vector<144x128xf32>, vector<288x128xf32> -> vector<288x128xf32>
    %c0_20 = arith.constant 0 : index
    %c0_21 = arith.constant 0 : index
    %64 = vector.load %arg2[%c0_20, %c0_21] : memref<1x128xf32, #tpu.memory_space<vmem>>, vector<1x128xf32>
    %65 = vector.broadcast %64 : vector<1x128xf32> to vector<288x128xf32>
    %66 = arith.addf %63, %65 : vector<288x128xf32>
    %cst_22 = arith.constant dense<0.000000e+00> : vector<1x128xf32>
    %67 = tpu.matmul %20, %66, %cst_22 {dimension_numbers = #tpu.dot_dimension_numbers<[1], [0], [0], [1], [0, 0, 1, 1], [], []>} : vector<1x288xf32>, vector<288x128xf32>, vector<1x128xf32> -> vector<1x128xf32>
    %68 = arith.mulf %66, %66 : vector<288x128xf32>
    %cst_23 = arith.constant dense<0.000000e+00> : vector<1x128xf32>
    %69 = tpu.matmul %20, %68, %cst_23 {dimension_numbers = #tpu.dot_dimension_numbers<[1], [0], [0], [1], [0, 0, 1, 1], [], []>} : vector<1x288xf32>, vector<288x128xf32>, vector<1x128xf32> -> vector<1x128xf32>
    %c0_24 = arith.constant 0 : index
    %c0_25 = arith.constant 0 : index
    %70 = vector.load %arg3[%c0_24, %c0_25] : memref<1x128xf32, #tpu.memory_space<vmem>>, vector<1x128xf32>
    %c0_26 = arith.constant 0 : index
    %c0_27 = arith.constant 0 : index
    %71 = vector.load %arg4[%c0_26, %c0_27] : memref<1x128xf32, #tpu.memory_space<vmem>>, vector<1x128xf32>
    %cst_28 = arith.constant 1.620000e+02 : f32
    %72 = vector.broadcast %cst_28 : f32 to vector<1x128xf32>
    %73 = arith.divf %67, %72 : vector<1x128xf32>
    %cst_29 = arith.constant 1.620000e+02 : f32
    %74 = vector.broadcast %cst_29 : f32 to vector<1x128xf32>
    %75 = arith.divf %69, %74 : vector<1x128xf32>
    %76 = arith.mulf %73, %73 : vector<1x128xf32>
    %77 = arith.subf %75, %76 : vector<1x128xf32>
    %cst_30 = arith.constant 0.000000e+00 : f32
    %78 = vector.broadcast %cst_30 : f32 to vector<1x128xf32>
    %79 = arith.maximumf %77, %78 : vector<1x128xf32>
    %80 = vector.broadcast %73 : vector<1x128xf32> to vector<288x128xf32>
    %81 = arith.subf %66, %80 : vector<288x128xf32>
    %cst_31 = arith.constant 9.99999974E-6 : f32
    %82 = vector.broadcast %cst_31 : f32 to vector<1x128xf32>
    %83 = arith.addf %79, %82 : vector<1x128xf32>
    %84 = math.rsqrt %83 : vector<1x128xf32>
    %85 = arith.mulf %70, %84 : vector<1x128xf32>
    %86 = vector.broadcast %85 : vector<1x128xf32> to vector<288x128xf32>
    %87 = arith.mulf %81, %86 : vector<288x128xf32>
    %88 = vector.broadcast %71 : vector<1x128xf32> to vector<288x128xf32>
    %89 = arith.addf %87, %88 : vector<288x128xf32>
    %cst_32 = arith.constant 0.000000e+00 : f32
    %90 = vector.broadcast %cst_32 : f32 to vector<288x128xf32>
    %91 = arith.maximumf %89, %90 : vector<288x128xf32>
    %cst_33 = arith.constant 0.000000e+00 : f32
    %92 = vector.shape_cast %60 : vector<288x1xi1> to vector<288x1xi1>
    %93 = vector.broadcast %92 : vector<288x1xi1> to vector<288x128xi1>
    %94 = vector.broadcast %cst_33 : f32 to vector<288x128xf32>
    %95 = arith.select %93, %91, %94 : vector<288x128xi1>, vector<288x128xf32>
    %cst_34 = arith.constant 0.000000e+00 : f32
    %96 = vector.broadcast %cst_34 : f32 to vector<2x224x128xf32>
    %c0_35 = arith.constant 0 : index
    %c0_36 = arith.constant 0 : index
    %c0_37 = arith.constant 0 : index
    %97 = vector.load %arg12[%c0_35, %c0_36, %c0_37] : memref<2x224x128xf32, #tpu.memory_space<vmem>>, vector<2x224x128xf32>
    tpu.vector_store %arg12[%c0_35, %c0_36, %c0_37], %96 {strides = array<i32>} : memref<2x224x128xf32, #tpu.memory_space<vmem>>, vector<2x224x128xf32>,
    %98 = vector.extract_strided_slice %95 {offsets = [0, 0], sizes = [144, 128], strides = [1, 1]} : vector<288x128xf32> to vector<144x128xf32>
    %c0_38 = arith.constant 0 : index
    %c34 = arith.constant 34 : index
    %c0_39 = arith.constant 0 : index
    %99 = vector.load %arg12[%c0_38, %c34, %c0_39] : memref<2x224x128xf32, #tpu.memory_space<vmem>>, vector<1x144x128xf32>
    %100 = vector.shape_cast %99 : vector<1x144x128xf32> to vector<144x128xf32>
    %101 = vector.shape_cast %98 : vector<144x128xf32> to vector<1x144x128xf32>
    tpu.vector_store %arg12[%c0_38, %c34, %c0_39], %101 {strides = array<i32>} : memref<2x224x128xf32, #tpu.memory_space<vmem>>, vector<1x144x128xf32>,
    %102 = vector.extract_strided_slice %95 {offsets = [144, 0], sizes = [144, 128], strides = [1, 1]} : vector<288x128xf32> to vector<144x128xf32>
    %c1 = arith.constant 1 : index
    %c34_40 = arith.constant 34 : index
    %c0_41 = arith.constant 0 : index
    %103 = vector.load %arg12[%c1, %c34_40, %c0_41] : memref<2x224x128xf32, #tpu.memory_space<vmem>>, vector<1x144x128xf32>
    %104 = vector.shape_cast %103 : vector<1x144x128xf32> to vector<144x128xf32>
    %105 = vector.shape_cast %102 : vector<144x128xf32> to vector<1x144x128xf32>
    tpu.vector_store %arg12[%c1, %c34_40, %c0_41], %105 {strides = array<i32>} : memref<2x224x128xf32, #tpu.memory_space<vmem>>, vector<1x144x128xf32>,
    %cst_42 = arith.constant 0.000000e+00 : f32
    %106 = vector.broadcast %cst_42 : f32 to vector<144x128xf32>
    %c0_43 = arith.constant 0 : index
    %c0_44 = arith.constant 0 : index
    %c0_45 = arith.constant 0 : index
    %107 = vector.load %arg12[%c0_43, %c0_44, %c0_45] : memref<2x224x128xf32, #tpu.memory_space<vmem>>, vector<1x144x128xf32>
    %108 = vector.shape_cast %107 : vector<1x144x128xf32> to vector<144x128xf32>
    %c0_46 = arith.constant 0 : index
    %c0_47 = arith.constant 0 : index
    %c0_48 = arith.constant 0 : index
    %109 = vector.load %arg5[%c0_46, %c0_47, %c0_48] : memref<25x128x128xf32, #tpu.memory_space<vmem>>, vector<1x128x128xf32>
    %110 = vector.shape_cast %109 : vector<1x128x128xf32> to vector<128x128xf32>
    %cst_49 = arith.constant dense<0.000000e+00> : vector<144x128xf32>
    %111 = tpu.matmul %108, %110, %cst_49 {dimension_numbers = #tpu.dot_dimension_numbers<[1], [0], [0], [1], [0, 0, 1, 1], [], []>} : vector<144x128xf32>, vector<128x128xf32>, vector<144x128xf32> -> vector<144x128xf32>
    %112 = arith.addf %106, %111 : vector<144x128xf32>
    %c0_50 = arith.constant 0 : index
    %c1_51 = arith.constant 1 : index
    %c0_52 = arith.constant 0 : index
    %113 = vector.load %arg12[%c0_50, %c1_51, %c0_52] : memref<2x224x128xf32, #tpu.memory_space<vmem>>, vector<1x144x128xf32>
    %114 = vector.shape_cast %113 : vector<1x144x128xf32> to vector<144x128xf32>
    %c1_53 = arith.constant 1 : index
    %c0_54 = arith.constant 0 : index
    %c0_55 = arith.constant 0 : index
    %115 = vector.load %arg5[%c1_53, %c0_54, %c0_55] : memref<25x128x128xf32, #tpu.memory_space<vmem>>, vector<1x128x128xf32>
    %116 = vector.shape_cast %115 : vector<1x128x128xf32> to vector<128x128xf32>
    %cst_56 = arith.constant dense<0.000000e+00> : vector<144x128xf32>
    %117 = tpu.matmul %114, %116, %cst_56 {dimension_numbers = #tpu.dot_dimension_numbers<[1], [0], [0], [1], [0, 0, 1, 1], [], []>} : vector<144x128xf32>, vector<128x128xf32>, vector<144x128xf32> -> vector<144x128xf32>
    %118 = arith.addf %112, %117 : vector<144x128xf32>
    %c0_57 = arith.constant 0 : index
    %c2 = arith.constant 2 : index
    %c0_58 = arith.constant 0 : index
    %119 = vector.load %arg12[%c0_57, %c2, %c0_58] : memref<2x224x128xf32, #tpu.memory_space<vmem>>, vector<1x144x128xf32>
    %120 = vector.shape_cast %119 : vector<1x144x128xf32> to vector<144x128xf32>
    %c2_59 = arith.constant 2 : index
    %c0_60 = arith.constant 0 : index
    %c0_61 = arith.constant 0 : index
    %121 = vector.load %arg5[%c2_59, %c0_60, %c0_61] : memref<25x128x128xf32, #tpu.memory_space<vmem>>, vector<1x128x128xf32>
    %122 = vector.shape_cast %121 : vector<1x128x128xf32> to vector<128x128xf32>
    %cst_62 = arith.constant dense<0.000000e+00> : vector<144x128xf32>
    %123 = tpu.matmul %120, %122, %cst_62 {dimension_numbers = #tpu.dot_dimension_numbers<[1], [0], [0], [1], [0, 0, 1, 1], [], []>} : vector<144x128xf32>, vector<128x128xf32>, vector<144x128xf32> -> vector<144x128xf32>
    %124 = arith.addf %118, %123 : vector<144x128xf32>
    %c0_63 = arith.constant 0 : index
    %c3 = arith.constant 3 : index
    %c0_64 = arith.constant 0 : index
    %125 = vector.load %arg12[%c0_63, %c3, %c0_64] : memref<2x224x128xf32, #tpu.memory_space<vmem>>, vector<1x144x128xf32>
    %126 = vector.shape_cast %125 : vector<1x144x128xf32> to vector<144x128xf32>
    %c3_65 = arith.constant 3 : index
    %c0_66 = arith.constant 0 : index
    %c0_67 = arith.constant 0 : index
    %127 = vector.load %arg5[%c3_65, %c0_66, %c0_67] : memref<25x128x128xf32, #tpu.memory_space<vmem>>, vector<1x128x128xf32>
    %128 = vector.shape_cast %127 : vector<1x128x128xf32> to vector<128x128xf32>
    %cst_68 = arith.constant dense<0.000000e+00> : vector<144x128xf32>
    %129 = tpu.matmul %126, %128, %cst_68 {dimension_numbers = #tpu.dot_dimension_numbers<[1], [0], [0], [1], [0, 0, 1, 1], [], []>} : vector<144x128xf32>, vector<128x128xf32>, vector<144x128xf32> -> vector<144x128xf32>
    %130 = arith.addf %124, %129 : vector<144x128xf32>
    %c0_69 = arith.constant 0 : index
    %c4 = arith.constant 4 : index
    %c0_70 = arith.constant 0 : index
    %131 = vector.load %arg12[%c0_69, %c4, %c0_70] : memref<2x224x128xf32, #tpu.memory_space<vmem>>, vector<1x144x128xf32>
    %132 = vector.shape_cast %131 : vector<1x144x128xf32> to vector<144x128xf32>
    %c4_71 = arith.constant 4 : index
    %c0_72 = arith.constant 0 : index
    %c0_73 = arith.constant 0 : index
    %133 = vector.load %arg5[%c4_71, %c0_72, %c0_73] : memref<25x128x128xf32, #tpu.memory_space<vmem>>, vector<1x128x128xf32>
    %134 = vector.shape_cast %133 : vector<1x128x128xf32> to vector<128x128xf32>
    %cst_74 = arith.constant dense<0.000000e+00> : vector<144x128xf32>
    %135 = tpu.matmul %132, %134, %cst_74 {dimension_numbers = #tpu.dot_dimension_numbers<[1], [0], [0], [1], [0, 0, 1, 1], [], []>} : vector<144x128xf32>, vector<128x128xf32>, vector<144x128xf32> -> vector<144x128xf32>
    %136 = arith.addf %130, %135 : vector<144x128xf32>
    %c0_75 = arith.constant 0 : index
    %c16 = arith.constant 16 : index
    %c0_76 = arith.constant 0 : index
    %137 = vector.load %arg12[%c0_75, %c16, %c0_76] : memref<2x224x128xf32, #tpu.memory_space<vmem>>, vector<1x144x128xf32>
    %138 = vector.shape_cast %137 : vector<1x144x128xf32> to vector<144x128xf32>
    %c5 = arith.constant 5 : index
    %c0_77 = arith.constant 0 : index
    %c0_78 = arith.constant 0 : index
    %139 = vector.load %arg5[%c5, %c0_77, %c0_78] : memref<25x128x128xf32, #tpu.memory_space<vmem>>, vector<1x128x128xf32>
    %140 = vector.shape_cast %139 : vector<1x128x128xf32> to vector<128x128xf32>
    %cst_79 = arith.constant dense<0.000000e+00> : vector<144x128xf32>
    %141 = tpu.matmul %138, %140, %cst_79 {dimension_numbers = #tpu.dot_dimension_numbers<[1], [0], [0], [1], [0, 0, 1, 1], [], []>} : vector<144x128xf32>, vector<128x128xf32>, vector<144x128xf32> -> vector<144x128xf32>
    %142 = arith.addf %136, %141 : vector<144x128xf32>
    %c0_80 = arith.constant 0 : index
    %c17 = arith.constant 17 : index
    %c0_81 = arith.constant 0 : index
    %143 = vector.load %arg12[%c0_80, %c17, %c0_81] : memref<2x224x128xf32, #tpu.memory_space<vmem>>, vector<1x144x128xf32>
    %144 = vector.shape_cast %143 : vector<1x144x128xf32> to vector<144x128xf32>
    %c6 = arith.constant 6 : index
    %c0_82 = arith.constant 0 : index
    %c0_83 = arith.constant 0 : index
    %145 = vector.load %arg5[%c6, %c0_82, %c0_83] : memref<25x128x128xf32, #tpu.memory_space<vmem>>, vector<1x128x128xf32>
    %146 = vector.shape_cast %145 : vector<1x128x128xf32> to vector<128x128xf32>
    %cst_84 = arith.constant dense<0.000000e+00> : vector<144x128xf32>
    %147 = tpu.matmul %144, %146, %cst_84 {dimension_numbers = #tpu.dot_dimension_numbers<[1], [0], [0], [1], [0, 0, 1, 1], [], []>} : vector<144x128xf32>, vector<128x128xf32>, vector<144x128xf32> -> vector<144x128xf32>
    %148 = arith.addf %142, %147 : vector<144x128xf32>
    %c0_85 = arith.constant 0 : index
    %c18 = arith.constant 18 : index
    %c0_86 = arith.constant 0 : index
    %149 = vector.load %arg12[%c0_85, %c18, %c0_86] : memref<2x224x128xf32, #tpu.memory_space<vmem>>, vector<1x144x128xf32>
    %150 = vector.shape_cast %149 : vector<1x144x128xf32> to vector<144x128xf32>
    %c7 = arith.constant 7 : index
    %c0_87 = arith.constant 0 : index
    %c0_88 = arith.constant 0 : index
    %151 = vector.load %arg5[%c7, %c0_87, %c0_88] : memref<25x128x128xf32, #tpu.memory_space<vmem>>, vector<1x128x128xf32>
    %152 = vector.shape_cast %151 : vector<1x128x128xf32> to vector<128x128xf32>
    %cst_89 = arith.constant dense<0.000000e+00> : vector<144x128xf32>
    %153 = tpu.matmul %150, %152, %cst_89 {dimension_numbers = #tpu.dot_dimension_numbers<[1], [0], [0], [1], [0, 0, 1, 1], [], []>} : vector<144x128xf32>, vector<128x128xf32>, vector<144x128xf32> -> vector<144x128xf32>
    %154 = arith.addf %148, %153 : vector<144x128xf32>
    %c0_90 = arith.constant 0 : index
    %c19 = arith.constant 19 : index
    %c0_91 = arith.constant 0 : index
    %155 = vector.load %arg12[%c0_90, %c19, %c0_91] : memref<2x224x128xf32, #tpu.memory_space<vmem>>, vector<1x144x128xf32>
    %156 = vector.shape_cast %155 : vector<1x144x128xf32> to vector<144x128xf32>
    %c8 = arith.constant 8 : index
    %c0_92 = arith.constant 0 : index
    %c0_93 = arith.constant 0 : index
    %157 = vector.load %arg5[%c8, %c0_92, %c0_93] : memref<25x128x128xf32, #tpu.memory_space<vmem>>, vector<1x128x128xf32>
    %158 = vector.shape_cast %157 : vector<1x128x128xf32> to vector<128x128xf32>
    %cst_94 = arith.constant dense<0.000000e+00> : vector<144x128xf32>
    %159 = tpu.matmul %156, %158, %cst_94 {dimension_numbers = #tpu.dot_dimension_numbers<[1], [0], [0], [1], [0, 0, 1, 1], [], []>} : vector<144x128xf32>, vector<128x128xf32>, vector<144x128xf32> -> vector<144x128xf32>
    %160 = arith.addf %154, %159 : vector<144x128xf32>
    %c0_95 = arith.constant 0 : index
    %c20 = arith.constant 20 : index
    %c0_96 = arith.constant 0 : index
    %161 = vector.load %arg12[%c0_95, %c20, %c0_96] : memref<2x224x128xf32, #tpu.memory_space<vmem>>, vector<1x144x128xf32>
    %162 = vector.shape_cast %161 : vector<1x144x128xf32> to vector<144x128xf32>
    %c9 = arith.constant 9 : index
    %c0_97 = arith.constant 0 : index
    %c0_98 = arith.constant 0 : index
    %163 = vector.load %arg5[%c9, %c0_97, %c0_98] : memref<25x128x128xf32, #tpu.memory_space<vmem>>, vector<1x128x128xf32>
    %164 = vector.shape_cast %163 : vector<1x128x128xf32> to vector<128x128xf32>
    %cst_99 = arith.constant dense<0.000000e+00> : vector<144x128xf32>
    %165 = tpu.matmul %162, %164, %cst_99 {dimension_numbers = #tpu.dot_dimension_numbers<[1], [0], [0], [1], [0, 0, 1, 1], [], []>} : vector<144x128xf32>, vector<128x128xf32>, vector<144x128xf32> -> vector<144x128xf32>
    %166 = arith.addf %160, %165 : vector<144x128xf32>
    %c0_100 = arith.constant 0 : index
    %c32 = arith.constant 32 : index
    %c0_101 = arith.constant 0 : index
    %167 = vector.load %arg12[%c0_100, %c32, %c0_101] : memref<2x224x128xf32, #tpu.memory_space<vmem>>, vector<1x144x128xf32>
    %168 = vector.shape_cast %167 : vector<1x144x128xf32> to vector<144x128xf32>
    %c10 = arith.constant 10 : index
    %c0_102 = arith.constant 0 : index
    %c0_103 = arith.constant 0 : index
    %169 = vector.load %arg5[%c10, %c0_102, %c0_103] : memref<25x128x128xf32, #tpu.memory_space<vmem>>, vector<1x128x128xf32>
    %170 = vector.shape_cast %169 : vector<1x128x128xf32> to vector<128x128xf32>
    %cst_104 = arith.constant dense<0.000000e+00> : vector<144x128xf32>
    %171 = tpu.matmul %168, %170, %cst_104 {dimension_numbers = #tpu.dot_dimension_numbers<[1], [0], [0], [1], [0, 0, 1, 1], [], []>} : vector<144x128xf32>, vector<128x128xf32>, vector<144x128xf32> -> vector<144x128xf32>
    %172 = arith.addf %166, %171 : vector<144x128xf32>
    %c0_105 = arith.constant 0 : index
    %c33 = arith.constant 33 : index
    %c0_106 = arith.constant 0 : index
    %173 = vector.load %arg12[%c0_105, %c33, %c0_106] : memref<2x224x128xf32, #tpu.memory_space<vmem>>, vector<1x144x128xf32>
    %174 = vector.shape_cast %173 : vector<1x144x128xf32> to vector<144x128xf32>
    %c11 = arith.constant 11 : index
    %c0_107 = arith.constant 0 : index
    %c0_108 = arith.constant 0 : index
    %175 = vector.load %arg5[%c11, %c0_107, %c0_108] : memref<25x128x128xf32, #tpu.memory_space<vmem>>, vector<1x128x128xf32>
    %176 = vector.shape_cast %175 : vector<1x128x128xf32> to vector<128x128xf32>
    %cst_109 = arith.constant dense<0.000000e+00> : vector<144x128xf32>
    %177 = tpu.matmul %174, %176, %cst_109 {dimension_numbers = #tpu.dot_dimension_numbers<[1], [0], [0], [1], [0, 0, 1, 1], [], []>} : vector<144x128xf32>, vector<128x128xf32>, vector<144x128xf32> -> vector<144x128xf32>
    %178 = arith.addf %172, %177 : vector<144x128xf32>
    %c0_110 = arith.constant 0 : index
    %c34_111 = arith.constant 34 : index
    %c0_112 = arith.constant 0 : index
    %179 = vector.load %arg12[%c0_110, %c34_111, %c0_112] : memref<2x224x128xf32, #tpu.memory_space<vmem>>, vector<1x144x128xf32>
    %180 = vector.shape_cast %179 : vector<1x144x128xf32> to vector<144x128xf32>
    %c12 = arith.constant 12 : index
    %c0_113 = arith.constant 0 : index
    %c0_114 = arith.constant 0 : index
    %181 = vector.load %arg5[%c12, %c0_113, %c0_114] : memref<25x128x128xf32, #tpu.memory_space<vmem>>, vector<1x128x128xf32>
    %182 = vector.shape_cast %181 : vector<1x128x128xf32> to vector<128x128xf32>
    %cst_115 = arith.constant dense<0.000000e+00> : vector<144x128xf32>
    %183 = tpu.matmul %180, %182, %cst_115 {dimension_numbers = #tpu.dot_dimension_numbers<[1], [0], [0], [1], [0, 0, 1, 1], [], []>} : vector<144x128xf32>, vector<128x128xf32>, vector<144x128xf32> -> vector<144x128xf32>
    %184 = arith.addf %178, %183 : vector<144x128xf32>
    %c0_116 = arith.constant 0 : index
    %c35 = arith.constant 35 : index
    %c0_117 = arith.constant 0 : index
    %185 = vector.load %arg12[%c0_116, %c35, %c0_117] : memref<2x224x128xf32, #tpu.memory_space<vmem>>, vector<1x144x128xf32>
    %186 = vector.shape_cast %185 : vector<1x144x128xf32> to vector<144x128xf32>
    %c13 = arith.constant 13 : index
    %c0_118 = arith.constant 0 : index
    %c0_119 = arith.constant 0 : index
    %187 = vector.load %arg5[%c13, %c0_118, %c0_119] : memref<25x128x128xf32, #tpu.memory_space<vmem>>, vector<1x128x128xf32>
    %188 = vector.shape_cast %187 : vector<1x128x128xf32> to vector<128x128xf32>
    %cst_120 = arith.constant dense<0.000000e+00> : vector<144x128xf32>
    %189 = tpu.matmul %186, %188, %cst_120 {dimension_numbers = #tpu.dot_dimension_numbers<[1], [0], [0], [1], [0, 0, 1, 1], [], []>} : vector<144x128xf32>, vector<128x128xf32>, vector<144x128xf32> -> vector<144x128xf32>
    %190 = arith.addf %184, %189 : vector<144x128xf32>
    %c0_121 = arith.constant 0 : index
    %c36 = arith.constant 36 : index
    %c0_122 = arith.constant 0 : index
    %191 = vector.load %arg12[%c0_121, %c36, %c0_122] : memref<2x224x128xf32, #tpu.memory_space<vmem>>, vector<1x144x128xf32>
    %192 = vector.shape_cast %191 : vector<1x144x128xf32> to vector<144x128xf32>
    %c14 = arith.constant 14 : index
    %c0_123 = arith.constant 0 : index
    %c0_124 = arith.constant 0 : index
    %193 = vector.load %arg5[%c14, %c0_123, %c0_124] : memref<25x128x128xf32, #tpu.memory_space<vmem>>, vector<1x128x128xf32>
    %194 = vector.shape_cast %193 : vector<1x128x128xf32> to vector<128x128xf32>
    %cst_125 = arith.constant dense<0.000000e+00> : vector<144x128xf32>
    %195 = tpu.matmul %192, %194, %cst_125 {dimension_numbers = #tpu.dot_dimension_numbers<[1], [0], [0], [1], [0, 0, 1, 1], [], []>} : vector<144x128xf32>, vector<128x128xf32>, vector<144x128xf32> -> vector<144x128xf32>
    %196 = arith.addf %190, %195 : vector<144x128xf32>
    %c0_126 = arith.constant 0 : index
    %c48 = arith.constant 48 : index
    %c0_127 = arith.constant 0 : index
    %197 = vector.load %arg12[%c0_126, %c48, %c0_127] : memref<2x224x128xf32, #tpu.memory_space<vmem>>, vector<1x144x128xf32>
    %198 = vector.shape_cast %197 : vector<1x144x128xf32> to vector<144x128xf32>
    %c15 = arith.constant 15 : index
    %c0_128 = arith.constant 0 : index
    %c0_129 = arith.constant 0 : index
    %199 = vector.load %arg5[%c15, %c0_128, %c0_129] : memref<25x128x128xf32, #tpu.memory_space<vmem>>, vector<1x128x128xf32>
    %200 = vector.shape_cast %199 : vector<1x128x128xf32> to vector<128x128xf32>
    %cst_130 = arith.constant dense<0.000000e+00> : vector<144x128xf32>
    %201 = tpu.matmul %198, %200, %cst_130 {dimension_numbers = #tpu.dot_dimension_numbers<[1], [0], [0], [1], [0, 0, 1, 1], [], []>} : vector<144x128xf32>, vector<128x128xf32>, vector<144x128xf32> -> vector<144x128xf32>
    %202 = arith.addf %196, %201 : vector<144x128xf32>
    %c0_131 = arith.constant 0 : index
    %c49 = arith.constant 49 : index
    %c0_132 = arith.constant 0 : index
    %203 = vector.load %arg12[%c0_131, %c49, %c0_132] : memref<2x224x128xf32, #tpu.memory_space<vmem>>, vector<1x144x128xf32>
    %204 = vector.shape_cast %203 : vector<1x144x128xf32> to vector<144x128xf32>
    %c16_133 = arith.constant 16 : index
    %c0_134 = arith.constant 0 : index
    %c0_135 = arith.constant 0 : index
    %205 = vector.load %arg5[%c16_133, %c0_134, %c0_135] : memref<25x128x128xf32, #tpu.memory_space<vmem>>, vector<1x128x128xf32>
    %206 = vector.shape_cast %205 : vector<1x128x128xf32> to vector<128x128xf32>
    %cst_136 = arith.constant dense<0.000000e+00> : vector<144x128xf32>
    %207 = tpu.matmul %204, %206, %cst_136 {dimension_numbers = #tpu.dot_dimension_numbers<[1], [0], [0], [1], [0, 0, 1, 1], [], []>} : vector<144x128xf32>, vector<128x128xf32>, vector<144x128xf32> -> vector<144x128xf32>
    %208 = arith.addf %202, %207 : vector<144x128xf32>
    %c0_137 = arith.constant 0 : index
    %c50 = arith.constant 50 : index
    %c0_138 = arith.constant 0 : index
    %209 = vector.load %arg12[%c0_137, %c50, %c0_138] : memref<2x224x128xf32, #tpu.memory_space<vmem>>, vector<1x144x128xf32>
    %210 = vector.shape_cast %209 : vector<1x144x128xf32> to vector<144x128xf32>
    %c17_139 = arith.constant 17 : index
    %c0_140 = arith.constant 0 : index
    %c0_141 = arith.constant 0 : index
    %211 = vector.load %arg5[%c17_139, %c0_140, %c0_141] : memref<25x128x128xf32, #tpu.memory_space<vmem>>, vector<1x128x128xf32>
    %212 = vector.shape_cast %211 : vector<1x128x128xf32> to vector<128x128xf32>
    %cst_142 = arith.constant dense<0.000000e+00> : vector<144x128xf32>
    %213 = tpu.matmul %210, %212, %cst_142 {dimension_numbers = #tpu.dot_dimension_numbers<[1], [0], [0], [1], [0, 0, 1, 1], [], []>} : vector<144x128xf32>, vector<128x128xf32>, vector<144x128xf32> -> vector<144x128xf32>
    %214 = arith.addf %208, %213 : vector<144x128xf32>
    %c0_143 = arith.constant 0 : index
    %c51 = arith.constant 51 : index
    %c0_144 = arith.constant 0 : index
    %215 = vector.load %arg12[%c0_143, %c51, %c0_144] : memref<2x224x128xf32, #tpu.memory_space<vmem>>, vector<1x144x128xf32>
    %216 = vector.shape_cast %215 : vector<1x144x128xf32> to vector<144x128xf32>
    %c18_145 = arith.constant 18 : index
    %c0_146 = arith.constant 0 : index
    %c0_147 = arith.constant 0 : index
    %217 = vector.load %arg5[%c18_145, %c0_146, %c0_147] : memref<25x128x128xf32, #tpu.memory_space<vmem>>, vector<1x128x128xf32>
    %218 = vector.shape_cast %217 : vector<1x128x128xf32> to vector<128x128xf32>
    %cst_148 = arith.constant dense<0.000000e+00> : vector<144x128xf32>
    %219 = tpu.matmul %216, %218, %cst_148 {dimension_numbers = #tpu.dot_dimension_numbers<[1], [0], [0], [1], [0, 0, 1, 1], [], []>} : vector<144x128xf32>, vector<128x128xf32>, vector<144x128xf32> -> vector<144x128xf32>
    %220 = arith.addf %214, %219 : vector<144x128xf32>
    %c0_149 = arith.constant 0 : index
    %c52 = arith.constant 52 : index
    %c0_150 = arith.constant 0 : index
    %221 = vector.load %arg12[%c0_149, %c52, %c0_150] : memref<2x224x128xf32, #tpu.memory_space<vmem>>, vector<1x144x128xf32>
    %222 = vector.shape_cast %221 : vector<1x144x128xf32> to vector<144x128xf32>
    %c19_151 = arith.constant 19 : index
    %c0_152 = arith.constant 0 : index
    %c0_153 = arith.constant 0 : index
    %223 = vector.load %arg5[%c19_151, %c0_152, %c0_153] : memref<25x128x128xf32, #tpu.memory_space<vmem>>, vector<1x128x128xf32>
    %224 = vector.shape_cast %223 : vector<1x128x128xf32> to vector<128x128xf32>
    %cst_154 = arith.constant dense<0.000000e+00> : vector<144x128xf32>
    %225 = tpu.matmul %222, %224, %cst_154 {dimension_numbers = #tpu.dot_dimension_numbers<[1], [0], [0], [1], [0, 0, 1, 1], [], []>} : vector<144x128xf32>, vector<128x128xf32>, vector<144x128xf32> -> vector<144x128xf32>
    %226 = arith.addf %220, %225 : vector<144x128xf32>
    %c0_155 = arith.constant 0 : index
    %c64 = arith.constant 64 : index
    %c0_156 = arith.constant 0 : index
    %227 = vector.load %arg12[%c0_155, %c64, %c0_156] : memref<2x224x128xf32, #tpu.memory_space<vmem>>, vector<1x144x128xf32>
    %228 = vector.shape_cast %227 : vector<1x144x128xf32> to vector<144x128xf32>
    %c20_157 = arith.constant 20 : index
    %c0_158 = arith.constant 0 : index
    %c0_159 = arith.constant 0 : index
    %229 = vector.load %arg5[%c20_157, %c0_158, %c0_159] : memref<25x128x128xf32, #tpu.memory_space<vmem>>, vector<1x128x128xf32>
    %230 = vector.shape_cast %229 : vector<1x128x128xf32> to vector<128x128xf32>
    %cst_160 = arith.constant dense<0.000000e+00> : vector<144x128xf32>
    %231 = tpu.matmul %228, %230, %cst_160 {dimension_numbers = #tpu.dot_dimension_numbers<[1], [0], [0], [1], [0, 0, 1, 1], [], []>} : vector<144x128xf32>, vector<128x128xf32>, vector<144x128xf32> -> vector<144x128xf32>
    %232 = arith.addf %226, %231 : vector<144x128xf32>
    %c0_161 = arith.constant 0 : index
    %c65 = arith.constant 65 : index
    %c0_162 = arith.constant 0 : index
    %233 = vector.load %arg12[%c0_161, %c65, %c0_162] : memref<2x224x128xf32, #tpu.memory_space<vmem>>, vector<1x144x128xf32>
    %234 = vector.shape_cast %233 : vector<1x144x128xf32> to vector<144x128xf32>
    %c21 = arith.constant 21 : index
    %c0_163 = arith.constant 0 : index
    %c0_164 = arith.constant 0 : index
    %235 = vector.load %arg5[%c21, %c0_163, %c0_164] : memref<25x128x128xf32, #tpu.memory_space<vmem>>, vector<1x128x128xf32>
    %236 = vector.shape_cast %235 : vector<1x128x128xf32> to vector<128x128xf32>
    %cst_165 = arith.constant dense<0.000000e+00> : vector<144x128xf32>
    %237 = tpu.matmul %234, %236, %cst_165 {dimension_numbers = #tpu.dot_dimension_numbers<[1], [0], [0], [1], [0, 0, 1, 1], [], []>} : vector<144x128xf32>, vector<128x128xf32>, vector<144x128xf32> -> vector<144x128xf32>
    %238 = arith.addf %232, %237 : vector<144x128xf32>
    %c0_166 = arith.constant 0 : index
    %c66 = arith.constant 66 : index
    %c0_167 = arith.constant 0 : index
    %239 = vector.load %arg12[%c0_166, %c66, %c0_167] : memref<2x224x128xf32, #tpu.memory_space<vmem>>, vector<1x144x128xf32>
    %240 = vector.shape_cast %239 : vector<1x144x128xf32> to vector<144x128xf32>
    %c22 = arith.constant 22 : index
    %c0_168 = arith.constant 0 : index
    %c0_169 = arith.constant 0 : index
    %241 = vector.load %arg5[%c22, %c0_168, %c0_169] : memref<25x128x128xf32, #tpu.memory_space<vmem>>, vector<1x128x128xf32>
    %242 = vector.shape_cast %241 : vector<1x128x128xf32> to vector<128x128xf32>
    %cst_170 = arith.constant dense<0.000000e+00> : vector<144x128xf32>
    %243 = tpu.matmul %240, %242, %cst_170 {dimension_numbers = #tpu.dot_dimension_numbers<[1], [0], [0], [1], [0, 0, 1, 1], [], []>} : vector<144x128xf32>, vector<128x128xf32>, vector<144x128xf32> -> vector<144x128xf32>
    %244 = arith.addf %238, %243 : vector<144x128xf32>
    %c0_171 = arith.constant 0 : index
    %c67 = arith.constant 67 : index
    %c0_172 = arith.constant 0 : index
    %245 = vector.load %arg12[%c0_171, %c67, %c0_172] : memref<2x224x128xf32, #tpu.memory_space<vmem>>, vector<1x144x128xf32>
    %246 = vector.shape_cast %245 : vector<1x144x128xf32> to vector<144x128xf32>
    %c23 = arith.constant 23 : index
    %c0_173 = arith.constant 0 : index
    %c0_174 = arith.constant 0 : index
    %247 = vector.load %arg5[%c23, %c0_173, %c0_174] : memref<25x128x128xf32, #tpu.memory_space<vmem>>, vector<1x128x128xf32>
    %248 = vector.shape_cast %247 : vector<1x128x128xf32> to vector<128x128xf32>
    %cst_175 = arith.constant dense<0.000000e+00> : vector<144x128xf32>
    %249 = tpu.matmul %246, %248, %cst_175 {dimension_numbers = #tpu.dot_dimension_numbers<[1], [0], [0], [1], [0, 0, 1, 1], [], []>} : vector<144x128xf32>, vector<128x128xf32>, vector<144x128xf32> -> vector<144x128xf32>
    %250 = arith.addf %244, %249 : vector<144x128xf32>
    %c0_176 = arith.constant 0 : index
    %c68 = arith.constant 68 : index
    %c0_177 = arith.constant 0 : index
    %251 = vector.load %arg12[%c0_176, %c68, %c0_177] : memref<2x224x128xf32, #tpu.memory_space<vmem>>, vector<1x144x128xf32>
    %252 = vector.shape_cast %251 : vector<1x144x128xf32> to vector<144x128xf32>
    %c24 = arith.constant 24 : index
    %c0_178 = arith.constant 0 : index
    %c0_179 = arith.constant 0 : index
    %253 = vector.load %arg5[%c24, %c0_178, %c0_179] : memref<25x128x128xf32, #tpu.memory_space<vmem>>, vector<1x128x128xf32>
    %254 = vector.shape_cast %253 : vector<1x128x128xf32> to vector<128x128xf32>
    %cst_180 = arith.constant dense<0.000000e+00> : vector<144x128xf32>
    %255 = tpu.matmul %252, %254, %cst_180 {dimension_numbers = #tpu.dot_dimension_numbers<[1], [0], [0], [1], [0, 0, 1, 1], [], []>} : vector<144x128xf32>, vector<128x128xf32>, vector<144x128xf32> -> vector<144x128xf32>
    %256 = arith.addf %250, %255 : vector<144x128xf32>
    %c0_181 = arith.constant 0 : index
    %c0_182 = arith.constant 0 : index
    %257 = vector.load %arg6[%c0_181, %c0_182] : memref<1x128xf32, #tpu.memory_space<vmem>>, vector<1x128xf32>
    %258 = vector.broadcast %257 : vector<1x128xf32> to vector<144x128xf32>
    %259 = arith.addf %256, %258 : vector<144x128xf32>
    %cst_183 = arith.constant 0.000000e+00 : f32
    %260 = vector.broadcast %cst_183 : f32 to vector<144x128xf32>
    %c1_184 = arith.constant 1 : index
    %c0_185 = arith.constant 0 : index
    %c0_186 = arith.constant 0 : index
    %261 = vector.load %arg12[%c1_184, %c0_185, %c0_186] : memref<2x224x128xf32, #tpu.memory_space<vmem>>, vector<1x144x128xf32>
    %262 = vector.shape_cast %261 : vector<1x144x128xf32> to vector<144x128xf32>
    %c0_187 = arith.constant 0 : index
    %c0_188 = arith.constant 0 : index
    %c0_189 = arith.constant 0 : index
    %263 = vector.load %arg5[%c0_187, %c0_188, %c0_189] : memref<25x128x128xf32, #tpu.memory_space<vmem>>, vector<1x128x128xf32>
    %264 = vector.shape_cast %263 : vector<1x128x128xf32> to vector<128x128xf32>
    %cst_190 = arith.constant dense<0.000000e+00> : vector<144x128xf32>
    %265 = tpu.matmul %262, %264, %cst_190 {dimension_numbers = #tpu.dot_dimension_numbers<[1], [0], [0], [1], [0, 0, 1, 1], [], []>} : vector<144x128xf32>, vector<128x128xf32>, vector<144x128xf32> -> vector<144x128xf32>
    %266 = arith.addf %260, %265 : vector<144x128xf32>
    %c1_191 = arith.constant 1 : index
    %c1_192 = arith.constant 1 : index
    %c0_193 = arith.constant 0 : index
    %267 = vector.load %arg12[%c1_191, %c1_192, %c0_193] : memref<2x224x128xf32, #tpu.memory_space<vmem>>, vector<1x144x128xf32>
    %268 = vector.shape_cast %267 : vector<1x144x128xf32> to vector<144x128xf32>
    %c1_194 = arith.constant 1 : index
    %c0_195 = arith.constant 0 : index
    %c0_196 = arith.constant 0 : index
    %269 = vector.load %arg5[%c1_194, %c0_195, %c0_196] : memref<25x128x128xf32, #tpu.memory_space<vmem>>, vector<1x128x128xf32>
    %270 = vector.shape_cast %269 : vector<1x128x128xf32> to vector<128x128xf32>
    %cst_197 = arith.constant dense<0.000000e+00> : vector<144x128xf32>
    %271 = tpu.matmul %268, %270, %cst_197 {dimension_numbers = #tpu.dot_dimension_numbers<[1], [0], [0], [1], [0, 0, 1, 1], [], []>} : vector<144x128xf32>, vector<128x128xf32>, vector<144x128xf32> -> vector<144x128xf32>
    %272 = arith.addf %266, %271 : vector<144x128xf32>
    %c1_198 = arith.constant 1 : index
    %c2_199 = arith.constant 2 : index
    %c0_200 = arith.constant 0 : index
    %273 = vector.load %arg12[%c1_198, %c2_199, %c0_200] : memref<2x224x128xf32, #tpu.memory_space<vmem>>, vector<1x144x128xf32>
    %274 = vector.shape_cast %273 : vector<1x144x128xf32> to vector<144x128xf32>
    %c2_201 = arith.constant 2 : index
    %c0_202 = arith.constant 0 : index
    %c0_203 = arith.constant 0 : index
    %275 = vector.load %arg5[%c2_201, %c0_202, %c0_203] : memref<25x128x128xf32, #tpu.memory_space<vmem>>, vector<1x128x128xf32>
    %276 = vector.shape_cast %275 : vector<1x128x128xf32> to vector<128x128xf32>
    %cst_204 = arith.constant dense<0.000000e+00> : vector<144x128xf32>
    %277 = tpu.matmul %274, %276, %cst_204 {dimension_numbers = #tpu.dot_dimension_numbers<[1], [0], [0], [1], [0, 0, 1, 1], [], []>} : vector<144x128xf32>, vector<128x128xf32>, vector<144x128xf32> -> vector<144x128xf32>
    %278 = arith.addf %272, %277 : vector<144x128xf32>
    %c1_205 = arith.constant 1 : index
    %c3_206 = arith.constant 3 : index
    %c0_207 = arith.constant 0 : index
    %279 = vector.load %arg12[%c1_205, %c3_206, %c0_207] : memref<2x224x128xf32, #tpu.memory_space<vmem>>, vector<1x144x128xf32>
    %280 = vector.shape_cast %279 : vector<1x144x128xf32> to vector<144x128xf32>
    %c3_208 = arith.constant 3 : index
    %c0_209 = arith.constant 0 : index
    %c0_210 = arith.constant 0 : index
    %281 = vector.load %arg5[%c3_208, %c0_209, %c0_210] : memref<25x128x128xf32, #tpu.memory_space<vmem>>, vector<1x128x128xf32>
    %282 = vector.shape_cast %281 : vector<1x128x128xf32> to vector<128x128xf32>
    %cst_211 = arith.constant dense<0.000000e+00> : vector<144x128xf32>
    %283 = tpu.matmul %280, %282, %cst_211 {dimension_numbers = #tpu.dot_dimension_numbers<[1], [0], [0], [1], [0, 0, 1, 1], [], []>} : vector<144x128xf32>, vector<128x128xf32>, vector<144x128xf32> -> vector<144x128xf32>
    %284 = arith.addf %278, %283 : vector<144x128xf32>
    %c1_212 = arith.constant 1 : index
    %c4_213 = arith.constant 4 : index
    %c0_214 = arith.constant 0 : index
    %285 = vector.load %arg12[%c1_212, %c4_213, %c0_214] : memref<2x224x128xf32, #tpu.memory_space<vmem>>, vector<1x144x128xf32>
    %286 = vector.shape_cast %285 : vector<1x144x128xf32> to vector<144x128xf32>
    %c4_215 = arith.constant 4 : index
    %c0_216 = arith.constant 0 : index
    %c0_217 = arith.constant 0 : index
    %287 = vector.load %arg5[%c4_215, %c0_216, %c0_217] : memref<25x128x128xf32, #tpu.memory_space<vmem>>, vector<1x128x128xf32>
    %288 = vector.shape_cast %287 : vector<1x128x128xf32> to vector<128x128xf32>
    %cst_218 = arith.constant dense<0.000000e+00> : vector<144x128xf32>
    %289 = tpu.matmul %286, %288, %cst_218 {dimension_numbers = #tpu.dot_dimension_numbers<[1], [0], [0], [1], [0, 0, 1, 1], [], []>} : vector<144x128xf32>, vector<128x128xf32>, vector<144x128xf32> -> vector<144x128xf32>
    %290 = arith.addf %284, %289 : vector<144x128xf32>
    %c1_219 = arith.constant 1 : index
    %c16_220 = arith.constant 16 : index
    %c0_221 = arith.constant 0 : index
    %291 = vector.load %arg12[%c1_219, %c16_220, %c0_221] : memref<2x224x128xf32, #tpu.memory_space<vmem>>, vector<1x144x128xf32>
    %292 = vector.shape_cast %291 : vector<1x144x128xf32> to vector<144x128xf32>
    %c5_222 = arith.constant 5 : index
    %c0_223 = arith.constant 0 : index
    %c0_224 = arith.constant 0 : index
    %293 = vector.load %arg5[%c5_222, %c0_223, %c0_224] : memref<25x128x128xf32, #tpu.memory_space<vmem>>, vector<1x128x128xf32>
    %294 = vector.shape_cast %293 : vector<1x128x128xf32> to vector<128x128xf32>
    %cst_225 = arith.constant dense<0.000000e+00> : vector<144x128xf32>
    %295 = tpu.matmul %292, %294, %cst_225 {dimension_numbers = #tpu.dot_dimension_numbers<[1], [0], [0], [1], [0, 0, 1, 1], [], []>} : vector<144x128xf32>, vector<128x128xf32>, vector<144x128xf32> -> vector<144x128xf32>
    %296 = arith.addf %290, %295 : vector<144x128xf32>
    %c1_226 = arith.constant 1 : index
    %c17_227 = arith.constant 17 : index
    %c0_228 = arith.constant 0 : index
    %297 = vector.load %arg12[%c1_226, %c17_227, %c0_228] : memref<2x224x128xf32, #tpu.memory_space<vmem>>, vector<1x144x128xf32>
    %298 = vector.shape_cast %297 : vector<1x144x128xf32> to vector<144x128xf32>
    %c6_229 = arith.constant 6 : index
    %c0_230 = arith.constant 0 : index
    %c0_231 = arith.constant 0 : index
    %299 = vector.load %arg5[%c6_229, %c0_230, %c0_231] : memref<25x128x128xf32, #tpu.memory_space<vmem>>, vector<1x128x128xf32>
    %300 = vector.shape_cast %299 : vector<1x128x128xf32> to vector<128x128xf32>
    %cst_232 = arith.constant dense<0.000000e+00> : vector<144x128xf32>
    %301 = tpu.matmul %298, %300, %cst_232 {dimension_numbers = #tpu.dot_dimension_numbers<[1], [0], [0], [1], [0, 0, 1, 1], [], []>} : vector<144x128xf32>, vector<128x128xf32>, vector<144x128xf32> -> vector<144x128xf32>
    %302 = arith.addf %296, %301 : vector<144x128xf32>
    %c1_233 = arith.constant 1 : index
    %c18_234 = arith.constant 18 : index
    %c0_235 = arith.constant 0 : index
    %303 = vector.load %arg12[%c1_233, %c18_234, %c0_235] : memref<2x224x128xf32, #tpu.memory_space<vmem>>, vector<1x144x128xf32>
    %304 = vector.shape_cast %303 : vector<1x144x128xf32> to vector<144x128xf32>
    %c7_236 = arith.constant 7 : index
    %c0_237 = arith.constant 0 : index
    %c0_238 = arith.constant 0 : index
    %305 = vector.load %arg5[%c7_236, %c0_237, %c0_238] : memref<25x128x128xf32, #tpu.memory_space<vmem>>, vector<1x128x128xf32>
    %306 = vector.shape_cast %305 : vector<1x128x128xf32> to vector<128x128xf32>
    %cst_239 = arith.constant dense<0.000000e+00> : vector<144x128xf32>
    %307 = tpu.matmul %304, %306, %cst_239 {dimension_numbers = #tpu.dot_dimension_numbers<[1], [0], [0], [1], [0, 0, 1, 1], [], []>} : vector<144x128xf32>, vector<128x128xf32>, vector<144x128xf32> -> vector<144x128xf32>
    %308 = arith.addf %302, %307 : vector<144x128xf32>
    %c1_240 = arith.constant 1 : index
    %c19_241 = arith.constant 19 : index
    %c0_242 = arith.constant 0 : index
    %309 = vector.load %arg12[%c1_240, %c19_241, %c0_242] : memref<2x224x128xf32, #tpu.memory_space<vmem>>, vector<1x144x128xf32>
    %310 = vector.shape_cast %309 : vector<1x144x128xf32> to vector<144x128xf32>
    %c8_243 = arith.constant 8 : index
    %c0_244 = arith.constant 0 : index
    %c0_245 = arith.constant 0 : index
    %311 = vector.load %arg5[%c8_243, %c0_244, %c0_245] : memref<25x128x128xf32, #tpu.memory_space<vmem>>, vector<1x128x128xf32>
    %312 = vector.shape_cast %311 : vector<1x128x128xf32> to vector<128x128xf32>
    %cst_246 = arith.constant dense<0.000000e+00> : vector<144x128xf32>
    %313 = tpu.matmul %310, %312, %cst_246 {dimension_numbers = #tpu.dot_dimension_numbers<[1], [0], [0], [1], [0, 0, 1, 1], [], []>} : vector<144x128xf32>, vector<128x128xf32>, vector<144x128xf32> -> vector<144x128xf32>
    %314 = arith.addf %308, %313 : vector<144x128xf32>
    %c1_247 = arith.constant 1 : index
    %c20_248 = arith.constant 20 : index
    %c0_249 = arith.constant 0 : index
    %315 = vector.load %arg12[%c1_247, %c20_248, %c0_249] : memref<2x224x128xf32, #tpu.memory_space<vmem>>, vector<1x144x128xf32>
    %316 = vector.shape_cast %315 : vector<1x144x128xf32> to vector<144x128xf32>
    %c9_250 = arith.constant 9 : index
    %c0_251 = arith.constant 0 : index
    %c0_252 = arith.constant 0 : index
    %317 = vector.load %arg5[%c9_250, %c0_251, %c0_252] : memref<25x128x128xf32, #tpu.memory_space<vmem>>, vector<1x128x128xf32>
    %318 = vector.shape_cast %317 : vector<1x128x128xf32> to vector<128x128xf32>
    %cst_253 = arith.constant dense<0.000000e+00> : vector<144x128xf32>
    %319 = tpu.matmul %316, %318, %cst_253 {dimension_numbers = #tpu.dot_dimension_numbers<[1], [0], [0], [1], [0, 0, 1, 1], [], []>} : vector<144x128xf32>, vector<128x128xf32>, vector<144x128xf32> -> vector<144x128xf32>
    %320 = arith.addf %314, %319 : vector<144x128xf32>
    %c1_254 = arith.constant 1 : index
    %c32_255 = arith.constant 32 : index
    %c0_256 = arith.constant 0 : index
    %321 = vector.load %arg12[%c1_254, %c32_255, %c0_256] : memref<2x224x128xf32, #tpu.memory_space<vmem>>, vector<1x144x128xf32>
    %322 = vector.shape_cast %321 : vector<1x144x128xf32> to vector<144x128xf32>
    %c10_257 = arith.constant 10 : index
    %c0_258 = arith.constant 0 : index
    %c0_259 = arith.constant 0 : index
    %323 = vector.load %arg5[%c10_257, %c0_258, %c0_259] : memref<25x128x128xf32, #tpu.memory_space<vmem>>, vector<1x128x128xf32>
    %324 = vector.shape_cast %323 : vector<1x128x128xf32> to vector<128x128xf32>
    %cst_260 = arith.constant dense<0.000000e+00> : vector<144x128xf32>
    %325 = tpu.matmul %322, %324, %cst_260 {dimension_numbers = #tpu.dot_dimension_numbers<[1], [0], [0], [1], [0, 0, 1, 1], [], []>} : vector<144x128xf32>, vector<128x128xf32>, vector<144x128xf32> -> vector<144x128xf32>
    %326 = arith.addf %320, %325 : vector<144x128xf32>
    %c1_261 = arith.constant 1 : index
    %c33_262 = arith.constant 33 : index
    %c0_263 = arith.constant 0 : index
    %327 = vector.load %arg12[%c1_261, %c33_262, %c0_263] : memref<2x224x128xf32, #tpu.memory_space<vmem>>, vector<1x144x128xf32>
    %328 = vector.shape_cast %327 : vector<1x144x128xf32> to vector<144x128xf32>
    %c11_264 = arith.constant 11 : index
    %c0_265 = arith.constant 0 : index
    %c0_266 = arith.constant 0 : index
    %329 = vector.load %arg5[%c11_264, %c0_265, %c0_266] : memref<25x128x128xf32, #tpu.memory_space<vmem>>, vector<1x128x128xf32>
    %330 = vector.shape_cast %329 : vector<1x128x128xf32> to vector<128x128xf32>
    %cst_267 = arith.constant dense<0.000000e+00> : vector<144x128xf32>
    %331 = tpu.matmul %328, %330, %cst_267 {dimension_numbers = #tpu.dot_dimension_numbers<[1], [0], [0], [1], [0, 0, 1, 1], [], []>} : vector<144x128xf32>, vector<128x128xf32>, vector<144x128xf32> -> vector<144x128xf32>
    %332 = arith.addf %326, %331 : vector<144x128xf32>
    %c1_268 = arith.constant 1 : index
    %c34_269 = arith.constant 34 : index
    %c0_270 = arith.constant 0 : index
    %333 = vector.load %arg12[%c1_268, %c34_269, %c0_270] : memref<2x224x128xf32, #tpu.memory_space<vmem>>, vector<1x144x128xf32>
    %334 = vector.shape_cast %333 : vector<1x144x128xf32> to vector<144x128xf32>
    %c12_271 = arith.constant 12 : index
    %c0_272 = arith.constant 0 : index
    %c0_273 = arith.constant 0 : index
    %335 = vector.load %arg5[%c12_271, %c0_272, %c0_273] : memref<25x128x128xf32, #tpu.memory_space<vmem>>, vector<1x128x128xf32>
    %336 = vector.shape_cast %335 : vector<1x128x128xf32> to vector<128x128xf32>
    %cst_274 = arith.constant dense<0.000000e+00> : vector<144x128xf32>
    %337 = tpu.matmul %334, %336, %cst_274 {dimension_numbers = #tpu.dot_dimension_numbers<[1], [0], [0], [1], [0, 0, 1, 1], [], []>} : vector<144x128xf32>, vector<128x128xf32>, vector<144x128xf32> -> vector<144x128xf32>
    %338 = arith.addf %332, %337 : vector<144x128xf32>
    %c1_275 = arith.constant 1 : index
    %c35_276 = arith.constant 35 : index
    %c0_277 = arith.constant 0 : index
    %339 = vector.load %arg12[%c1_275, %c35_276, %c0_277] : memref<2x224x128xf32, #tpu.memory_space<vmem>>, vector<1x144x128xf32>
    %340 = vector.shape_cast %339 : vector<1x144x128xf32> to vector<144x128xf32>
    %c13_278 = arith.constant 13 : index
    %c0_279 = arith.constant 0 : index
    %c0_280 = arith.constant 0 : index
    %341 = vector.load %arg5[%c13_278, %c0_279, %c0_280] : memref<25x128x128xf32, #tpu.memory_space<vmem>>, vector<1x128x128xf32>
    %342 = vector.shape_cast %341 : vector<1x128x128xf32> to vector<128x128xf32>
    %cst_281 = arith.constant dense<0.000000e+00> : vector<144x128xf32>
    %343 = tpu.matmul %340, %342, %cst_281 {dimension_numbers = #tpu.dot_dimension_numbers<[1], [0], [0], [1], [0, 0, 1, 1], [], []>} : vector<144x128xf32>, vector<128x128xf32>, vector<144x128xf32> -> vector<144x128xf32>
    %344 = arith.addf %338, %343 : vector<144x128xf32>
    %c1_282 = arith.constant 1 : index
    %c36_283 = arith.constant 36 : index
    %c0_284 = arith.constant 0 : index
    %345 = vector.load %arg12[%c1_282, %c36_283, %c0_284] : memref<2x224x128xf32, #tpu.memory_space<vmem>>, vector<1x144x128xf32>
    %346 = vector.shape_cast %345 : vector<1x144x128xf32> to vector<144x128xf32>
    %c14_285 = arith.constant 14 : index
    %c0_286 = arith.constant 0 : index
    %c0_287 = arith.constant 0 : index
    %347 = vector.load %arg5[%c14_285, %c0_286, %c0_287] : memref<25x128x128xf32, #tpu.memory_space<vmem>>, vector<1x128x128xf32>
    %348 = vector.shape_cast %347 : vector<1x128x128xf32> to vector<128x128xf32>
    %cst_288 = arith.constant dense<0.000000e+00> : vector<144x128xf32>
    %349 = tpu.matmul %346, %348, %cst_288 {dimension_numbers = #tpu.dot_dimension_numbers<[1], [0], [0], [1], [0, 0, 1, 1], [], []>} : vector<144x128xf32>, vector<128x128xf32>, vector<144x128xf32> -> vector<144x128xf32>
    %350 = arith.addf %344, %349 : vector<144x128xf32>
    %c1_289 = arith.constant 1 : index
    %c48_290 = arith.constant 48 : index
    %c0_291 = arith.constant 0 : index
    %351 = vector.load %arg12[%c1_289, %c48_290, %c0_291] : memref<2x224x128xf32, #tpu.memory_space<vmem>>, vector<1x144x128xf32>
    %352 = vector.shape_cast %351 : vector<1x144x128xf32> to vector<144x128xf32>
    %c15_292 = arith.constant 15 : index
    %c0_293 = arith.constant 0 : index
    %c0_294 = arith.constant 0 : index
    %353 = vector.load %arg5[%c15_292, %c0_293, %c0_294] : memref<25x128x128xf32, #tpu.memory_space<vmem>>, vector<1x128x128xf32>
    %354 = vector.shape_cast %353 : vector<1x128x128xf32> to vector<128x128xf32>
    %cst_295 = arith.constant dense<0.000000e+00> : vector<144x128xf32>
    %355 = tpu.matmul %352, %354, %cst_295 {dimension_numbers = #tpu.dot_dimension_numbers<[1], [0], [0], [1], [0, 0, 1, 1], [], []>} : vector<144x128xf32>, vector<128x128xf32>, vector<144x128xf32> -> vector<144x128xf32>
    %356 = arith.addf %350, %355 : vector<144x128xf32>
    %c1_296 = arith.constant 1 : index
    %c49_297 = arith.constant 49 : index
    %c0_298 = arith.constant 0 : index
    %357 = vector.load %arg12[%c1_296, %c49_297, %c0_298] : memref<2x224x128xf32, #tpu.memory_space<vmem>>, vector<1x144x128xf32>
    %358 = vector.shape_cast %357 : vector<1x144x128xf32> to vector<144x128xf32>
    %c16_299 = arith.constant 16 : index
    %c0_300 = arith.constant 0 : index
    %c0_301 = arith.constant 0 : index
    %359 = vector.load %arg5[%c16_299, %c0_300, %c0_301] : memref<25x128x128xf32, #tpu.memory_space<vmem>>, vector<1x128x128xf32>
    %360 = vector.shape_cast %359 : vector<1x128x128xf32> to vector<128x128xf32>
    %cst_302 = arith.constant dense<0.000000e+00> : vector<144x128xf32>
    %361 = tpu.matmul %358, %360, %cst_302 {dimension_numbers = #tpu.dot_dimension_numbers<[1], [0], [0], [1], [0, 0, 1, 1], [], []>} : vector<144x128xf32>, vector<128x128xf32>, vector<144x128xf32> -> vector<144x128xf32>
    %362 = arith.addf %356, %361 : vector<144x128xf32>
    %c1_303 = arith.constant 1 : index
    %c50_304 = arith.constant 50 : index
    %c0_305 = arith.constant 0 : index
    %363 = vector.load %arg12[%c1_303, %c50_304, %c0_305] : memref<2x224x128xf32, #tpu.memory_space<vmem>>, vector<1x144x128xf32>
    %364 = vector.shape_cast %363 : vector<1x144x128xf32> to vector<144x128xf32>
    %c17_306 = arith.constant 17 : index
    %c0_307 = arith.constant 0 : index
    %c0_308 = arith.constant 0 : index
    %365 = vector.load %arg5[%c17_306, %c0_307, %c0_308] : memref<25x128x128xf32, #tpu.memory_space<vmem>>, vector<1x128x128xf32>
    %366 = vector.shape_cast %365 : vector<1x128x128xf32> to vector<128x128xf32>
    %cst_309 = arith.constant dense<0.000000e+00> : vector<144x128xf32>
    %367 = tpu.matmul %364, %366, %cst_309 {dimension_numbers = #tpu.dot_dimension_numbers<[1], [0], [0], [1], [0, 0, 1, 1], [], []>} : vector<144x128xf32>, vector<128x128xf32>, vector<144x128xf32> -> vector<144x128xf32>
    %368 = arith.addf %362, %367 : vector<144x128xf32>
    %c1_310 = arith.constant 1 : index
    %c51_311 = arith.constant 51 : index
    %c0_312 = arith.constant 0 : index
    %369 = vector.load %arg12[%c1_310, %c51_311, %c0_312] : memref<2x224x128xf32, #tpu.memory_space<vmem>>, vector<1x144x128xf32>
    %370 = vector.shape_cast %369 : vector<1x144x128xf32> to vector<144x128xf32>
    %c18_313 = arith.constant 18 : index
    %c0_314 = arith.constant 0 : index
    %c0_315 = arith.constant 0 : index
    %371 = vector.load %arg5[%c18_313, %c0_314, %c0_315] : memref<25x128x128xf32, #tpu.memory_space<vmem>>, vector<1x128x128xf32>
    %372 = vector.shape_cast %371 : vector<1x128x128xf32> to vector<128x128xf32>
    %cst_316 = arith.constant dense<0.000000e+00> : vector<144x128xf32>
    %373 = tpu.matmul %370, %372, %cst_316 {dimension_numbers = #tpu.dot_dimension_numbers<[1], [0], [0], [1], [0, 0, 1, 1], [], []>} : vector<144x128xf32>, vector<128x128xf32>, vector<144x128xf32> -> vector<144x128xf32>
    %374 = arith.addf %368, %373 : vector<144x128xf32>
    %c1_317 = arith.constant 1 : index
    %c52_318 = arith.constant 52 : index
    %c0_319 = arith.constant 0 : index
    %375 = vector.load %arg12[%c1_317, %c52_318, %c0_319] : memref<2x224x128xf32, #tpu.memory_space<vmem>>, vector<1x144x128xf32>
    %376 = vector.shape_cast %375 : vector<1x144x128xf32> to vector<144x128xf32>
    %c19_320 = arith.constant 19 : index
    %c0_321 = arith.constant 0 : index
    %c0_322 = arith.constant 0 : index
    %377 = vector.load %arg5[%c19_320, %c0_321, %c0_322] : memref<25x128x128xf32, #tpu.memory_space<vmem>>, vector<1x128x128xf32>
    %378 = vector.shape_cast %377 : vector<1x128x128xf32> to vector<128x128xf32>
    %cst_323 = arith.constant dense<0.000000e+00> : vector<144x128xf32>
    %379 = tpu.matmul %376, %378, %cst_323 {dimension_numbers = #tpu.dot_dimension_numbers<[1], [0], [0], [1], [0, 0, 1, 1], [], []>} : vector<144x128xf32>, vector<128x128xf32>, vector<144x128xf32> -> vector<144x128xf32>
    %380 = arith.addf %374, %379 : vector<144x128xf32>
    %c1_324 = arith.constant 1 : index
    %c64_325 = arith.constant 64 : index
    %c0_326 = arith.constant 0 : index
    %381 = vector.load %arg12[%c1_324, %c64_325, %c0_326] : memref<2x224x128xf32, #tpu.memory_space<vmem>>, vector<1x144x128xf32>
    %382 = vector.shape_cast %381 : vector<1x144x128xf32> to vector<144x128xf32>
    %c20_327 = arith.constant 20 : index
    %c0_328 = arith.constant 0 : index
    %c0_329 = arith.constant 0 : index
    %383 = vector.load %arg5[%c20_327, %c0_328, %c0_329] : memref<25x128x128xf32, #tpu.memory_space<vmem>>, vector<1x128x128xf32>
    %384 = vector.shape_cast %383 : vector<1x128x128xf32> to vector<128x128xf32>
    %cst_330 = arith.constant dense<0.000000e+00> : vector<144x128xf32>
    %385 = tpu.matmul %382, %384, %cst_330 {dimension_numbers = #tpu.dot_dimension_numbers<[1], [0], [0], [1], [0, 0, 1, 1], [], []>} : vector<144x128xf32>, vector<128x128xf32>, vector<144x128xf32> -> vector<144x128xf32>
    %386 = arith.addf %380, %385 : vector<144x128xf32>
    %c1_331 = arith.constant 1 : index
    %c65_332 = arith.constant 65 : index
    %c0_333 = arith.constant 0 : index
    %387 = vector.load %arg12[%c1_331, %c65_332, %c0_333] : memref<2x224x128xf32, #tpu.memory_space<vmem>>, vector<1x144x128xf32>
    %388 = vector.shape_cast %387 : vector<1x144x128xf32> to vector<144x128xf32>
    %c21_334 = arith.constant 21 : index
    %c0_335 = arith.constant 0 : index
    %c0_336 = arith.constant 0 : index
    %389 = vector.load %arg5[%c21_334, %c0_335, %c0_336] : memref<25x128x128xf32, #tpu.memory_space<vmem>>, vector<1x128x128xf32>
    %390 = vector.shape_cast %389 : vector<1x128x128xf32> to vector<128x128xf32>
    %cst_337 = arith.constant dense<0.000000e+00> : vector<144x128xf32>
    %391 = tpu.matmul %388, %390, %cst_337 {dimension_numbers = #tpu.dot_dimension_numbers<[1], [0], [0], [1], [0, 0, 1, 1], [], []>} : vector<144x128xf32>, vector<128x128xf32>, vector<144x128xf32> -> vector<144x128xf32>
    %392 = arith.addf %386, %391 : vector<144x128xf32>
    %c1_338 = arith.constant 1 : index
    %c66_339 = arith.constant 66 : index
    %c0_340 = arith.constant 0 : index
    %393 = vector.load %arg12[%c1_338, %c66_339, %c0_340] : memref<2x224x128xf32, #tpu.memory_space<vmem>>, vector<1x144x128xf32>
    %394 = vector.shape_cast %393 : vector<1x144x128xf32> to vector<144x128xf32>
    %c22_341 = arith.constant 22 : index
    %c0_342 = arith.constant 0 : index
    %c0_343 = arith.constant 0 : index
    %395 = vector.load %arg5[%c22_341, %c0_342, %c0_343] : memref<25x128x128xf32, #tpu.memory_space<vmem>>, vector<1x128x128xf32>
    %396 = vector.shape_cast %395 : vector<1x128x128xf32> to vector<128x128xf32>
    %cst_344 = arith.constant dense<0.000000e+00> : vector<144x128xf32>
    %397 = tpu.matmul %394, %396, %cst_344 {dimension_numbers = #tpu.dot_dimension_numbers<[1], [0], [0], [1], [0, 0, 1, 1], [], []>} : vector<144x128xf32>, vector<128x128xf32>, vector<144x128xf32> -> vector<144x128xf32>
    %398 = arith.addf %392, %397 : vector<144x128xf32>
    %c1_345 = arith.constant 1 : index
    %c67_346 = arith.constant 67 : index
    %c0_347 = arith.constant 0 : index
    %399 = vector.load %arg12[%c1_345, %c67_346, %c0_347] : memref<2x224x128xf32, #tpu.memory_space<vmem>>, vector<1x144x128xf32>
    %400 = vector.shape_cast %399 : vector<1x144x128xf32> to vector<144x128xf32>
    %c23_348 = arith.constant 23 : index
    %c0_349 = arith.constant 0 : index
    %c0_350 = arith.constant 0 : index
    %401 = vector.load %arg5[%c23_348, %c0_349, %c0_350] : memref<25x128x128xf32, #tpu.memory_space<vmem>>, vector<1x128x128xf32>
    %402 = vector.shape_cast %401 : vector<1x128x128xf32> to vector<128x128xf32>
    %cst_351 = arith.constant dense<0.000000e+00> : vector<144x128xf32>
    %403 = tpu.matmul %400, %402, %cst_351 {dimension_numbers = #tpu.dot_dimension_numbers<[1], [0], [0], [1], [0, 0, 1, 1], [], []>} : vector<144x128xf32>, vector<128x128xf32>, vector<144x128xf32> -> vector<144x128xf32>
    %404 = arith.addf %398, %403 : vector<144x128xf32>
    %c1_352 = arith.constant 1 : index
    %c68_353 = arith.constant 68 : index
    %c0_354 = arith.constant 0 : index
    %405 = vector.load %arg12[%c1_352, %c68_353, %c0_354] : memref<2x224x128xf32, #tpu.memory_space<vmem>>, vector<1x144x128xf32>
    %406 = vector.shape_cast %405 : vector<1x144x128xf32> to vector<144x128xf32>
    %c24_355 = arith.constant 24 : index
    %c0_356 = arith.constant 0 : index
    %c0_357 = arith.constant 0 : index
    %407 = vector.load %arg5[%c24_355, %c0_356, %c0_357] : memref<25x128x128xf32, #tpu.memory_space<vmem>>, vector<1x128x128xf32>
    %408 = vector.shape_cast %407 : vector<1x128x128xf32> to vector<128x128xf32>
    %cst_358 = arith.constant dense<0.000000e+00> : vector<144x128xf32>
    %409 = tpu.matmul %406, %408, %cst_358 {dimension_numbers = #tpu.dot_dimension_numbers<[1], [0], [0], [1], [0, 0, 1, 1], [], []>} : vector<144x128xf32>, vector<128x128xf32>, vector<144x128xf32> -> vector<144x128xf32>
    %410 = arith.addf %404, %409 : vector<144x128xf32>
    %c0_359 = arith.constant 0 : index
    %c0_360 = arith.constant 0 : index
    %411 = vector.load %arg6[%c0_359, %c0_360] : memref<1x128xf32, #tpu.memory_space<vmem>>, vector<1x128xf32>
    %412 = vector.broadcast %411 : vector<1x128xf32> to vector<144x128xf32>
    %413 = arith.addf %410, %412 : vector<144x128xf32>
    %414 = arith.mulf %259, %259 : vector<144x128xf32>
    %415 = arith.addf %259, %413 : vector<144x128xf32>
    %416 = arith.mulf %413, %413 : vector<144x128xf32>
    %417 = arith.addf %414, %416 : vector<144x128xf32>
    %cst_361 = arith.constant dense<0.000000e+00> : vector<1x128xf32>
    %418 = tpu.matmul %41, %415, %cst_361 {dimension_numbers = #tpu.dot_dimension_numbers<[1], [0], [0], [1], [0, 0, 1, 1], [], []>} : vector<1x144xf32>, vector<144x128xf32>, vector<1x128xf32> -> vector<1x128xf32>
    %cst_362 = arith.constant dense<0.000000e+00> : vector<1x128xf32>
    %419 = tpu.matmul %41, %417, %cst_362 {dimension_numbers = #tpu.dot_dimension_numbers<[1], [0], [0], [1], [0, 0, 1, 1], [], []>} : vector<1x144xf32>, vector<144x128xf32>, vector<1x128xf32> -> vector<1x128xf32>
    %c0_363 = arith.constant 0 : index
    %c0_364 = arith.constant 0 : index
    %420 = vector.load %arg7[%c0_363, %c0_364] : memref<1x128xf32, #tpu.memory_space<vmem>>, vector<1x128xf32>
    %c0_365 = arith.constant 0 : index
    %c0_366 = arith.constant 0 : index
    %421 = vector.load %arg8[%c0_365, %c0_366] : memref<1x128xf32, #tpu.memory_space<vmem>>, vector<1x128xf32>
    %cst_367 = arith.constant 1.620000e+02 : f32
    %422 = vector.broadcast %cst_367 : f32 to vector<1x128xf32>
    %423 = arith.divf %418, %422 : vector<1x128xf32>
    %cst_368 = arith.constant 1.620000e+02 : f32
    %424 = vector.broadcast %cst_368 : f32 to vector<1x128xf32>
    %425 = arith.divf %419, %424 : vector<1x128xf32>
    %426 = arith.mulf %423, %423 : vector<1x128xf32>
    %427 = arith.subf %425, %426 : vector<1x128xf32>
    %cst_369 = arith.constant 0.000000e+00 : f32
    %428 = vector.broadcast %cst_369 : f32 to vector<1x128xf32>
    %429 = arith.maximumf %427, %428 : vector<1x128xf32>
    %430 = vector.broadcast %423 : vector<1x128xf32> to vector<144x128xf32>
    %431 = arith.subf %259, %430 : vector<144x128xf32>
    %cst_370 = arith.constant 9.99999974E-6 : f32
    %432 = vector.broadcast %cst_370 : f32 to vector<1x128xf32>
    %433 = arith.addf %429, %432 : vector<1x128xf32>
    %434 = math.rsqrt %433 : vector<1x128xf32>
    %435 = arith.mulf %420, %434 : vector<1x128xf32>
    %436 = vector.broadcast %435 : vector<1x128xf32> to vector<144x128xf32>
    %437 = arith.mulf %431, %436 : vector<144x128xf32>
    %438 = vector.broadcast %421 : vector<1x128xf32> to vector<144x128xf32>
    %439 = arith.addf %437, %438 : vector<144x128xf32>
    %cst_371 = arith.constant 0.000000e+00 : f32
    %440 = vector.broadcast %cst_371 : f32 to vector<144x128xf32>
    %441 = arith.maximumf %439, %440 : vector<144x128xf32>
    %c0_372 = arith.constant 0 : index
    %c0_373 = arith.constant 0 : index
    %c0_374 = arith.constant 0 : index
    %442 = vector.load %arg13[%c0_372, %c0_373, %c0_374] : memref<2x144x128xf32, #tpu.memory_space<vmem>>, vector<1x144x128xf32>
    %443 = vector.shape_cast %442 : vector<1x144x128xf32> to vector<144x128xf32>
    %444 = vector.shape_cast %441 : vector<144x128xf32> to vector<1x144x128xf32>
    tpu.vector_store %arg13[%c0_372, %c0_373, %c0_374], %444 {strides = array<i32>} : memref<2x144x128xf32, #tpu.memory_space<vmem>>, vector<1x144x128xf32>,
    %c0_375 = arith.constant 0 : index
    %c0_376 = arith.constant 0 : index
    %445 = vector.load %arg7[%c0_375, %c0_376] : memref<1x128xf32, #tpu.memory_space<vmem>>, vector<1x128xf32>
    %c0_377 = arith.constant 0 : index
    %c0_378 = arith.constant 0 : index
    %446 = vector.load %arg8[%c0_377, %c0_378] : memref<1x128xf32, #tpu.memory_space<vmem>>, vector<1x128xf32>
    %cst_379 = arith.constant 1.620000e+02 : f32
    %447 = vector.broadcast %cst_379 : f32 to vector<1x128xf32>
    %448 = arith.divf %418, %447 : vector<1x128xf32>
    %cst_380 = arith.constant 1.620000e+02 : f32
    %449 = vector.broadcast %cst_380 : f32 to vector<1x128xf32>
    %450 = arith.divf %419, %449 : vector<1x128xf32>
    %451 = arith.mulf %448, %448 : vector<1x128xf32>
    %452 = arith.subf %450, %451 : vector<1x128xf32>
    %cst_381 = arith.constant 0.000000e+00 : f32
    %453 = vector.broadcast %cst_381 : f32 to vector<1x128xf32>
    %454 = arith.maximumf %452, %453 : vector<1x128xf32>
    %455 = vector.broadcast %448 : vector<1x128xf32> to vector<144x128xf32>
    %456 = arith.subf %413, %455 : vector<144x128xf32>
    %cst_382 = arith.constant 9.99999974E-6 : f32
    %457 = vector.broadcast %cst_382 : f32 to vector<1x128xf32>
    %458 = arith.addf %454, %457 : vector<1x128xf32>
    %459 = math.rsqrt %458 : vector<1x128xf32>
    %460 = arith.mulf %445, %459 : vector<1x128xf32>
    %461 = vector.broadcast %460 : vector<1x128xf32> to vector<144x128xf32>
    %462 = arith.mulf %456, %461 : vector<144x128xf32>
    %463 = vector.broadcast %446 : vector<1x128xf32> to vector<144x128xf32>
    %464 = arith.addf %462, %463 : vector<144x128xf32>
    %cst_383 = arith.constant 0.000000e+00 : f32
    %465 = vector.broadcast %cst_383 : f32 to vector<144x128xf32>
    %466 = arith.maximumf %464, %465 : vector<144x128xf32>
    %c1_384 = arith.constant 1 : index
    %c0_385 = arith.constant 0 : index
    %c0_386 = arith.constant 0 : index
    %467 = vector.load %arg13[%c1_384, %c0_385, %c0_386] : memref<2x144x128xf32, #tpu.memory_space<vmem>>, vector<1x144x128xf32>
    %468 = vector.shape_cast %467 : vector<1x144x128xf32> to vector<144x128xf32>
    %469 = vector.shape_cast %466 : vector<144x128xf32> to vector<1x144x128xf32>
    tpu.vector_store %arg13[%c1_384, %c0_385, %c0_386], %469 {strides = array<i32>} : memref<2x144x128xf32, #tpu.memory_space<vmem>>, vector<1x144x128xf32>,
    %cst_387 = arith.constant 0.000000e+00 : f32
    %470 = vector.broadcast %cst_387 : f32 to vector<2x128xf32>
    %c0_388 = arith.constant 0 : index
    %c0_389 = arith.constant 0 : index
    %c0_390 = arith.constant 0 : index
    %471 = vector.load %arg13[%c0_388, %c0_389, %c0_390] : memref<2x144x128xf32, #tpu.memory_space<vmem>>, vector<2x1x128xf32>
    %472 = vector.shape_cast %471 : vector<2x1x128xf32> to vector<2x128xf32>
    %c0_391 = arith.constant 0 : index
    %c1_392 = arith.constant 1 : index
    %c0_393 = arith.constant 0 : index
    %473 = vector.load %arg13[%c0_391, %c1_392, %c0_393] : memref<2x144x128xf32, #tpu.memory_space<vmem>>, vector<2x1x128xf32>
    %474 = vector.shape_cast %473 : vector<2x1x128xf32> to vector<2x128xf32>
    %475 = arith.maximumf %472, %474 : vector<2x128xf32>
    %c0_394 = arith.constant 0 : index
    %c16_395 = arith.constant 16 : index
    %c0_396 = arith.constant 0 : index
    %476 = vector.load %arg13[%c0_394, %c16_395, %c0_396] : memref<2x144x128xf32, #tpu.memory_space<vmem>>, vector<2x1x128xf32>
    %477 = vector.shape_cast %476 : vector<2x1x128xf32> to vector<2x128xf32>
    %c0_397 = arith.constant 0 : index
    %c17_398 = arith.constant 17 : index
    %c0_399 = arith.constant 0 : index
    %478 = vector.load %arg13[%c0_397, %c17_398, %c0_399] : memref<2x144x128xf32, #tpu.memory_space<vmem>>, vector<2x1x128xf32>
    %479 = vector.shape_cast %478 : vector<2x1x128xf32> to vector<2x128xf32>
    %480 = arith.maximumf %477, %479 : vector<2x128xf32>
    %481 = arith.maximumf %475, %480 : vector<2x128xf32>
    %c0_400 = arith.constant 0 : index
    %c0_401 = arith.constant 0 : index
    %c0_402 = arith.constant 0 : index
    %482 = vector.load %arg9[%c0_400, %c0_401, %c0_402] : memref<16x128x128xf32, #tpu.memory_space<vmem>>, vector<1x128x128xf32>
    %483 = vector.shape_cast %482 : vector<1x128x128xf32> to vector<128x128xf32>
    %cst_403 = arith.constant dense<0.000000e+00> : vector<2x128xf32>
    %484 = tpu.matmul %481, %483, %cst_403 {dimension_numbers = #tpu.dot_dimension_numbers<[1], [0], [0], [1], [0, 0, 1, 1], [], []>} : vector<2x128xf32>, vector<128x128xf32>, vector<2x128xf32> -> vector<2x128xf32>
    %485 = arith.addf %470, %484 : vector<2x128xf32>
    %c0_404 = arith.constant 0 : index
    %c2_405 = arith.constant 2 : index
    %c0_406 = arith.constant 0 : index
    %486 = vector.load %arg13[%c0_404, %c2_405, %c0_406] : memref<2x144x128xf32, #tpu.memory_space<vmem>>, vector<2x1x128xf32>
    %487 = vector.shape_cast %486 : vector<2x1x128xf32> to vector<2x128xf32>
    %c0_407 = arith.constant 0 : index
    %c3_408 = arith.constant 3 : index
    %c0_409 = arith.constant 0 : index
    %488 = vector.load %arg13[%c0_407, %c3_408, %c0_409] : memref<2x144x128xf32, #tpu.memory_space<vmem>>, vector<2x1x128xf32>
    %489 = vector.shape_cast %488 : vector<2x1x128xf32> to vector<2x128xf32>
    %490 = arith.maximumf %487, %489 : vector<2x128xf32>
    %c0_410 = arith.constant 0 : index
    %c18_411 = arith.constant 18 : index
    %c0_412 = arith.constant 0 : index
    %491 = vector.load %arg13[%c0_410, %c18_411, %c0_412] : memref<2x144x128xf32, #tpu.memory_space<vmem>>, vector<2x1x128xf32>
    %492 = vector.shape_cast %491 : vector<2x1x128xf32> to vector<2x128xf32>
    %c0_413 = arith.constant 0 : index
    %c19_414 = arith.constant 19 : index
    %c0_415 = arith.constant 0 : index
    %493 = vector.load %arg13[%c0_413, %c19_414, %c0_415] : memref<2x144x128xf32, #tpu.memory_space<vmem>>, vector<2x1x128xf32>
    %494 = vector.shape_cast %493 : vector<2x1x128xf32> to vector<2x128xf32>
    %495 = arith.maximumf %492, %494 : vector<2x128xf32>
    %496 = arith.maximumf %490, %495 : vector<2x128xf32>
    %c1_416 = arith.constant 1 : index
    %c0_417 = arith.constant 0 : index
    %c0_418 = arith.constant 0 : index
    %497 = vector.load %arg9[%c1_416, %c0_417, %c0_418] : memref<16x128x128xf32, #tpu.memory_space<vmem>>, vector<1x128x128xf32>
    %498 = vector.shape_cast %497 : vector<1x128x128xf32> to vector<128x128xf32>
    %cst_419 = arith.constant dense<0.000000e+00> : vector<2x128xf32>
    %499 = tpu.matmul %496, %498, %cst_419 {dimension_numbers = #tpu.dot_dimension_numbers<[1], [0], [0], [1], [0, 0, 1, 1], [], []>} : vector<2x128xf32>, vector<128x128xf32>, vector<2x128xf32> -> vector<2x128xf32>
    %500 = arith.addf %485, %499 : vector<2x128xf32>
    %c0_420 = arith.constant 0 : index
    %c4_421 = arith.constant 4 : index
    %c0_422 = arith.constant 0 : index
    %501 = vector.load %arg13[%c0_420, %c4_421, %c0_422] : memref<2x144x128xf32, #tpu.memory_space<vmem>>, vector<2x1x128xf32>
    %502 = vector.shape_cast %501 : vector<2x1x128xf32> to vector<2x128xf32>
    %c0_423 = arith.constant 0 : index
    %c5_424 = arith.constant 5 : index
    %c0_425 = arith.constant 0 : index
    %503 = vector.load %arg13[%c0_423, %c5_424, %c0_425] : memref<2x144x128xf32, #tpu.memory_space<vmem>>, vector<2x1x128xf32>
    %504 = vector.shape_cast %503 : vector<2x1x128xf32> to vector<2x128xf32>
    %505 = arith.maximumf %502, %504 : vector<2x128xf32>
    %c0_426 = arith.constant 0 : index
    %c20_427 = arith.constant 20 : index
    %c0_428 = arith.constant 0 : index
    %506 = vector.load %arg13[%c0_426, %c20_427, %c0_428] : memref<2x144x128xf32, #tpu.memory_space<vmem>>, vector<2x1x128xf32>
    %507 = vector.shape_cast %506 : vector<2x1x128xf32> to vector<2x128xf32>
    %c0_429 = arith.constant 0 : index
    %c21_430 = arith.constant 21 : index
    %c0_431 = arith.constant 0 : index
    %508 = vector.load %arg13[%c0_429, %c21_430, %c0_431] : memref<2x144x128xf32, #tpu.memory_space<vmem>>, vector<2x1x128xf32>
    %509 = vector.shape_cast %508 : vector<2x1x128xf32> to vector<2x128xf32>
    %510 = arith.maximumf %507, %509 : vector<2x128xf32>
    %511 = arith.maximumf %505, %510 : vector<2x128xf32>
    %c2_432 = arith.constant 2 : index
    %c0_433 = arith.constant 0 : index
    %c0_434 = arith.constant 0 : index
    %512 = vector.load %arg9[%c2_432, %c0_433, %c0_434] : memref<16x128x128xf32, #tpu.memory_space<vmem>>, vector<1x128x128xf32>
    %513 = vector.shape_cast %512 : vector<1x128x128xf32> to vector<128x128xf32>
    %cst_435 = arith.constant dense<0.000000e+00> : vector<2x128xf32>
    %514 = tpu.matmul %511, %513, %cst_435 {dimension_numbers = #tpu.dot_dimension_numbers<[1], [0], [0], [1], [0, 0, 1, 1], [], []>} : vector<2x128xf32>, vector<128x128xf32>, vector<2x128xf32> -> vector<2x128xf32>
    %515 = arith.addf %500, %514 : vector<2x128xf32>
    %c0_436 = arith.constant 0 : index
    %c6_437 = arith.constant 6 : index
    %c0_438 = arith.constant 0 : index
    %516 = vector.load %arg13[%c0_436, %c6_437, %c0_438] : memref<2x144x128xf32, #tpu.memory_space<vmem>>, vector<2x1x128xf32>
    %517 = vector.shape_cast %516 : vector<2x1x128xf32> to vector<2x128xf32>
    %c0_439 = arith.constant 0 : index
    %c7_440 = arith.constant 7 : index
    %c0_441 = arith.constant 0 : index
    %518 = vector.load %arg13[%c0_439, %c7_440, %c0_441] : memref<2x144x128xf32, #tpu.memory_space<vmem>>, vector<2x1x128xf32>
    %519 = vector.shape_cast %518 : vector<2x1x128xf32> to vector<2x128xf32>
    %520 = arith.maximumf %517, %519 : vector<2x128xf32>
    %c0_442 = arith.constant 0 : index
    %c22_443 = arith.constant 22 : index
    %c0_444 = arith.constant 0 : index
    %521 = vector.load %arg13[%c0_442, %c22_443, %c0_444] : memref<2x144x128xf32, #tpu.memory_space<vmem>>, vector<2x1x128xf32>
    %522 = vector.shape_cast %521 : vector<2x1x128xf32> to vector<2x128xf32>
    %c0_445 = arith.constant 0 : index
    %c23_446 = arith.constant 23 : index
    %c0_447 = arith.constant 0 : index
    %523 = vector.load %arg13[%c0_445, %c23_446, %c0_447] : memref<2x144x128xf32, #tpu.memory_space<vmem>>, vector<2x1x128xf32>
    %524 = vector.shape_cast %523 : vector<2x1x128xf32> to vector<2x128xf32>
    %525 = arith.maximumf %522, %524 : vector<2x128xf32>
    %526 = arith.maximumf %520, %525 : vector<2x128xf32>
    %c3_448 = arith.constant 3 : index
    %c0_449 = arith.constant 0 : index
    %c0_450 = arith.constant 0 : index
    %527 = vector.load %arg9[%c3_448, %c0_449, %c0_450] : memref<16x128x128xf32, #tpu.memory_space<vmem>>, vector<1x128x128xf32>
    %528 = vector.shape_cast %527 : vector<1x128x128xf32> to vector<128x128xf32>
    %cst_451 = arith.constant dense<0.000000e+00> : vector<2x128xf32>
    %529 = tpu.matmul %526, %528, %cst_451 {dimension_numbers = #tpu.dot_dimension_numbers<[1], [0], [0], [1], [0, 0, 1, 1], [], []>} : vector<2x128xf32>, vector<128x128xf32>, vector<2x128xf32> -> vector<2x128xf32>
    %530 = arith.addf %515, %529 : vector<2x128xf32>
    %c0_452 = arith.constant 0 : index
    %c32_453 = arith.constant 32 : index
    %c0_454 = arith.constant 0 : index
    %531 = vector.load %arg13[%c0_452, %c32_453, %c0_454] : memref<2x144x128xf32, #tpu.memory_space<vmem>>, vector<2x1x128xf32>
    %532 = vector.shape_cast %531 : vector<2x1x128xf32> to vector<2x128xf32>
    %c0_455 = arith.constant 0 : index
    %c33_456 = arith.constant 33 : index
    %c0_457 = arith.constant 0 : index
    %533 = vector.load %arg13[%c0_455, %c33_456, %c0_457] : memref<2x144x128xf32, #tpu.memory_space<vmem>>, vector<2x1x128xf32>
    %534 = vector.shape_cast %533 : vector<2x1x128xf32> to vector<2x128xf32>
    %535 = arith.maximumf %532, %534 : vector<2x128xf32>
    %c0_458 = arith.constant 0 : index
    %c48_459 = arith.constant 48 : index
    %c0_460 = arith.constant 0 : index
    %536 = vector.load %arg13[%c0_458, %c48_459, %c0_460] : memref<2x144x128xf32, #tpu.memory_space<vmem>>, vector<2x1x128xf32>
    %537 = vector.shape_cast %536 : vector<2x1x128xf32> to vector<2x128xf32>
    %c0_461 = arith.constant 0 : index
    %c49_462 = arith.constant 49 : index
    %c0_463 = arith.constant 0 : index
    %538 = vector.load %arg13[%c0_461, %c49_462, %c0_463] : memref<2x144x128xf32, #tpu.memory_space<vmem>>, vector<2x1x128xf32>
    %539 = vector.shape_cast %538 : vector<2x1x128xf32> to vector<2x128xf32>
    %540 = arith.maximumf %537, %539 : vector<2x128xf32>
    %541 = arith.maximumf %535, %540 : vector<2x128xf32>
    %c4_464 = arith.constant 4 : index
    %c0_465 = arith.constant 0 : index
    %c0_466 = arith.constant 0 : index
    %542 = vector.load %arg9[%c4_464, %c0_465, %c0_466] : memref<16x128x128xf32, #tpu.memory_space<vmem>>, vector<1x128x128xf32>
    %543 = vector.shape_cast %542 : vector<1x128x128xf32> to vector<128x128xf32>
    %cst_467 = arith.constant dense<0.000000e+00> : vector<2x128xf32>
    %544 = tpu.matmul %541, %543, %cst_467 {dimension_numbers = #tpu.dot_dimension_numbers<[1], [0], [0], [1], [0, 0, 1, 1], [], []>} : vector<2x128xf32>, vector<128x128xf32>, vector<2x128xf32> -> vector<2x128xf32>
    %545 = arith.addf %530, %544 : vector<2x128xf32>
    %c0_468 = arith.constant 0 : index
    %c34_469 = arith.constant 34 : index
    %c0_470 = arith.constant 0 : index
    %546 = vector.load %arg13[%c0_468, %c34_469, %c0_470] : memref<2x144x128xf32, #tpu.memory_space<vmem>>, vector<2x1x128xf32>
    %547 = vector.shape_cast %546 : vector<2x1x128xf32> to vector<2x128xf32>
    %c0_471 = arith.constant 0 : index
    %c35_472 = arith.constant 35 : index
    %c0_473 = arith.constant 0 : index
    %548 = vector.load %arg13[%c0_471, %c35_472, %c0_473] : memref<2x144x128xf32, #tpu.memory_space<vmem>>, vector<2x1x128xf32>
    %549 = vector.shape_cast %548 : vector<2x1x128xf32> to vector<2x128xf32>
    %550 = arith.maximumf %547, %549 : vector<2x128xf32>
    %c0_474 = arith.constant 0 : index
    %c50_475 = arith.constant 50 : index
    %c0_476 = arith.constant 0 : index
    %551 = vector.load %arg13[%c0_474, %c50_475, %c0_476] : memref<2x144x128xf32, #tpu.memory_space<vmem>>, vector<2x1x128xf32>
    %552 = vector.shape_cast %551 : vector<2x1x128xf32> to vector<2x128xf32>
    %c0_477 = arith.constant 0 : index
    %c51_478 = arith.constant 51 : index
    %c0_479 = arith.constant 0 : index
    %553 = vector.load %arg13[%c0_477, %c51_478, %c0_479] : memref<2x144x128xf32, #tpu.memory_space<vmem>>, vector<2x1x128xf32>
    %554 = vector.shape_cast %553 : vector<2x1x128xf32> to vector<2x128xf32>
    %555 = arith.maximumf %552, %554 : vector<2x128xf32>
    %556 = arith.maximumf %550, %555 : vector<2x128xf32>
    %c5_480 = arith.constant 5 : index
    %c0_481 = arith.constant 0 : index
    %c0_482 = arith.constant 0 : index
    %557 = vector.load %arg9[%c5_480, %c0_481, %c0_482] : memref<16x128x128xf32, #tpu.memory_space<vmem>>, vector<1x128x128xf32>
    %558 = vector.shape_cast %557 : vector<1x128x128xf32> to vector<128x128xf32>
    %cst_483 = arith.constant dense<0.000000e+00> : vector<2x128xf32>
    %559 = tpu.matmul %556, %558, %cst_483 {dimension_numbers = #tpu.dot_dimension_numbers<[1], [0], [0], [1], [0, 0, 1, 1], [], []>} : vector<2x128xf32>, vector<128x128xf32>, vector<2x128xf32> -> vector<2x128xf32>
    %560 = arith.addf %545, %559 : vector<2x128xf32>
    %c0_484 = arith.constant 0 : index
    %c36_485 = arith.constant 36 : index
    %c0_486 = arith.constant 0 : index
    %561 = vector.load %arg13[%c0_484, %c36_485, %c0_486] : memref<2x144x128xf32, #tpu.memory_space<vmem>>, vector<2x1x128xf32>
    %562 = vector.shape_cast %561 : vector<2x1x128xf32> to vector<2x128xf32>
    %c0_487 = arith.constant 0 : index
    %c37 = arith.constant 37 : index
    %c0_488 = arith.constant 0 : index
    %563 = vector.load %arg13[%c0_487, %c37, %c0_488] : memref<2x144x128xf32, #tpu.memory_space<vmem>>, vector<2x1x128xf32>
    %564 = vector.shape_cast %563 : vector<2x1x128xf32> to vector<2x128xf32>
    %565 = arith.maximumf %562, %564 : vector<2x128xf32>
    %c0_489 = arith.constant 0 : index
    %c52_490 = arith.constant 52 : index
    %c0_491 = arith.constant 0 : index
    %566 = vector.load %arg13[%c0_489, %c52_490, %c0_491] : memref<2x144x128xf32, #tpu.memory_space<vmem>>, vector<2x1x128xf32>
    %567 = vector.shape_cast %566 : vector<2x1x128xf32> to vector<2x128xf32>
    %c0_492 = arith.constant 0 : index
    %c53 = arith.constant 53 : index
    %c0_493 = arith.constant 0 : index
    %568 = vector.load %arg13[%c0_492, %c53, %c0_493] : memref<2x144x128xf32, #tpu.memory_space<vmem>>, vector<2x1x128xf32>
    %569 = vector.shape_cast %568 : vector<2x1x128xf32> to vector<2x128xf32>
    %570 = arith.maximumf %567, %569 : vector<2x128xf32>
    %571 = arith.maximumf %565, %570 : vector<2x128xf32>
    %c6_494 = arith.constant 6 : index
    %c0_495 = arith.constant 0 : index
    %c0_496 = arith.constant 0 : index
    %572 = vector.load %arg9[%c6_494, %c0_495, %c0_496] : memref<16x128x128xf32, #tpu.memory_space<vmem>>, vector<1x128x128xf32>
    %573 = vector.shape_cast %572 : vector<1x128x128xf32> to vector<128x128xf32>
    %cst_497 = arith.constant dense<0.000000e+00> : vector<2x128xf32>
    %574 = tpu.matmul %571, %573, %cst_497 {dimension_numbers = #tpu.dot_dimension_numbers<[1], [0], [0], [1], [0, 0, 1, 1], [], []>} : vector<2x128xf32>, vector<128x128xf32>, vector<2x128xf32> -> vector<2x128xf32>
    %575 = arith.addf %560, %574 : vector<2x128xf32>
    %c0_498 = arith.constant 0 : index
    %c38 = arith.constant 38 : index
    %c0_499 = arith.constant 0 : index
    %576 = vector.load %arg13[%c0_498, %c38, %c0_499] : memref<2x144x128xf32, #tpu.memory_space<vmem>>, vector<2x1x128xf32>
    %577 = vector.shape_cast %576 : vector<2x1x128xf32> to vector<2x128xf32>
    %c0_500 = arith.constant 0 : index
    %c39 = arith.constant 39 : index
    %c0_501 = arith.constant 0 : index
    %578 = vector.load %arg13[%c0_500, %c39, %c0_501] : memref<2x144x128xf32, #tpu.memory_space<vmem>>, vector<2x1x128xf32>
    %579 = vector.shape_cast %578 : vector<2x1x128xf32> to vector<2x128xf32>
    %580 = arith.maximumf %577, %579 : vector<2x128xf32>
    %c0_502 = arith.constant 0 : index
    %c54 = arith.constant 54 : index
    %c0_503 = arith.constant 0 : index
    %581 = vector.load %arg13[%c0_502, %c54, %c0_503] : memref<2x144x128xf32, #tpu.memory_space<vmem>>, vector<2x1x128xf32>
    %582 = vector.shape_cast %581 : vector<2x1x128xf32> to vector<2x128xf32>
    %c0_504 = arith.constant 0 : index
    %c55 = arith.constant 55 : index
    %c0_505 = arith.constant 0 : index
    %583 = vector.load %arg13[%c0_504, %c55, %c0_505] : memref<2x144x128xf32, #tpu.memory_space<vmem>>, vector<2x1x128xf32>
    %584 = vector.shape_cast %583 : vector<2x1x128xf32> to vector<2x128xf32>
    %585 = arith.maximumf %582, %584 : vector<2x128xf32>
    %586 = arith.maximumf %580, %585 : vector<2x128xf32>
    %c7_506 = arith.constant 7 : index
    %c0_507 = arith.constant 0 : index
    %c0_508 = arith.constant 0 : index
    %587 = vector.load %arg9[%c7_506, %c0_507, %c0_508] : memref<16x128x128xf32, #tpu.memory_space<vmem>>, vector<1x128x128xf32>
    %588 = vector.shape_cast %587 : vector<1x128x128xf32> to vector<128x128xf32>
    %cst_509 = arith.constant dense<0.000000e+00> : vector<2x128xf32>
    %589 = tpu.matmul %586, %588, %cst_509 {dimension_numbers = #tpu.dot_dimension_numbers<[1], [0], [0], [1], [0, 0, 1, 1], [], []>} : vector<2x128xf32>, vector<128x128xf32>, vector<2x128xf32> -> vector<2x128xf32>
    %590 = arith.addf %575, %589 : vector<2x128xf32>
    %c0_510 = arith.constant 0 : index
    %c64_511 = arith.constant 64 : index
    %c0_512 = arith.constant 0 : index
    %591 = vector.load %arg13[%c0_510, %c64_511, %c0_512] : memref<2x144x128xf32, #tpu.memory_space<vmem>>, vector<2x1x128xf32>
    %592 = vector.shape_cast %591 : vector<2x1x128xf32> to vector<2x128xf32>
    %c0_513 = arith.constant 0 : index
    %c65_514 = arith.constant 65 : index
    %c0_515 = arith.constant 0 : index
    %593 = vector.load %arg13[%c0_513, %c65_514, %c0_515] : memref<2x144x128xf32, #tpu.memory_space<vmem>>, vector<2x1x128xf32>
    %594 = vector.shape_cast %593 : vector<2x1x128xf32> to vector<2x128xf32>
    %595 = arith.maximumf %592, %594 : vector<2x128xf32>
    %c0_516 = arith.constant 0 : index
    %c80 = arith.constant 80 : index
    %c0_517 = arith.constant 0 : index
    %596 = vector.load %arg13[%c0_516, %c80, %c0_517] : memref<2x144x128xf32, #tpu.memory_space<vmem>>, vector<2x1x128xf32>
    %597 = vector.shape_cast %596 : vector<2x1x128xf32> to vector<2x128xf32>
    %c0_518 = arith.constant 0 : index
    %c81 = arith.constant 81 : index
    %c0_519 = arith.constant 0 : index
    %598 = vector.load %arg13[%c0_518, %c81, %c0_519] : memref<2x144x128xf32, #tpu.memory_space<vmem>>, vector<2x1x128xf32>
    %599 = vector.shape_cast %598 : vector<2x1x128xf32> to vector<2x128xf32>
    %600 = arith.maximumf %597, %599 : vector<2x128xf32>
    %601 = arith.maximumf %595, %600 : vector<2x128xf32>
    %c8_520 = arith.constant 8 : index
    %c0_521 = arith.constant 0 : index
    %c0_522 = arith.constant 0 : index
    %602 = vector.load %arg9[%c8_520, %c0_521, %c0_522] : memref<16x128x128xf32, #tpu.memory_space<vmem>>, vector<1x128x128xf32>
    %603 = vector.shape_cast %602 : vector<1x128x128xf32> to vector<128x128xf32>
    %cst_523 = arith.constant dense<0.000000e+00> : vector<2x128xf32>
    %604 = tpu.matmul %601, %603, %cst_523 {dimension_numbers = #tpu.dot_dimension_numbers<[1], [0], [0], [1], [0, 0, 1, 1], [], []>} : vector<2x128xf32>, vector<128x128xf32>, vector<2x128xf32> -> vector<2x128xf32>
    %605 = arith.addf %590, %604 : vector<2x128xf32>
    %c0_524 = arith.constant 0 : index
    %c66_525 = arith.constant 66 : index
    %c0_526 = arith.constant 0 : index
    %606 = vector.load %arg13[%c0_524, %c66_525, %c0_526] : memref<2x144x128xf32, #tpu.memory_space<vmem>>, vector<2x1x128xf32>
    %607 = vector.shape_cast %606 : vector<2x1x128xf32> to vector<2x128xf32>
    %c0_527 = arith.constant 0 : index
    %c67_528 = arith.constant 67 : index
    %c0_529 = arith.constant 0 : index
    %608 = vector.load %arg13[%c0_527, %c67_528, %c0_529] : memref<2x144x128xf32, #tpu.memory_space<vmem>>, vector<2x1x128xf32>
    %609 = vector.shape_cast %608 : vector<2x1x128xf32> to vector<2x128xf32>
    %610 = arith.maximumf %607, %609 : vector<2x128xf32>
    %c0_530 = arith.constant 0 : index
    %c82 = arith.constant 82 : index
    %c0_531 = arith.constant 0 : index
    %611 = vector.load %arg13[%c0_530, %c82, %c0_531] : memref<2x144x128xf32, #tpu.memory_space<vmem>>, vector<2x1x128xf32>
    %612 = vector.shape_cast %611 : vector<2x1x128xf32> to vector<2x128xf32>
    %c0_532 = arith.constant 0 : index
    %c83 = arith.constant 83 : index
    %c0_533 = arith.constant 0 : index
    %613 = vector.load %arg13[%c0_532, %c83, %c0_533] : memref<2x144x128xf32, #tpu.memory_space<vmem>>, vector<2x1x128xf32>
    %614 = vector.shape_cast %613 : vector<2x1x128xf32> to vector<2x128xf32>
    %615 = arith.maximumf %612, %614 : vector<2x128xf32>
    %616 = arith.maximumf %610, %615 : vector<2x128xf32>
    %c9_534 = arith.constant 9 : index
    %c0_535 = arith.constant 0 : index
    %c0_536 = arith.constant 0 : index
    %617 = vector.load %arg9[%c9_534, %c0_535, %c0_536] : memref<16x128x128xf32, #tpu.memory_space<vmem>>, vector<1x128x128xf32>
    %618 = vector.shape_cast %617 : vector<1x128x128xf32> to vector<128x128xf32>
    %cst_537 = arith.constant dense<0.000000e+00> : vector<2x128xf32>
    %619 = tpu.matmul %616, %618, %cst_537 {dimension_numbers = #tpu.dot_dimension_numbers<[1], [0], [0], [1], [0, 0, 1, 1], [], []>} : vector<2x128xf32>, vector<128x128xf32>, vector<2x128xf32> -> vector<2x128xf32>
    %620 = arith.addf %605, %619 : vector<2x128xf32>
    %c0_538 = arith.constant 0 : index
    %c68_539 = arith.constant 68 : index
    %c0_540 = arith.constant 0 : index
    %621 = vector.load %arg13[%c0_538, %c68_539, %c0_540] : memref<2x144x128xf32, #tpu.memory_space<vmem>>, vector<2x1x128xf32>
    %622 = vector.shape_cast %621 : vector<2x1x128xf32> to vector<2x128xf32>
    %c0_541 = arith.constant 0 : index
    %c69 = arith.constant 69 : index
    %c0_542 = arith.constant 0 : index
    %623 = vector.load %arg13[%c0_541, %c69, %c0_542] : memref<2x144x128xf32, #tpu.memory_space<vmem>>, vector<2x1x128xf32>
    %624 = vector.shape_cast %623 : vector<2x1x128xf32> to vector<2x128xf32>
    %625 = arith.maximumf %622, %624 : vector<2x128xf32>
    %c0_543 = arith.constant 0 : index
    %c84 = arith.constant 84 : index
    %c0_544 = arith.constant 0 : index
    %626 = vector.load %arg13[%c0_543, %c84, %c0_544] : memref<2x144x128xf32, #tpu.memory_space<vmem>>, vector<2x1x128xf32>
    %627 = vector.shape_cast %626 : vector<2x1x128xf32> to vector<2x128xf32>
    %c0_545 = arith.constant 0 : index
    %c85 = arith.constant 85 : index
    %c0_546 = arith.constant 0 : index
    %628 = vector.load %arg13[%c0_545, %c85, %c0_546] : memref<2x144x128xf32, #tpu.memory_space<vmem>>, vector<2x1x128xf32>
    %629 = vector.shape_cast %628 : vector<2x1x128xf32> to vector<2x128xf32>
    %630 = arith.maximumf %627, %629 : vector<2x128xf32>
    %631 = arith.maximumf %625, %630 : vector<2x128xf32>
    %c10_547 = arith.constant 10 : index
    %c0_548 = arith.constant 0 : index
    %c0_549 = arith.constant 0 : index
    %632 = vector.load %arg9[%c10_547, %c0_548, %c0_549] : memref<16x128x128xf32, #tpu.memory_space<vmem>>, vector<1x128x128xf32>
    %633 = vector.shape_cast %632 : vector<1x128x128xf32> to vector<128x128xf32>
    %cst_550 = arith.constant dense<0.000000e+00> : vector<2x128xf32>
    %634 = tpu.matmul %631, %633, %cst_550 {dimension_numbers = #tpu.dot_dimension_numbers<[1], [0], [0], [1], [0, 0, 1, 1], [], []>} : vector<2x128xf32>, vector<128x128xf32>, vector<2x128xf32> -> vector<2x128xf32>
    %635 = arith.addf %620, %634 : vector<2x128xf32>
    %c0_551 = arith.constant 0 : index
    %c70 = arith.constant 70 : index
    %c0_552 = arith.constant 0 : index
    %636 = vector.load %arg13[%c0_551, %c70, %c0_552] : memref<2x144x128xf32, #tpu.memory_space<vmem>>, vector<2x1x128xf32>
    %637 = vector.shape_cast %636 : vector<2x1x128xf32> to vector<2x128xf32>
    %c0_553 = arith.constant 0 : index
    %c71 = arith.constant 71 : index
    %c0_554 = arith.constant 0 : index
    %638 = vector.load %arg13[%c0_553, %c71, %c0_554] : memref<2x144x128xf32, #tpu.memory_space<vmem>>, vector<2x1x128xf32>
    %639 = vector.shape_cast %638 : vector<2x1x128xf32> to vector<2x128xf32>
    %640 = arith.maximumf %637, %639 : vector<2x128xf32>
    %c0_555 = arith.constant 0 : index
    %c86 = arith.constant 86 : index
    %c0_556 = arith.constant 0 : index
    %641 = vector.load %arg13[%c0_555, %c86, %c0_556] : memref<2x144x128xf32, #tpu.memory_space<vmem>>, vector<2x1x128xf32>
    %642 = vector.shape_cast %641 : vector<2x1x128xf32> to vector<2x128xf32>
    %c0_557 = arith.constant 0 : index
    %c87 = arith.constant 87 : index
    %c0_558 = arith.constant 0 : index
    %643 = vector.load %arg13[%c0_557, %c87, %c0_558] : memref<2x144x128xf32, #tpu.memory_space<vmem>>, vector<2x1x128xf32>
    %644 = vector.shape_cast %643 : vector<2x1x128xf32> to vector<2x128xf32>
    %645 = arith.maximumf %642, %644 : vector<2x128xf32>
    %646 = arith.maximumf %640, %645 : vector<2x128xf32>
    %c11_559 = arith.constant 11 : index
    %c0_560 = arith.constant 0 : index
    %c0_561 = arith.constant 0 : index
    %647 = vector.load %arg9[%c11_559, %c0_560, %c0_561] : memref<16x128x128xf32, #tpu.memory_space<vmem>>, vector<1x128x128xf32>
    %648 = vector.shape_cast %647 : vector<1x128x128xf32> to vector<128x128xf32>
    %cst_562 = arith.constant dense<0.000000e+00> : vector<2x128xf32>
    %649 = tpu.matmul %646, %648, %cst_562 {dimension_numbers = #tpu.dot_dimension_numbers<[1], [0], [0], [1], [0, 0, 1, 1], [], []>} : vector<2x128xf32>, vector<128x128xf32>, vector<2x128xf32> -> vector<2x128xf32>
    %650 = arith.addf %635, %649 : vector<2x128xf32>
    %c0_563 = arith.constant 0 : index
    %c96 = arith.constant 96 : index
    %c0_564 = arith.constant 0 : index
    %651 = vector.load %arg13[%c0_563, %c96, %c0_564] : memref<2x144x128xf32, #tpu.memory_space<vmem>>, vector<2x1x128xf32>
    %652 = vector.shape_cast %651 : vector<2x1x128xf32> to vector<2x128xf32>
    %c0_565 = arith.constant 0 : index
    %c97 = arith.constant 97 : index
    %c0_566 = arith.constant 0 : index
    %653 = vector.load %arg13[%c0_565, %c97, %c0_566] : memref<2x144x128xf32, #tpu.memory_space<vmem>>, vector<2x1x128xf32>
    %654 = vector.shape_cast %653 : vector<2x1x128xf32> to vector<2x128xf32>
    %655 = arith.maximumf %652, %654 : vector<2x128xf32>
    %c0_567 = arith.constant 0 : index
    %c112 = arith.constant 112 : index
    %c0_568 = arith.constant 0 : index
    %656 = vector.load %arg13[%c0_567, %c112, %c0_568] : memref<2x144x128xf32, #tpu.memory_space<vmem>>, vector<2x1x128xf32>
    %657 = vector.shape_cast %656 : vector<2x1x128xf32> to vector<2x128xf32>
    %c0_569 = arith.constant 0 : index
    %c113 = arith.constant 113 : index
    %c0_570 = arith.constant 0 : index
    %658 = vector.load %arg13[%c0_569, %c113, %c0_570] : memref<2x144x128xf32, #tpu.memory_space<vmem>>, vector<2x1x128xf32>
    %659 = vector.shape_cast %658 : vector<2x1x128xf32> to vector<2x128xf32>
    %660 = arith.maximumf %657, %659 : vector<2x128xf32>
    %661 = arith.maximumf %655, %660 : vector<2x128xf32>
    %c12_571 = arith.constant 12 : index
    %c0_572 = arith.constant 0 : index
    %c0_573 = arith.constant 0 : index
    %662 = vector.load %arg9[%c12_571, %c0_572, %c0_573] : memref<16x128x128xf32, #tpu.memory_space<vmem>>, vector<1x128x128xf32>
    %663 = vector.shape_cast %662 : vector<1x128x128xf32> to vector<128x128xf32>
    %cst_574 = arith.constant dense<0.000000e+00> : vector<2x128xf32>
    %664 = tpu.matmul %661, %663, %cst_574 {dimension_numbers = #tpu.dot_dimension_numbers<[1], [0], [0], [1], [0, 0, 1, 1], [], []>} : vector<2x128xf32>, vector<128x128xf32>, vector<2x128xf32> -> vector<2x128xf32>
    %665 = arith.addf %650, %664 : vector<2x128xf32>
    %c0_575 = arith.constant 0 : index
    %c98 = arith.constant 98 : index
    %c0_576 = arith.constant 0 : index
    %666 = vector.load %arg13[%c0_575, %c98, %c0_576] : memref<2x144x128xf32, #tpu.memory_space<vmem>>, vector<2x1x128xf32>
    %667 = vector.shape_cast %666 : vector<2x1x128xf32> to vector<2x128xf32>
    %c0_577 = arith.constant 0 : index
    %c99 = arith.constant 99 : index
    %c0_578 = arith.constant 0 : index
    %668 = vector.load %arg13[%c0_577, %c99, %c0_578] : memref<2x144x128xf32, #tpu.memory_space<vmem>>, vector<2x1x128xf32>
    %669 = vector.shape_cast %668 : vector<2x1x128xf32> to vector<2x128xf32>
    %670 = arith.maximumf %667, %669 : vector<2x128xf32>
    %c0_579 = arith.constant 0 : index
    %c114 = arith.constant 114 : index
    %c0_580 = arith.constant 0 : index
    %671 = vector.load %arg13[%c0_579, %c114, %c0_580] : memref<2x144x128xf32, #tpu.memory_space<vmem>>, vector<2x1x128xf32>
    %672 = vector.shape_cast %671 : vector<2x1x128xf32> to vector<2x128xf32>
    %c0_581 = arith.constant 0 : index
    %c115 = arith.constant 115 : index
    %c0_582 = arith.constant 0 : index
    %673 = vector.load %arg13[%c0_581, %c115, %c0_582] : memref<2x144x128xf32, #tpu.memory_space<vmem>>, vector<2x1x128xf32>
    %674 = vector.shape_cast %673 : vector<2x1x128xf32> to vector<2x128xf32>
    %675 = arith.maximumf %672, %674 : vector<2x128xf32>
    %676 = arith.maximumf %670, %675 : vector<2x128xf32>
    %c13_583 = arith.constant 13 : index
    %c0_584 = arith.constant 0 : index
    %c0_585 = arith.constant 0 : index
    %677 = vector.load %arg9[%c13_583, %c0_584, %c0_585] : memref<16x128x128xf32, #tpu.memory_space<vmem>>, vector<1x128x128xf32>
    %678 = vector.shape_cast %677 : vector<1x128x128xf32> to vector<128x128xf32>
    %cst_586 = arith.constant dense<0.000000e+00> : vector<2x128xf32>
    %679 = tpu.matmul %676, %678, %cst_586 {dimension_numbers = #tpu.dot_dimension_numbers<[1], [0], [0], [1], [0, 0, 1, 1], [], []>} : vector<2x128xf32>, vector<128x128xf32>, vector<2x128xf32> -> vector<2x128xf32>
    %680 = arith.addf %665, %679 : vector<2x128xf32>
    %c0_587 = arith.constant 0 : index
    %c100 = arith.constant 100 : index
    %c0_588 = arith.constant 0 : index
    %681 = vector.load %arg13[%c0_587, %c100, %c0_588] : memref<2x144x128xf32, #tpu.memory_space<vmem>>, vector<2x1x128xf32>
    %682 = vector.shape_cast %681 : vector<2x1x128xf32> to vector<2x128xf32>
    %c0_589 = arith.constant 0 : index
    %c101 = arith.constant 101 : index
    %c0_590 = arith.constant 0 : index
    %683 = vector.load %arg13[%c0_589, %c101, %c0_590] : memref<2x144x128xf32, #tpu.memory_space<vmem>>, vector<2x1x128xf32>
    %684 = vector.shape_cast %683 : vector<2x1x128xf32> to vector<2x128xf32>
    %685 = arith.maximumf %682, %684 : vector<2x128xf32>
    %c0_591 = arith.constant 0 : index
    %c116 = arith.constant 116 : index
    %c0_592 = arith.constant 0 : index
    %686 = vector.load %arg13[%c0_591, %c116, %c0_592] : memref<2x144x128xf32, #tpu.memory_space<vmem>>, vector<2x1x128xf32>
    %687 = vector.shape_cast %686 : vector<2x1x128xf32> to vector<2x128xf32>
    %c0_593 = arith.constant 0 : index
    %c117 = arith.constant 117 : index
    %c0_594 = arith.constant 0 : index
    %688 = vector.load %arg13[%c0_593, %c117, %c0_594] : memref<2x144x128xf32, #tpu.memory_space<vmem>>, vector<2x1x128xf32>
    %689 = vector.shape_cast %688 : vector<2x1x128xf32> to vector<2x128xf32>
    %690 = arith.maximumf %687, %689 : vector<2x128xf32>
    %691 = arith.maximumf %685, %690 : vector<2x128xf32>
    %c14_595 = arith.constant 14 : index
    %c0_596 = arith.constant 0 : index
    %c0_597 = arith.constant 0 : index
    %692 = vector.load %arg9[%c14_595, %c0_596, %c0_597] : memref<16x128x128xf32, #tpu.memory_space<vmem>>, vector<1x128x128xf32>
    %693 = vector.shape_cast %692 : vector<1x128x128xf32> to vector<128x128xf32>
    %cst_598 = arith.constant dense<0.000000e+00> : vector<2x128xf32>
    %694 = tpu.matmul %691, %693, %cst_598 {dimension_numbers = #tpu.dot_dimension_numbers<[1], [0], [0], [1], [0, 0, 1, 1], [], []>} : vector<2x128xf32>, vector<128x128xf32>, vector<2x128xf32> -> vector<2x128xf32>
    %695 = arith.addf %680, %694 : vector<2x128xf32>
    %c0_599 = arith.constant 0 : index
    %c102 = arith.constant 102 : index
    %c0_600 = arith.constant 0 : index
    %696 = vector.load %arg13[%c0_599, %c102, %c0_600] : memref<2x144x128xf32, #tpu.memory_space<vmem>>, vector<2x1x128xf32>
    %697 = vector.shape_cast %696 : vector<2x1x128xf32> to vector<2x128xf32>
    %c0_601 = arith.constant 0 : index
    %c103 = arith.constant 103 : index
    %c0_602 = arith.constant 0 : index
    %698 = vector.load %arg13[%c0_601, %c103, %c0_602] : memref<2x144x128xf32, #tpu.memory_space<vmem>>, vector<2x1x128xf32>
    %699 = vector.shape_cast %698 : vector<2x1x128xf32> to vector<2x128xf32>
    %700 = arith.maximumf %697, %699 : vector<2x128xf32>
    %c0_603 = arith.constant 0 : index
    %c118 = arith.constant 118 : index
    %c0_604 = arith.constant 0 : index
    %701 = vector.load %arg13[%c0_603, %c118, %c0_604] : memref<2x144x128xf32, #tpu.memory_space<vmem>>, vector<2x1x128xf32>
    %702 = vector.shape_cast %701 : vector<2x1x128xf32> to vector<2x128xf32>
    %c0_605 = arith.constant 0 : index
    %c119 = arith.constant 119 : index
    %c0_606 = arith.constant 0 : index
    %703 = vector.load %arg13[%c0_605, %c119, %c0_606] : memref<2x144x128xf32, #tpu.memory_space<vmem>>, vector<2x1x128xf32>
    %704 = vector.shape_cast %703 : vector<2x1x128xf32> to vector<2x128xf32>
    %705 = arith.maximumf %702, %704 : vector<2x128xf32>
    %706 = arith.maximumf %700, %705 : vector<2x128xf32>
    %c15_607 = arith.constant 15 : index
    %c0_608 = arith.constant 0 : index
    %c0_609 = arith.constant 0 : index
    %707 = vector.load %arg9[%c15_607, %c0_608, %c0_609] : memref<16x128x128xf32, #tpu.memory_space<vmem>>, vector<1x128x128xf32>
    %708 = vector.shape_cast %707 : vector<1x128x128xf32> to vector<128x128xf32>
    %cst_610 = arith.constant dense<0.000000e+00> : vector<2x128xf32>
    %709 = tpu.matmul %706, %708, %cst_610 {dimension_numbers = #tpu.dot_dimension_numbers<[1], [0], [0], [1], [0, 0, 1, 1], [], []>} : vector<2x128xf32>, vector<128x128xf32>, vector<2x128xf32> -> vector<2x128xf32>
    %710 = arith.addf %695, %709 : vector<2x128xf32>
    %c0_611 = arith.constant 0 : index
    %c0_612 = arith.constant 0 : index
    %711 = vector.load %arg10[%c0_611, %c0_612] : memref<1x128xf32, #tpu.memory_space<vmem>>, vector<1x128xf32>
    %712 = vector.broadcast %711 : vector<1x128xf32> to vector<2x128xf32>
    %713 = arith.addf %710, %712 : vector<2x128xf32>
    %c0_613 = arith.constant 0 : index
    %c0_614 = arith.constant 0 : index
    %714 = vector.load %arg11[%c0_613, %c0_614] : memref<2x128xf32, #tpu.memory_space<vmem>>, vector<2x128xf32>
    tpu.vector_store %arg11[%c0_613, %c0_614], %713 {strides = array<i32>} : memref<2x128xf32, #tpu.memory_space<vmem>>, vector<2x128xf32>,
    return
  }
}

</mosaic_0001>

<bundles_post_ra>
// kernel: convnet_forward.1
= control target key start
LH: loop header
LB: loop body
LE: loop exit
PB: predicated region body
PF: predicated region fallthrough
CT: control target
= control target key end

     0   :  { %v27172_v3 = vmov 0.0|0.0   ;;  %vm27192_vm0 = vcmask 130048   ;;  %s27158_s0 = inlined_call_operand.vmem [shape: f32[288,144], index: 0, kind: input, shape index: {}]   ;;  %s27159_s1 = inlined_call_operand.vmem [shape: f32[144,128], index: 1, kind: input, shape index: {}]   ;;  %s27160_s2 = inlined_call_operand.vmem [shape: f32[1,128], index: 2, kind: input, shape index: {}]   ;;  %s27161_s3 = inlined_call_operand.vmem [shape: f32[1,128], index: 3, kind: input, shape index: {}]   ;;  %s27162_s4 = inlined_call_operand.vmem [shape: f32[1,128], index: 4, kind: input, shape index: {}]   ;;  %s27163_s5 = inlined_call_operand.vmem [shape: f32[25,128,128], index: 5, kind: input, shape index: {}]   ;;  %s27164_s6 = inlined_call_operand.vmem [shape: f32[1,128], index: 6, kind: input, shape index: {}]   ;;  %s27165_s7 = inlined_call_operand.vmem [shape: f32[1,128], index: 7, kind: input, shape index: {}]   ;;  %s27166_s8 = inlined_call_operand.vmem [shape: f32[1,128], index: 8, kind: input, shape index: {}]   ;;  %s27167_s9 = inlined_call_operand.vmem [shape: f32[16,128,128], index: 9, kind: input, shape index: {}]   ;;  %s27168_s10 = inlined_call_operand.vmem [shape: f32[1,128], index: 10, kind: input, shape index: {}]   ;;  %s27169_s11 = inlined_call_operand.hbm [shape: f32[2,128], index: 11, kind: output, shape index: {}]  }
   0x1   :  { %v665_v0 = vld [vmem:[%s27159_s1] sm:$0xff]  ;;  %v666_v1 = vld [vmem:[%s27159_s1 + $0x8] sm:$0xff]  ;;  %v667_v2 = vld [vmem:[%s27159_s1 + $0x10] sm:$0xff]  ;;  %20114 = vmatprep.subr.bf16.mxu0 %v27172_v3 }
   0x2   :  { %v20115_v4 = vpack.c.bf16 %v666_v1, %v665_v0  ;;  %v668_v5 = vld [vmem:[%s27159_s1 + $0x18] sm:$0xff]  ;;  %v669_v7 = vld [vmem:[%s27159_s1 + $0x20] sm:$0xff]  ;;  %v670_v8 = vld [vmem:[%s27159_s1 + $0x28] sm:$0xff] }
   0x3   :  { %v20118_v6 = vpack.c.bf16 %v668_v5, %v667_v2  ;;  %v594_v9 = vld [vmem:[%s27158_s0 + $0x8] sm:$0xff]  ;;  %v20121_v10 = vpack.c.bf16 %v670_v8, %v669_v7  ;;  %v671_v11 = vld [vmem:[%s27159_s1 + $0x30] sm:$0xff]  ;;  %v672_v12 = vld [vmem:[%s27159_s1 + $0x38] sm:$0xff] }
   0x4   :  { %20116 = vmatpush1.bf16.msra.mxu0 %v20115_v4  ;;  %13855 = vmatprep.mubr.msk.f32.mxu0 %vm27192_vm0, %v594_v9  ;;  %v20124_v13 = vpack.c.bf16 %v672_v12, %v671_v11  ;;  %v673_v14 = vld [vmem:[%s27159_s1 + $0x40] sm:$0xff]  ;;  %v674_v15 = vld [vmem:[%s27159_s1 + $0x48] sm:$0xff]  ;;  %v675_v17 = vld [vmem:[%s27159_s1 + $0x50] sm:$0xff] }
   0x5   :  { %20117 = vmatprep.subr.bf16.mxu0 %v27172_v3  ;;  %v20127_v16 = vpack.c.bf16 %v674_v15, %v673_v14  ;;  %v676_v18 = vld [vmem:[%s27159_s1 + $0x58] sm:$0xff]  ;;  %v677_v20 = vld [vmem:[%s27159_s1 + $0x60] sm:$0xff]  ;;  %v678_v21 = vld [vmem:[%s27159_s1 + $0x68] sm:$0xff] }
   0x6   :  { %v20130_v19 = vpack.c.bf16 %v676_v18, %v675_v17  ;;  %v20133_v22 = vpack.c.bf16 %v678_v21, %v677_v20  ;;  %v679_v23 = vld [vmem:[%s27159_s1 + $0x70] sm:$0xff]  ;;  %v680_v24 = vld [vmem:[%s27159_s1 + $0x78] sm:$0xff] }
   0x8   :  { %20119 = vmatpush1.bf16.msra.mxu0 %v20118_v6 }
   0x9   :  { %20120 = vmatprep.subr.bf16.mxu0 %v27172_v3 }
   0xc   :  { %20122 = vmatpush1.bf16.msra.mxu0 %v20121_v10 }
   0xd   :  { %20123 = vmatprep.subr.bf16.mxu0 %v27172_v3 }
  0x10   :  { %20125 = vmatpush1.bf16.msra.mxu0 %v20124_v13 }
  0x11   :  { %20126 = vmatprep.subr.bf16.mxu0 %v27172_v3 }
  0x14   :  { %20128 = vmatpush1.bf16.msra.mxu0 %v20127_v16 }
  0x15   :  { %20129 = vmatprep.subr.bf16.mxu0 %v27172_v3 }
  0x18   :  { %20131 = vmatpush1.bf16.msra.mxu0 %v20130_v19 }
  0x19   :  { %20132 = vmatprep.subr.bf16.mxu0 %v27172_v3 }
  0x1a   :  { %16 = vsyncpa [#allocation5], 0  ;;  %v20136_v25 = vpack.c.bf16 %v680_v24, %v679_v23  ;;  %v681_v26 = vld [vmem:[%s27159_s1 + $0x80] sm:$0xff]  ;;  %v682_v27 = vld [vmem:[%s27159_s1 + $0x88] sm:$0xff]  ;;  %v23175_v38 = vmov 0.0   ;;  %vm27193_vm3 = vmmov 0  }
  0x1b   :  { %v20139_v28 = vpack.c.bf16 %v682_v27, %v681_v26  ;;  %v593_v29 = vld [vmem:[%s27158_s0] sm:$0xff]  ;;  %v596_v30 = vld [vmem:[%s27158_s0 + $0x18] sm:$0xff]  ;;  %v595_v31 = vld [vmem:[%s27158_s0 + $0x10] sm:$0xff]  ;;  %1647 = vst [vmem:[#allocation2 + $0x20] sm:$0xff] %v23175_v38  ;;  %vm1044_vm5 = vcmask 261120   ;;  %s23178_s28 = smov [#allocation4]  }
  0x1c   :  { %20134 = vmatpush1.bf16.msra.mxu0 %v20133_v22  ;;  %v598_v32 = vld [vmem:[%s27158_s0 + $0x28] sm:$0xff]  ;;  %v597_v33 = vld [vmem:[%s27158_s0 + $0x20] sm:$0xff]  ;;  %v600_v34 = vld [vmem:[%s27158_s0 + $0x38] sm:$0xff]  ;;  %1648 = vst [vmem:[#allocation2 + $0x28] sm:$0xff] %v23175_v38  ;;  %s13843_s29 = sshll.u32 %s23178_s28, 4  ;;  %s13844_s29 = int_to_ptr.vmem [resolvable:$true] %s13843_s29 }
  0x1d   :  { %20135 = vmatprep.subr.bf16.mxu0 %v27172_v3  ;;  %v599_v35 = vld [vmem:[%s27158_s0 + $0x30] sm:$0xff]  ;;  %v602_v36 = vld [vmem:[%s27158_s0 + $0x48] sm:$0xff]  ;;  %v601_v37 = vld [vmem:[%s27158_s0 + $0x40] sm:$0xff]  ;;  %1643 = vst [vmem:[#allocation2] sm:$0xff] %v23175_v38  ;;  %s23150_s30 = scalar_lea.vmem %s13844_s29, 32  ;;  %p23155_p1 = scmp.lt.s32.totalorder %s13844_s29, %s13844_s29 }
  0x1e   :  { %1644 = vst [vmem:[#allocation2 + $0x8] sm:$0xff] %v23175_v38  ;;  %1645 = vst [vmem:[#allocation2 + $0x10] sm:$0xff] %v23175_v38  ;;  %v604_v39 = vld [vmem:[%s27158_s0 + $0x58] sm:$0xff]  ;;  %v603_v40 = vld [vmem:[%s27158_s0 + $0x50] sm:$0xff]  ;;  %p23151_p0 = scmp.ne.s32.totalorder %s13844_s29, %s23150_s30  ;;  %p23156_p2 = scmp.lt.s32.totalorder %s23150_s30, %s23150_s30 }
  0x1f   :  { %1646 = vst [vmem:[#allocation2 + $0x18] sm:$0xff] %v23175_v38  ;;  %1649 = vst [vmem:[#allocation2 + $0x30] sm:$0xff] %v23175_v38  ;;  %v606_v41 = vld [vmem:[%s27158_s0 + $0x68] sm:$0xff]  ;;  %v605_v42 = vld [vmem:[%s27158_s0 + $0x60] sm:$0xff] }
  0x20   :  { %20137 = vmatpush1.bf16.msra.mxu0 %v20136_v25  ;;  %1650 = vst [vmem:[#allocation2 + $0x38] sm:$0xff] %v23175_v38  ;;  %1651 = vst [vmem:[#allocation2 + $0x40] sm:$0xff] %v23175_v38  ;;  %v608_v43 = vld [vmem:[%s27158_s0 + $0x78] sm:$0xff]  ;;  %v607_v44 = vld [vmem:[%s27158_s0 + $0x70] sm:$0xff]  ;;  %p23157_p3 = por %p23156_p2, %p23155_p1 }
  0x21   :  { %20138 = vmatprep.subr.bf16.mxu0 %v27172_v3  ;;  %1652 = vst [vmem:[#allocation2 + $0x48] sm:$0xff] %v23175_v38  ;;  %1653 = vst [vmem:[#allocation2 + $0x50] sm:$0xff] %v23175_v38  ;;  %v610_v45 = vld [vmem:[%s27158_s0 + $0x88] sm:$0xff]  ;;  %v609_v46 = vld [vmem:[%s27158_s0 + $0x80] sm:$0xff] }
  0x22   :  { %1654 = vst [vmem:[#allocation2 + $0x58] sm:$0xff] %v23175_v38  ;;  %1655 = vst [vmem:[#allocation2 + $0x60] sm:$0xff] %v23175_v38  ;;  %v612_v47 = vld [vmem:[%s27158_s0 + $0x98] sm:$0xff]  ;;  %v611_v48 = vld [vmem:[%s27158_s0 + $0x90] sm:$0xff]  ;;  %p23158_p4 = pnand %p23157_p3, %p23151_p0 }
  0x23   :  { %1656 = vst [vmem:[#allocation2 + $0x68] sm:$0xff] %v23175_v38  ;;  %1657 = vst [vmem:[#allocation2 + $0x70] sm:$0xff] %v23175_v38  ;;  %v614_v49 = vld [vmem:[%s27158_s0 + $0xa8] sm:$0xff]  ;;  %v613_v50 = vld [vmem:[%s27158_s0 + $0xa0] sm:$0xff] }
  0x24   :  { %20140 = vmatpush1.bf16.msra.mxu0 %v20139_v28  ;;  %1658 = vst [vmem:[#allocation2 + $0x78] sm:$0xff] %v23175_v38  ;;  %1659 = vst [vmem:[#allocation2 + $0x80] sm:$0xff] %v23175_v38  ;;  %v616_v51 = vld [vmem:[%s27158_s0 + $0xb8] sm:$0xff]  ;;  %v615_v52 = vld [vmem:[%s27158_s0 + $0xb0] sm:$0xff] }
  0x25   :  { %1660 = vst [vmem:[#allocation2 + $0x88] sm:$0xff] %v23175_v38  ;;  %1661 = vst [vmem:[#allocation2 + $0x90] sm:$0xff] %v23175_v38  ;;  %v618_v53 = vld [vmem:[%s27158_s0 + $0xc8] sm:$0xff]  ;;  %v617_v54 = vld [vmem:[%s27158_s0 + $0xc0] sm:$0xff] }
  0x26   :  { %1662 = vst [vmem:[#allocation2 + $0x98] sm:$0xff] %v23175_v38  ;;  %1663 = vst [vmem:[#allocation2 + $0xa0] sm:$0xff] %v23175_v38  ;;  %v620_v55 = vld [vmem:[%s27158_s0 + $0xd8] sm:$0xff]  ;;  %v619_v56 = vld [vmem:[%s27158_s0 + $0xd0] sm:$0xff] }
  0x27   :  { %864 = vmatmul.mubr.f32.vlgmr.msra.gmra.mrb[0].mxu0 %v593_v29  ;;  %1664 = vst [vmem:[#allocation2 + $0xa8] sm:$0xff] %v23175_v38  ;;  %1665 = vst [vmem:[#allocation2 + $0xb0] sm:$0xff] %v23175_v38  ;;  %v622_v57 = vld [vmem:[%s27158_s0 + $0xe8] sm:$0xff]  ;;  %v621_v58 = vld [vmem:[%s27158_s0 + $0xe0] sm:$0xff] }
  0x28   :  { %13856 = vmatprep.mubr.msk.f32.mxu0 %vm27192_vm0, %v596_v30  ;;  %1666 = vst [vmem:[#allocation2 + $0xb8] sm:$0xff] %v23175_v38  ;;  %1667 = vst [vmem:[#allocation2 + $0xc0] sm:$0xff] %v23175_v38  ;;  %v624_v59 = vld [vmem:[%s27158_s0 + $0xf8] sm:$0xff]  ;;  %v623_v60 = vld [vmem:[%s27158_s0 + $0xf0] sm:$0xff] }
  0x29   :  { %1668 = vst [vmem:[#allocation2 + $0xc8] sm:$0xff] %v23175_v38  ;;  %1669 = vst [vmem:[#allocation2 + $0xd0] sm:$0xff] %v23175_v38  ;;  %v626_v61 = vld [vmem:[%s27158_s0 + $0x108] sm:$0xff]  ;;  %v625_v62 = vld [vmem:[%s27158_s0 + $0x100] sm:$0xff] }
  0x2a   :  { %1671 = vst [vmem:[#allocation2 + $0xe0] sm:$0xff] %v23175_v38  ;;  %1672 = vst [vmem:[#allocation2 + $0xe8] sm:$0xff] %v23175_v38  ;;  %v628_v63 = vld [vmem:[%s27158_s0 + $0x118] sm:$0xff]  ;;  %v627_v0 = vld [vmem:[%s27158_s0 + $0x110] sm:$0xff] }
  0x2b   :  { %869 = vmatmul.mubr.f32.gmra.mrb[2].mxu0 %v595_v31  ;;  %1673 = vst [vmem:[#allocation2 + $0xf0] sm:$0xff] %v23175_v38  ;;  %1674 = vst [vmem:[#allocation2 + $0xf8] sm:$0xff] %v23175_v38  ;;  %v630_v1 = vld [vmem:[%s27158_s0 + $0x128] sm:$0xff]  ;;  %v629_v2 = vld [vmem:[%s27158_s0 + $0x120] sm:$0xff] }
  0x2c   :  { %13857 = vmatprep.mubr.msk.f32.mxu0 %vm27192_vm0, %v598_v32  ;;  %1675 = vst [vmem:[#allocation2 + $0x100] sm:$0xff] %v23175_v38  ;;  %1676 = vst [vmem:[#allocation2 + $0x108] sm:$0xff] %v23175_v38  ;;  %v632_v4 = vld [vmem:[%s27158_s0 + $0x138] sm:$0xff]  ;;  %v631_v5 = vld [vmem:[%s27158_s0 + $0x130] sm:$0xff] }
  0x2d   :  { %1677 = vst [vmem:[#allocation2 + $0x110] sm:$0xff] %v23175_v38  ;;  %1678 = vst [vmem:[#allocation2 + $0x118] sm:$0xff] %v23175_v38  ;;  %v634_v6 = vld [vmem:[%s27158_s0 + $0x148] sm:$0xff]  ;;  %v633_v7 = vld [vmem:[%s27158_s0 + $0x140] sm:$0xff] }
  0x2e   :  { %1679 = vst [vmem:[#allocation2 + $0x120] sm:$0xff] %v23175_v38  ;;  %1680 = vst [vmem:[#allocation2 + $0x128] sm:$0xff] %v23175_v38  ;;  %v636_v8 = vld [vmem:[%s27158_s0 + $0x158] sm:$0xff]  ;;  %v635_v9 = vld [vmem:[%s27158_s0 + $0x150] sm:$0xff] }
  0x2f   :  { %874 = vmatmul.mubr.f32.gmra.mrb[4].mxu0 %v597_v33  ;;  %1681 = vst [vmem:[#allocation2 + $0x130] sm:$0xff] %v23175_v38  ;;  %1682 = vst [vmem:[#allocation2 + $0x138] sm:$0xff] %v23175_v38  ;;  %v638_v10 = vld [vmem:[%s27158_s0 + $0x168] sm:$0xff]  ;;  %v637_v11 = vld [vmem:[%s27158_s0 + $0x160] sm:$0xff] }
  0x30   :  { %13858 = vmatprep.mubr.msk.f32.mxu0 %vm27192_vm0, %v600_v34  ;;  %1683 = vst [vmem:[#allocation2 + $0x140] sm:$0xff] %v23175_v38  ;;  %1684 = vst [vmem:[#allocation2 + $0x148] sm:$0xff] %v23175_v38  ;;  %v640_v12 = vld [vmem:[%s27158_s0 + $0x178] sm:$0xff]  ;;  %v639_v13 = vld [vmem:[%s27158_s0 + $0x170] sm:$0xff] }
  0x31   :  { %1685 = vst [vmem:[#allocation2 + $0x150] sm:$0xff] %v23175_v38  ;;  %1686 = vst [vmem:[#allocation2 + $0x158] sm:$0xff] %v23175_v38  ;;  %v642_v14 = vld [vmem:[%s27158_s0 + $0x188] sm:$0xff]  ;;  %v641_v15 = vld [vmem:[%s27158_s0 + $0x180] sm:$0xff] }
  0x32   :  { %1687 = vst [vmem:[#allocation2 + $0x160] sm:$0xff] %v23175_v38  ;;  %1688 = vst [vmem:[#allocation2 + $0x168] sm:$0xff] %v23175_v38  ;;  %v644_v16 = vld [vmem:[%s27158_s0 + $0x198] sm:$0xff]  ;;  %v643_v17 = vld [vmem:[%s27158_s0 + $0x190] sm:$0xff] }
  0x33   :  { %879 = vmatmul.mubr.f32.gmra.mrb[6].mxu0 %v599_v35  ;;  %1689 = vst [vmem:[#allocation2 + $0x170] sm:$0xff] %v23175_v38  ;;  %1690 = vst [vmem:[#allocation2 + $0x178] sm:$0xff] %v23175_v38  ;;  %v646_v18 = vld [vmem:[%s27158_s0 + $0x1a8] sm:$0xff]  ;;  %v645_v19 = vld [vmem:[%s27158_s0 + $0x1a0] sm:$0xff] }
  0x34   :  { %13859 = vmatprep.mubr.msk.f32.mxu0 %vm27192_vm0, %v602_v36  ;;  %1691 = vst [vmem:[#allocation2 + $0x180] sm:$0xff] %v23175_v38  ;;  %1692 = vst [vmem:[#allocation2 + $0x188] sm:$0xff] %v23175_v38  ;;  %v648_v20 = vld [vmem:[%s27158_s0 + $0x1b8] sm:$0xff]  ;;  %v647_v21 = vld [vmem:[%s27158_s0 + $0x1b0] sm:$0xff] }
  0x35   :  { %1693 = vst [vmem:[#allocation2 + $0x190] sm:$0xff] %v23175_v38  ;;  %1694 = vst [vmem:[#allocation2 + $0x198] sm:$0xff] %v23175_v38  ;;  %v650_v22 = vld [vmem:[%s27158_s0 + $0x1c8] sm:$0xff]  ;;  %v649_v23 = vld [vmem:[%s27158_s0 + $0x1c0] sm:$0xff] }
  0x36   :  { %1695 = vst [vmem:[#allocation2 + $0x1a0] sm:$0xff] %v23175_v38  ;;  %1696 = vst [vmem:[#allocation2 + $0x1a8] sm:$0xff] %v23175_v38  ;;  %v652_v24 = vld [vmem:[%s27158_s0 + $0x1d8] sm:$0xff]  ;;  %v651_v25 = vld [vmem:[%s27158_s0 + $0x1d0] sm:$0xff] }
  0x37   :  { %1697 = vst [vmem:[#allocation2 + $0x1b0] sm:$0xff] %v23175_v38  ;;  %884 = vmatmul.mubr.f32.gmra.mrb[8].mxu0 %v601_v37  ;;  %v654_v26 = vld [vmem:[%s27158_s0 + $0x1e8] sm:$0xff]  ;;  %v653_v27 = vld [vmem:[%s27158_s0 + $0x1e0] sm:$0xff]  ;;  %v656_v28 = vld [vmem:[%s27158_s0 + $0x1f8] sm:$0xff] }
  0x38   :  { %13860 = vmatprep.mubr.msk.f32.mxu0 %vm27192_vm0, %v604_v39  ;;  %v655_v29 = vld [vmem:[%s27158_s0 + $0x1f0] sm:$0xff]  ;;  %v658_v30 = vld [vmem:[%s27158_s0 + $0x208] sm:$0xff]  ;;  %v657_v31 = vld [vmem:[%s27158_s0 + $0x200] sm:$0xff]  ;;  %v39_v39 = vlaneseq }
  0x39   :  { %v660_v32 = vld [vmem:[%s27158_s0 + $0x218] sm:$0xff]  ;;  %v659_v33 = vld [vmem:[%s27158_s0 + $0x210] sm:$0xff]  ;;  %v662_v34 = vld [vmem:[%s27158_s0 + $0x228] sm:$0xff] }
  0x3a   :  { %v661_v35 = vld [vmem:[%s27158_s0 + $0x220] sm:$0xff]  ;;  %v664_v36 = vld [vmem:[%s27158_s0 + $0x238] sm:$0xff]  ;;  %v663_v37 = vld [vmem:[%s27158_s0 + $0x230] sm:$0xff] }
  0x3b   :  { %889 = vmatmul.mubr.f32.gmra.mrb[10].mxu0 %v603_v40 }
  0x3c   :  { %13861 = vmatprep.mubr.msk.f32.mxu0 %vm27192_vm0, %v606_v41 }
  0x3f   :  { %894 = vmatmul.mubr.f32.gmra.mrb[12].mxu0 %v605_v42  ;;  %v23611_v42 = vand.u32 127, %v39_v39 }
  0x40   :  { %13862 = vmatprep.mubr.msk.f32.mxu0 %vm27192_vm0, %v608_v43 }
  0x41   :  { %v41_v43 = vadd.s32 128, %v23611_v42 }
  0x43   :  { %899 = vmatmul.mubr.f32.gmra.mrb[14].mxu0 %v607_v44 }
  0x44   :  { %13863 = vmatprep.mubr.msk.f32.mxu0 %vm27192_vm0, %v610_v45 }
  0x47   :  { %904 = vmatmul.mubr.f32.gmra.mrb[16].mxu0 %v609_v46  ;;  %v54_v46 = vand.u32 15, %v41_v43 }
  0x48   :  { %13864 = vmatprep.mubr.msk.f32.mxu0 %vm27192_vm0, %v612_v47  ;;  %v27231_v47 = vmov 0 }
  0x49   :  { %vm23614_vm1 = vcmp.lt.s32.totalorder %v54_v46, 9 }
  0x4a   :  { %v27232_v47 = vsel %vm23614_vm1, 4294967295, %v27231_v47 }
  0x4b   :  { %909 = vmatmul.mubr.f32.gmra.mrb[18].mxu0 %v611_v48  ;;  %27233 = vst [vmem:[#allocation7_spill] sm:$0xff] %v27232_v47 }
  0x4c   :  { %13865 = vmatprep.mubr.msk.f32.mxu0 %vm27192_vm0, %v614_v49  ;;  %v27170_v49 = vmov 1.0  }
  0x4d   :  { %13891 = vmatprep.mubr.msk.f32.mxu1 %vm23614_vm1, %v27170_v49 }
  0x4f   :  { %914 = vmatmul.mubr.f32.gmra.mrb[20].mxu0 %v613_v50 }
  0x50   :  { %13866 = vmatprep.mubr.msk.f32.mxu0 %vm27192_vm0, %v616_v51 }
  0x53   :  { %919 = vmatmul.mubr.f32.gmra.mrb[22].mxu0 %v615_v52 }
  0x54   :  { %13867 = vmatprep.mubr.msk.f32.mxu0 %vm27192_vm0, %v618_v53 }
  0x57   :  { %924 = vmatmul.mubr.f32.gmra.mrb[24].mxu0 %v617_v54 }
  0x58   :  { %13868 = vmatprep.mubr.msk.f32.mxu0 %vm27192_vm0, %v620_v55 }
  0x5b   :  { %929 = vmatmul.mubr.f32.gmra.mrb[26].mxu0 %v619_v56 }
  0x5c   :  { %13869 = vmatprep.mubr.msk.f32.mxu0 %vm27192_vm0, %v622_v57 }
  0x5f   :  { %934 = vmatmul.mubr.f32.gmra.mrb[28].mxu0 %v621_v58 }
  0x60   :  { %13870 = vmatprep.mubr.msk.f32.mxu0 %vm27192_vm0, %v624_v59 }
  0x63   :  { %939 = vmatmul.mubr.f32.gmra.mrb[30].mxu0 %v623_v60 }
  0x64   :  { %13871 = vmatprep.mubr.msk.f32.mxu0 %vm27192_vm0, %v626_v61 }
  0x67   :  { %944 = vmatmul.mubr.f32.gmra.mrb[32].mxu0 %v625_v62 }
  0x68   :  { %13872 = vmatprep.mubr.msk.f32.mxu0 %vm27192_vm0, %v628_v63 }
  0x6b   :  { %949 = vmatmul.mubr.f32.gmra.mrb[34].mxu0 %v627_v0 }
  0x6c   :  { %13873 = vmatprep.mubr.msk.f32.mxu0 %vm27192_vm0, %v630_v1 }
  0x6f   :  { %954 = vmatmul.mubr.f32.gmra.mrb[36].mxu0 %v629_v2 }
  0x70   :  { %13874 = vmatprep.mubr.msk.f32.mxu0 %vm27192_vm0, %v632_v4 }
  0x73   :  { %959 = vmatmul.mubr.f32.gmra.mrb[38].mxu0 %v631_v5 }
  0x74   :  { %13875 = vmatprep.mubr.msk.f32.mxu0 %vm27192_vm0, %v634_v6 }
  0x77   :  { %964 = vmatmul.mubr.f32.gmra.mrb[40].mxu0 %v633_v7 }
  0x78   :  { %13876 = vmatprep.mubr.msk.f32.mxu0 %vm27192_vm0, %v636_v8 }
  0x7b   :  { %969 = vmatmul.mubr.f32.gmra.mrb[42].mxu0 %v635_v9 }
  0x7c   :  { %13877 = vmatprep.mubr.msk.f32.mxu0 %vm27192_vm0, %v638_v10 }
  0x7f   :  { %974 = vmatmul.mubr.f32.gmra.mrb[44].mxu0 %v637_v11 }
  0x80   :  { %13878 = vmatprep.mubr.msk.f32.mxu0 %vm27192_vm0, %v640_v12 }
  0x83   :  { %979 = vmatmul.mubr.f32.gmra.mrb[46].mxu0 %v639_v13  ;;  %v13898_v13 = vld [vmem:[%s27163_s5 + $0x80] sm:$0xff] }
  0x84   :  { %13879 = vmatprep.mubr.msk.f32.mxu0 %vm27192_vm0, %v642_v14  ;;  %v13899_v14 = vld [vmem:[%s27163_s5 + $0x88] sm:$0xff] }
  0x87   :  { %984 = vmatmul.mubr.f32.gmra.mrb[48].mxu0 %v641_v15  ;;  %v13900_v15 = vld [vmem:[%s27163_s5 + $0x90] sm:$0xff] }
  0x88   :  { %13880 = vmatprep.mubr.msk.f32.mxu0 %vm27192_vm0, %v644_v16 }
  0x8b   :  { %989 = vmatmul.mubr.f32.gmra.mrb[50].mxu0 %v643_v17  ;;  %v23656_v17 = vpack.c.bf16 %v13899_v14, %v13898_v13 }
  0x8c   :  { %13881 = vmatprep.mubr.msk.f32.mxu0 %vm27192_vm0, %v646_v18  ;;  %v13901_v18 = vld [vmem:[%s27163_s5 + $0x98] sm:$0xff] }
  0x8d   :  { %21018 = vmatprep.subr.bf16.mxu0 %v23656_v17 }
  0x8e   :  { %21020 = vmatpush3.bf16.msra.mxu0 %v23656_v17 }
  0x8f   :  { %994 = vmatmul.mubr.f32.gmra.mrb[52].mxu0 %v645_v19  ;;  %v23661_v19 = vpack.c.bf16 %v13901_v18, %v13900_v15 }
  0x90   :  { %13882 = vmatprep.mubr.msk.f32.mxu0 %vm27192_vm0, %v648_v20  ;;  %v13902_v20 = vld [vmem:[%s27163_s5 + $0xa0] sm:$0xff] }
  0x91   :  { %21022 = vmatprep.subr.bf16.mxu0 %v23661_v19 }
  0x92   :  { %21024 = vmatpush3.bf16.msra.mxu0 %v23661_v19 }
  0x93   :  { %999 = vmatmul.mubr.f32.gmra.mrb[54].mxu0 %v647_v21  ;;  %v13903_v21 = vld [vmem:[%s27163_s5 + $0xa8] sm:$0xff] }
  0x94   :  { %13883 = vmatprep.mubr.msk.f32.mxu0 %vm27192_vm0, %v650_v22 }
  0x97   :  { %1004 = vmatmul.mubr.f32.gmra.mrb[56].mxu0 %v649_v23 }
  0x98   :  { %13884 = vmatprep.mubr.msk.f32.mxu0 %vm27192_vm0, %v652_v24  ;;  %v23672_v24 = vpack.c.bf16 %v13903_v21, %v13902_v20 }
  0x9a   :  { %21026 = vmatprep.subr.bf16.mxu0 %v23672_v24 }
  0x9b   :  { %1009 = vmatmul.mubr.f32.gmra.mrb[58].mxu0 %v651_v25  ;;  %v13904_v25 = vld [vmem:[%s27163_s5 + $0xb0] sm:$0xff] }
  0x9c   :  { %13885 = vmatprep.mubr.msk.f32.mxu0 %vm27192_vm0, %v654_v26  ;;  %v13905_v26 = vld [vmem:[%s27163_s5 + $0xb8] sm:$0xff]  ;;  %21028 = vmatpush3.bf16.msra.mxu0 %v23672_v24 }
  0x9f   :  { %1014 = vmatmul.mubr.f32.gmra.mrb[60].mxu0 %v653_v27  ;;  %v23683_v27 = vld [vmem:[%s27160_s2] ss:$0 sm:$0xff] }
  0xa0   :  { %13886 = vmatprep.mubr.msk.f32.mxu0 %vm27192_vm0, %v656_v28 }
  0xa3   :  { %1019 = vmatmul.mubr.f32.gmra.mrb[62].mxu0 %v655_v29 }
  0xa4   :  { %13887 = vmatprep.mubr.msk.f32.mxu0 %vm27192_vm0, %v658_v30 }
  0xa7   :  { %1024 = vmatmul.mubr.f32.gmra.mrb[64].mxu0 %v657_v31 }
  0xa8   :  { %13888 = vmatprep.mubr.msk.f32.mxu0 %vm27192_vm0, %v660_v32 }
  0xab   :  { %1029 = vmatmul.mubr.f32.gmra.mrb[66].mxu0 %v659_v33  ;;  %v23696_v33 = vpack.c.bf16 %v13905_v26, %v13904_v25 }
  0xac   :  { %13889 = vmatprep.mubr.msk.f32.mxu0 %vm27192_vm0, %v662_v34 }
  0xad   :  { %21030 = vmatprep.subr.bf16.mxu0 %v23696_v33 }
  0xae   :  { %21032 = vmatpush3.bf16.msra.mxu0 %v23696_v33 }
  0xaf   :  { %1034 = vmatmul.mubr.f32.gmra.mrb[68].mxu0 %v661_v35 }
  0xb0   :  { %13890 = vmatprep.mubr.msk.f32.mxu0 %vm27192_vm0, %v664_v36 }
  0xb3   :  { %1039 = vmatmul.mubr.f32.gmra.mrb[70].mxu0 %v663_v37 }
  0xfa   :  { %v23608_v40 = vpop.f32.mrb[0].mxu0 }
  0xfb   :  { %v867_v41 = vpop.f32.mrb[1].mxu0  ;;  %v23700_v34 = vadd.f32 %v23683_v27, %v23608_v40 }
  0xfe   :  { %v870_v44 = vpop.f32.mrb[2].mxu0 }
  0xff   :  { %v872_v45 = vpop.f32.mrb[3].mxu0  ;;  %v23686_v28 = vadd.f32 %v23683_v27, %v870_v44 }
 0x101   :  { %v20143_v37 = vpack.c.bf16 %v23686_v28, %v23700_v34 }
 0x102   :  { %v23618_v48 = vpop.f32.mrb[4].mxu0 }
 0x103   :  { %v877_v50 = vpop.f32.mrb[5].mxu0 }
 0x104   :  { %v23720_v50 = vadd.f32 %v23683_v27, %v23618_v48 }
 0x106   :  { %v880_v51 = vpop.f32.mrb[6].mxu0 }
 0x107   :  { %v882_v52 = vpop.f32.mrb[7].mxu0  ;;  %v23709_v43 = vadd.f32 %v23683_v27, %v880_v51 }
 0x109   :  { %v20147_v51 = vpack.c.bf16 %v23709_v43, %v23720_v50 }
 0x10a   :  { %v23623_v53 = vpop.f32.mrb[8].mxu0 }
 0x10b   :  { %v887_v54 = vpop.f32.mrb[9].mxu0 }
 0x10e   :  { %v23625_v55 = vpop.f32.mrb[10].mxu0 }
 0x10f   :  { %v892_v56 = vpop.f32.mrb[11].mxu0 }
 0x112   :  { %v23627_v57 = vpop.f32.mrb[12].mxu0 }
 0x113   :  { %v897_v58 = vpop.f32.mrb[13].mxu0 }
 0x114   :  { %v23728_v58 = vadd.f32 %v23683_v27, %v23625_v55 }
 0x116   :  { %v23629_v59 = vpop.f32.mrb[14].mxu0 }
 0x117   :  { %v902_v60 = vpop.f32.mrb[15].mxu0 }
 0x11a   :  { %v23631_v61 = vpop.f32.mrb[16].mxu0 }
 0x11b   :  { %v907_v62 = vpop.f32.mrb[17].mxu0 }
 0x11e   :  { %v23633_v63 = vpop.f32.mrb[18].mxu0 }
 0x11f   :  { %v912_v0 = vpop.f32.mrb[19].mxu0 }
 0x122   :  { %v23635_v1 = vpop.f32.mrb[20].mxu0 }
 0x123   :  { %v917_v2 = vpop.f32.mrb[21].mxu0 }
 0x124   :  { %v23738_v2 = vadd.f32 %v23683_v27, %v23623_v53 }
 0x126   :  { %v23637_v4 = vpop.f32.mrb[22].mxu0  ;;  %v20151_v55 = vpack.c.bf16 %v23728_v58, %v23738_v2 }
 0x127   :  { %v922_v5 = vpop.f32.mrb[23].mxu0 }
 0x12a   :  { %v23639_v6 = vpop.f32.mrb[24].mxu0 }
 0x12b   :  { %v927_v7 = vpop.f32.mrb[25].mxu0 }
 0x12e   :  { %v23641_v8 = vpop.f32.mrb[26].mxu0 }
 0x12f   :  { %v932_v9 = vpop.f32.mrb[27].mxu0 }
 0x132   :  { %v23643_v10 = vpop.f32.mrb[28].mxu0 }
 0x133   :  { %v937_v11 = vpop.f32.mrb[29].mxu0 }
 0x134   :  { %v23746_v11 = vadd.f32 %v23683_v27, %v23629_v59 }
 0x136   :  { %v23645_v12 = vpop.f32.mrb[30].mxu0 }
 0x137   :  { %v942_v16 = vpop.f32.mrb[31].mxu0 }
 0x138   :  { %v23756_v16 = vadd.f32 %v23683_v27, %v23627_v57 }
 0x13a   :  { %v945_v22 = vpop.f32.mrb[32].mxu0  ;;  %v20155_v59 = vpack.c.bf16 %v23746_v11, %v23756_v16 }
 0x13b   :  { %v947_v23 = vpop.f32.mrb[33].mxu0  ;;  %v23690_v30 = vadd.f32 %v23683_v27, %v945_v22  ;;  %v23764_v22 = vadd.f32 %v23683_v27, %v23633_v63 }
 0x13e   :  { %v950_v29 = vpop.f32.mrb[34].mxu0 }
 0x13f   :  { %v23693_v31 = vadd.f32 %v23683_v27, %v950_v29  ;;  %v952_v32 = vpop.f32.mrb[35].mxu0  ;;  %v23774_v29 = vadd.f32 %v23683_v27, %v23631_v61 }
 0x141   :  { %v20141_v35 = vpack.c.bf16 %v23693_v31, %v23690_v30  ;;  %v20159_v63 = vpack.c.bf16 %v23764_v22, %v23774_v29 }
 0x142   :  { %v955_v36 = vpop.f32.mrb[36].mxu0 }
 0x143   :  { %v957_v41 = vpop.f32.mrb[37].mxu0  ;;  %20142 = vmatprep.subr.bf16.mxu1 %v20141_v35  ;;  %v23713_v40 = vadd.f32 %v23683_v27, %v955_v36 }
 0x144   :  { %20144 = vmatpush3.bf16.msra.mxu1 %v20143_v37  ;;  %v23782_v37 = vadd.f32 %v23683_v27, %v23637_v4 }
 0x146   :  { %v960_v44 = vpop.f32.mrb[38].mxu0 }
 0x147   :  { %v23716_v45 = vadd.f32 %v23683_v27, %v960_v44  ;;  %v962_v46 = vpop.f32.mrb[39].mxu0 }
 0x149   :  { %v20145_v52 = vpack.c.bf16 %v23716_v45, %v23713_v40 }
 0x14a   :  { %v965_v54 = vpop.f32.mrb[40].mxu0 }
 0x14b   :  { %v967_v56 = vpop.f32.mrb[41].mxu0  ;;  %20146 = vmatprep.subr.bf16.mxu1 %v20145_v52  ;;  %v23731_v62 = vadd.f32 %v23683_v27, %v965_v54  ;;  %v23792_v52 = vadd.f32 %v23683_v27, %v23635_v1 }
 0x14c   :  { %20148 = vmatpush3.bf16.msra.mxu1 %v20147_v51 }
 0x14d   :  { %v20163_v4 = vpack.c.bf16 %v23782_v37, %v23792_v52 }
 0x14e   :  { %v970_v60 = vpop.f32.mrb[42].mxu0 }
 0x14f   :  { %v23734_v48 = vadd.f32 %v23683_v27, %v970_v60  ;;  %v972_v0 = vpop.f32.mrb[43].mxu0  ;;  %v23800_v60 = vadd.f32 %v23683_v27, %v23641_v8 }
 0x151   :  { %v20149_v5 = vpack.c.bf16 %v23734_v48, %v23731_v62 }
 0x152   :  { %v975_v7 = vpop.f32.mrb[44].mxu0 }
 0x153   :  { %v977_v9 = vpop.f32.mrb[45].mxu0  ;;  %20150 = vmatprep.subr.bf16.mxu1 %v20149_v5  ;;  %v23749_v14 = vadd.f32 %v23683_v27, %v975_v7 }
 0x154   :  { %20152 = vmatpush3.bf16.msra.mxu1 %v20151_v55  ;;  %v23810_v55 = vadd.f32 %v23683_v27, %v23639_v6 }
 0x156   :  { %v980_v13 = vpop.f32.mrb[46].mxu0  ;;  %v20167_v8 = vpack.c.bf16 %v23800_v60, %v23810_v55 }
 0x157   :  { %v23752_v53 = vadd.f32 %v23683_v27, %v980_v13  ;;  %v982_v15 = vpop.f32.mrb[47].mxu0 }
 0x159   :  { %v20153_v18 = vpack.c.bf16 %v23752_v53, %v23749_v14 }
 0x15a   :  { %v985_v20 = vpop.f32.mrb[48].mxu0 }
 0x15b   :  { %v987_v21 = vpop.f32.mrb[49].mxu0  ;;  %20154 = vmatprep.subr.bf16.mxu1 %v20153_v18  ;;  %v23767_v25 = vadd.f32 %v23683_v27, %v985_v20  ;;  %v23818_v18 = vadd.f32 %v23683_v27, %v23645_v12 }
 0x15c   :  { %20156 = vmatpush3.bf16.msra.mxu1 %v20155_v59 }
 0x15e   :  { %v990_v23 = vpop.f32.mrb[50].mxu0 }
 0x15f   :  { %v23770_v57 = vadd.f32 %v23683_v27, %v990_v23  ;;  %v992_v26 = vpop.f32.mrb[51].mxu0  ;;  %v23828_v23 = vadd.f32 %v23683_v27, %v23643_v10 }
 0x160   :  { %v47_v26 = vand.u32 15, %v23611_v42 }
 0x161   :  { %v20157_v32 = vpack.c.bf16 %v23770_v57, %v23767_v25  ;;  %v20171_v12 = vpack.c.bf16 %v23818_v18, %v23828_v23 }
 0x162   :  { %v995_v35 = vpop.f32.mrb[52].mxu0  ;;  %vm23835_vm2 = vcmp.lt.s32.totalorder %v47_v26, 9 }
 0x163   :  { %v997_v36 = vpop.f32.mrb[53].mxu0  ;;  %20158 = vmatprep.subr.bf16.mxu1 %v20157_v32  ;;  %v23785_v44 = vadd.f32 %v23683_v27, %v995_v35 }
 0x164   :  { %20160 = vmatpush3.bf16.msra.mxu1 %v20159_v63  ;;  %v27234_v36 = vmov 0 }
 0x165   :  { %v27235_v36 = vsel %vm23835_vm2, 4294967295, %v27234_v36 }
 0x166   :  { %v1000_v41 = vpop.f32.mrb[54].mxu0  ;;  %27236 = vst [vmem:[#allocation8_spill] sm:$0xff] %v27235_v36 }
 0x167   :  { %v23788_v61 = vadd.f32 %v23683_v27, %v1000_v41  ;;  %v1002_v46 = vpop.f32.mrb[55].mxu0 }
 0x169   :  { %v20161_v54 = vpack.c.bf16 %v23788_v61, %v23785_v44 }
 0x16a   :  { %v1005_v51 = vpop.f32.mrb[56].mxu0 }
 0x16b   :  { %v1007_v56 = vpop.f32.mrb[57].mxu0  ;;  %20162 = vmatprep.subr.bf16.mxu1 %v20161_v54  ;;  %v23803_v5 = vadd.f32 %v23683_v27, %v1005_v51  ;;  %v42_v51 = vadd.s32 256, %v23611_v42 }
 0x16c   :  { %20164 = vmatpush3.bf16.msra.mxu1 %v20163_v4 }
 0x16e   :  { %v1010_v0 = vpop.f32.mrb[58].mxu0 }
 0x16f   :  { %v23806_v1 = vadd.f32 %v23683_v27, %v1010_v0  ;;  %v1012_v7 = vpop.f32.mrb[59].mxu0 }
 0x170   :  { %v61_v7 = vand.u32 15, %v42_v51  ;;  %v1209_v51 = vmul.f32 %v23734_v48, %v23734_v48 }
 0x171   :  { %v20165_v9 = vpack.c.bf16 %v23806_v1, %v23803_v5 }
 0x172   :  { %v1015_v13 = vpop.f32.mrb[60].mxu0  ;;  %vm81_vm4 = vcmp.lt.s32.totalorder %v61_v7, 9 }
 0x173   :  { %v1017_v15 = vpop.f32.mrb[61].mxu0  ;;  %20166 = vmatprep.subr.bf16.mxu1 %v20165_v9  ;;  %v23821_v59 = vadd.f32 %v23683_v27, %v1015_v13  ;;  %v1205_v9 = vmul.f32 %v23693_v31, %v23693_v31 }
 0x174   :  { %20168 = vmatpush3.bf16.msra.mxu1 %v20167_v8 }
 0x176   :  { %v1020_v20 = vpop.f32.mrb[62].mxu0 }
 0x177   :  { %v23824_v6 = vadd.f32 %v23683_v27, %v1020_v20  ;;  %v1022_v21 = vpop.f32.mrb[63].mxu0  ;;  %v1204_v20 = vmul.f32 %v23690_v30, %v23690_v30 }
 0x178   :  { %v1189_v21 = vmul.f32 %v23686_v28, %v23686_v28 }
 0x179   :  { %v20169_v32 = vpack.c.bf16 %v23824_v6, %v23821_v59 }
 0x17a   :  { %v1025_v35 = vpop.f32.mrb[64].mxu0 }
 0x17b   :  { %v1027_v63 = vpop.f32.mrb[65].mxu0  ;;  %20170 = vmatprep.subr.bf16.mxu1 %v20169_v32  ;;  %v23841_v41 = vadd.f32 %v23683_v27, %v1025_v35  ;;  %v1207_v32 = vmul.f32 %v23716_v45, %v23716_v45  ;;  %v20179_v35 = vpack.c.bf16 %v1205_v9, %v1204_v20  ;;  %v1193_v9 = vmul.f32 %v23728_v58, %v23728_v58 }
 0x17c   :  { %20172 = vmatpush3.bf16.msra.mxu1 %v20171_v12  ;;  %v1188_v12 = vmul.f32 %v23700_v34, %v23700_v34  ;;  %v1206_v63 = vmul.f32 %v23713_v40, %v23713_v40  ;;  %v1192_v20 = vmul.f32 %v23738_v2, %v23738_v2 }
 0x17d   :  { %20173 = vmatprep.subr.bf16.mxu1 %v27172_v3 }
 0x17e   :  { %v1030_v10 = vpop.f32.mrb[66].mxu0 }
 0x17f   :  { %v23844_v46 = vadd.f32 %v23683_v27, %v1030_v10  ;;  %v1032_v54 = vpop.f32.mrb[67].mxu0  ;;  %13892 = vmatmul.mubr.msk.f32.vlgmr.msra.gmra.mrb[0].mxu1 %vm23835_vm2, %v27170_v49  ;;  %v20181_v10 = vpack.c.bf16 %v1189_v21, %v1188_v12  ;;  %v1210_v21 = vmul.f32 %v23749_v14, %v23749_v14 }
 0x180   :  { %16590 = vmatprep.mubr.msk.f32.mxu1 %vm27193_vm3, %v23175_v38  ;;  %v1191_v54 = vmul.f32 %v23709_v43, %v23709_v43 }
 0x181   :  { %v20174_v4 = vpack.c.bf16 %v23844_v46, %v23841_v41 }
 0x182   :  { %v1035_v56 = vpop.f32.mrb[68].mxu0 }
 0x183   :  { %v1037_v0 = vpop.f32.mrb[69].mxu0  ;;  %20175 = vmatpush3.bf16.msra.mxu1 %v20174_v4  ;;  %v23858_v8 = vadd.f32 %v23683_v27, %v1035_v56  ;;  %v20183_v4 = vpack.c.bf16 %v1207_v32, %v1206_v63  ;;  %v1190_v56 = vmul.f32 %v23720_v50, %v23720_v50  ;;  %v1195_v32 = vmul.f32 %v23746_v11, %v23746_v11 }
 0x184   :  { %20176 = vmatprep.subr.bf16.mxu1 %v27172_v3  ;;  %v1208_v0 = vmul.f32 %v23731_v62, %v23731_v62  ;;  %v1194_v63 = vmul.f32 %v23756_v16, %v23756_v16 }
 0x185   :  { %v20185_v7 = vpack.c.bf16 %v1191_v54, %v1190_v56 }
 0x186   :  { %v1040_v13 = vpop.f32.mrb[70].mxu0  ;;  %v20193_v54 = vpack.c.bf16 %v1195_v32, %v1194_v63 }
 0x187   :  { %v23861_v15 = vadd.f32 %v23683_v27, %v1040_v13  ;;  %v1042_v42 = vpop.f32.mrb[71].mxu0  ;;  %v23874_v27 = vsel %vm81_vm4, 1.0, %v23175_v38  ;;  %v1211_v13 = vmul.f32 %v23752_v53, %v23752_v53 }
 0x188   :  { %v20187_v42 = vpack.c.bf16 %v1209_v51, %v1208_v0  ;;  %v1197_v51 = vmul.f32 %v23764_v22, %v23764_v22  ;;  %v1196_v0 = vmul.f32 %v23774_v29, %v23774_v29 }
 0x189   :  { %v20177_v26 = vpack.c.bf16 %v23861_v15, %v23858_v8  ;;  %v20191_v12 = vpack.c.bf16 %v1211_v13, %v1210_v21  ;;  %v1199_v13 = vmul.f32 %v23782_v37, %v23782_v37  ;;  %v1198_v21 = vmul.f32 %v23792_v52, %v23792_v52 }
 0x18b   :  { %20178 = vmatpush3.bf16.msra.mxu1 %v20177_v26  ;;  %v20189_v26 = vpack.c.bf16 %v1193_v9, %v1192_v20  ;;  %v20197_v9 = vpack.c.bf16 %v1197_v51, %v1196_v0  ;;  %v20201_v32 = vpack.c.bf16 %v1199_v13, %v1198_v21  ;;  %v1202_v0 = vmul.f32 %v23828_v23, %v23828_v23 }
 0x18c   :  { %20180 = vmatprep.subr.bf16.mxu1 %v20179_v35  ;;  %v1213_v35 = vmul.f32 %v23770_v57, %v23770_v57  ;;  %v1220_v13 = vmul.f32 %v23841_v41, %v23841_v41  ;;  %v1222_v21 = vmul.f32 %v23858_v8, %v23858_v8 }
 0x18e   :  { %16591 = vmatmul.mubr.msk.f32.vlgmr.msra.gmra.mrb[2].mxu1 %vm1044_vm5, %v23874_v27 }
 0x18f   :  { %20182 = vmatpush3.bf16.msra.mxu1 %v20181_v10  ;;  %13894 = vmatprep.mubr.msk.f32.mxu1 %vm23614_vm1, %v27170_v49  ;;  %v1212_v10 = vmul.f32 %v23767_v25, %v23767_v25 }
 0x190   :  { %20184 = vmatprep.subr.bf16.mxu1 %v20183_v4  ;;  %v1215_v4 = vmul.f32 %v23788_v61, %v23788_v61 }
 0x191   :  { %v20195_v56 = vpack.c.bf16 %v1213_v35, %v1212_v10  ;;  %v1201_v35 = vmul.f32 %v23800_v60, %v23800_v60  ;;  %v1200_v10 = vmul.f32 %v23810_v55, %v23810_v55 }
 0x193   :  { %20186 = vmatpush3.bf16.msra.mxu1 %v20185_v7  ;;  %v1214_v7 = vmul.f32 %v23785_v44, %v23785_v44  ;;  %v20205_v51 = vpack.c.bf16 %v1201_v35, %v1200_v10  ;;  %v13911_v35 = vld [vmem:[%s27163_s5 + $0xe8] sm:$0xff]  ;;  %v13913_v10 = vld [vmem:[%s27163_s5 + $0xf8] sm:$0xff] }
 0x194   :  { %20188 = vmatprep.subr.bf16.mxu1 %v20187_v42  ;;  %v1217_v42 = vmul.f32 %v23806_v1, %v23806_v1 }
 0x195   :  { %v20199_v20 = vpack.c.bf16 %v1215_v4, %v1214_v7  ;;  %v1203_v4 = vmul.f32 %v23818_v18, %v23818_v18 }
 0x197   :  { %20190 = vmatpush3.bf16.msra.mxu1 %v20189_v26  ;;  %v1216_v26 = vmul.f32 %v23803_v5, %v23803_v5  ;;  %v20209_v7 = vpack.c.bf16 %v1203_v4, %v1202_v0  ;;  %v6942_v4 = vld [vmem:[#allocation2 + $0xe1] sm:$0xff]  ;;  %v6943_v0 = vld [vmem:[#allocation2 + $0xe9] sm:$0xff] }
 0x198   :  { %20192 = vmatprep.subr.bf16.mxu1 %v20191_v12  ;;  %v1219_v12 = vmul.f32 %v23824_v6, %v23824_v6  ;;  %18111 = vmatprep.mubr.f32.mxu0 %v6942_v4 }
 0x199   :  { %v20203_v63 = vpack.c.bf16 %v1217_v42, %v1216_v26 }
 0x19b   :  { %20194 = vmatpush3.bf16.msra.mxu1 %v20193_v54  ;;  %v1218_v54 = vmul.f32 %v23821_v59, %v23821_v59 }
 0x19c   :  { %20196 = vmatprep.subr.bf16.mxu1 %v20195_v56 }
 0x19d   :  { %v20207_v56 = vpack.c.bf16 %v1219_v12, %v1218_v54 }
 0x19f   :  { %20198 = vmatpush3.bf16.msra.mxu1 %v20197_v9  ;;  %v1221_v9 = vmul.f32 %v23844_v46, %v23844_v46 }
 0x1a0   :  { %20200 = vmatprep.subr.bf16.mxu1 %v20199_v20  ;;  %v1223_v20 = vmul.f32 %v23861_v15, %v23861_v15 }
 0x1a1   :  { %v20212_v42 = vpack.c.bf16 %v1221_v9, %v1220_v13  ;;  %v1755_v9 = vld [vmem:[%s27163_s5 + $0x8] sm:$0xff] }
 0x1a2   :  { %v20215_v26 = vpack.c.bf16 %v1223_v20, %v1222_v21  ;;  %v1772_v13 = vld [vmem:[#allocation2 + $0x11] sm:$0xff]  ;;  %v1756_v21 = vld [vmem:[%s27163_s5 + $0x10] sm:$0xff] }
 0x1a3   :  { %20202 = vmatpush3.bf16.msra.mxu1 %v20201_v32  ;;  %v6944_v20 = vld [vmem:[#allocation2 + $0xf1] sm:$0xff] }
 0x1a4   :  { %20204 = vmatprep.subr.bf16.mxu1 %v20203_v63  ;;  %v13912_v63 = vld [vmem:[%s27163_s5 + $0xf0] sm:$0xff] }
 0x1a5   :  { %v20245_v54 = vpack.c.bf16 %v13913_v10, %v13912_v63  ;;  %v1762_v63 = vld [vmem:[%s27163_s5 + $0x40] sm:$0xff]  ;;  %v1763_v10 = vld [vmem:[%s27163_s5 + $0x48] sm:$0xff] }
 0x1a7   :  { %20206 = vmatpush3.bf16.msra.mxu1 %v20205_v51  ;;  %v1770_v51 = vld [vmem:[#allocation2 + $0x1] sm:$0xff] }
 0x1a8   :  { %20208 = vmatprep.subr.bf16.mxu1 %v20207_v56  ;;  %v1771_v56 = vld [vmem:[#allocation2 + $0x9] sm:$0xff] }
 0x1ab   :  { %20210 = vmatpush3.bf16.msra.mxu1 %v20209_v7  ;;  %v1754_v7 = vld [vmem:[%s27163_s5] sm:$0xff] }
 0x1ac   :  { %20211 = vmatprep.subr.bf16.mxu1 %v27172_v3 }
 0x1ae   :  { %13895 = vmatmul.mubr.msk.f32.vlgmr.msra.gmra.mrb[4].mxu1 %vm23835_vm2, %v27170_v49 }
 0x1af   :  { %20213 = vmatpush3.bf16.msra.mxu1 %v20212_v42  ;;  %16601 = vmatprep.mubr.msk.f32.mxu1 %vm27193_vm3, %v23175_v38  ;;  %v13906_v38 = vld [vmem:[%s27163_s5 + $0xc0] sm:$0xff]  ;;  %v20249_v42 = vpack.c.bf16 %v1755_v9, %v1754_v7  ;;  %v1765_v7 = vld [vmem:[%s27163_s5 + $0x58] sm:$0xff] }
 0x1b0   :  { %20214 = vmatprep.subr.bf16.mxu1 %v27172_v3 }
 0x1b3   :  { %20216 = vmatpush3.bf16.msra.mxu1 %v20215_v26  ;;  %v1773_v26 = vld [vmem:[#allocation2 + $0x19] sm:$0xff] }
 0x1b4   :  { %20218 = vmatprep.subr.bf16.mxu1 %v23656_v17 }
 0x1b6   :  { %16602 = vmatmul.mubr.msk.f32.vlgmr.msra.gmra.mrb[6].mxu1 %vm1044_vm5, %v23874_v27 }
 0x1b7   :  { %20220 = vmatpush3.bf16.msra.mxu1 %v23656_v17  ;;  %v13907_v17 = vld [vmem:[%s27163_s5 + $0xc8] sm:$0xff]  ;;  %16636 = vmatprep.mubr.f32.mxu1 %v1770_v51 }
 0x1b8   :  { %20222 = vmatprep.subr.bf16.mxu1 %v23661_v19  ;;  %v20233_v27 = vpack.c.bf16 %v13907_v17, %v13906_v38  ;;  %v1757_v38 = vld [vmem:[%s27163_s5 + $0x18] sm:$0xff] }
 0x1b9   :  { %v20253_v17 = vpack.c.bf16 %v1757_v38, %v1756_v21  ;;  %v1768_v21 = vld [vmem:[%s27163_s5 + $0x70] sm:$0xff] }
 0x1ba   :  { %21034 = vmatprep.subr.bf16.mxu0 %v20233_v27 }
 0x1bb   :  { %20224 = vmatpush3.bf16.msra.mxu1 %v23661_v19  ;;  %v13908_v19 = vld [vmem:[%s27163_s5 + $0xd0] sm:$0xff]  ;;  %21036 = vmatpush3.bf16.msra.mxu0 %v20233_v27 }
 0x1bc   :  { %20226 = vmatprep.subr.bf16.mxu1 %v23672_v24 }
 0x1bf   :  { %20228 = vmatpush3.bf16.msra.mxu1 %v23672_v24  ;;  %v13909_v24 = vld [vmem:[%s27163_s5 + $0xd8] sm:$0xff] }
 0x1c0   :  { %20230 = vmatprep.subr.bf16.mxu1 %v23696_v33  ;;  %v20237_v32 = vpack.c.bf16 %v13909_v24, %v13908_v19  ;;  %v6945_v19 = vld [vmem:[#allocation2 + $0xf9] sm:$0xff] }
 0x1c1   :  { %v1759_v24 = vld [vmem:[%s27163_s5 + $0x28] sm:$0xff] }
 0x1c2   :  { %21038 = vmatprep.subr.bf16.mxu0 %v20237_v32 }
 0x1c3   :  { %20232 = vmatpush3.bf16.msra.mxu1 %v23696_v33  ;;  %21040 = vmatpush3.bf16.msra.mxu0 %v20237_v32  ;;  %v13910_v33 = vld [vmem:[%s27163_s5 + $0xe0] sm:$0xff] }
 0x1c4   :  { %20234 = vmatprep.subr.bf16.mxu1 %v20233_v27  ;;  %v20241_v12 = vpack.c.bf16 %v13911_v35, %v13910_v33  ;;  %v1760_v33 = vld [vmem:[%s27163_s5 + $0x30] sm:$0xff]  ;;  %v1761_v35 = vld [vmem:[%s27163_s5 + $0x38] sm:$0xff] }
 0x1c6   :  { %21042 = vmatprep.subr.bf16.mxu0 %v20241_v12 }
 0x1c7   :  { %20236 = vmatpush3.bf16.msra.mxu1 %v20233_v27  ;;  %21044 = vmatpush3.bf16.msra.mxu0 %v20241_v12  ;;  %v1758_v27 = vld [vmem:[%s27163_s5 + $0x20] sm:$0xff] }
 0x1c8   :  { %20238 = vmatprep.subr.bf16.mxu1 %v20237_v32  ;;  %21046 = vmatprep.subr.bf16.mxu0 %v20245_v54 }
 0x1cb   :  { %20240 = vmatpush3.bf16.msra.mxu1 %v20237_v32  ;;  %21048 = vmatpush3.bf16.msra.mxu0 %v20245_v54  ;;  %v20257_v32 = vpack.c.bf16 %v1759_v24, %v1758_v27 }
 0x1cc   :  { %20242 = vmatprep.subr.bf16.mxu1 %v20241_v12  ;;  %21050 = vmatprep.subr.bf16.mxu0 %v20249_v42 }
 0x1ce   :  { %18112 = vmatmul.mubr.f32.vlgmr.msra.gmra.mrb[72].mxu0 %v6943_v0  ;;  %v1764_v0 = vld [vmem:[%s27163_s5 + $0x50] sm:$0xff] }
 0x1cf   :  { %20244 = vmatpush3.bf16.msra.mxu1 %v20241_v12  ;;  %18114 = vmatprep.mubr.f32.mxu0 %v6944_v20  ;;  %v20261_v12 = vpack.c.bf16 %v1761_v35, %v1760_v33  ;;  %v20269_v9 = vpack.c.bf16 %v1765_v7, %v1764_v0  ;;  %v24043_v0 = vshrl.u32 %v39_v39, 7 }
 0x1d0   :  { %20246 = vmatprep.subr.bf16.mxu1 %v20245_v54  ;;  %21052 = vmatpush3.bf16.msra.mxu0 %v20249_v42 }
 0x1d1   :  { %21054 = vmatprep.subr.bf16.mxu0 %v20253_v17  ;;  %27238 = vst [vmem:[#allocation10_spill] sm:$0xff] %v24043_v0  ;;  %v24061_v39 = vadd.s32 168, %v24043_v0 }
 0x1d2   :  { %18115 = vmatmul.mubr.f32.gmra.mrb[74].mxu0 %v6945_v19  ;;  %v13915_v19 = vld [vmem:[%s27163_s5 + $0x108] sm:$0xff] }
 0x1d3   :  { %20248 = vmatpush3.bf16.msra.mxu1 %v20245_v54  ;;  %v20265_v54 = vpack.c.bf16 %v1763_v10, %v1762_v63 }
 0x1d4   :  { %20250 = vmatprep.subr.bf16.mxu1 %v20249_v42  ;;  %21056 = vmatpush3.bf16.msra.mxu0 %v20253_v17 }
 0x1d5   :  { %21058 = vmatprep.subr.bf16.mxu0 %v20257_v32 }
 0x1d6   :  { %16637 = vmatmul.mubr.f32.vlgmr.msra.gmra.mrb[8].mxu1 %v1771_v56 }
 0x1d7   :  { %16639 = vmatprep.mubr.f32.mxu1 %v1772_v13  ;;  %20252 = vmatpush3.bf16.msra.mxu1 %v20249_v42  ;;  %v1766_v13 = vld [vmem:[%s27163_s5 + $0x60] sm:$0xff]  ;;  %v1767_v42 = vld [vmem:[%s27163_s5 + $0x68] sm:$0xff] }
 0x1d8   :  { %20254 = vmatprep.subr.bf16.mxu1 %v20253_v17  ;;  %21060 = vmatpush3.bf16.msra.mxu0 %v20257_v32  ;;  %v20273_v20 = vpack.c.bf16 %v1767_v42, %v1766_v13  ;;  %v24049_v42 = vadd.s32 280, %v24043_v0 }
 0x1d9   :  { %21062 = vmatprep.subr.bf16.mxu0 %v20261_v12 }
 0x1da   :  { %16640 = vmatmul.mubr.f32.gmra.mrb[10].mxu1 %v1773_v26  ;;  %v1769_v26 = vld [vmem:[%s27163_s5 + $0x78] sm:$0xff] }
 0x1db   :  { %20256 = vmatpush3.bf16.msra.mxu1 %v20253_v17  ;;  %v20277_v38 = vpack.c.bf16 %v1769_v26, %v1768_v21  ;;  %v13914_v17 = vld [vmem:[%s27163_s5 + $0x100] sm:$0xff]  ;;  %v24052_v21 = vadd.s32 8, %v24043_v0  ;;  %v24055_v26 = vadd.s32 152, %v24043_v0 }
 0x1dc   :  { %20258 = vmatprep.subr.bf16.mxu1 %v20257_v32  ;;  %21064 = vmatpush3.bf16.msra.mxu0 %v20261_v12  ;;  %v24038_v24 = vpack.c.bf16 %v13915_v19, %v13914_v17  ;;  %v24064_v19 = vadd.s32 40, %v24043_v0 }
 0x1dd   :  { %21066 = vmatprep.subr.bf16.mxu0 %v20265_v54 }
 0x1de   :  { %27237 = vst [vmem:[#allocation9_spill] sm:$0xff] %v24038_v24  ;;  %27240 = vst [vmem:[#allocation12_spill] sm:$0xff] %v24064_v19 }
 0x1df   :  { %20260 = vmatpush3.bf16.msra.mxu1 %v20257_v32 }
 0x1e0   :  { %20262 = vmatprep.subr.bf16.mxu1 %v20261_v12  ;;  %21068 = vmatpush3.bf16.msra.mxu0 %v20265_v54 }
 0x1e1   :  { %21070 = vmatprep.subr.bf16.mxu0 %v20269_v9 }
 0x1e3   :  { %20264 = vmatpush3.bf16.msra.mxu1 %v20261_v12 }
 0x1e4   :  { %20266 = vmatprep.subr.bf16.mxu1 %v20265_v54  ;;  %21072 = vmatpush3.bf16.msra.mxu0 %v20269_v9 }
 0x1e5   :  { %21074 = vmatprep.subr.bf16.mxu0 %v20273_v20 }
 0x1e7   :  { %20268 = vmatpush3.bf16.msra.mxu1 %v20265_v54 }
 0x1e8   :  { %20270 = vmatprep.subr.bf16.mxu1 %v20269_v9  ;;  %21076 = vmatpush3.bf16.msra.mxu0 %v20273_v20 }
 0x1e9   :  { %21078 = vmatprep.subr.bf16.mxu0 %v20277_v38 }
 0x1eb   :  { %20272 = vmatpush3.bf16.msra.mxu1 %v20269_v9 }
 0x1ec   :  { %20274 = vmatprep.subr.bf16.mxu1 %v20273_v20  ;;  %21080 = vmatpush3.bf16.msra.mxu0 %v20277_v38 }
 0x1ed   :  { %21082 = vmatprep.subr.bf16.mxu0 %v24038_v24 }
 0x1ef   :  { %20276 = vmatpush3.bf16.msra.mxu1 %v20273_v20 }
 0x1f0   :  { %20278 = vmatprep.subr.bf16.mxu1 %v20277_v38 }
 0x1f3   :  { %20280 = vmatpush3.bf16.msra.mxu1 %v20277_v38  ;;  %v24058_v38 = vadd.s32 24, %v24043_v0 }
 0x1f4   :  { %20282 = vmatprep.subr.bf16.mxu1 %v24038_v24  ;;  %v24116_v24 = vadd.s32 120, %v24043_v0 }
 0x252   :  { %v14562_v51 = vpop.f32.mrb[0].mxu1 }
 0x253   :  { %v14563_v4 = vpop.f32.mrb[1].mxu1 }
 0x254   :  { %v14564_v56 = vadd.f32 %v14563_v4, %v14562_v51 }
 0x261   :  { %v1184_v27 = vpop.f32.mrb[2].mxu1 }
 0x262   :  { %v1185_v32 = vadd.f32 %v14564_v56, %v1184_v27  ;;  %v16592_v33 = vpop.f32.mrb[3].mxu1  ;;  %v24046_v56 = vsub.s32 0, %v24043_v0  ;;  %v24067_v27 = vadd.s32 184, %v24043_v0 }
 0x263   :  { %v24073_v33 = vadd.s32 200, %v24043_v0 }
 0x264   :  { %v1367_v10 = vmul.f32 0.0061728396, %v1185_v32  ;;  %27239 = vst [vmem:[#allocation11_spill] sm:$0xff] %v24046_v56  ;;  %27241 = vst [vmem:[#allocation13_spill] sm:$0xff] %v24067_v27  ;;  %v24070_v32 = vadd.s32 56, %v24043_v0 }
 0x265   :  { %27243 = vst [vmem:[#allocation15_spill] sm:$0xff] %v24073_v33 }
 0x266   :  { %v1369_v7 = vmul.f32 %v1367_v10, %v1367_v10  ;;  %27242 = vst [vmem:[#allocation14_spill] sm:$0xff] %v24070_v32 }
 0x281   :  { %v14602_v35 = vpop.f32.mrb[4].mxu1 }
 0x282   :  { %v14603_v12 = vpop.f32.mrb[5].mxu1 }
 0x283   :  { %v14604_v63 = vadd.f32 %v14603_v12, %v14602_v35  ;;  %v24076_v35 = vadd.s32 72, %v24043_v0  ;;  %v24079_v12 = vadd.s32 216, %v24043_v0 }
 0x285   :  { %27244 = vst [vmem:[#allocation16_spill] sm:$0xff] %v24076_v35  ;;  %27245 = vst [vmem:[#allocation17_spill] sm:$0xff] %v24079_v12 }
 0x289   :  { %v1360_v54 = vpop.f32.mrb[6].mxu1 }
 0x28a   :  { %v1361_v51 = vadd.f32 %v14604_v63, %v1360_v54  ;;  %v16603_v4 = vpop.f32.mrb[7].mxu1  ;;  %v24082_v63 = vadd.s32 88, %v24043_v0  ;;  %v24085_v54 = vadd.s32 232, %v24043_v0 }
 0x28b   :  { %v24091_v4 = vadd.s32 248, %v24043_v0 }
 0x28c   :  { %v1368_v9 = vmul.f32 0.0061728396, %v1361_v51  ;;  %27246 = vst [vmem:[#allocation18_spill] sm:$0xff] %v24082_v63  ;;  %27247 = vst [vmem:[#allocation19_spill] sm:$0xff] %v24085_v54  ;;  %v24088_v51 = vadd.s32 104, %v24043_v0 }
 0x28d   :  { %27249 = vst [vmem:[#allocation21_spill] sm:$0xff] %v24091_v4 }
 0x28e   :  { %v1370_v13 = vsub.f32 %v1368_v9, %v1369_v7  ;;  %27248 = vst [vmem:[#allocation20_spill] sm:$0xff] %v24088_v51  ;;  %v24095_v9 = vrot.slane %v1367_v10, %v24046_v56  ;;  %v24119_v7 = vadd.s32 264, %v24043_v0 }
 0x290   :  { %v1371_v20 = vmax.f32 %v1370_v13, 0.0  ;;  %v1376_v3 = vsub.f32 %v23700_v34, %v24095_v9  ;;  %v1377_v47 = vsub.f32 %v23686_v28, %v24095_v9  ;;  %v1378_v13 = vsub.f32 %v23720_v50, %v24095_v9 }
 0x291   :  { %v1380_v49 = vsub.f32 %v23738_v2, %v24095_v9  ;;  %v1381_v34 = vsub.f32 %v23728_v58, %v24095_v9  ;;  %v1382_v28 = vsub.f32 %v23756_v16, %v24095_v9  ;;  %v1384_v10 = vsub.f32 %v23774_v29, %v24095_v9 }
 0x292   :  { %v1412_v17 = vadd.f32 1e-05, %v1371_v20  ;;  %v1383_v20 = vsub.f32 %v23746_v11, %v24095_v9  ;;  %v1385_v50 = vsub.f32 %v23764_v22, %v24095_v9  ;;  %v1387_v2 = vsub.f32 %v23782_v37, %v24095_v9  ;;  %v1364_v11 = vld [vmem:[%s27161_s3] sm:$0x1] }
 0x293   :  { %v1388_v58 = vsub.f32 %v23810_v55, %v24095_v9  ;;  %v1389_v16 = vsub.f32 %v23800_v60, %v24095_v9  ;;  %v1390_v29 = vsub.f32 %v23828_v23, %v24095_v9  ;;  %v1391_v22 = vsub.f32 %v23818_v18, %v24095_v9 }
 0x294   :  { %23124 = vrsqrt.f32 %v1412_v17  ;;  %v1379_v17 = vsub.f32 %v23709_v43, %v24095_v9  ;;  %v1386_v43 = vsub.f32 %v23792_v52, %v24095_v9  ;;  %v1392_v52 = vsub.f32 %v23690_v30, %v24095_v9 }
 0x295   :  { %v1393_v37 = vsub.f32 %v23693_v31, %v24095_v9  ;;  %v1394_v60 = vsub.f32 %v23713_v40, %v24095_v9  ;;  %v1395_v36 = vsub.f32 %v23716_v45, %v24095_v9  ;;  %v1396_v0 = vsub.f32 %v23731_v62, %v24095_v9 }
 0x296   :  { %v1397_v23 = vsub.f32 %v23734_v48, %v24095_v9  ;;  %v1398_v18 = vsub.f32 %v23749_v14, %v24095_v9  ;;  %v1399_v30 = vsub.f32 %v23752_v53, %v24095_v9  ;;  %v1400_v31 = vsub.f32 %v23767_v25, %v24095_v9 }
 0x297   :  { %v1401_v40 = vsub.f32 %v23770_v57, %v24095_v9  ;;  %v1402_v45 = vsub.f32 %v23785_v44, %v24095_v9  ;;  %v1403_v62 = vsub.f32 %v23788_v61, %v24095_v9  ;;  %v1404_v48 = vsub.f32 %v23803_v5, %v24095_v9 }
 0x298   :  { %v1405_v14 = vsub.f32 %v23806_v1, %v24095_v9  ;;  %v1406_v53 = vsub.f32 %v23821_v59, %v24095_v9  ;;  %v1407_v25 = vsub.f32 %v23824_v6, %v24095_v9  ;;  %v1408_v44 = vsub.f32 %v23841_v41, %v24095_v9 }
 0x299   :  { %v1409_v61 = vsub.f32 %v23844_v46, %v24095_v9  ;;  %v1410_v5 = vsub.f32 %v23858_v8, %v24095_v9  ;;  %v1411_v1 = vsub.f32 %v23861_v15, %v24095_v9 }
 0x29e   :  { %v23125_v55 = vpop.eup %23124 }
 0x29f   :  { %v1414_v4 = vmul.f32 %v23125_v55, %v1364_v11 }
 0x2a1   :  { %v1419_v57 = vrot.slane %v1414_v4, %v24046_v56 }
 0x2a3   :  { %v1421_v11 = vmul.f32 %v1419_v57, %v1376_v3  ;;  %v1422_v55 = vmul.f32 %v1419_v57, %v1377_v47  ;;  %v1423_v59 = vmul.f32 %v1419_v57, %v1378_v13  ;;  %v1424_v51 = vmul.f32 %v1419_v57, %v1379_v17 }
 0x2a4   :  { %v1425_v54 = vmul.f32 %v1419_v57, %v1380_v49  ;;  %v1426_v6 = vmul.f32 %v1419_v57, %v1381_v34  ;;  %v1427_v63 = vmul.f32 %v1419_v57, %v1382_v28  ;;  %v1428_v4 = vmul.f32 %v1419_v57, %v1383_v20  ;;  %v24198_v20 = vld [vmem:[%s27162_s4] ss:$0 sm:$0xff] }
 0x2a5   :  { %v1429_v56 = vmul.f32 %v1419_v57, %v1384_v10  ;;  %v1430_v12 = vmul.f32 %v1419_v57, %v1385_v50  ;;  %v1431_v41 = vmul.f32 %v1419_v57, %v1386_v43  ;;  %v1432_v35 = vmul.f32 %v1419_v57, %v1387_v2 }
 0x2a6   :  { %v1433_v33 = vmul.f32 %v1419_v57, %v1388_v58  ;;  %v1434_v46 = vmul.f32 %v1419_v57, %v1389_v16  ;;  %v1435_v32 = vmul.f32 %v1419_v57, %v1390_v29  ;;  %v1436_v27 = vmul.f32 %v1419_v57, %v1391_v22 }
 0x2a7   :  { %v1437_v8 = vmul.f32 %v1419_v57, %v1392_v52  ;;  %v24193_v19 = vmul.f32 %v1419_v57, %v1393_v37  ;;  %v1439_v15 = vmul.f32 %v1419_v57, %v1394_v60  ;;  %v1440_v3 = vmul.f32 %v1419_v57, %v1395_v36  ;;  %v27297_v60 = vld [vmem:[#allocation20_spill] sm:$0xff]  ;;  %v27301_v37 = vld [vmem:[#allocation21_spill] sm:$0xff] }
 0x2a8   :  { %v1441_v47 = vmul.f32 %v1419_v57, %v1396_v0  ;;  %v1442_v9 = vmul.f32 %v1419_v57, %v1397_v23  ;;  %v1443_v13 = vmul.f32 %v1419_v57, %v1398_v18  ;;  %v1444_v49 = vmul.f32 %v1419_v57, %v1399_v30 }
 0x2a9   :  { %v1445_v17 = vmul.f32 %v1419_v57, %v1400_v31  ;;  %v1446_v10 = vmul.f32 %v1419_v57, %v1401_v40  ;;  %v1447_v34 = vmul.f32 %v1419_v57, %v1402_v45  ;;  %v1448_v28 = vmul.f32 %v1419_v57, %v1403_v62 }
 0x2aa   :  { %v1449_v50 = vmul.f32 %v1419_v57, %v1404_v48  ;;  %v1450_v43 = vmul.f32 %v1419_v57, %v1405_v14  ;;  %v1451_v2 = vmul.f32 %v1419_v57, %v1406_v53  ;;  %v1452_v58 = vmul.f32 %v1419_v57, %v1407_v25 }
 0x2ab   :  { %v1453_v16 = vmul.f32 %v1419_v57, %v1408_v44  ;;  %v1454_v29 = vmul.f32 %v1419_v57, %v1409_v61  ;;  %v1455_v36 = vmul.f32 %v1419_v57, %v1410_v5  ;;  %v1456_v0 = vmul.f32 %v1419_v57, %v1411_v1 }
 0x2ac   :  { %v24201_v22 = vadd.f32 %v24198_v20, %v1421_v11  ;;  %v24204_v52 = vadd.f32 %v24198_v20, %v1422_v55  ;;  %v24209_v23 = vadd.f32 %v24198_v20, %v1423_v59  ;;  %v24212_v18 = vadd.f32 %v24198_v20, %v1424_v51 }
 0x2ad   :  { %v24215_v30 = vadd.f32 %v24198_v20, %v1425_v54  ;;  %v24218_v31 = vadd.f32 %v24198_v20, %v1426_v6  ;;  %v24221_v40 = vadd.f32 %v24198_v20, %v1427_v63  ;;  %v24224_v45 = vadd.f32 %v24198_v20, %v1428_v4 }
 0x2ae   :  { %v24227_v62 = vadd.f32 %v24198_v20, %v1429_v56  ;;  %v24230_v48 = vadd.f32 %v24198_v20, %v1430_v12  ;;  %v24233_v51 = vadd.f32 %v24198_v20, %v1431_v41  ;;  %v24236_v54 = vadd.f32 %v24198_v20, %v1432_v35 }
 0x2af   :  { %v24239_v14 = vadd.f32 %v24198_v20, %v1433_v33  ;;  %v24242_v63 = vadd.f32 %v24198_v20, %v1434_v46  ;;  %v24245_v53 = vadd.f32 %v24198_v20, %v1435_v32  ;;  %v24248_v56 = vadd.f32 %v24198_v20, %v1436_v27 }
 0x2b0   :  { %v24251_v12 = vadd.f32 %v24198_v20, %v1437_v8  ;;  %v24254_v25 = vadd.f32 %v24198_v20, %v1439_v15  ;;  %v24257_v35 = vadd.f32 %v24198_v20, %v1440_v3  ;;  %v24260_v33 = vadd.f32 %v24198_v20, %v1441_v47 }
 0x2b1   :  { %v24263_v57 = vadd.f32 %v24198_v20, %v1442_v9  ;;  %v24266_v32 = vadd.f32 %v24198_v20, %v1443_v13  ;;  %v24269_v27 = vadd.f32 %v24198_v20, %v1444_v49  ;;  %v24272_v44 = vadd.f32 %v24198_v20, %v1445_v17  ;;  %v27265_v49 = vld [vmem:[#allocation12_spill] sm:$0xff] }
 0x2b2   :  { %v24275_v61 = vadd.f32 %v24198_v20, %v1446_v10  ;;  %v24278_v5 = vadd.f32 %v24198_v20, %v1447_v34  ;;  %v24281_v1 = vadd.f32 %v24198_v20, %v1448_v28  ;;  %v24284_v11 = vadd.f32 %v24198_v20, %v1449_v50  ;;  %v27269_v10 = vld [vmem:[#allocation13_spill] sm:$0xff]  ;;  %v27273_v50 = vld [vmem:[#allocation14_spill] sm:$0xff] }
 0x2b3   :  { %v24287_v55 = vadd.f32 %v24198_v20, %v1450_v43  ;;  %v24290_v59 = vadd.f32 %v24198_v20, %v1451_v2  ;;  %v27250_v6 = vand.u32 15, %v24052_v21  ;;  %v27253_v41 = vand.u32 15, %v24055_v26 }
 0x2b4   :  { %v27256_v8 = vand.u32 15, %v24058_v38  ;;  %v27259_v3 = vand.u32 15, %v24061_v39  ;;  %v27262_v47 = vand.u32 15, %v24049_v42  ;;  %v24323_v9 = vadd.f32 %v24198_v20, %v1452_v58 }
 0x2b5   :  { %vm24294_vm6 = vcmp.lt.s32.totalorder %v27250_v6, 9  ;;  %vm24300_vm7 = vcmp.lt.s32.totalorder %v27253_v41, 9  ;;  %v24326_v38 = vadd.f32 %v24198_v20, %v1453_v16  ;;  %v24329_v13 = vadd.f32 %v24198_v20, %v1454_v29  ;;  %v27277_v6 = vld [vmem:[#allocation15_spill] sm:$0xff] }
 0x2b6   :  { %vm24306_vm8 = vcmp.lt.s32.totalorder %v27256_v8, 9  ;;  %vm24312_vm9 = vcmp.lt.s32.totalorder %v27259_v3, 9  ;;  %vm24318_vm10 = vcmp.lt.s32.totalorder %v27262_v47, 9  ;;  %v24332_v39 = vadd.f32 %v24198_v20, %v1455_v36  ;;  %v27281_v3 = vld [vmem:[#allocation16_spill] sm:$0xff]  ;;  %v27293_v29 = vld [vmem:[#allocation19_spill] sm:$0xff] }
 0x2b7   :  { %v27266_v17 = vand.u32 15, %v27265_v49  ;;  %v27270_v34 = vand.u32 15, %v27269_v10  ;;  %v27274_v43 = vand.u32 15, %v27273_v50  ;;  %v24353_v58 = vadd.f32 %v24198_v20, %v1456_v0  ;;  %v27285_v0 = vld [vmem:[#allocation17_spill] sm:$0xff] }
 0x2b8   :  { %v27198_v16 = vmax.f32 %v24201_v22, 0.0  ;;  %v27199_v36 = vmax.f32 %v24209_v23, 0.0  ;;  %v27278_v41 = vand.u32 15, %v27277_v6  ;;  %v27282_v47 = vand.u32 15, %v27281_v3 }
 0x2b9   :  { %vm24336_vm11 = vcmp.lt.s32.totalorder %v27266_v17, 9  ;;  %vm24342_vm12 = vcmp.lt.s32.totalorder %v27270_v34, 9  ;;  %vm24348_vm13 = vcmp.lt.s32.totalorder %v27274_v43, 9  ;;  %v27286_v17 = vand.u32 15, %v27285_v0  ;;  %v27289_v34 = vld [vmem:[#allocation18_spill] sm:$0xff]  ;;  %v2324_v43 = vld [vmem:[#allocation2 + $0xb] sm:$0xff] }
 0x2ba   :  { %vm24360_vm14 = vcmp.lt.s32.totalorder %v27278_v41, 9  ;;  %vm24366_vm15 = vcmp.lt.s32.totalorder %v27282_v47, 9  ;;  %v27290_v50 = vand.u32 15, %v27289_v34  ;;  %v27294_v0 = vand.u32 15, %v27293_v29  ;;  %1699 = vst [vmem:[#allocation2 + $0x22] sm:$0xff] %v27198_v16  ;;  %1701 = vst [vmem:[#allocation2 + $0x32] sm:$0xff] %v27199_v36 }
 0x2bb   :  { %vm24372_vm4 = vcmp.lt.s32.totalorder %v27286_v17, 9  ;;  %v27298_v34 = vand.u32 15, %v27297_v60  ;;  %v27302_v6 = vand.u32 15, %v27301_v37  ;;  %v27303_v41 = vmov 0  ;;  %v2325_v17 = vld [vmem:[#allocation2 + $0x13] sm:$0xff] }
 0x2bc   :  { %vm24378_vm5 = vcmp.lt.s32.totalorder %v27290_v50, 9  ;;  %vm24388_vm0 = vcmp.lt.s32.totalorder %v27294_v0, 9  ;;  %v27201_v29 = vmax.f32 %v24227_v62, 0.0  ;;  %v27202_v60 = vmax.f32 %v24239_v14, 0.0  ;;  %v7463_v50 = vld [vmem:[#allocation2 + $0xf3] sm:$0xff] }
 0x2bd   :  { %vm24394_vm3 = vcmp.lt.s32.totalorder %v27298_v34, 9  ;;  %vm24400_vm2 = vcmp.lt.s32.totalorder %v27302_v6, 9  ;;  %v1513_v34 = vmax.f32 %v24245_v53, 0.0  ;;  %v27305_v3 = vmax.f32 %v24215_v30, 0.0 }
 0x2be   :  { %v27304_v41 = vsel %vm24400_vm2, 4294967295, %v27303_v41  ;;  %v27306_v0 = vmax.f32 %v24221_v40, 0.0  ;;  %v27307_v47 = vand.u32 15, %v24116_v24  ;;  %v27310_v36 = vand.u32 15, %v24119_v7  ;;  %1707 = vst [vmem:[#allocation2 + $0x62] sm:$0xff] %v27201_v29  ;;  %1711 = vst [vmem:[#allocation2 + $0x82] sm:$0xff] %v27202_v60 }
 0x2bf   :  { %1703 = vst [vmem:[#allocation2 + $0x42] sm:$0xff] %v27305_v3  ;;  %v1515_v6 = vmax.f32 %v24251_v12, 0.0  ;;  %v27203_v3 = vmax.f32 %v24254_v25, 0.0  ;;  %v27313_v24 = vmax.f32 %v24233_v51, 0.0  ;;  %v27208_v7 = vmax.f32 %v24260_v33, 0.0  ;;  %1713 = vst [vmem:[#allocation2 + $0x92] sm:$0xff] %v1513_v34 }
 0x2c0   :  { %1705 = vst [vmem:[#allocation2 + $0x52] sm:$0xff] %v27306_v0  ;;  %vm24422_vm1 = vcmp.lt.s32.totalorder %v27307_v47, 9  ;;  %vm24428_vm2 = vcmp.lt.s32.totalorder %v27310_v36, 9  ;;  %v27204_v12 = vmax.f32 %v24272_v44, 0.0  ;;  %v27205_v29 = vmax.f32 %v24278_v5, 0.0 }
 0x2c1   :  { %1709 = vst [vmem:[#allocation2 + $0x72] sm:$0xff] %v27313_v24  ;;  %1715 = vst [vmem:[#allocation2 + $0xa2] sm:$0xff] %v1515_v6  ;;  %v27206_v36 = vmax.f32 %v24284_v11, 0.0  ;;  %v27210_v53 = vmax.f32 %v24287_v55, 0.0  ;;  %v27207_v47 = vmax.f32 %v24290_v59, 0.0  ;;  %v27209_v34 = vmax.f32 %v24323_v9, 0.0 }
 0x2c2   :  { %1718 = vst [vmem:[#allocation2 + $0x102] sm:$0xff] %v27203_v3  ;;  %1720 = vst [vmem:[#allocation2 + $0x112] sm:$0xff] %v27208_v7  ;;  %v27314_v60 = vmax.f32 %v24266_v32, 0.0  ;;  %v1531_v24 = vmax.f32 %v24326_v38, 0.0  ;;  %v1532_v6 = vmax.f32 %v24329_v13, 0.0  ;;  %v1533_v3 = vmax.f32 %v24332_v39, 0.0 }
 0x2c3   :  { %v1534_v0 = vmax.f32 %v24353_v58, 0.0  ;;  %1724 = vst [vmem:[#allocation2 + $0x132] sm:$0xff] %v27204_v12  ;;  %1726 = vst [vmem:[#allocation2 + $0x142] sm:$0xff] %v27205_v29  ;;  %v27315_v38 = vmax.f32 %v24204_v52, 0.0  ;;  %v27316_v39 = vmax.f32 %v24257_v35, 0.0  ;;  %v27317_v12 = vmax.f32 %v24212_v18, 0.0 }
 0x2c4   :  { %1722 = vst [vmem:[#allocation2 + $0x122] sm:$0xff] %v27314_v60  ;;  %1728 = vst [vmem:[#allocation2 + $0x152] sm:$0xff] %v27206_v36  ;;  %v1774_v60 = vld [vmem:[#allocation2 + $0x21] sm:$0xff]  ;;  %v27318_v36 = vmax.f32 %v24263_v57, 0.0  ;;  %v27321_v26 = vmax.f32 %v24224_v45, 0.0  ;;  %v27357_v4 = vmax.f32 %v24212_v18, 0.0 }
 0x2c5   :  { %1730 = vst [vmem:[#allocation2 + $0x162] sm:$0xff] %v27207_v47  ;;  %v1608_v13 = vsel %vm24294_vm6, %v27315_v38, 0.0  ;;  %v1626_v58 = vsel %vm24300_vm7, %v27316_v39, 0.0  ;;  %v1610_v29 = vsel %vm24306_vm8, %v27317_v12, 0.0  ;;  %v1642_v7 = vsel %vm24318_vm10, %v1534_v0, 0.0  ;;  %1732 = vst [vmem:[#allocation2 + $0x172] sm:$0xff] %v1531_v24  ;;  %16642 = vmatprep.mubr.f32.mxu1 %v1774_v60 }
 0x2c6   :  { %v1628_v47 = vsel %vm24312_vm9, %v27318_v36, 0.0  ;;  %1734 = vst [vmem:[#allocation2 + $0x182] sm:$0xff] %v1533_v3  ;;  %1700 = vst [vmem:[#allocation2 + $0x2a] sm:$0xff] %v1608_v13  ;;  %v27319_v38 = vmax.f32 %v24218_v31, 0.0  ;;  %v27320_v39 = vmax.f32 %v24269_v27, 0.0  ;;  %v1614_v3 = vsel %vm24348_vm13, %v27321_v26, 0.0 }
 0x2c7   :  { %1719 = vst [vmem:[#allocation2 + $0x10a] sm:$0xff] %v1626_v58  ;;  %1702 = vst [vmem:[#allocation2 + $0x3a] sm:$0xff] %v1610_v29  ;;  %v27322_v29 = vmax.f32 %v24275_v61, 0.0  ;;  %v27324_v60 = vmax.f32 %v24281_v1, 0.0  ;;  %vm27327_vm10 = vnez %v27304_v41  ;;  %v27358_v46 = vmax.f32 %v24263_v57, 0.0 }
 0x2c8   :  { %1721 = vst [vmem:[#allocation2 + $0x11a] sm:$0xff] %v1628_v47  ;;  %v1612_v12 = vsel %vm24336_vm11, %v27319_v38, 0.0  ;;  %v1630_v36 = vsel %vm24342_vm12, %v27320_v39, 0.0  ;;  %1735 = vst [vmem:[#allocation2 + $0x18a] sm:$0xff] %v1642_v7  ;;  %v27323_v47 = vmax.f32 %v24230_v48, 0.0  ;;  %v27325_v7 = vmax.f32 %v24236_v54, 0.0 }
 0x2c9   :  { %1704 = vst [vmem:[#allocation2 + $0x4a] sm:$0xff] %v1612_v12  ;;  %1723 = vst [vmem:[#allocation2 + $0x12a] sm:$0xff] %v1630_v36  ;;  %v1632_v0 = vsel %vm24360_vm14, %v27322_v29, 0.0  ;;  %v1634_v13 = vsel %vm24372_vm4, %v27324_v60, 0.0  ;;  %v1480_v38 = vadd.f32 %v24198_v20, %v24193_v19  ;;  %v1636_v12 = vsel %vm24388_vm0, %v27210_v53, 0.0  ;;  %v6946_v19 = vld [vmem:[#allocation2 + $0x101] sm:$0xff] }
 0x2ca   :  { %1706 = vst [vmem:[#allocation2 + $0x5a] sm:$0xff] %v1614_v3  ;;  %v1616_v24 = vsel %vm24366_vm15, %v27323_v47, 0.0  ;;  %v1618_v58 = vsel %vm24378_vm5, %v27325_v7, 0.0  ;;  %1725 = vst [vmem:[#allocation2 + $0x13a] sm:$0xff] %v1632_v0  ;;  %v27326_v39 = vmax.f32 %v24242_v63, 0.0  ;;  %v1638_v26 = vsel %vm27327_vm10, %v27209_v34, 0.0  ;;  %18117 = vmatprep.mubr.f32.mxu0 %v6946_v19 }
 0x2cb   :  { %1708 = vst [vmem:[#allocation2 + $0x6a] sm:$0xff] %v1616_v24  ;;  %1727 = vst [vmem:[#allocation2 + $0x14a] sm:$0xff] %v1634_v13  ;;  %v27328_v20 = vmax.f32 %v24248_v56, 0.0  ;;  %v1640_v29 = vsel %vm24428_vm2, %v1532_v6, 0.0  ;;  %v27329_v0 = vld [vmem:[#allocation10_spill] sm:$0xff]  ;;  %v1516_v24 = vmax.f32 %v1480_v38, 0.0 }
 0x2cc   :  { %1710 = vst [vmem:[#allocation2 + $0x7a] sm:$0xff] %v1618_v58  ;;  %v1620_v36 = vsel %vm24394_vm3, %v27326_v39, 0.0  ;;  %1729 = vst [vmem:[#allocation2 + $0x15a] sm:$0xff] %v1636_v12  ;;  %v106_v47 = vadd.s32 136, %v27329_v0  ;;  %v27360_v18 = vmax.f32 %v24266_v32, 0.0  ;;  %v27361_v15 = vmax.f32 %v24218_v31, 0.0 }
 0x2cd   :  { %1712 = vst [vmem:[#allocation2 + $0x8a] sm:$0xff] %v1620_v36  ;;  %1731 = vst [vmem:[#allocation2 + $0x16a] sm:$0xff] %v1638_v26  ;;  %v1622_v3 = vsel %vm24422_vm1, %v27328_v20, 0.0  ;;  %v1775_v60 = vld [vmem:[#allocation2 + $0x29] sm:$0xff]  ;;  %v1776_v7 = vld [vmem:[#allocation2 + $0x31] sm:$0xff]  ;;  %v27362_v21 = vmax.f32 %v24269_v27, 0.0 }
 0x2ce   :  { %1714 = vst [vmem:[#allocation2 + $0x9a] sm:$0xff] %v1622_v3  ;;  %1733 = vst [vmem:[#allocation2 + $0x17a] sm:$0xff] %v1640_v29  ;;  %v6947_v13 = vld [vmem:[#allocation2 + $0x109] sm:$0xff]  ;;  %v248_v58 = vand.u32 15, %v106_v47  ;;  %16643 = vmatmul.mubr.f32.gmra.mrb[12].mxu1 %v1775_v60  ;;  %v6948_v12 = vld [vmem:[#allocation2 + $0x111] sm:$0xff]  ;;  %v27364_v31 = vmax.f32 %v24272_v44, 0.0 }
 0x2cf   :  { %18118 = vmatmul.mubr.f32.gmra.mrb[76].mxu0 %v6947_v13  ;;  %16645 = vmatprep.mubr.f32.mxu1 %v1776_v7  ;;  %v1777_v16 = vld [vmem:[#allocation2 + $0x39] sm:$0xff]  ;;  %v1778_v37 = vld [vmem:[#allocation2 + $0x41] sm:$0xff]  ;;  %v27365_v42 = vmax.f32 %v24224_v45, 0.0  ;;  %v27366_v28 = vmax.f32 %v24275_v61, 0.0  ;;  %v27368_v45 = vmax.f32 %v24278_v5, 0.0  ;;  %v27369_v2 = vmax.f32 %v24230_v48, 0.0 }
 0x2d0   :  { %18120 = vmatprep.mubr.f32.mxu0 %v6948_v12  ;;  %vm574_vm10 = vcmp.lt.s32.totalorder %v248_v58, 9  ;;  %v6949_v39 = vld [vmem:[#allocation2 + $0x119] sm:$0xff]  ;;  %v6950_v6 = vld [vmem:[#allocation2 + $0x121] sm:$0xff]  ;;  %v1779_v38 = vld [vmem:[#allocation2 + $0x49] sm:$0xff]  ;;  %v27370_v8 = vmax.f32 %v24281_v1, 0.0  ;;  %v27372_v48 = vmax.f32 %v24284_v11, 0.0 }
 0x2d1   :  { %v1624_v56 = vsel %vm574_vm10, %v1516_v24, 0.0  ;;  %v6951_v36 = vld [vmem:[#allocation2 + $0x129] sm:$0xff]  ;;  %v1780_v26 = vld [vmem:[#allocation2 + $0x51] sm:$0xff]  ;;  %v1781_v20 = vld [vmem:[#allocation2 + $0x59] sm:$0xff]  ;;  %v27373_v49 = vmax.f32 %v24236_v54, 0.0  ;;  %v27374_v10 = vmax.f32 %v24287_v55, 0.0 }
 0x2d2   :  { %1716 = vst [vmem:[#allocation2 + $0xaa] sm:$0xff] %v1624_v56  ;;  %16646 = vmatmul.mubr.f32.gmra.mrb[14].mxu1 %v1777_v16  ;;  %v6952_v19 = vld [vmem:[#allocation2 + $0x131] sm:$0xff]  ;;  %v6953_v3 = vld [vmem:[#allocation2 + $0x139] sm:$0xff]  ;;  %v1782_v29 = vld [vmem:[#allocation2 + $0x61] sm:$0xff]  ;;  %v27376_v11 = vmax.f32 %v24290_v59, 0.0  ;;  %v27377_v54 = vmax.f32 %v24242_v63, 0.0 }
 0x2d3   :  { %18121 = vmatmul.mubr.f32.gmra.mrb[78].mxu0 %v6949_v39  ;;  %16648 = vmatprep.mubr.f32.mxu1 %v1778_v37  ;;  %v6954_v0 = vld [vmem:[#allocation2 + $0x141] sm:$0xff]  ;;  %v1783_v47 = vld [vmem:[#allocation2 + $0x69] sm:$0xff]  ;;  %v1784_v60 = vld [vmem:[#allocation2 + $0x71] sm:$0xff]  ;;  %v27378_v55 = vmax.f32 %v24323_v9, 0.0  ;;  %vm27401_vm1 = vmmov 0  }
 0x2d4   :  { %18123 = vmatprep.mubr.f32.mxu0 %v6950_v6  ;;  %v6955_v24 = vld [vmem:[#allocation2 + $0x149] sm:$0xff]  ;;  %v6956_v13 = vld [vmem:[#allocation2 + $0x151] sm:$0xff]  ;;  %v1785_v7 = vld [vmem:[#allocation2 + $0x79] sm:$0xff] }
 0x2d5   :  { %v6957_v58 = vld [vmem:[#allocation2 + $0x159] sm:$0xff]  ;;  %v1786_v12 = vld [vmem:[#allocation2 + $0x81] sm:$0xff]  ;;  %v1787_v16 = vld [vmem:[#allocation2 + $0x89] sm:$0xff] }
 0x2d6   :  { %16649 = vmatmul.mubr.f32.gmra.mrb[16].mxu1 %v1779_v38  ;;  %v6958_v56 = vld [vmem:[#allocation2 + $0x161] sm:$0xff]  ;;  %v6959_v39 = vld [vmem:[#allocation2 + $0x169] sm:$0xff]  ;;  %v13943_v32 = vld [vmem:[%s27163_s5 + $0x1e8] sm:$0xff] }
 0x2d7   :  { %18124 = vmatmul.mubr.f32.gmra.mrb[80].mxu0 %v6951_v36  ;;  %16651 = vmatprep.mubr.f32.mxu1 %v1780_v26  ;;  %v13916_v37 = vld [vmem:[%s27163_s5 + $0x110] sm:$0xff]  ;;  %v13917_v6 = vld [vmem:[%s27163_s5 + $0x118] sm:$0xff]  ;;  %v13918_v26 = vld [vmem:[%s27163_s5 + $0x120] sm:$0xff] }
 0x2d8   :  { %18126 = vmatprep.mubr.f32.mxu0 %v6952_v19  ;;  %v24545_v38 = vld [vmem:[#allocation2] sm:$0xff]  ;;  %v20285_v36 = vpack.c.bf16 %v13917_v6, %v13916_v37  ;;  %v13919_v19 = vld [vmem:[%s27163_s5 + $0x128] sm:$0xff]  ;;  %v24622_v34 = vld [vmem:[#allocation2 + $0x130] sm:$0xff] }
 0x2d9   :  { %v24595_v37 = vld [vmem:[#allocation2 + $0x118] sm:$0xff]  ;;  %27336 = vst [vmem:[#allocation17_spill] sm:$0xff] %v24622_v34  ;;  %v13945_v44 = vld [vmem:[%s27163_s5 + $0x1f8] sm:$0xff]  ;;  %v13950_v9 = vld [vmem:[%s27163_s5 + $0x220] sm:$0xff] }
 0x2da   :  { %16652 = vmatmul.mubr.f32.gmra.mrb[18].mxu1 %v1781_v20  ;;  %v27330_v20 = vld [vmem:[#allocation9_spill] sm:$0xff]  ;;  %v13949_v59 = vld [vmem:[%s27163_s5 + $0x218] sm:$0xff] }
 0x2db   :  { %18127 = vmatmul.mubr.f32.gmra.mrb[82].mxu0 %v6953_v3  ;;  %16654 = vmatprep.mubr.f32.mxu1 %v1782_v29  ;;  %v20289_v3 = vpack.c.bf16 %v13919_v19, %v13918_v26  ;;  %v24563_v29 = vld [vmem:[#allocation2 + $0x20] sm:$0xff]  ;;  %v13947_v5 = vld [vmem:[%s27163_s5 + $0x208] sm:$0xff]  ;;  %v7462_v63 = vld [vmem:[#allocation2 + $0xeb] sm:$0xff] }
 0x2dc   :  { %18129 = vmatprep.mubr.f32.mxu0 %v6954_v0  ;;  %v13920_v0 = vld [vmem:[%s27163_s5 + $0x130] sm:$0xff] }
 0x2dd   :  { %v24602_v26 = vld [vmem:[#allocation2 + $0x40] sm:$0xff] }
 0x2de   :  { %16655 = vmatmul.mubr.f32.gmra.mrb[20].mxu1 %v1783_v47  ;;  %v13921_v47 = vld [vmem:[%s27163_s5 + $0x138] sm:$0xff]  ;;  %27331 = vst [vmem:[#allocation12_spill] sm:$0xff] %v24602_v26  ;;  %v24604_v19 = vld [vmem:[#allocation2 + $0x120] sm:$0xff] }
 0x2df   :  { %18130 = vmatmul.mubr.f32.gmra.mrb[84].mxu0 %v6955_v24  ;;  %16657 = vmatprep.mubr.f32.mxu1 %v1784_v60  ;;  %v24572_v24 = vld [vmem:[#allocation2 + $0x100] sm:$0xff]  ;;  %v24575_v60 = vld [vmem:[#allocation2 + $0x28] sm:$0xff]  ;;  %27332 = vst [vmem:[#allocation13_spill] sm:$0xff] %v24604_v19 }
 0x2e0   :  { %18132 = vmatprep.mubr.f32.mxu0 %v6956_v13  ;;  %v24577_v13 = vld [vmem:[#allocation2 + $0x108] sm:$0xff] }
 0x2e2   :  { %16658 = vmatmul.mubr.f32.gmra.mrb[22].mxu1 %v1785_v7  ;;  %v20293_v7 = vpack.c.bf16 %v13921_v47, %v13920_v0  ;;  %v24613_v0 = vld [vmem:[#allocation2 + $0x128] sm:$0xff] }
 0x2e3   :  { %18133 = vmatmul.mubr.f32.gmra.mrb[86].mxu0 %v6957_v58  ;;  %16660 = vmatprep.mubr.f32.mxu1 %v1786_v12  ;;  %v24581_v58 = vld [vmem:[#allocation2 + $0x30] sm:$0xff]  ;;  %27334 = vst [vmem:[#allocation15_spill] sm:$0xff] %v24613_v0 }
 0x2e4   :  { %18135 = vmatprep.mubr.f32.mxu0 %v6958_v56  ;;  %v13922_v12 = vld [vmem:[%s27163_s5 + $0x140] sm:$0xff]  ;;  %v13923_v56 = vld [vmem:[%s27163_s5 + $0x148] sm:$0xff] }
 0x2e5   :  { %v20297_v6 = vpack.c.bf16 %v13923_v56, %v13922_v12  ;;  %v13926_v12 = vld [vmem:[%s27163_s5 + $0x160] sm:$0xff] }
 0x2e6   :  { %16661 = vmatmul.mubr.f32.gmra.mrb[24].mxu1 %v1787_v16  ;;  %v24590_v16 = vld [vmem:[#allocation2 + $0x110] sm:$0xff] }
 0x2e7   :  { %18136 = vmatmul.mubr.f32.gmra.mrb[88].mxu0 %v6959_v39  ;;  %16695 = vmatprep.mubr.f32.mxu1 %v24545_v38  ;;  %v24593_v39 = vld [vmem:[#allocation2 + $0x38] sm:$0xff]  ;;  %v24620_v56 = vld [vmem:[#allocation2 + $0x50] sm:$0xff] }
 0x2e8   :  { %18170 = vmatprep.mubr.f32.mxu0 %v24545_v38  ;;  %27335 = vst [vmem:[#allocation16_spill] sm:$0xff] %v24620_v56 }
 0x2ea   :  { %16696 = vmatmul.mubr.f32.vlgmr.msra.gmra.mrb[8].mxu1 %v24545_v38 }
 0x2eb   :  { %18171 = vmatmul.mubr.f32.vlgmr.msra.gmra.mrb[72].mxu0 %v24545_v38  ;;  %20284 = vmatpush3.bf16.msra.mxu1 %v27330_v20 }
 0x2ec   :  { %21084 = vmatpush3.bf16.msra.mxu0 %v27330_v20  ;;  %16698 = vmatprep.mubr.f32.mxu1 %v24545_v38  ;;  %v13925_v20 = vld [vmem:[%s27163_s5 + $0x158] sm:$0xff] }
 0x2ed   :  { %18173 = vmatprep.mubr.f32.mxu0 %v24545_v38  ;;  %20286 = vmatprep.subr.bf16.mxu1 %v20285_v36 }
 0x2ee   :  { %21086 = vmatprep.subr.bf16.mxu0 %v20285_v36  ;;  %16699 = vmatmul.mubr.f32.gmra.mrb[10].mxu1 %v24545_v38 }
 0x2ef   :  { %18174 = vmatmul.mubr.f32.gmra.mrb[74].mxu0 %v24545_v38  ;;  %16701 = vmatprep.mubr.f32.mxu1 %v24563_v29 }
 0x2f0   :  { %20288 = vmatpush3.bf16.msra.mxu1 %v20285_v36  ;;  %18176 = vmatprep.mubr.f32.mxu0 %v24572_v24 }
 0x2f1   :  { %21088 = vmatpush3.bf16.msra.mxu0 %v20285_v36  ;;  %20290 = vmatprep.subr.bf16.mxu1 %v20289_v3  ;;  %v13924_v36 = vld [vmem:[%s27163_s5 + $0x150] sm:$0xff] }
 0x2f2   :  { %21090 = vmatprep.subr.bf16.mxu0 %v20289_v3  ;;  %16702 = vmatmul.mubr.f32.gmra.mrb[12].mxu1 %v24575_v60  ;;  %v20301_v47 = vpack.c.bf16 %v13925_v20, %v13924_v36  ;;  %v24629_v36 = vld [vmem:[#allocation2 + $0x58] sm:$0xff] }
 0x2f3   :  { %18177 = vmatmul.mubr.f32.gmra.mrb[76].mxu0 %v24577_v13  ;;  %16704 = vmatprep.mubr.f32.mxu1 %v24581_v58  ;;  %27337 = vst [vmem:[#allocation18_spill] sm:$0xff] %v24629_v36  ;;  %v24631_v20 = vld [vmem:[#allocation2 + $0x138] sm:$0xff] }
 0x2f4   :  { %20292 = vmatpush3.bf16.msra.mxu1 %v20289_v3  ;;  %18179 = vmatprep.mubr.f32.mxu0 %v24590_v16  ;;  %27338 = vst [vmem:[#allocation19_spill] sm:$0xff] %v24631_v20 }
 0x2f5   :  { %21092 = vmatpush3.bf16.msra.mxu0 %v20289_v3  ;;  %20294 = vmatprep.subr.bf16.mxu1 %v20293_v7  ;;  %v24611_v3 = vld [vmem:[#allocation2 + $0x48] sm:$0xff] }
 0x2f6   :  { %21094 = vmatprep.subr.bf16.mxu0 %v20293_v7  ;;  %16705 = vmatmul.mubr.f32.gmra.mrb[14].mxu1 %v24593_v39  ;;  %27333 = vst [vmem:[#allocation14_spill] sm:$0xff] %v24611_v3 }
 0x2f7   :  { %18180 = vmatmul.mubr.f32.gmra.mrb[78].mxu0 %v24595_v37  ;;  %16707 = vmatprep.mubr.f32.mxu1 %v24602_v26  ;;  %v2118_v26 = vld [vmem:[#allocation2 + $0x1a] sm:$0xff] }
 0x2f8   :  { %18182 = vmatprep.mubr.f32.mxu0 %v24604_v19  ;;  %20296 = vmatpush3.bf16.msra.mxu1 %v20293_v7  ;;  %v24679_v19 = vld [vmem:[#allocation2 + $0x168] sm:$0xff] }
 0x2f9   :  { %21096 = vmatpush3.bf16.msra.mxu0 %v20293_v7  ;;  %20298 = vmatprep.subr.bf16.mxu1 %v20297_v6  ;;  %v13927_v7 = vld [vmem:[%s27163_s5 + $0x168] sm:$0xff]  ;;  %27350 = vst [vmem:[#allocation29_spill] sm:$0xff] %v24679_v19 }
 0x2fa   :  { %21098 = vmatprep.subr.bf16.mxu0 %v20297_v6  ;;  %16708 = vmatmul.mubr.f32.gmra.mrb[16].mxu1 %v24611_v3  ;;  %v20305_v53 = vpack.c.bf16 %v13927_v7, %v13926_v12  ;;  %v24647_v12 = vld [vmem:[#allocation2 + $0x68] sm:$0xff]  ;;  %v24673_v3 = vld [vmem:[#allocation2 + $0x160] sm:$0xff] }
 0x2fb   :  { %18183 = vmatmul.mubr.f32.gmra.mrb[80].mxu0 %v24613_v0  ;;  %16710 = vmatprep.mubr.f32.mxu1 %v24620_v56  ;;  %v13928_v0 = vld [vmem:[%s27163_s5 + $0x170] sm:$0xff]  ;;  %27341 = vst [vmem:[#allocation10_spill] sm:$0xff] %v24647_v12  ;;  %v24649_v7 = vld [vmem:[#allocation2 + $0x148] sm:$0xff]  ;;  %27348 = vst [vmem:[#allocation27_spill] sm:$0xff] %v24673_v3 }
 0x2fc   :  { %18185 = vmatprep.mubr.f32.mxu0 %v24622_v34  ;;  %20300 = vmatpush3.bf16.msra.mxu1 %v20297_v6  ;;  %v24638_v56 = vld [vmem:[#allocation2 + $0x60] sm:$0xff]  ;;  %27342 = vst [vmem:[#allocation9_spill] sm:$0xff] %v24649_v7 }
 0x2fd   :  { %21100 = vmatpush3.bf16.msra.mxu0 %v20297_v6  ;;  %20302 = vmatprep.subr.bf16.mxu1 %v20301_v47  ;;  %27339 = vst [vmem:[#allocation20_spill] sm:$0xff] %v24638_v56  ;;  %v24640_v34 = vld [vmem:[#allocation2 + $0x140] sm:$0xff]  ;;  %v13929_v6 = vld [vmem:[%s27163_s5 + $0x178] sm:$0xff] }
 0x2fe   :  { %21102 = vmatprep.subr.bf16.mxu0 %v20301_v47  ;;  %16711 = vmatmul.mubr.f32.gmra.mrb[18].mxu1 %v24629_v36  ;;  %27340 = vst [vmem:[#allocation21_spill] sm:$0xff] %v24640_v34  ;;  %v13930_v36 = vld [vmem:[%s27163_s5 + $0x180] sm:$0xff] }
 0x2ff   :  { %18186 = vmatmul.mubr.f32.gmra.mrb[82].mxu0 %v24631_v20  ;;  %16713 = vmatprep.mubr.f32.mxu1 %v24638_v56  ;;  %v20309_v20 = vpack.c.bf16 %v13929_v6, %v13928_v0  ;;  %v24656_v56 = vld [vmem:[#allocation2 + $0x70] sm:$0xff]  ;;  %v24665_v0 = vld [vmem:[#allocation2 + $0x78] sm:$0xff] }
 0x300   :  { %18188 = vmatprep.mubr.f32.mxu0 %v24640_v34  ;;  %20304 = vmatpush3.bf16.msra.mxu1 %v20301_v47  ;;  %27343 = vst [vmem:[#allocation22_spill] sm:$0xff] %v24656_v56  ;;  %v24658_v34 = vld [vmem:[#allocation2 + $0x150] sm:$0xff]  ;;  %27345 = vst [vmem:[#allocation24_spill] sm:$0xff] %v24665_v0  ;;  %v24667_v6 = vld [vmem:[#allocation2 + $0x158] sm:$0xff] }
 0x301   :  { %21104 = vmatpush3.bf16.msra.mxu0 %v20301_v47  ;;  %20306 = vmatprep.subr.bf16.mxu1 %v20305_v53  ;;  %27344 = vst [vmem:[#allocation23_spill] sm:$0xff] %v24658_v34  ;;  %v13931_v47 = vld [vmem:[%s27163_s5 + $0x188] sm:$0xff]  ;;  %27346 = vst [vmem:[#allocation25_spill] sm:$0xff] %v24667_v6 }
 0x302   :  { %21106 = vmatprep.subr.bf16.mxu0 %v20305_v53  ;;  %16714 = vmatmul.mubr.f32.gmra.mrb[20].mxu1 %v24647_v12  ;;  %v24671_v12 = vld [vmem:[#allocation2 + $0x80] sm:$0xff] }
 0x303   :  { %18189 = vmatmul.mubr.f32.gmra.mrb[84].mxu0 %v24649_v7  ;;  %16716 = vmatprep.mubr.f32.mxu1 %v24656_v56  ;;  %v20313_v7 = vpack.c.bf16 %v13931_v47, %v13930_v36  ;;  %27347 = vst [vmem:[#allocation26_spill] sm:$0xff] %v24671_v12  ;;  %v24677_v56 = vld [vmem:[#allocation2 + $0x88] sm:$0xff]  ;;  %v13932_v36 = vld [vmem:[%s27163_s5 + $0x190] sm:$0xff] }
 0x304   :  { %18191 = vmatprep.mubr.f32.mxu0 %v24658_v34  ;;  %20308 = vmatpush3.bf16.msra.mxu1 %v20305_v53  ;;  %v7270_v34 = vld [vmem:[#allocation2 + $0xe2] sm:$0xff]  ;;  %27349 = vst [vmem:[#allocation28_spill] sm:$0xff] %v24677_v56  ;;  %v2116_v47 = vld [vmem:[#allocation2 + $0xa] sm:$0xff] }
 0x305   :  { %21108 = vmatpush3.bf16.msra.mxu0 %v20305_v53  ;;  %20310 = vmatprep.subr.bf16.mxu1 %v20309_v20  ;;  %v2115_v53 = vld [vmem:[#allocation2 + $0x2] sm:$0xff] }
 0x306   :  { %21110 = vmatprep.subr.bf16.mxu0 %v20309_v20  ;;  %16717 = vmatmul.mubr.f32.gmra.mrb[22].mxu1 %v24665_v0 }
 0x307   :  { %18192 = vmatmul.mubr.f32.gmra.mrb[86].mxu0 %v24667_v6  ;;  %16719 = vmatprep.mubr.f32.mxu1 %v24671_v12  ;;  %v2117_v12 = vld [vmem:[#allocation2 + $0x12] sm:$0xff] }
 0x308   :  { %18194 = vmatprep.mubr.f32.mxu0 %v24673_v3  ;;  %20312 = vmatpush3.bf16.msra.mxu1 %v20309_v20  ;;  %v7271_v3 = vld [vmem:[#allocation2 + $0xea] sm:$0xff]  ;;  %v7272_v6 = vld [vmem:[#allocation2 + $0xf2] sm:$0xff] }
 0x309   :  { %21112 = vmatpush3.bf16.msra.mxu0 %v20309_v20  ;;  %20314 = vmatprep.subr.bf16.mxu1 %v20313_v7  ;;  %v13933_v20 = vld [vmem:[%s27163_s5 + $0x198] sm:$0xff] }
 0x30a   :  { %21114 = vmatprep.subr.bf16.mxu0 %v20313_v7  ;;  %16720 = vmatmul.mubr.f32.gmra.mrb[24].mxu1 %v24677_v56  ;;  %v20317_v0 = vpack.c.bf16 %v13933_v20, %v13932_v36  ;;  %v13935_v56 = vld [vmem:[%s27163_s5 + $0x1a8] sm:$0xff]  ;;  %v13937_v36 = vld [vmem:[%s27163_s5 + $0x1b8] sm:$0xff]  ;;  %v27351_v20 = vmax.f32 %v24201_v22, 0.0  ;;  %v13938_v22 = vld [vmem:[%s27163_s5 + $0x1c0] sm:$0xff] }
 0x30b   :  { %18195 = vmatmul.mubr.f32.gmra.mrb[88].mxu0 %v24679_v19  ;;  %16754 = vmatprep.mubr.f32.mxu1 %v2115_v53  ;;  %v13934_v19 = vld [vmem:[%s27163_s5 + $0x1a0] sm:$0xff]  ;;  %v7273_v53 = vld [vmem:[#allocation2 + $0xfa] sm:$0xff] }
 0x30c   :  { %18229 = vmatprep.mubr.f32.mxu0 %v7270_v34  ;;  %v20321_v34 = vpack.c.bf16 %v13935_v56, %v13934_v19  ;;  %v27353_v19 = vmax.f32 %v24204_v52, 0.0  ;;  %v27354_v56 = vmax.f32 %v24257_v35, 0.0  ;;  %v27356_v52 = vmax.f32 %v24260_v33, 0.0  ;;  %v13941_v33 = vld [vmem:[%s27163_s5 + $0x1d8] sm:$0xff] }
 0x30e   :  { %16755 = vmatmul.mubr.f32.vlgmr.msra.gmra.mrb[8].mxu1 %v2116_v47  ;;  %v27367_v47 = vmax.f32 %v24227_v62, 0.0  ;;  %v13946_v62 = vld [vmem:[%s27163_s5 + $0x200] sm:$0xff] }
 0x30f   :  { %18230 = vmatmul.mubr.f32.vlgmr.msra.gmra.mrb[72].mxu0 %v7271_v3  ;;  %20316 = vmatpush3.bf16.msra.mxu1 %v20313_v7  ;;  %v13936_v3 = vld [vmem:[%s27163_s5 + $0x1b0] sm:$0xff]  ;;  %v20345_v1 = vpack.c.bf16 %v13947_v5, %v13946_v62  ;;  %v13961_v5 = vld [vmem:[%s27163_s5 + $0x278] sm:$0xff] }
 0x310   :  { %21116 = vmatpush3.bf16.msra.mxu0 %v20313_v7  ;;  %16757 = vmatprep.mubr.f32.mxu1 %v2117_v12  ;;  %v27352_v12 = vmax.f32 %v24254_v25, 0.0  ;;  %v13939_v25 = vld [vmem:[%s27163_s5 + $0x1c8] sm:$0xff]  ;;  %v27355_v7 = vmax.f32 %v24209_v23, 0.0  ;;  %v13940_v23 = vld [vmem:[%s27163_s5 + $0x1d0] sm:$0xff] }
 0x311   :  { %18232 = vmatprep.mubr.f32.mxu0 %v7272_v6  ;;  %20318 = vmatprep.subr.bf16.mxu1 %v20317_v0  ;;  %v20329_v35 = vpack.c.bf16 %v13939_v25, %v13938_v22  ;;  %v20333_v57 = vpack.c.bf16 %v13941_v33, %v13940_v23  ;;  %v27363_v6 = vmax.f32 %v24221_v40, 0.0  ;;  %v13944_v40 = vld [vmem:[%s27163_s5 + $0x1f0] sm:$0xff]  ;;  %v13953_v22 = vld [vmem:[%s27163_s5 + $0x238] sm:$0xff]  ;;  %v13955_v23 = vld [vmem:[%s27163_s5 + $0x248] sm:$0xff] }
 0x312   :  { %21118 = vmatprep.subr.bf16.mxu0 %v20317_v0  ;;  %16758 = vmatmul.mubr.f32.gmra.mrb[10].mxu1 %v2118_v26  ;;  %v20325_v26 = vpack.c.bf16 %v13937_v36, %v13936_v3  ;;  %v20341_v61 = vpack.c.bf16 %v13945_v44, %v13944_v40  ;;  %v7461_v3 = vld [vmem:[#allocation2 + $0xe3] sm:$0xff]  ;;  %v7467_v33 = vld [vmem:[#allocation2 + $0x113] sm:$0xff] }
 0x313   :  { %18233 = vmatmul.mubr.f32.gmra.mrb[74].mxu0 %v7273_v53  ;;  %16760 = vmatprep.mubr.f32.mxu1 %v27351_v20  ;;  %v27371_v53 = vmax.f32 %v24233_v51, 0.0  ;;  %v27375_v51 = vmax.f32 %v24239_v14, 0.0  ;;  %v13948_v14 = vld [vmem:[%s27163_s5 + $0x210] sm:$0xff]  ;;  %v7471_v40 = vld [vmem:[#allocation2 + $0x133] sm:$0xff] }
 0x314   :  { %20320 = vmatpush3.bf16.msra.mxu1 %v20317_v0  ;;  %18235 = vmatprep.mubr.f32.mxu0 %v27352_v12  ;;  %v20349_v36 = vpack.c.bf16 %v13949_v59, %v13948_v14  ;;  %v2326_v20 = vld [vmem:[#allocation2 + $0x1b] sm:$0xff]  ;;  %v7465_v25 = vld [vmem:[#allocation2 + $0x103] sm:$0xff] }
 0x315   :  { %21120 = vmatpush3.bf16.msra.mxu0 %v20317_v0  ;;  %20322 = vmatprep.subr.bf16.mxu1 %v20321_v34  ;;  %v27359_v0 = vmax.f32 %v24215_v30, 0.0  ;;  %v13942_v30 = vld [vmem:[%s27163_s5 + $0x1e0] sm:$0xff]  ;;  %v7464_v12 = vld [vmem:[#allocation2 + $0xfb] sm:$0xff]  ;;  %v7477_v14 = vld [vmem:[#allocation2 + $0x163] sm:$0xff] }
 0x316   :  { %21122 = vmatprep.subr.bf16.mxu0 %v20321_v34  ;;  %23136 = vmatmul.mubr.msk.f32.gmra.mrb[12].mxu1 %vm24294_vm6, %v27353_v19  ;;  %v20337_v27 = vpack.c.bf16 %v13943_v32, %v13942_v30  ;;  %v2327_v19 = vld [vmem:[#allocation2 + $0x23] sm:$0xff]  ;;  %v13959_v44 = vld [vmem:[%s27163_s5 + $0x268] sm:$0xff] }
 0x317   :  { %23137 = vmatmul.mubr.msk.f32.gmra.mrb[76].mxu0 %vm24300_vm7, %v27354_v56  ;;  %16763 = vmatprep.mubr.f32.mxu1 %v27355_v7  ;;  %v13952_v56 = vld [vmem:[%s27163_s5 + $0x230] sm:$0xff]  ;;  %v2328_v7 = vld [vmem:[#allocation2 + $0x2b] sm:$0xff] }
 0x318   :  { %20324 = vmatpush3.bf16.msra.mxu1 %v20321_v34  ;;  %18238 = vmatprep.mubr.f32.mxu0 %v27356_v52  ;;  %v7466_v52 = vld [vmem:[#allocation2 + $0x10b] sm:$0xff]  ;;  %v7469_v30 = vld [vmem:[#allocation2 + $0x123] sm:$0xff] }
 0x319   :  { %21124 = vmatpush3.bf16.msra.mxu0 %v20321_v34  ;;  %20326 = vmatprep.subr.bf16.mxu1 %v20325_v26  ;;  %v2323_v34 = vld [vmem:[#allocation2 + $0x3] sm:$0xff] }
 0x31a   :  { %21126 = vmatprep.subr.bf16.mxu0 %v20325_v26  ;;  %23138 = vmatmul.mubr.msk.f32.gmra.mrb[14].mxu1 %vm24306_vm8, %v27357_v4  ;;  %v2329_v4 = vld [vmem:[#allocation2 + $0x33] sm:$0xff]  ;;  %v13957_v32 = vld [vmem:[%s27163_s5 + $0x258] sm:$0xff]  ;;  %v13960_v62 = vld [vmem:[%s27163_s5 + $0x270] sm:$0xff]  ;;  %vm12182_vm8 = vcmask 1041409  }
 0x31b   :  { %23139 = vmatmul.mubr.msk.f32.gmra.mrb[78].mxu0 %vm24312_vm9, %v27358_v46  ;;  %16766 = vmatprep.mubr.f32.mxu1 %v27359_v0  ;;  %v13954_v46 = vld [vmem:[%s27163_s5 + $0x240] sm:$0xff]  ;;  %v2330_v0 = vld [vmem:[#allocation2 + $0x3b] sm:$0xff]  ;;  %v2531_v59 = vld [vmem:[#allocation2 + $0x4] sm:$0xff] }
 0x31c   :  { %18241 = vmatprep.mubr.f32.mxu0 %v27360_v18  ;;  %20328 = vmatpush3.bf16.msra.mxu1 %v20325_v26  ;;  %v7468_v18 = vld [vmem:[#allocation2 + $0x11b] sm:$0xff] }
 0x31d   :  { %21128 = vmatpush3.bf16.msra.mxu0 %v20325_v26  ;;  %20330 = vmatprep.subr.bf16.mxu1 %v20329_v35 }
 0x31e   :  { %21130 = vmatprep.subr.bf16.mxu0 %v20329_v35  ;;  %23140 = vmatmul.mubr.msk.f32.gmra.mrb[16].mxu1 %vm24336_vm11, %v27361_v15  ;;  %v13956_v15 = vld [vmem:[%s27163_s5 + $0x250] sm:$0xff] }
 0x31f   :  { %23141 = vmatmul.mubr.msk.f32.gmra.mrb[80].mxu0 %vm24342_vm12, %v27362_v21  ;;  %16769 = vmatprep.mubr.f32.mxu1 %v27363_v6  ;;  %v2331_v21 = vld [vmem:[#allocation2 + $0x43] sm:$0xff]  ;;  %v2332_v6 = vld [vmem:[#allocation2 + $0x4b] sm:$0xff] }
 0x320   :  { %18244 = vmatprep.mubr.f32.mxu0 %v27364_v31  ;;  %20332 = vmatpush3.bf16.msra.mxu1 %v20329_v35  ;;  %v7470_v31 = vld [vmem:[#allocation2 + $0x12b] sm:$0xff] }
 0x321   :  { %21132 = vmatpush3.bf16.msra.mxu0 %v20329_v35  ;;  %20334 = vmatprep.subr.bf16.mxu1 %v20333_v57  ;;  %v20357_v35 = vpack.c.bf16 %v13953_v22, %v13952_v56  ;;  %v13967_v56 = vld [vmem:[%s27163_s5 + $0x2a8] sm:$0xff] }
 0x322   :  { %21134 = vmatprep.subr.bf16.mxu0 %v20333_v57  ;;  %23142 = vmatmul.mubr.msk.f32.gmra.mrb[18].mxu1 %vm24348_vm13, %v27365_v42  ;;  %v13958_v42 = vld [vmem:[%s27163_s5 + $0x260] sm:$0xff]  ;;  %v2534_v22 = vld [vmem:[#allocation2 + $0x1c] sm:$0xff] }
 0x323   :  { %23143 = vmatmul.mubr.msk.f32.gmra.mrb[82].mxu0 %vm24360_vm14, %v27366_v28  ;;  %16772 = vmatprep.mubr.f32.mxu1 %v27367_v47  ;;  %v2333_v28 = vld [vmem:[#allocation2 + $0x53] sm:$0xff]  ;;  %v2334_v47 = vld [vmem:[#allocation2 + $0x5b] sm:$0xff] }
 0x324   :  { %18247 = vmatprep.mubr.f32.mxu0 %v27368_v45  ;;  %20336 = vmatpush3.bf16.msra.mxu1 %v20333_v57  ;;  %v7472_v45 = vld [vmem:[#allocation2 + $0x13b] sm:$0xff] }
 0x325   :  { %21136 = vmatpush3.bf16.msra.mxu0 %v20333_v57  ;;  %20338 = vmatprep.subr.bf16.mxu1 %v20337_v27  ;;  %v20361_v57 = vpack.c.bf16 %v13955_v23, %v13954_v46  ;;  %v7656_v46 = vld [vmem:[#allocation2 + $0x104] sm:$0xff]  ;;  %v2536_v23 = vld [vmem:[#allocation2 + $0x2c] sm:$0xff] }
 0x326   :  { %21138 = vmatprep.subr.bf16.mxu0 %v20337_v27  ;;  %23144 = vmatmul.mubr.msk.f32.gmra.mrb[20].mxu1 %vm24366_vm15, %v27369_v2  ;;  %v20369_v2 = vpack.c.bf16 %v13959_v44, %v13958_v42  ;;  %v13972_v42 = vld [vmem:[%s27163_s5 + $0x2d0] sm:$0xff]  ;;  %v7661_v44 = vld [vmem:[#allocation2 + $0x12c] sm:$0xff] }
 0x327   :  { %23145 = vmatmul.mubr.msk.f32.gmra.mrb[84].mxu0 %vm24372_vm4, %v27370_v8  ;;  %16775 = vmatprep.mubr.f32.mxu1 %v27371_v53  ;;  %v7473_v8 = vld [vmem:[#allocation2 + $0x143] sm:$0xff]  ;;  %v2336_v53 = vld [vmem:[#allocation2 + $0x6b] sm:$0xff] }
 0x328   :  { %18250 = vmatprep.mubr.f32.mxu0 %v27372_v48  ;;  %20340 = vmatpush3.bf16.msra.mxu1 %v20337_v27  ;;  %v7474_v48 = vld [vmem:[#allocation2 + $0x14b] sm:$0xff] }
 0x329   :  { %21140 = vmatpush3.bf16.msra.mxu0 %v20337_v27  ;;  %20342 = vmatprep.subr.bf16.mxu1 %v20341_v61  ;;  %v20365_v27 = vpack.c.bf16 %v13957_v32, %v13956_v15  ;;  %v13971_v15 = vld [vmem:[%s27163_s5 + $0x2c8] sm:$0xff] }
 0x32a   :  { %21142 = vmatprep.subr.bf16.mxu0 %v20341_v61  ;;  %23146 = vmatmul.mubr.msk.f32.gmra.mrb[22].mxu1 %vm24378_vm5, %v27373_v49  ;;  %v20373_v49 = vpack.c.bf16 %v13961_v5, %v13960_v62  ;;  %v7659_v32 = vld [vmem:[#allocation2 + $0x11c] sm:$0xff] }
 0x32b   :  { %23147 = vmatmul.mubr.msk.f32.gmra.mrb[86].mxu0 %vm24388_vm0, %v27374_v10  ;;  %16778 = vmatprep.mubr.f32.mxu1 %v27375_v51  ;;  %vm27379_vm0 = vnez %v27304_v41  ;;  %v13951_v41 = vld [vmem:[%s27163_s5 + $0x228] sm:$0xff]  ;;  %v13962_v51 = vld [vmem:[%s27163_s5 + $0x280] sm:$0xff] }
 0x32c   :  { %18253 = vmatprep.mubr.f32.mxu0 %v27376_v11  ;;  %20344 = vmatpush3.bf16.msra.mxu1 %v20341_v61  ;;  %v20353_v26 = vpack.c.bf16 %v13951_v41, %v13950_v9  ;;  %v7475_v10 = vld [vmem:[#allocation2 + $0x153] sm:$0xff]  ;;  %v2542_v62 = vld [vmem:[#allocation2 + $0x5c] sm:$0xff] }
 0x32d   :  { %21144 = vmatpush3.bf16.msra.mxu0 %v20341_v61  ;;  %20346 = vmatprep.subr.bf16.mxu1 %v20345_v1  ;;  %v2335_v61 = vld [vmem:[#allocation2 + $0x63] sm:$0xff]  ;;  %v13963_v11 = vld [vmem:[%s27163_s5 + $0x288] sm:$0xff]  ;;  %v2532_v9 = vld [vmem:[#allocation2 + $0xc] sm:$0xff] }
 0x32e   :  { %21146 = vmatprep.subr.bf16.mxu0 %v20345_v1  ;;  %23148 = vmatmul.mubr.msk.f32.gmra.mrb[24].mxu1 %vm24394_vm3, %v27377_v54  ;;  %v20377_v54 = vpack.c.bf16 %v13963_v11, %v13962_v51  ;;  %v7653_v41 = vld [vmem:[#allocation2 + $0xec] sm:$0xff]  ;;  %v7663_v5 = vld [vmem:[#allocation2 + $0x13c] sm:$0xff]  ;;  %vm27404_vm3 = vcmask 130048  }
 0x32f   :  { %23149 = vmatmul.mubr.msk.f32.gmra.mrb[88].mxu0 %vm27379_vm0, %v27378_v55  ;;  %16813 = vmatprep.mubr.f32.mxu1 %v2323_v34  ;;  %v2338_v34 = vld [vmem:[#allocation2 + $0x7b] sm:$0xff]  ;;  %v2339_v55 = vld [vmem:[#allocation2 + $0x83] sm:$0xff]  ;;  %v2544_v51 = vld [vmem:[#allocation2 + $0x6c] sm:$0xff] }
 0x330   :  { %18288 = vmatprep.mubr.f32.mxu0 %v7461_v3  ;;  %v7476_v3 = vld [vmem:[#allocation2 + $0x15b] sm:$0xff]  ;;  %v7665_v11 = vld [vmem:[#allocation2 + $0x14c] sm:$0xff]  ;;  %vm27408_vm7 = vmmov %vm27404_vm3 }
 0x332   :  { %16814 = vmatmul.mubr.f32.vlgmr.msra.gmra.mrb[8].mxu1 %v2324_v43  ;;  %v7652_v43 = vld [vmem:[#allocation2 + $0xe4] sm:$0xff] }
 0x333   :  { %18289 = vmatmul.mubr.f32.vlgmr.msra.gmra.mrb[72].mxu0 %v7462_v63  ;;  %20348 = vmatpush3.bf16.msra.mxu1 %v20345_v1  ;;  %v2340_v63 = vld [vmem:[#allocation2 + $0x8b] sm:$0xff] }
 0x334   :  { %21148 = vmatpush3.bf16.msra.mxu0 %v20345_v1  ;;  %16816 = vmatprep.mubr.f32.mxu1 %v2325_v17  ;;  %v2337_v1 = vld [vmem:[#allocation2 + $0x73] sm:$0xff]  ;;  %v7478_v17 = vld [vmem:[#allocation2 + $0x16b] sm:$0xff] }
 0x335   :  { %18291 = vmatprep.mubr.f32.mxu0 %v7463_v50  ;;  %20350 = vmatprep.subr.bf16.mxu1 %v20349_v36  ;;  %v13964_v50 = vld [vmem:[%s27163_s5 + $0x290] sm:$0xff] }
 0x336   :  { %21150 = vmatprep.subr.bf16.mxu0 %v20349_v36  ;;  %16817 = vmatmul.mubr.f32.gmra.mrb[10].mxu1 %v2326_v20  ;;  %v2533_v20 = vld [vmem:[#allocation2 + $0x14] sm:$0xff] }
 0x337   :  { %18292 = vmatmul.mubr.f32.gmra.mrb[74].mxu0 %v7464_v12  ;;  %16819 = vmatprep.mubr.f32.mxu1 %v2327_v19  ;;  %v7654_v12 = vld [vmem:[#allocation2 + $0xf4] sm:$0xff] }
 0x338   :  { %20352 = vmatpush3.bf16.msra.mxu1 %v20349_v36  ;;  %18294 = vmatprep.mubr.f32.mxu0 %v7465_v25  ;;  %v13966_v19 = vld [vmem:[%s27163_s5 + $0x2a0] sm:$0xff]  ;;  %v7655_v25 = vld [vmem:[#allocation2 + $0xfc] sm:$0xff] }
 0x339   :  { %21152 = vmatpush3.bf16.msra.mxu0 %v20349_v36  ;;  %20354 = vmatprep.subr.bf16.mxu1 %v20353_v26  ;;  %v13965_v36 = vld [vmem:[%s27163_s5 + $0x298] sm:$0xff] }
 0x33a   :  { %21154 = vmatprep.subr.bf16.mxu0 %v20353_v26  ;;  %16820 = vmatmul.mubr.f32.gmra.mrb[12].mxu1 %v2328_v7  ;;  %v20385_v7 = vpack.c.bf16 %v13967_v56, %v13966_v19  ;;  %v13983_v19 = vld [vmem:[%s27163_s5 + $0x328] sm:$0xff] }
 0x33b   :  { %18295 = vmatmul.mubr.f32.gmra.mrb[76].mxu0 %v7466_v52  ;;  %16822 = vmatprep.mubr.f32.mxu1 %v2329_v4  ;;  %v2535_v52 = vld [vmem:[#allocation2 + $0x24] sm:$0xff] }
 0x33c   :  { %20356 = vmatpush3.bf16.msra.mxu1 %v20353_v26  ;;  %18297 = vmatprep.mubr.f32.mxu0 %v7467_v33  ;;  %v13969_v4 = vld [vmem:[%s27163_s5 + $0x2b8] sm:$0xff] }
 0x33d   :  { %21156 = vmatpush3.bf16.msra.mxu0 %v20353_v26  ;;  %20358 = vmatprep.subr.bf16.mxu1 %v20357_v35  ;;  %v20381_v26 = vpack.c.bf16 %v13965_v36, %v13964_v50  ;;  %v7657_v33 = vld [vmem:[#allocation2 + $0x10c] sm:$0xff]  ;;  %v7668_v50 = vld [vmem:[#allocation2 + $0x164] sm:$0xff] }
 0x33e   :  { %21158 = vmatprep.subr.bf16.mxu0 %v20357_v35  ;;  %16823 = vmatmul.mubr.f32.gmra.mrb[14].mxu1 %v2330_v0  ;;  %v2548_v36 = vld [vmem:[#allocation2 + $0x8c] sm:$0xff] }
 0x33f   :  { %18298 = vmatmul.mubr.f32.gmra.mrb[78].mxu0 %v7468_v18  ;;  %16825 = vmatprep.mubr.f32.mxu1 %v2331_v21  ;;  %v2537_v18 = vld [vmem:[#allocation2 + $0x34] sm:$0xff] }
 0x340   :  { %18300 = vmatprep.mubr.f32.mxu0 %v7469_v30  ;;  %20360 = vmatpush3.bf16.msra.mxu1 %v20357_v35  ;;  %v7658_v21 = vld [vmem:[#allocation2 + $0x114] sm:$0xff]  ;;  %v2538_v30 = vld [vmem:[#allocation2 + $0x3c] sm:$0xff] }
 0x341   :  { %21160 = vmatpush3.bf16.msra.mxu0 %v20357_v35  ;;  %20362 = vmatprep.subr.bf16.mxu1 %v20361_v57  ;;  %v13968_v35 = vld [vmem:[%s27163_s5 + $0x2b0] sm:$0xff] }
 0x342   :  { %21162 = vmatprep.subr.bf16.mxu0 %v20361_v57  ;;  %16826 = vmatmul.mubr.f32.gmra.mrb[16].mxu1 %v2332_v6  ;;  %v20389_v0 = vpack.c.bf16 %v13969_v4, %v13968_v35  ;;  %v2539_v6 = vld [vmem:[#allocation2 + $0x44] sm:$0xff]  ;;  %v27385_v35 = vld [vmem:[#allocation17_spill] sm:$0xff] }
 0x343   :  { %18301 = vmatmul.mubr.f32.gmra.mrb[80].mxu0 %v7470_v31  ;;  %16828 = vmatprep.mubr.f32.mxu1 %v2333_v28  ;;  %v13973_v28 = vld [vmem:[%s27163_s5 + $0x2d8] sm:$0xff] }
 0x344   :  { %18303 = vmatprep.mubr.f32.mxu0 %v7471_v40  ;;  %20364 = vmatpush3.bf16.msra.mxu1 %v20361_v57  ;;  %v2540_v40 = vld [vmem:[#allocation2 + $0x4c] sm:$0xff] }
 0x345   :  { %21164 = vmatpush3.bf16.msra.mxu0 %v20361_v57  ;;  %20366 = vmatprep.subr.bf16.mxu1 %v20365_v27  ;;  %v13970_v57 = vld [vmem:[%s27163_s5 + $0x2c0] sm:$0xff] }
 0x346   :  { %21166 = vmatprep.subr.bf16.mxu0 %v20365_v27  ;;  %16829 = vmatmul.mubr.f32.gmra.mrb[18].mxu1 %v2334_v47  ;;  %v20393_v31 = vpack.c.bf16 %v13971_v15, %v13970_v57  ;;  %v2541_v47 = vld [vmem:[#allocation2 + $0x54] sm:$0xff] }
 0x347   :  { %18304 = vmatmul.mubr.f32.gmra.mrb[82].mxu0 %v7472_v45  ;;  %16831 = vmatprep.mubr.f32.mxu1 %v2335_v61  ;;  %v20397_v45 = vpack.c.bf16 %v13973_v28, %v13972_v42  ;;  %v7662_v61 = vld [vmem:[#allocation2 + $0x134] sm:$0xff]  ;;  %v27394_v28 = vld [vmem:[#allocation24_spill] sm:$0xff] }
 0x348   :  { %18306 = vmatprep.mubr.f32.mxu0 %v7473_v8  ;;  %20368 = vmatpush3.bf16.msra.mxu1 %v20365_v27  ;;  %v13975_v8 = vld [vmem:[%s27163_s5 + $0x2e8] sm:$0xff] }
 0x349   :  { %21168 = vmatpush3.bf16.msra.mxu0 %v20365_v27  ;;  %20370 = vmatprep.subr.bf16.mxu1 %v20369_v2  ;;  %v7660_v27 = vld [vmem:[#allocation2 + $0x124] sm:$0xff]  ;;  %v27389_v57 = vld [vmem:[#allocation21_spill] sm:$0xff] }
 0x34a   :  { %21170 = vmatprep.subr.bf16.mxu0 %v20369_v2  ;;  %16832 = vmatmul.mubr.f32.gmra.mrb[20].mxu1 %v2336_v53  ;;  %v2543_v53 = vld [vmem:[#allocation2 + $0x64] sm:$0xff] }
 0x34b   :  { %18307 = vmatmul.mubr.f32.gmra.mrb[84].mxu0 %v7474_v48  ;;  %16834 = vmatprep.mubr.f32.mxu1 %v2337_v1  ;;  %v7664_v1 = vld [vmem:[#allocation2 + $0x144] sm:$0xff] }
 0x34c   :  { %18309 = vmatprep.mubr.f32.mxu0 %v7475_v10  ;;  %20372 = vmatpush3.bf16.msra.mxu1 %v20369_v2  ;;  %v13977_v10 = vld [vmem:[%s27163_s5 + $0x2f8] sm:$0xff] }
 0x34d   :  { %21172 = vmatpush3.bf16.msra.mxu0 %v20369_v2  ;;  %20374 = vmatprep.subr.bf16.mxu1 %v20373_v49  ;;  %v13974_v2 = vld [vmem:[%s27163_s5 + $0x2e0] sm:$0xff] }
 0x34e   :  { %21174 = vmatprep.subr.bf16.mxu0 %v20373_v49  ;;  %16835 = vmatmul.mubr.f32.gmra.mrb[22].mxu1 %v2338_v34  ;;  %v20401_v48 = vpack.c.bf16 %v13975_v8, %v13974_v2  ;;  %v2545_v34 = vld [vmem:[#allocation2 + $0x74] sm:$0xff]  ;;  %v27398_v8 = vld [vmem:[#allocation28_spill] sm:$0xff] }
 0x34f   :  { %18310 = vmatmul.mubr.f32.gmra.mrb[86].mxu0 %v7476_v3  ;;  %16837 = vmatprep.mubr.f32.mxu1 %v2339_v55  ;;  %v13978_v55 = vld [vmem:[%s27163_s5 + $0x300] sm:$0xff] }
 0x350   :  { %18312 = vmatprep.mubr.f32.mxu0 %v7477_v14  ;;  %20376 = vmatpush3.bf16.msra.mxu1 %v20373_v49  ;;  %v13979_v14 = vld [vmem:[%s27163_s5 + $0x308] sm:$0xff] }
 0x351   :  { %21176 = vmatpush3.bf16.msra.mxu0 %v20373_v49  ;;  %20378 = vmatprep.subr.bf16.mxu1 %v20377_v54  ;;  %v13976_v49 = vld [vmem:[%s27163_s5 + $0x2f0] sm:$0xff] }
 0x352   :  { %21178 = vmatprep.subr.bf16.mxu0 %v20377_v54  ;;  %16838 = vmatmul.mubr.f32.gmra.mrb[24].mxu1 %v2340_v63  ;;  %v20405_v3 = vpack.c.bf16 %v13977_v10, %v13976_v49  ;;  %v20409_v63 = vpack.c.bf16 %v13979_v14, %v13978_v55  ;;  %v2756_v49 = vld [vmem:[#allocation2 + $0x98] sm:$0xff]  ;;  %v13998_v55 = vld [vmem:[%s27163_s5 + $0x3a0] sm:$0xff] }
 0x353   :  { %18313 = vmatmul.mubr.f32.gmra.mrb[88].mxu0 %v7478_v17  ;;  %16872 = vmatprep.mubr.f32.mxu1 %v2531_v59  ;;  %v2546_v59 = vld [vmem:[#allocation2 + $0x7c] sm:$0xff]  ;;  %v2547_v17 = vld [vmem:[#allocation2 + $0x84] sm:$0xff] }
 0x354   :  { %18347 = vmatprep.mubr.f32.mxu0 %v7652_v43  ;;  %v7667_v43 = vld [vmem:[#allocation2 + $0x15c] sm:$0xff] }
 0x355   :  { %v7860_v10 = vld [vmem:[#allocation2 + $0x178] sm:$0xff] }
 0x356   :  { %16873 = vmatmul.mubr.f32.vlgmr.msra.gmra.mrb[8].mxu1 %v2532_v9  ;;  %v7669_v9 = vld [vmem:[#allocation2 + $0x16c] sm:$0xff]  ;;  %v13999_v14 = vld [vmem:[%s27163_s5 + $0x3a8] sm:$0xff] }
 0x357   :  { %18348 = vmatmul.mubr.f32.vlgmr.msra.gmra.mrb[72].mxu0 %v7653_v41  ;;  %20380 = vmatpush3.bf16.msra.mxu1 %v20377_v54  ;;  %v13980_v41 = vld [vmem:[%s27163_s5 + $0x310] sm:$0xff] }
 0x358   :  { %21180 = vmatpush3.bf16.msra.mxu0 %v20377_v54  ;;  %16875 = vmatprep.mubr.f32.mxu1 %v2533_v20  ;;  %v7666_v54 = vld [vmem:[#allocation2 + $0x154] sm:$0xff]  ;;  %v13981_v20 = vld [vmem:[%s27163_s5 + $0x318] sm:$0xff] }
 0x359   :  { %18350 = vmatprep.mubr.f32.mxu0 %v7654_v12  ;;  %20382 = vmatprep.subr.bf16.mxu1 %v20381_v26  ;;  %v20413_v12 = vpack.c.bf16 %v13981_v20, %v13980_v41  ;;  %v14001_v41 = vld [vmem:[%s27163_s5 + $0x3b8] sm:$0xff]  ;;  %v8038_v20 = vld [vmem:[#allocation2 + $0x111] sm:$0xff] }
 0x35a   :  { %21182 = vmatprep.subr.bf16.mxu0 %v20381_v26  ;;  %16876 = vmatmul.mubr.f32.gmra.mrb[10].mxu1 %v2534_v22  ;;  %v13985_v22 = vld [vmem:[%s27163_s5 + $0x338] sm:$0xff] }
 0x35b   :  { %18351 = vmatmul.mubr.f32.gmra.mrb[74].mxu0 %v7655_v25  ;;  %16878 = vmatprep.mubr.f32.mxu1 %v2535_v52  ;;  %v13988_v25 = vld [vmem:[%s27163_s5 + $0x350] sm:$0xff]  ;;  %v27384_v52 = vld [vmem:[#allocation16_spill] sm:$0xff] }
 0x35c   :  { %20384 = vmatpush3.bf16.msra.mxu1 %v20381_v26  ;;  %18353 = vmatprep.mubr.f32.mxu0 %v7656_v46  ;;  %v27386_v46 = vld [vmem:[#allocation18_spill] sm:$0xff] }
 0x35d   :  { %21184 = vmatpush3.bf16.msra.mxu0 %v20381_v26  ;;  %20386 = vmatprep.subr.bf16.mxu1 %v20385_v7  ;;  %v13982_v26 = vld [vmem:[%s27163_s5 + $0x320] sm:$0xff] }
 0x35e   :  { %21186 = vmatprep.subr.bf16.mxu0 %v20385_v7  ;;  %16879 = vmatmul.mubr.f32.gmra.mrb[12].mxu1 %v2536_v23  ;;  %v20417_v56 = vpack.c.bf16 %v13983_v19, %v13982_v26  ;;  %v27387_v23 = vld [vmem:[#allocation19_spill] sm:$0xff]  ;;  %v8039_v26 = vld [vmem:[#allocation2 + $0x119] sm:$0xff] }
 0x35f   :  { %18354 = vmatmul.mubr.f32.gmra.mrb[76].mxu0 %v7657_v33  ;;  %16881 = vmatprep.mubr.f32.mxu1 %v2537_v18  ;;  %v13990_v33 = vld [vmem:[%s27163_s5 + $0x360] sm:$0xff] }
 0x360   :  { %20388 = vmatpush3.bf16.msra.mxu1 %v20385_v7  ;;  %18356 = vmatprep.mubr.f32.mxu0 %v7658_v21  ;;  %v27388_v18 = vld [vmem:[#allocation20_spill] sm:$0xff]  ;;  %v27390_v21 = vld [vmem:[#allocation10_spill] sm:$0xff] }
 0x361   :  { %21188 = vmatpush3.bf16.msra.mxu0 %v20385_v7  ;;  %20390 = vmatprep.subr.bf16.mxu1 %v20389_v0  ;;  %v13989_v7 = vld [vmem:[%s27163_s5 + $0x358] sm:$0xff] }
 0x362   :  { %21190 = vmatprep.subr.bf16.mxu0 %v20389_v0  ;;  %16882 = vmatmul.mubr.f32.gmra.mrb[14].mxu1 %v2538_v30  ;;  %v20429_v4 = vpack.c.bf16 %v13989_v7, %v13988_v25  ;;  %v27391_v30 = vld [vmem:[#allocation9_spill] sm:$0xff] }
 0x363   :  { %18357 = vmatmul.mubr.f32.gmra.mrb[78].mxu0 %v7659_v32  ;;  %16884 = vmatprep.mubr.f32.mxu1 %v2539_v6  ;;  %v13992_v32 = vld [vmem:[%s27163_s5 + $0x370] sm:$0xff]  ;;  %v13993_v6 = vld [vmem:[%s27163_s5 + $0x378] sm:$0xff] }
 0x364   :  { %18359 = vmatprep.mubr.f32.mxu0 %v7660_v27  ;;  %20392 = vmatpush3.bf16.msra.mxu1 %v20389_v0  ;;  %v27393_v27 = vld [vmem:[#allocation23_spill] sm:$0xff]  ;;  %v20437_v42 = vpack.c.bf16 %v13993_v6, %v13992_v32  ;;  %v2956_v25 = vld [vmem:[#allocation2 + $0x59] sm:$0xff] }
 0x365   :  { %21192 = vmatpush3.bf16.msra.mxu0 %v20389_v0  ;;  %20394 = vmatprep.subr.bf16.mxu1 %v20393_v31  ;;  %v13991_v0 = vld [vmem:[%s27163_s5 + $0x368] sm:$0xff] }
 0x366   :  { %21194 = vmatprep.subr.bf16.mxu0 %v20393_v31  ;;  %16885 = vmatmul.mubr.f32.gmra.mrb[16].mxu1 %v2540_v40  ;;  %v20433_v15 = vpack.c.bf16 %v13991_v0, %v13990_v33  ;;  %v27395_v40 = vld [vmem:[#allocation25_spill] sm:$0xff]  ;;  %v2958_v33 = vld [vmem:[#allocation2 + $0x69] sm:$0xff] }
 0x367   :  { %18360 = vmatmul.mubr.f32.gmra.mrb[80].mxu0 %v7661_v44  ;;  %16887 = vmatprep.mubr.f32.mxu1 %v2541_v47  ;;  %v13994_v44 = vld [vmem:[%s27163_s5 + $0x380] sm:$0xff]  ;;  %v13995_v47 = vld [vmem:[%s27163_s5 + $0x388] sm:$0xff] }
 0x368   :  { %18362 = vmatprep.mubr.f32.mxu0 %v7662_v61  ;;  %20396 = vmatpush3.bf16.msra.mxu1 %v20393_v31  ;;  %v27397_v61 = vld [vmem:[#allocation27_spill] sm:$0xff]  ;;  %v20441_v2 = vpack.c.bf16 %v13995_v47, %v13994_v44  ;;  %v8043_v7 = vld [vmem:[#allocation2 + $0x139] sm:$0xff] }
 0x369   :  { %21196 = vmatpush3.bf16.msra.mxu0 %v20393_v31  ;;  %20398 = vmatprep.subr.bf16.mxu1 %v20397_v45  ;;  %v27392_v31 = vld [vmem:[#allocation22_spill] sm:$0xff]  ;;  %v8045_v0 = vld [vmem:[#allocation2 + $0x149] sm:$0xff] }
 0x36a   :  { %21198 = vmatprep.subr.bf16.mxu0 %v20397_v45  ;;  %16888 = vmatmul.mubr.f32.gmra.mrb[18].mxu1 %v2542_v62  ;;  %v27399_v62 = vld [vmem:[#allocation29_spill] sm:$0xff]  ;;  %v2962_v44 = vld [vmem:[#allocation2 + $0x89] sm:$0xff] }
 0x36b   :  { %18363 = vmatmul.mubr.f32.gmra.mrb[82].mxu0 %v7663_v5  ;;  %16890 = vmatprep.mubr.f32.mxu1 %v2543_v53  ;;  %v2755_v5 = vld [vmem:[#allocation2 + $0x90] sm:$0xff]  ;;  %v2960_v32 = vld [vmem:[#allocation2 + $0x79] sm:$0xff] }
 0x36c   :  { %18365 = vmatprep.mubr.f32.mxu0 %v7664_v1  ;;  %20400 = vmatpush3.bf16.msra.mxu1 %v20397_v45  ;;  %v7859_v53 = vld [vmem:[#allocation2 + $0x170] sm:$0xff]  ;;  %v8047_v6 = vld [vmem:[#allocation2 + $0x159] sm:$0xff] }
 0x36d   :  { %21200 = vmatpush3.bf16.msra.mxu0 %v20397_v45  ;;  %20402 = vmatprep.subr.bf16.mxu1 %v20401_v48  ;;  %v27396_v45 = vld [vmem:[#allocation26_spill] sm:$0xff]  ;;  %v8034_v1 = vld [vmem:[#allocation2 + $0xf1] sm:$0xff]  ;;  %v8049_v47 = vld [vmem:[#allocation2 + $0x169] sm:$0xff] }
 0x36e   :  { %21202 = vmatprep.subr.bf16.mxu0 %v20401_v48  ;;  %16891 = vmatmul.mubr.f32.gmra.mrb[20].mxu1 %v2544_v51  ;;  %v13996_v51 = vld [vmem:[%s27163_s5 + $0x390] sm:$0xff] }
 0x36f   :  { %18366 = vmatmul.mubr.f32.gmra.mrb[84].mxu0 %v7665_v11  ;;  %16893 = vmatprep.mubr.f32.mxu1 %v2545_v34  ;;  %v13997_v11 = vld [vmem:[%s27163_s5 + $0x398] sm:$0xff]  ;;  %v2948_v34 = vld [vmem:[#allocation2 + $0x19] sm:$0xff] }
 0x370   :  { %18368 = vmatprep.mubr.f32.mxu0 %v7666_v54  ;;  %20404 = vmatpush3.bf16.msra.mxu1 %v20401_v48  ;;  %v20445_v54 = vpack.c.bf16 %v13997_v11, %v13996_v51  ;;  %v14014_v11 = vld [vmem:[%s27163_s5 + $0x420] sm:$0xff] }
 0x371   :  { %21204 = vmatpush3.bf16.msra.mxu0 %v20401_v48  ;;  %20406 = vmatprep.subr.bf16.mxu1 %v20405_v3  ;;  %v2947_v48 = vld [vmem:[#allocation2 + $0x11] sm:$0xff] }
 0x372   :  { %21206 = vmatprep.subr.bf16.mxu0 %v20405_v3  ;;  %16894 = vmatmul.mubr.f32.gmra.mrb[22].mxu1 %v2546_v59  ;;  %v2949_v59 = vld [vmem:[#allocation2 + $0x21] sm:$0xff] }
 0x373   :  { %18369 = vmatmul.mubr.f32.gmra.mrb[86].mxu0 %v7667_v43  ;;  %16896 = vmatprep.mubr.f32.mxu1 %v2547_v17  ;;  %v8036_v43 = vld [vmem:[#allocation2 + $0x101] sm:$0xff]  ;;  %v8037_v17 = vld [vmem:[#allocation2 + $0x109] sm:$0xff] }
 0x374   :  { %18371 = vmatprep.mubr.f32.mxu0 %v7668_v50  ;;  %20408 = vmatpush3.bf16.msra.mxu1 %v20405_v3  ;;  %v20449_v50 = vpack.c.bf16 %v13999_v14, %v13998_v55  ;;  %v3158_v55 = vld [vmem:[#allocation2 + $0x2a] sm:$0xff] }
 0x375   :  { %21208 = vmatpush3.bf16.msra.mxu0 %v20405_v3  ;;  %20410 = vmatprep.subr.bf16.mxu1 %v20409_v63  ;;  %v8035_v3 = vld [vmem:[#allocation2 + $0xf9] sm:$0xff]  ;;  %v8228_v14 = vld [vmem:[#allocation2 + $0x10a] sm:$0xff] }
 0x376   :  { %21210 = vmatprep.subr.bf16.mxu0 %v20409_v63  ;;  %16897 = vmatmul.mubr.f32.gmra.mrb[24].mxu1 %v2548_v36  ;;  %v2951_v36 = vld [vmem:[#allocation2 + $0x31] sm:$0xff] }
 0x377   :  { %18372 = vmatmul.mubr.f32.gmra.mrb[88].mxu0 %v7669_v9  ;;  %16931 = vmatprep.mubr.f32.mxu1 %v24545_v38  ;;  %v14000_v9 = vld [vmem:[%s27163_s5 + $0x3b0] sm:$0xff] }
 0x378   :  { %18406 = vmatprep.mubr.f32.mxu0 %v24545_v38  ;;  %v20453_v19 = vpack.c.bf16 %v14001_v41, %v14000_v9  ;;  %v8230_v9 = vld [vmem:[#allocation2 + $0x11a] sm:$0xff] }
 0x37a   :  { %16932 = vmatmul.mubr.f32.vlgmr.msra.gmra.mrb[8].mxu1 %v24545_v38 }
 0x37b   :  { %18407 = vmatmul.mubr.f32.vlgmr.msra.gmra.mrb[72].mxu0 %v24545_v38  ;;  %20412 = vmatpush3.bf16.msra.mxu1 %v20409_v63  ;;  %v13984_v38 = vld [vmem:[%s27163_s5 + $0x330] sm:$0xff] }
 0x37c   :  { %21212 = vmatpush3.bf16.msra.mxu0 %v20409_v63  ;;  %16934 = vmatprep.mubr.f32.mxu1 %v24563_v29  ;;  %v20421_v29 = vpack.c.bf16 %v13985_v22, %v13984_v38  ;;  %v2950_v63 = vld [vmem:[#allocation2 + $0x29] sm:$0xff]  ;;  %v14003_v22 = vld [vmem:[%s27163_s5 + $0x3c8] sm:$0xff] }
 0x37d   :  { %18409 = vmatprep.mubr.f32.mxu0 %v24572_v24  ;;  %20414 = vmatprep.subr.bf16.mxu1 %v20413_v12  ;;  %v13986_v24 = vld [vmem:[%s27163_s5 + $0x340] sm:$0xff] }
 0x37e   :  { %21214 = vmatprep.subr.bf16.mxu0 %v20413_v12  ;;  %16935 = vmatmul.mubr.f32.gmra.mrb[10].mxu1 %v24575_v60  ;;  %v13987_v60 = vld [vmem:[%s27163_s5 + $0x348] sm:$0xff]  ;;  %v14002_v38 = vld [vmem:[%s27163_s5 + $0x3c0] sm:$0xff] }
 0x37f   :  { %18410 = vmatmul.mubr.f32.gmra.mrb[74].mxu0 %v24577_v13  ;;  %16937 = vmatprep.mubr.f32.mxu1 %v24581_v58  ;;  %v27380_v13 = vld [vmem:[#allocation12_spill] sm:$0xff]  ;;  %v27381_v58 = vld [vmem:[#allocation13_spill] sm:$0xff] }
 0x380   :  { %20416 = vmatpush3.bf16.msra.mxu1 %v20413_v12  ;;  %18412 = vmatprep.mubr.f32.mxu0 %v24590_v16  ;;  %v20425_v16 = vpack.c.bf16 %v13987_v60, %v13986_v24  ;;  %v2954_v24 = vld [vmem:[#allocation2 + $0x49] sm:$0xff] }
 0x381   :  { %21216 = vmatpush3.bf16.msra.mxu0 %v20413_v12  ;;  %20418 = vmatprep.subr.bf16.mxu1 %v20417_v56  ;;  %v2952_v12 = vld [vmem:[#allocation2 + $0x39] sm:$0xff]  ;;  %v8041_v60 = vld [vmem:[#allocation2 + $0x129] sm:$0xff] }
 0x382   :  { %21218 = vmatprep.subr.bf16.mxu0 %v20417_v56  ;;  %16938 = vmatmul.mubr.f32.gmra.mrb[12].mxu1 %v24593_v39  ;;  %v27382_v39 = vld [vmem:[#allocation14_spill] sm:$0xff] }
 0x383   :  { %18413 = vmatmul.mubr.f32.gmra.mrb[76].mxu0 %v24595_v37  ;;  %16940 = vmatprep.mubr.f32.mxu1 %v27380_v13  ;;  %v27383_v37 = vld [vmem:[#allocation15_spill] sm:$0xff]  ;;  %v2955_v13 = vld [vmem:[#allocation2 + $0x51] sm:$0xff] }
 0x384   :  { %20420 = vmatpush3.bf16.msra.mxu1 %v20417_v56  ;;  %18415 = vmatprep.mubr.f32.mxu0 %v27381_v58  ;;  %v20457_v58 = vpack.c.bf16 %v14003_v22, %v14002_v38  ;;  %v8232_v38 = vld [vmem:[#allocation2 + $0x12a] sm:$0xff]  ;;  %v3163_v22 = vld [vmem:[#allocation2 + $0x52] sm:$0xff] }
 0x385   :  { %21220 = vmatpush3.bf16.msra.mxu0 %v20417_v56  ;;  %20422 = vmatprep.subr.bf16.mxu1 %v20421_v29  ;;  %v2953_v56 = vld [vmem:[#allocation2 + $0x41] sm:$0xff] }
 0x386   :  { %21222 = vmatprep.subr.bf16.mxu0 %v20421_v29  ;;  %16941 = vmatmul.mubr.f32.gmra.mrb[14].mxu1 %v27382_v39  ;;  %v14004_v39 = vld [vmem:[%s27163_s5 + $0x3d0] sm:$0xff] }
 0x387   :  { %18416 = vmatmul.mubr.f32.gmra.mrb[78].mxu0 %v27383_v37  ;;  %16943 = vmatprep.mubr.f32.mxu1 %v27384_v52  ;;  %v14005_v37 = vld [vmem:[%s27163_s5 + $0x3d8] sm:$0xff] }
 0x388   :  { %18418 = vmatprep.mubr.f32.mxu0 %v27385_v35  ;;  %20424 = vmatpush3.bf16.msra.mxu1 %v20421_v29  ;;  %v2957_v52 = vld [vmem:[#allocation2 + $0x61] sm:$0xff]  ;;  %v20461_v35 = vpack.c.bf16 %v14005_v37, %v14004_v39 }
 0x389   :  { %21224 = vmatpush3.bf16.msra.mxu0 %v20421_v29  ;;  %20426 = vmatprep.subr.bf16.mxu1 %v20425_v16  ;;  %v8040_v29 = vld [vmem:[#allocation2 + $0x121] sm:$0xff] }
 0x38a   :  { %21226 = vmatprep.subr.bf16.mxu0 %v20425_v16  ;;  %16944 = vmatmul.mubr.f32.gmra.mrb[16].mxu1 %v27386_v46  ;;  %v14006_v46 = vld [vmem:[%s27163_s5 + $0x3e0] sm:$0xff]  ;;  %v3165_v39 = vld [vmem:[#allocation2 + $0x62] sm:$0xff] }
 0x38b   :  { %18419 = vmatmul.mubr.f32.gmra.mrb[80].mxu0 %v27387_v23  ;;  %16946 = vmatprep.mubr.f32.mxu1 %v27388_v18  ;;  %v14007_v23 = vld [vmem:[%s27163_s5 + $0x3e8] sm:$0xff] }
 0x38c   :  { %18421 = vmatprep.mubr.f32.mxu0 %v27389_v57  ;;  %20428 = vmatpush3.bf16.msra.mxu1 %v20425_v16  ;;  %v2959_v18 = vld [vmem:[#allocation2 + $0x71] sm:$0xff]  ;;  %v20465_v57 = vpack.c.bf16 %v14007_v23, %v14006_v46 }
 0x38d   :  { %21228 = vmatpush3.bf16.msra.mxu0 %v20425_v16  ;;  %20430 = vmatprep.subr.bf16.mxu1 %v20429_v4  ;;  %v8042_v16 = vld [vmem:[#allocation2 + $0x131] sm:$0xff] }
 0x38e   :  { %21230 = vmatprep.subr.bf16.mxu0 %v20429_v4  ;;  %16947 = vmatmul.mubr.f32.gmra.mrb[18].mxu1 %v27390_v21  ;;  %v14008_v21 = vld [vmem:[%s27163_s5 + $0x3f0] sm:$0xff]  ;;  %v3167_v46 = vld [vmem:[#allocation2 + $0x72] sm:$0xff] }
 0x38f   :  { %18422 = vmatmul.mubr.f32.gmra.mrb[82].mxu0 %v27391_v30  ;;  %16949 = vmatprep.mubr.f32.mxu1 %v27392_v31  ;;  %v14009_v30 = vld [vmem:[%s27163_s5 + $0x3f8] sm:$0xff] }
 0x390   :  { %18424 = vmatprep.mubr.f32.mxu0 %v27393_v27  ;;  %20432 = vmatpush3.bf16.msra.mxu1 %v20429_v4  ;;  %v2961_v31 = vld [vmem:[#allocation2 + $0x81] sm:$0xff]  ;;  %v20469_v27 = vpack.c.bf16 %v14009_v30, %v14008_v21 }
 0x391   :  { %21232 = vmatpush3.bf16.msra.mxu0 %v20429_v4  ;;  %20434 = vmatprep.subr.bf16.mxu1 %v20433_v15  ;;  %v8044_v4 = vld [vmem:[#allocation2 + $0x141] sm:$0xff] }
 0x392   :  { %21234 = vmatprep.subr.bf16.mxu0 %v20433_v15  ;;  %16950 = vmatmul.mubr.f32.gmra.mrb[20].mxu1 %v27394_v28  ;;  %v14010_v28 = vld [vmem:[%s27163_s5 + $0x400] sm:$0xff]  ;;  %v3169_v21 = vld [vmem:[#allocation2 + $0x82] sm:$0xff] }
 0x393   :  { %18425 = vmatmul.mubr.f32.gmra.mrb[84].mxu0 %v27395_v40  ;;  %16952 = vmatprep.mubr.f32.mxu1 %v27396_v45  ;;  %v14011_v40 = vld [vmem:[%s27163_s5 + $0x408] sm:$0xff] }
 0x394   :  { %18427 = vmatprep.mubr.f32.mxu0 %v27397_v61  ;;  %20436 = vmatpush3.bf16.msra.mxu1 %v20433_v15  ;;  %v20473_v45 = vpack.c.bf16 %v14011_v40, %v14010_v28  ;;  %v2963_v61 = vld [vmem:[#allocation2 + $0x91] sm:$0xff] }
 0x395   :  { %21236 = vmatpush3.bf16.msra.mxu0 %v20433_v15  ;;  %20438 = vmatprep.subr.bf16.mxu1 %v20437_v42  ;;  %v8046_v15 = vld [vmem:[#allocation2 + $0x151] sm:$0xff] }
 0x396   :  { %21238 = vmatprep.subr.bf16.mxu0 %v20437_v42  ;;  %16953 = vmatmul.mubr.f32.gmra.mrb[22].mxu1 %v27398_v8  ;;  %v3155_v8 = vld [vmem:[#allocation2 + $0x12] sm:$0xff] }
 0x397   :  { %18428 = vmatmul.mubr.f32.gmra.mrb[86].mxu0 %v27399_v62  ;;  %16955 = vmatprep.mubr.f32.mxu1 %v2755_v5  ;;  %v8225_v62 = vld [vmem:[#allocation2 + $0xf2] sm:$0xff] }
 0x398   :  { %18430 = vmatprep.mubr.f32.mxu0 %v7859_v53  ;;  %20440 = vmatpush3.bf16.msra.mxu1 %v20437_v42  ;;  %v2964_v5 = vld [vmem:[#allocation2 + $0x99] sm:$0xff] }
 0x399   :  { %21240 = vmatpush3.bf16.msra.mxu0 %v20437_v42  ;;  %20442 = vmatprep.subr.bf16.mxu1 %v20441_v2  ;;  %v8048_v42 = vld [vmem:[#allocation2 + $0x161] sm:$0xff]  ;;  %v8051_v53 = vld [vmem:[#allocation2 + $0x179] sm:$0xff] }
 0x39a   :  { %21242 = vmatprep.subr.bf16.mxu0 %v20441_v2  ;;  %16956 = vmatmul.mubr.f32.gmra.mrb[24].mxu1 %v2756_v49  ;;  %v3156_v49 = vld [vmem:[#allocation2 + $0x1a] sm:$0xff]  ;;  %v3171_v40 = vld [vmem:[#allocation2 + $0x92] sm:$0xff] }
 0x39b   :  { %18431 = vmatmul.mubr.f32.gmra.mrb[88].mxu0 %v7860_v10  ;;  %16990 = vmatprep.mubr.f32.mxu1 %v2947_v48  ;;  %v14012_v48 = vld [vmem:[%s27163_s5 + $0x410] sm:$0xff] }
 0x39c   :  { %18465 = vmatprep.mubr.f32.mxu0 %v8034_v1  ;;  %v14013_v1 = vld [vmem:[%s27163_s5 + $0x418] sm:$0xff]  ;;  %v8226_v10 = vld [vmem:[#allocation2 + $0xfa] sm:$0xff] }
 0x39d   :  { %v20477_v51 = vpack.c.bf16 %v14013_v1, %v14012_v48  ;;  %v14030_v1 = vld [vmem:[%s27163_s5 + $0x4a0] sm:$0xff] }
 0x39e   :  { %16991 = vmatmul.mubr.f32.vlgmr.msra.gmra.mrb[8].mxu1 %v2948_v34  ;;  %v14015_v34 = vld [vmem:[%s27163_s5 + $0x428] sm:$0xff] }
 0x39f   :  { %18466 = vmatmul.mubr.f32.vlgmr.msra.gmra.mrb[72].mxu0 %v8035_v3  ;;  %20444 = vmatpush3.bf16.msra.mxu1 %v20441_v2  ;;  %v3157_v3 = vld [vmem:[#allocation2 + $0x22] sm:$0xff] }
 0x3a0   :  { %21244 = vmatpush3.bf16.msra.mxu0 %v20441_v2  ;;  %16993 = vmatprep.mubr.f32.mxu1 %v2949_v59  ;;  %v8050_v2 = vld [vmem:[#allocation2 + $0x171] sm:$0xff]  ;;  %v20481_v59 = vpack.c.bf16 %v14015_v34, %v14014_v11 }
 0x3a1   :  { %18468 = vmatprep.mubr.f32.mxu0 %v8036_v43  ;;  %20446 = vmatprep.subr.bf16.mxu1 %v20445_v54  ;;  %v3159_v43 = vld [vmem:[#allocation2 + $0x32] sm:$0xff] }
 0x3a2   :  { %21246 = vmatprep.subr.bf16.mxu0 %v20445_v54  ;;  %16994 = vmatmul.mubr.f32.gmra.mrb[10].mxu1 %v2950_v63  ;;  %v14016_v63 = vld [vmem:[%s27163_s5 + $0x430] sm:$0xff]  ;;  %v3366_v11 = vld [vmem:[#allocation2 + $0x2b] sm:$0xff] }
 0x3a3   :  { %18469 = vmatmul.mubr.f32.gmra.mrb[74].mxu0 %v8037_v17  ;;  %16996 = vmatprep.mubr.f32.mxu1 %v2951_v36  ;;  %v14017_v17 = vld [vmem:[%s27163_s5 + $0x438] sm:$0xff]  ;;  %v3160_v36 = vld [vmem:[#allocation2 + $0x3a] sm:$0xff] }
 0x3a4   :  { %20448 = vmatpush3.bf16.msra.mxu1 %v20445_v54  ;;  %18471 = vmatprep.mubr.f32.mxu0 %v8038_v20  ;;  %v20485_v41 = vpack.c.bf16 %v14017_v17, %v14016_v63  ;;  %v3161_v20 = vld [vmem:[#allocation2 + $0x42] sm:$0xff]  ;;  %v8419_v34 = vld [vmem:[#allocation2 + $0x10b] sm:$0xff] }
 0x3a5   :  { %21248 = vmatpush3.bf16.msra.mxu0 %v20445_v54  ;;  %20450 = vmatprep.subr.bf16.mxu1 %v20449_v50  ;;  %v8227_v54 = vld [vmem:[#allocation2 + $0x102] sm:$0xff] }
 0x3a6   :  { %21250 = vmatprep.subr.bf16.mxu0 %v20449_v50  ;;  %16997 = vmatmul.mubr.f32.gmra.mrb[12].mxu1 %v2952_v12  ;;  %v14018_v12 = vld [vmem:[%s27163_s5 + $0x440] sm:$0xff]  ;;  %v8421_v63 = vld [vmem:[#allocation2 + $0x11b] sm:$0xff] }
 0x3a7   :  { %18472 = vmatmul.mubr.f32.gmra.mrb[76].mxu0 %v8039_v26  ;;  %16999 = vmatprep.mubr.f32.mxu1 %v2953_v56  ;;  %v14019_v26 = vld [vmem:[%s27163_s5 + $0x448] sm:$0xff]  ;;  %v3162_v56 = vld [vmem:[#allocation2 + $0x4a] sm:$0xff] }
 0x3a8   :  { %20452 = vmatpush3.bf16.msra.mxu1 %v20449_v50  ;;  %18474 = vmatprep.mubr.f32.mxu0 %v8040_v29  ;;  %v20489_v29 = vpack.c.bf16 %v14019_v26, %v14018_v12  ;;  %v8423_v12 = vld [vmem:[#allocation2 + $0x12b] sm:$0xff]  ;;  %v3371_v26 = vld [vmem:[#allocation2 + $0x53] sm:$0xff] }
 0x3a9   :  { %21252 = vmatpush3.bf16.msra.mxu0 %v20449_v50  ;;  %20454 = vmatprep.subr.bf16.mxu1 %v20453_v19  ;;  %v8229_v50 = vld [vmem:[#allocation2 + $0x112] sm:$0xff] }
 0x3aa   :  { %21254 = vmatprep.subr.bf16.mxu0 %v20453_v19  ;;  %17000 = vmatmul.mubr.f32.gmra.mrb[14].mxu1 %v2954_v24  ;;  %v8233_v24 = vld [vmem:[#allocation2 + $0x132] sm:$0xff] }
 0x3ab   :  { %18475 = vmatmul.mubr.f32.gmra.mrb[78].mxu0 %v8041_v60  ;;  %17002 = vmatprep.mubr.f32.mxu1 %v2955_v13  ;;  %v14020_v60 = vld [vmem:[%s27163_s5 + $0x450] sm:$0xff]  ;;  %v14021_v13 = vld [vmem:[%s27163_s5 + $0x458] sm:$0xff] }
 0x3ac   :  { %18477 = vmatprep.mubr.f32.mxu0 %v8042_v16  ;;  %20456 = vmatpush3.bf16.msra.mxu1 %v20453_v19  ;;  %v8234_v16 = vld [vmem:[#allocation2 + $0x13a] sm:$0xff]  ;;  %v20493_v37 = vpack.c.bf16 %v14021_v13, %v14020_v60  ;;  %v3373_v60 = vld [vmem:[#allocation2 + $0x63] sm:$0xff] }
 0x3ad   :  { %21256 = vmatpush3.bf16.msra.mxu0 %v20453_v19  ;;  %20458 = vmatprep.subr.bf16.mxu1 %v20457_v58  ;;  %v8231_v19 = vld [vmem:[#allocation2 + $0x122] sm:$0xff] }
 0x3ae   :  { %21258 = vmatprep.subr.bf16.mxu0 %v20457_v58  ;;  %17003 = vmatmul.mubr.f32.gmra.mrb[16].mxu1 %v2956_v25  ;;  %v8235_v25 = vld [vmem:[#allocation2 + $0x142] sm:$0xff] }
 0x3af   :  { %18478 = vmatmul.mubr.f32.gmra.mrb[80].mxu0 %v8043_v7  ;;  %17005 = vmatprep.mubr.f32.mxu1 %v2957_v52  ;;  %v14022_v7 = vld [vmem:[%s27163_s5 + $0x460] sm:$0xff]  ;;  %v14023_v52 = vld [vmem:[%s27163_s5 + $0x468] sm:$0xff] }
 0x3b0   :  { %18480 = vmatprep.mubr.f32.mxu0 %v8044_v4  ;;  %20460 = vmatpush3.bf16.msra.mxu1 %v20457_v58  ;;  %v8236_v4 = vld [vmem:[#allocation2 + $0x14a] sm:$0xff]  ;;  %v20497_v23 = vpack.c.bf16 %v14023_v52, %v14022_v7  ;;  %v3375_v7 = vld [vmem:[#allocation2 + $0x73] sm:$0xff] }
 0x3b1   :  { %21260 = vmatpush3.bf16.msra.mxu0 %v20457_v58  ;;  %20462 = vmatprep.subr.bf16.mxu1 %v20461_v35  ;;  %v3164_v58 = vld [vmem:[#allocation2 + $0x5a] sm:$0xff] }
 0x3b2   :  { %21262 = vmatprep.subr.bf16.mxu0 %v20461_v35  ;;  %17006 = vmatmul.mubr.f32.gmra.mrb[18].mxu1 %v2958_v33  ;;  %v8237_v33 = vld [vmem:[#allocation2 + $0x152] sm:$0xff] }
 0x3b3   :  { %18481 = vmatmul.mubr.f32.gmra.mrb[82].mxu0 %v8045_v0  ;;  %17008 = vmatprep.mubr.f32.mxu1 %v2959_v18  ;;  %v14024_v0 = vld [vmem:[%s27163_s5 + $0x470] sm:$0xff]  ;;  %v14025_v18 = vld [vmem:[%s27163_s5 + $0x478] sm:$0xff] }
 0x3b4   :  { %18483 = vmatprep.mubr.f32.mxu0 %v8046_v15  ;;  %20464 = vmatpush3.bf16.msra.mxu1 %v20461_v35  ;;  %v8238_v15 = vld [vmem:[#allocation2 + $0x15a] sm:$0xff]  ;;  %v20501_v30 = vpack.c.bf16 %v14025_v18, %v14024_v0  ;;  %v3377_v0 = vld [vmem:[#allocation2 + $0x83] sm:$0xff] }
 0x3b5   :  { %21264 = vmatpush3.bf16.msra.mxu0 %v20461_v35  ;;  %20466 = vmatprep.subr.bf16.mxu1 %v20465_v57  ;;  %v3166_v35 = vld [vmem:[#allocation2 + $0x6a] sm:$0xff] }
 0x3b6   :  { %21266 = vmatprep.subr.bf16.mxu0 %v20465_v57  ;;  %17009 = vmatmul.mubr.f32.gmra.mrb[20].mxu1 %v2960_v32  ;;  %v8239_v32 = vld [vmem:[#allocation2 + $0x162] sm:$0xff] }
 0x3b7   :  { %18484 = vmatmul.mubr.f32.gmra.mrb[84].mxu0 %v8047_v6  ;;  %17011 = vmatprep.mubr.f32.mxu1 %v2961_v31  ;;  %v14026_v6 = vld [vmem:[%s27163_s5 + $0x480] sm:$0xff]  ;;  %v14027_v31 = vld [vmem:[%s27163_s5 + $0x488] sm:$0xff] }
 0x3b8   :  { %18486 = vmatprep.mubr.f32.mxu0 %v8048_v42  ;;  %20468 = vmatpush3.bf16.msra.mxu1 %v20465_v57  ;;  %v8240_v42 = vld [vmem:[#allocation2 + $0x16a] sm:$0xff]  ;;  %v20505_v28 = vpack.c.bf16 %v14027_v31, %v14026_v6  ;;  %v3379_v31 = vld [vmem:[#allocation2 + $0x93] sm:$0xff] }
 0x3b9   :  { %21268 = vmatpush3.bf16.msra.mxu0 %v20465_v57  ;;  %20470 = vmatprep.subr.bf16.mxu1 %v20469_v27  ;;  %v3168_v57 = vld [vmem:[#allocation2 + $0x7a] sm:$0xff] }
 0x3ba   :  { %21270 = vmatprep.subr.bf16.mxu0 %v20469_v27  ;;  %17012 = vmatmul.mubr.f32.gmra.mrb[22].mxu1 %v2962_v44  ;;  %v8241_v44 = vld [vmem:[#allocation2 + $0x172] sm:$0xff] }
 0x3bb   :  { %18487 = vmatmul.mubr.f32.gmra.mrb[86].mxu0 %v8049_v47  ;;  %17014 = vmatprep.mubr.f32.mxu1 %v2963_v61  ;;  %v3363_v47 = vld [vmem:[#allocation2 + $0x13] sm:$0xff] }
 0x3bc   :  { %18489 = vmatprep.mubr.f32.mxu0 %v8050_v2  ;;  %20472 = vmatpush3.bf16.msra.mxu1 %v20469_v27  ;;  %v23129_v61 = vld [vmem:[#allocation2 + $0x9a] sm:$0xff] }
 0x3bd   :  { %21272 = vmatpush3.bf16.msra.mxu0 %v20469_v27  ;;  %20474 = vmatprep.subr.bf16.mxu1 %v20473_v45  ;;  %v3170_v27 = vld [vmem:[#allocation2 + $0x8a] sm:$0xff]  ;;  %v23130_v2 = vld [vmem:[#allocation2 + $0x17a] sm:$0xff] }
 0x3be   :  { %21274 = vmatprep.subr.bf16.mxu0 %v20473_v45  ;;  %17015 = vmatmul.mubr.f32.gmra.mrb[24].mxu1 %v2964_v5  ;;  %v3364_v5 = vld [vmem:[#allocation2 + $0x1b] sm:$0xff] }
 0x3bf   :  { %18490 = vmatmul.mubr.f32.gmra.mrb[88].mxu0 %v8051_v53  ;;  %17049 = vmatprep.mubr.f32.mxu1 %v3155_v8  ;;  %v14028_v8 = vld [vmem:[%s27163_s5 + $0x490] sm:$0xff] }
 0x3c0   :  { %18524 = vmatprep.mubr.f32.mxu0 %v8225_v62  ;;  %v14029_v62 = vld [vmem:[%s27163_s5 + $0x498] sm:$0xff]  ;;  %v8417_v53 = vld [vmem:[#allocation2 + $0xfb] sm:$0xff] }
 0x3c1   :  { %v20509_v48 = vpack.c.bf16 %v14029_v62, %v14028_v8  ;;  %v14046_v62 = vld [vmem:[%s27163_s5 + $0x520] sm:$0xff] }
 0x3c2   :  { %17050 = vmatmul.mubr.f32.vlgmr.msra.gmra.mrb[8].mxu1 %v3156_v49  ;;  %v14031_v49 = vld [vmem:[%s27163_s5 + $0x4a8] sm:$0xff] }
 0x3c3   :  { %18525 = vmatmul.mubr.f32.vlgmr.msra.gmra.mrb[72].mxu0 %v8226_v10  ;;  %20476 = vmatpush3.bf16.msra.mxu1 %v20473_v45  ;;  %v3365_v10 = vld [vmem:[#allocation2 + $0x23] sm:$0xff] }
 0x3c4   :  { %21276 = vmatpush3.bf16.msra.mxu0 %v20473_v45  ;;  %17052 = vmatprep.mubr.f32.mxu1 %v3157_v3  ;;  %v8416_v45 = vld [vmem:[#allocation2 + $0xf3] sm:$0xff]  ;;  %v20513_v3 = vpack.c.bf16 %v14031_v49, %v14030_v1 }
 0x3c5   :  { %18527 = vmatprep.mubr.f32.mxu0 %v8227_v54  ;;  %20478 = vmatprep.subr.bf16.mxu1 %v20477_v51  ;;  %v3367_v54 = vld [vmem:[#allocation2 + $0x33] sm:$0xff] }
 0x3c6   :  { %21278 = vmatprep.subr.bf16.mxu0 %v20477_v51  ;;  %17053 = vmatmul.mubr.f32.gmra.mrb[10].mxu1 %v3158_v55  ;;  %v14032_v55 = vld [vmem:[%s27163_s5 + $0x4b0] sm:$0xff]  ;;  %v3574_v1 = vld [vmem:[#allocation2 + $0x2c] sm:$0xff] }
 0x3c7   :  { %18528 = vmatmul.mubr.f32.gmra.mrb[74].mxu0 %v8228_v14  ;;  %17055 = vmatprep.mubr.f32.mxu1 %v3159_v43  ;;  %v14033_v14 = vld [vmem:[%s27163_s5 + $0x4b8] sm:$0xff]  ;;  %v3368_v43 = vld [vmem:[#allocation2 + $0x3b] sm:$0xff] }
 0x3c8   :  { %20480 = vmatpush3.bf16.msra.mxu1 %v20477_v51  ;;  %18530 = vmatprep.mubr.f32.mxu0 %v8229_v50  ;;  %v20517_v17 = vpack.c.bf16 %v14033_v14, %v14032_v55  ;;  %v3369_v50 = vld [vmem:[#allocation2 + $0x43] sm:$0xff]  ;;  %v8610_v49 = vld [vmem:[#allocation2 + $0x10c] sm:$0xff] }
 0x3c9   :  { %21280 = vmatpush3.bf16.msra.mxu0 %v20477_v51  ;;  %20482 = vmatprep.subr.bf16.mxu1 %v20481_v59  ;;  %v8418_v51 = vld [vmem:[#allocation2 + $0x103] sm:$0xff] }
 0x3ca   :  { %21282 = vmatprep.subr.bf16.mxu0 %v20481_v59  ;;  %17056 = vmatmul.mubr.f32.gmra.mrb[12].mxu1 %v3160_v36  ;;  %v14034_v36 = vld [vmem:[%s27163_s5 + $0x4c0] sm:$0xff]  ;;  %v8612_v55 = vld [vmem:[#allocation2 + $0x11c] sm:$0xff] }
 0x3cb   :  { %18531 = vmatmul.mubr.f32.gmra.mrb[76].mxu0 %v8230_v9  ;;  %17058 = vmatprep.mubr.f32.mxu1 %v3161_v20  ;;  %v14035_v9 = vld [vmem:[%s27163_s5 + $0x4c8] sm:$0xff]  ;;  %v3370_v20 = vld [vmem:[#allocation2 + $0x4b] sm:$0xff] }
 0x3cc   :  { %20484 = vmatpush3.bf16.msra.mxu1 %v20481_v59  ;;  %18533 = vmatprep.mubr.f32.mxu0 %v8231_v19  ;;  %v20521_v19 = vpack.c.bf16 %v14035_v9, %v14034_v36  ;;  %v8614_v36 = vld [vmem:[#allocation2 + $0x12c] sm:$0xff]  ;;  %v3579_v9 = vld [vmem:[#allocation2 + $0x54] sm:$0xff] }
 0x3cd   :  { %21284 = vmatpush3.bf16.msra.mxu0 %v20481_v59  ;;  %20486 = vmatprep.subr.bf16.mxu1 %v20485_v41  ;;  %v8420_v59 = vld [vmem:[#allocation2 + $0x113] sm:$0xff] }
 0x3ce   :  { %21286 = vmatprep.subr.bf16.mxu0 %v20485_v41  ;;  %17059 = vmatmul.mubr.f32.gmra.mrb[14].mxu1 %v3162_v56  ;;  %v8424_v56 = vld [vmem:[#allocation2 + $0x133] sm:$0xff] }
 0x3cf   :  { %18534 = vmatmul.mubr.f32.gmra.mrb[78].mxu0 %v8232_v38  ;;  %17061 = vmatprep.mubr.f32.mxu1 %v3163_v22  ;;  %v14036_v38 = vld [vmem:[%s27163_s5 + $0x4d0] sm:$0xff]  ;;  %v14037_v22 = vld [vmem:[%s27163_s5 + $0x4d8] sm:$0xff] }
 0x3d0   :  { %18536 = vmatprep.mubr.f32.mxu0 %v8233_v24  ;;  %20488 = vmatpush3.bf16.msra.mxu1 %v20485_v41  ;;  %v8425_v24 = vld [vmem:[#allocation2 + $0x13b] sm:$0xff]  ;;  %v20525_v13 = vpack.c.bf16 %v14037_v22, %v14036_v38  ;;  %v3581_v38 = vld [vmem:[#allocation2 + $0x64] sm:$0xff] }
 0x3d1   :  { %21288 = vmatpush3.bf16.msra.mxu0 %v20485_v41  ;;  %20490 = vmatprep.subr.bf16.mxu1 %v20489_v29  ;;  %v8422_v41 = vld [vmem:[#allocation2 + $0x123] sm:$0xff] }
 0x3d2   :  { %21290 = vmatprep.subr.bf16.mxu0 %v20489_v29  ;;  %17062 = vmatmul.mubr.f32.gmra.mrb[16].mxu1 %v3164_v58  ;;  %v8426_v58 = vld [vmem:[#allocation2 + $0x143] sm:$0xff] }
 0x3d3   :  { %18537 = vmatmul.mubr.f32.gmra.mrb[80].mxu0 %v8234_v16  ;;  %17064 = vmatprep.mubr.f32.mxu1 %v3165_v39  ;;  %v14038_v16 = vld [vmem:[%s27163_s5 + $0x4e0] sm:$0xff]  ;;  %v14039_v39 = vld [vmem:[%s27163_s5 + $0x4e8] sm:$0xff] }
 0x3d4   :  { %18539 = vmatprep.mubr.f32.mxu0 %v8235_v25  ;;  %20492 = vmatpush3.bf16.msra.mxu1 %v20489_v29  ;;  %v8427_v25 = vld [vmem:[#allocation2 + $0x14b] sm:$0xff]  ;;  %v20529_v52 = vpack.c.bf16 %v14039_v39, %v14038_v16  ;;  %v3583_v16 = vld [vmem:[#allocation2 + $0x74] sm:$0xff] }
 0x3d5   :  { %21292 = vmatpush3.bf16.msra.mxu0 %v20489_v29  ;;  %20494 = vmatprep.subr.bf16.mxu1 %v20493_v37  ;;  %v3372_v29 = vld [vmem:[#allocation2 + $0x5b] sm:$0xff] }
 0x3d6   :  { %21294 = vmatprep.subr.bf16.mxu0 %v20493_v37  ;;  %17065 = vmatmul.mubr.f32.gmra.mrb[18].mxu1 %v3166_v35  ;;  %v8428_v35 = vld [vmem:[#allocation2 + $0x153] sm:$0xff] }
 0x3d7   :  { %18540 = vmatmul.mubr.f32.gmra.mrb[82].mxu0 %v8236_v4  ;;  %17067 = vmatprep.mubr.f32.mxu1 %v3167_v46  ;;  %v14040_v4 = vld [vmem:[%s27163_s5 + $0x4f0] sm:$0xff]  ;;  %v14041_v46 = vld [vmem:[%s27163_s5 + $0x4f8] sm:$0xff] }
 0x3d8   :  { %18542 = vmatprep.mubr.f32.mxu0 %v8237_v33  ;;  %20496 = vmatpush3.bf16.msra.mxu1 %v20493_v37  ;;  %v8429_v33 = vld [vmem:[#allocation2 + $0x15b] sm:$0xff]  ;;  %v20533_v18 = vpack.c.bf16 %v14041_v46, %v14040_v4  ;;  %v3585_v4 = vld [vmem:[#allocation2 + $0x84] sm:$0xff] }
 0x3d9   :  { %21296 = vmatpush3.bf16.msra.mxu0 %v20493_v37  ;;  %20498 = vmatprep.subr.bf16.mxu1 %v20497_v23  ;;  %v3374_v37 = vld [vmem:[#allocation2 + $0x6b] sm:$0xff] }
 0x3da   :  { %21298 = vmatprep.subr.bf16.mxu0 %v20497_v23  ;;  %17068 = vmatmul.mubr.f32.gmra.mrb[20].mxu1 %v3168_v57  ;;  %v8430_v57 = vld [vmem:[#allocation2 + $0x163] sm:$0xff] }
 0x3db   :  { %18543 = vmatmul.mubr.f32.gmra.mrb[84].mxu0 %v8238_v15  ;;  %17070 = vmatprep.mubr.f32.mxu1 %v3169_v21  ;;  %v14042_v15 = vld [vmem:[%s27163_s5 + $0x500] sm:$0xff]  ;;  %v14043_v21 = vld [vmem:[%s27163_s5 + $0x508] sm:$0xff] }
 0x3dc   :  { %18545 = vmatprep.mubr.f32.mxu0 %v8239_v32  ;;  %20500 = vmatpush3.bf16.msra.mxu1 %v20497_v23  ;;  %v8431_v32 = vld [vmem:[#allocation2 + $0x16b] sm:$0xff]  ;;  %v20537_v6 = vpack.c.bf16 %v14043_v21, %v14042_v15  ;;  %v3587_v21 = vld [vmem:[#allocation2 + $0x94] sm:$0xff] }
 0x3dd   :  { %21300 = vmatpush3.bf16.msra.mxu0 %v20497_v23  ;;  %20502 = vmatprep.subr.bf16.mxu1 %v20501_v30  ;;  %v3376_v23 = vld [vmem:[#allocation2 + $0x7b] sm:$0xff] }
 0x3de   :  { %21302 = vmatprep.subr.bf16.mxu0 %v20501_v30  ;;  %17071 = vmatmul.mubr.f32.gmra.mrb[22].mxu1 %v3170_v27  ;;  %v8432_v27 = vld [vmem:[#allocation2 + $0x173] sm:$0xff] }
 0x3df   :  { %18546 = vmatmul.mubr.f32.gmra.mrb[86].mxu0 %v8240_v42  ;;  %17073 = vmatprep.mubr.f32.mxu1 %v3171_v40  ;;  %v3571_v42 = vld [vmem:[#allocation2 + $0x14] sm:$0xff] }
 0x3e0   :  { %18548 = vmatprep.mubr.f32.mxu0 %v8241_v44  ;;  %20504 = vmatpush3.bf16.msra.mxu1 %v20501_v30  ;;  %v3380_v40 = vld [vmem:[#allocation2 + $0x9b] sm:$0xff] }
 0x3e1   :  { %21304 = vmatpush3.bf16.msra.mxu0 %v20501_v30  ;;  %20506 = vmatprep.subr.bf16.mxu1 %v20505_v28  ;;  %v3378_v30 = vld [vmem:[#allocation2 + $0x8b] sm:$0xff]  ;;  %v8433_v44 = vld [vmem:[#allocation2 + $0x17b] sm:$0xff] }
 0x3e2   :  { %21306 = vmatprep.subr.bf16.mxu0 %v20505_v28  ;;  %17074 = vmatmul.mubr.f32.gmra.mrb[24].mxu1 %v23129_v61  ;;  %v3572_v61 = vld [vmem:[#allocation2 + $0x1c] sm:$0xff] }
 0x3e3   :  { %18549 = vmatmul.mubr.f32.gmra.mrb[88].mxu0 %v23130_v2  ;;  %17108 = vmatprep.mubr.f32.mxu1 %v3363_v47  ;;  %v14044_v47 = vld [vmem:[%s27163_s5 + $0x510] sm:$0xff] }
 0x3e4   :  { %18583 = vmatprep.mubr.f32.mxu0 %v8416_v45  ;;  %v14045_v45 = vld [vmem:[%s27163_s5 + $0x518] sm:$0xff]  ;;  %v8608_v2 = vld [vmem:[#allocation2 + $0xfc] sm:$0xff] }
 0x3e5   :  { %v20541_v8 = vpack.c.bf16 %v14045_v45, %v14044_v47  ;;  %v14062_v45 = vld [vmem:[%s27163_s5 + $0x5a0] sm:$0xff] }
 0x3e6   :  { %17109 = vmatmul.mubr.f32.vlgmr.msra.gmra.mrb[8].mxu1 %v3364_v5  ;;  %v14047_v5 = vld [vmem:[%s27163_s5 + $0x528] sm:$0xff] }
 0x3e7   :  { %18584 = vmatmul.mubr.f32.vlgmr.msra.gmra.mrb[72].mxu0 %v8417_v53  ;;  %20508 = vmatpush3.bf16.msra.mxu1 %v20505_v28  ;;  %v3573_v53 = vld [vmem:[#allocation2 + $0x24] sm:$0xff] }
 0x3e8   :  { %21308 = vmatpush3.bf16.msra.mxu0 %v20505_v28  ;;  %17111 = vmatprep.mubr.f32.mxu1 %v3365_v10  ;;  %v8607_v28 = vld [vmem:[#allocation2 + $0xf4] sm:$0xff]  ;;  %v20545_v10 = vpack.c.bf16 %v14047_v5, %v14046_v62 }
 0x3e9   :  { %18586 = vmatprep.mubr.f32.mxu0 %v8418_v51  ;;  %20510 = vmatprep.subr.bf16.mxu1 %v20509_v48  ;;  %v3575_v51 = vld [vmem:[#allocation2 + $0x34] sm:$0xff] }
 0x3ea   :  { %21310 = vmatprep.subr.bf16.mxu0 %v20509_v48  ;;  %17112 = vmatmul.mubr.f32.gmra.mrb[10].mxu1 %v3366_v11  ;;  %v14048_v11 = vld [vmem:[%s27163_s5 + $0x530] sm:$0xff]  ;;  %v3782_v62 = vld [vmem:[#allocation2 + $0x38] sm:$0xff] }
 0x3eb   :  { %18587 = vmatmul.mubr.f32.gmra.mrb[74].mxu0 %v8419_v34  ;;  %17114 = vmatprep.mubr.f32.mxu1 %v3367_v54  ;;  %v14049_v34 = vld [vmem:[%s27163_s5 + $0x538] sm:$0xff]  ;;  %v3576_v54 = vld [vmem:[#allocation2 + $0x3c] sm:$0xff] }
 0x3ec   :  { %20512 = vmatpush3.bf16.msra.mxu1 %v20509_v48  ;;  %18589 = vmatprep.mubr.f32.mxu0 %v8420_v59  ;;  %v20549_v14 = vpack.c.bf16 %v14049_v34, %v14048_v11  ;;  %v3577_v59 = vld [vmem:[#allocation2 + $0x44] sm:$0xff]  ;;  %v8801_v5 = vld [vmem:[#allocation2 + $0x118] sm:$0xff] }
 0x3ed   :  { %21312 = vmatpush3.bf16.msra.mxu0 %v20509_v48  ;;  %20514 = vmatprep.subr.bf16.mxu1 %v20513_v3  ;;  %v8609_v48 = vld [vmem:[#allocation2 + $0x104] sm:$0xff] }
 0x3ee   :  { %21314 = vmatprep.subr.bf16.mxu0 %v20513_v3  ;;  %17115 = vmatmul.mubr.f32.gmra.mrb[12].mxu1 %v3368_v43  ;;  %v14050_v43 = vld [vmem:[%s27163_s5 + $0x540] sm:$0xff]  ;;  %v8803_v11 = vld [vmem:[#allocation2 + $0x128] sm:$0xff] }
 0x3ef   :  { %18590 = vmatmul.mubr.f32.gmra.mrb[76].mxu0 %v8421_v63  ;;  %17117 = vmatprep.mubr.f32.mxu1 %v3369_v50  ;;  %v14051_v63 = vld [vmem:[%s27163_s5 + $0x548] sm:$0xff]  ;;  %v3578_v50 = vld [vmem:[#allocation2 + $0x4c] sm:$0xff] }
 0x3f0   :  { %20516 = vmatpush3.bf16.msra.mxu1 %v20513_v3  ;;  %18592 = vmatprep.mubr.f32.mxu0 %v8422_v41  ;;  %v20553_v41 = vpack.c.bf16 %v14051_v63, %v14050_v43  ;;  %v8805_v43 = vld [vmem:[#allocation2 + $0x138] sm:$0xff]  ;;  %v3787_v63 = vld [vmem:[#allocation2 + $0x60] sm:$0xff] }
 0x3f1   :  { %21316 = vmatpush3.bf16.msra.mxu0 %v20513_v3  ;;  %20518 = vmatprep.subr.bf16.mxu1 %v20517_v17  ;;  %v8611_v3 = vld [vmem:[#allocation2 + $0x114] sm:$0xff] }
 0x3f2   :  { %21318 = vmatprep.subr.bf16.mxu0 %v20517_v17  ;;  %17118 = vmatmul.mubr.f32.gmra.mrb[14].mxu1 %v3370_v20  ;;  %v8615_v20 = vld [vmem:[#allocation2 + $0x134] sm:$0xff] }
 0x3f3   :  { %18593 = vmatmul.mubr.f32.gmra.mrb[78].mxu0 %v8423_v12  ;;  %17120 = vmatprep.mubr.f32.mxu1 %v3371_v26  ;;  %v14052_v12 = vld [vmem:[%s27163_s5 + $0x550] sm:$0xff]  ;;  %v14053_v26 = vld [vmem:[%s27163_s5 + $0x558] sm:$0xff] }
 0x3f4   :  { %18595 = vmatprep.mubr.f32.mxu0 %v8424_v56  ;;  %20520 = vmatpush3.bf16.msra.mxu1 %v20517_v17  ;;  %v8616_v56 = vld [vmem:[#allocation2 + $0x13c] sm:$0xff]  ;;  %v20557_v22 = vpack.c.bf16 %v14053_v26, %v14052_v12  ;;  %v3789_v12 = vld [vmem:[#allocation2 + $0x70] sm:$0xff] }
 0x3f5   :  { %21320 = vmatpush3.bf16.msra.mxu0 %v20517_v17  ;;  %20522 = vmatprep.subr.bf16.mxu1 %v20521_v19  ;;  %v8613_v17 = vld [vmem:[#allocation2 + $0x124] sm:$0xff] }
 0x3f6   :  { %21322 = vmatprep.subr.bf16.mxu0 %v20521_v19  ;;  %17121 = vmatmul.mubr.f32.gmra.mrb[16].mxu1 %v3372_v29  ;;  %v8617_v29 = vld [vmem:[#allocation2 + $0x144] sm:$0xff] }
 0x3f7   :  { %18596 = vmatmul.mubr.f32.gmra.mrb[80].mxu0 %v8425_v24  ;;  %17123 = vmatprep.mubr.f32.mxu1 %v3373_v60  ;;  %v14054_v24 = vld [vmem:[%s27163_s5 + $0x560] sm:$0xff]  ;;  %v14055_v60 = vld [vmem:[%s27163_s5 + $0x568] sm:$0xff] }
 0x3f8   :  { %18598 = vmatprep.mubr.f32.mxu0 %v8426_v58  ;;  %20524 = vmatpush3.bf16.msra.mxu1 %v20521_v19  ;;  %v8618_v58 = vld [vmem:[#allocation2 + $0x14c] sm:$0xff]  ;;  %v20561_v39 = vpack.c.bf16 %v14055_v60, %v14054_v24  ;;  %v3791_v24 = vld [vmem:[#allocation2 + $0x80] sm:$0xff] }
 0x3f9   :  { %21324 = vmatpush3.bf16.msra.mxu0 %v20521_v19  ;;  %20526 = vmatprep.subr.bf16.mxu1 %v20525_v13  ;;  %v3580_v19 = vld [vmem:[#allocation2 + $0x5c] sm:$0xff] }
 0x3fa   :  { %21326 = vmatprep.subr.bf16.mxu0 %v20525_v13  ;;  %17124 = vmatmul.mubr.f32.gmra.mrb[18].mxu1 %v3374_v37  ;;  %v8619_v37 = vld [vmem:[#allocation2 + $0x154] sm:$0xff] }
 0x3fb   :  { %18599 = vmatmul.mubr.f32.gmra.mrb[82].mxu0 %v8427_v25  ;;  %17126 = vmatprep.mubr.f32.mxu1 %v3375_v7  ;;  %v14056_v25 = vld [vmem:[%s27163_s5 + $0x570] sm:$0xff]  ;;  %v14057_v7 = vld [vmem:[%s27163_s5 + $0x578] sm:$0xff] }
 0x3fc   :  { %18601 = vmatprep.mubr.f32.mxu0 %v8428_v35  ;;  %20528 = vmatpush3.bf16.msra.mxu1 %v20525_v13  ;;  %v8620_v35 = vld [vmem:[#allocation2 + $0x15c] sm:$0xff]  ;;  %v20565_v46 = vpack.c.bf16 %v14057_v7, %v14056_v25  ;;  %v3793_v25 = vld [vmem:[#allocation2 + $0x90] sm:$0xff] }
 0x3fd   :  { %21328 = vmatpush3.bf16.msra.mxu0 %v20525_v13  ;;  %20530 = vmatprep.subr.bf16.mxu1 %v20529_v52  ;;  %v3582_v13 = vld [vmem:[#allocation2 + $0x6c] sm:$0xff] }
 0x3fe   :  { %21330 = vmatprep.subr.bf16.mxu0 %v20529_v52  ;;  %17127 = vmatmul.mubr.f32.gmra.mrb[20].mxu1 %v3376_v23  ;;  %v8621_v23 = vld [vmem:[#allocation2 + $0x164] sm:$0xff] }
 0x3ff   :  { %18602 = vmatmul.mubr.f32.gmra.mrb[84].mxu0 %v8429_v33  ;;  %17129 = vmatprep.mubr.f32.mxu1 %v3377_v0  ;;  %v14058_v33 = vld [vmem:[%s27163_s5 + $0x580] sm:$0xff]  ;;  %v14059_v0 = vld [vmem:[%s27163_s5 + $0x588] sm:$0xff] }
 0x400   :  { %18604 = vmatprep.mubr.f32.mxu0 %v8430_v57  ;;  %20532 = vmatpush3.bf16.msra.mxu1 %v20529_v52  ;;  %v8622_v57 = vld [vmem:[#allocation2 + $0x16c] sm:$0xff]  ;;  %v20569_v15 = vpack.c.bf16 %v14059_v0, %v14058_v33  ;;  %v3795_v0 = vld [vmem:[#allocation2 + $0xa0] sm:$0xff] }
 0x401   :  { %21332 = vmatpush3.bf16.msra.mxu0 %v20529_v52  ;;  %20534 = vmatprep.subr.bf16.mxu1 %v20533_v18  ;;  %v3584_v52 = vld [vmem:[#allocation2 + $0x7c] sm:$0xff] }
 0x402   :  { %21334 = vmatprep.subr.bf16.mxu0 %v20533_v18  ;;  %17130 = vmatmul.mubr.f32.gmra.mrb[22].mxu1 %v3378_v30  ;;  %v8623_v30 = vld [vmem:[#allocation2 + $0x174] sm:$0xff] }
 0x403   :  { %18605 = vmatmul.mubr.f32.gmra.mrb[86].mxu0 %v8431_v32  ;;  %17132 = vmatprep.mubr.f32.mxu1 %v3379_v31  ;;  %v3588_v32 = vld [vmem:[#allocation2 + $0x9c] sm:$0xff] }
 0x404   :  { %18607 = vmatprep.mubr.f32.mxu0 %v8432_v27  ;;  %20536 = vmatpush3.bf16.msra.mxu1 %v20533_v18  ;;  %v3779_v31 = vld [vmem:[#allocation2 + $0x20] sm:$0xff] }
 0x405   :  { %21336 = vmatpush3.bf16.msra.mxu0 %v20533_v18  ;;  %20538 = vmatprep.subr.bf16.mxu1 %v20537_v6  ;;  %v3586_v18 = vld [vmem:[#allocation2 + $0x8c] sm:$0xff]  ;;  %v8798_v27 = vld [vmem:[#allocation2 + $0x100] sm:$0xff] }
 0x406   :  { %21338 = vmatprep.subr.bf16.mxu0 %v20537_v6  ;;  %17133 = vmatmul.mubr.f32.gmra.mrb[24].mxu1 %v3380_v40  ;;  %v3780_v40 = vld [vmem:[#allocation2 + $0x28] sm:$0xff] }
 0x407   :  { %18608 = vmatmul.mubr.f32.gmra.mrb[88].mxu0 %v8433_v44  ;;  %17167 = vmatprep.mubr.f32.mxu1 %v3571_v42  ;;  %v14060_v42 = vld [vmem:[%s27163_s5 + $0x590] sm:$0xff]  ;;  %v8799_v44 = vld [vmem:[#allocation2 + $0x108] sm:$0xff] }
 0x408   :  { %18642 = vmatprep.mubr.f32.mxu0 %v8607_v28  ;;  %v14061_v28 = vld [vmem:[%s27163_s5 + $0x598] sm:$0xff] }
 0x409   :  { %v20573_v47 = vpack.c.bf16 %v14061_v28, %v14060_v42  ;;  %v14078_v28 = vld [vmem:[%s27163_s5 + $0x620] sm:$0xff] }
 0x40a   :  { %17168 = vmatmul.mubr.f32.vlgmr.msra.gmra.mrb[8].mxu1 %v3572_v61  ;;  %v14063_v61 = vld [vmem:[%s27163_s5 + $0x5a8] sm:$0xff] }
 0x40b   :  { %18643 = vmatmul.mubr.f32.vlgmr.msra.gmra.mrb[72].mxu0 %v8608_v2  ;;  %20540 = vmatpush3.bf16.msra.mxu1 %v20537_v6  ;;  %v3781_v2 = vld [vmem:[#allocation2 + $0x30] sm:$0xff] }
 0x40c   :  { %21340 = vmatpush3.bf16.msra.mxu0 %v20537_v6  ;;  %17170 = vmatprep.mubr.f32.mxu1 %v3573_v53  ;;  %v8624_v6 = vld [vmem:[#allocation2 + $0x17c] sm:$0xff]  ;;  %v20577_v53 = vpack.c.bf16 %v14063_v61, %v14062_v45 }
 0x40d   :  { %18645 = vmatprep.mubr.f32.mxu0 %v8609_v48  ;;  %20542 = vmatprep.subr.bf16.mxu1 %v20541_v8  ;;  %v3783_v48 = vld [vmem:[#allocation2 + $0x40] sm:$0xff] }
 0x40e   :  { %21342 = vmatprep.subr.bf16.mxu0 %v20541_v8  ;;  %17171 = vmatmul.mubr.f32.gmra.mrb[10].mxu1 %v3574_v1  ;;  %v14064_v1 = vld [vmem:[%s27163_s5 + $0x5b0] sm:$0xff] }
 0x40f   :  { %18646 = vmatmul.mubr.f32.gmra.mrb[74].mxu0 %v8610_v49  ;;  %17173 = vmatprep.mubr.f32.mxu1 %v3575_v51  ;;  %v14065_v49 = vld [vmem:[%s27163_s5 + $0x5b8] sm:$0xff]  ;;  %v3990_v45 = vld [vmem:[#allocation2 + $0x39] sm:$0xff] }
 0x410   :  { %20544 = vmatpush3.bf16.msra.mxu1 %v20541_v8  ;;  %18648 = vmatprep.mubr.f32.mxu0 %v8611_v3  ;;  %v3784_v51 = vld [vmem:[#allocation2 + $0x48] sm:$0xff]  ;;  %v20581_v34 = vpack.c.bf16 %v14065_v49, %v14064_v1  ;;  %v3785_v3 = vld [vmem:[#allocation2 + $0x50] sm:$0xff]  ;;  %v8992_v61 = vld [vmem:[#allocation2 + $0x119] sm:$0xff] }
 0x411   :  { %21344 = vmatpush3.bf16.msra.mxu0 %v20541_v8  ;;  %20546 = vmatprep.subr.bf16.mxu1 %v20545_v10  ;;  %v8800_v8 = vld [vmem:[#allocation2 + $0x110] sm:$0xff] }
 0x412   :  { %21346 = vmatprep.subr.bf16.mxu0 %v20545_v10  ;;  %17174 = vmatmul.mubr.f32.gmra.mrb[12].mxu1 %v3576_v54  ;;  %v14066_v54 = vld [vmem:[%s27163_s5 + $0x5c0] sm:$0xff] }
 0x413   :  { %18649 = vmatmul.mubr.f32.gmra.mrb[76].mxu0 %v8612_v55  ;;  %17176 = vmatprep.mubr.f32.mxu1 %v3577_v59  ;;  %v14067_v55 = vld [vmem:[%s27163_s5 + $0x5c8] sm:$0xff]  ;;  %v8994_v1 = vld [vmem:[#allocation2 + $0x129] sm:$0xff] }
 0x414   :  { %20548 = vmatpush3.bf16.msra.mxu1 %v20545_v10  ;;  %18651 = vmatprep.mubr.f32.mxu0 %v8613_v17  ;;  %v3786_v59 = vld [vmem:[#allocation2 + $0x58] sm:$0xff]  ;;  %v20585_v17 = vpack.c.bf16 %v14067_v55, %v14066_v54  ;;  %v3995_v55 = vld [vmem:[#allocation2 + $0x61] sm:$0xff] }
 0x415   :  { %21348 = vmatpush3.bf16.msra.mxu0 %v20545_v10  ;;  %20550 = vmatprep.subr.bf16.mxu1 %v20549_v14  ;;  %v8802_v10 = vld [vmem:[#allocation2 + $0x120] sm:$0xff] }
 0x416   :  { %21350 = vmatprep.subr.bf16.mxu0 %v20549_v14  ;;  %17177 = vmatmul.mubr.f32.gmra.mrb[14].mxu1 %v3578_v50  ;;  %v8806_v50 = vld [vmem:[#allocation2 + $0x140] sm:$0xff] }
 0x417   :  { %18652 = vmatmul.mubr.f32.gmra.mrb[78].mxu0 %v8614_v36  ;;  %17179 = vmatprep.mubr.f32.mxu1 %v3579_v9  ;;  %v14068_v36 = vld [vmem:[%s27163_s5 + $0x5d0] sm:$0xff]  ;;  %v14069_v9 = vld [vmem:[%s27163_s5 + $0x5d8] sm:$0xff] }
 0x418   :  { %18654 = vmatprep.mubr.f32.mxu0 %v8615_v20  ;;  %20552 = vmatpush3.bf16.msra.mxu1 %v20549_v14  ;;  %v8807_v20 = vld [vmem:[#allocation2 + $0x148] sm:$0xff]  ;;  %v20589_v26 = vpack.c.bf16 %v14069_v9, %v14068_v36  ;;  %v8996_v54 = vld [vmem:[#allocation2 + $0x139] sm:$0xff]  ;;  %v3997_v36 = vld [vmem:[#allocation2 + $0x71] sm:$0xff] }
 0x419   :  { %21352 = vmatpush3.bf16.msra.mxu0 %v20549_v14  ;;  %20554 = vmatprep.subr.bf16.mxu1 %v20553_v41  ;;  %v8804_v14 = vld [vmem:[#allocation2 + $0x130] sm:$0xff] }
 0x41a   :  { %21354 = vmatprep.subr.bf16.mxu0 %v20553_v41  ;;  %17180 = vmatmul.mubr.f32.gmra.mrb[16].mxu1 %v3580_v19  ;;  %v8808_v19 = vld [vmem:[#allocation2 + $0x150] sm:$0xff] }
 0x41b   :  { %18655 = vmatmul.mubr.f32.gmra.mrb[80].mxu0 %v8616_v56  ;;  %17182 = vmatprep.mubr.f32.mxu1 %v3581_v38  ;;  %v14070_v56 = vld [vmem:[%s27163_s5 + $0x5e0] sm:$0xff]  ;;  %v14071_v38 = vld [vmem:[%s27163_s5 + $0x5e8] sm:$0xff] }
 0x41c   :  { %18657 = vmatprep.mubr.f32.mxu0 %v8617_v29  ;;  %20556 = vmatpush3.bf16.msra.mxu1 %v20553_v41  ;;  %v8809_v29 = vld [vmem:[#allocation2 + $0x158] sm:$0xff]  ;;  %v20593_v60 = vpack.c.bf16 %v14071_v38, %v14070_v56  ;;  %v3999_v56 = vld [vmem:[#allocation2 + $0x81] sm:$0xff] }
 0x41d   :  { %21356 = vmatpush3.bf16.msra.mxu0 %v20553_v41  ;;  %20558 = vmatprep.subr.bf16.mxu1 %v20557_v22  ;;  %v3788_v41 = vld [vmem:[#allocation2 + $0x68] sm:$0xff] }
 0x41e   :  { %21358 = vmatprep.subr.bf16.mxu0 %v20557_v22  ;;  %17183 = vmatmul.mubr.f32.gmra.mrb[18].mxu1 %v3582_v13  ;;  %v8810_v13 = vld [vmem:[#allocation2 + $0x160] sm:$0xff] }
 0x41f   :  { %18658 = vmatmul.mubr.f32.gmra.mrb[82].mxu0 %v8618_v58  ;;  %17185 = vmatprep.mubr.f32.mxu1 %v3583_v16  ;;  %v14072_v58 = vld [vmem:[%s27163_s5 + $0x5f0] sm:$0xff]  ;;  %v14073_v16 = vld [vmem:[%s27163_s5 + $0x5f8] sm:$0xff] }
 0x420   :  { %18660 = vmatprep.mubr.f32.mxu0 %v8619_v37  ;;  %20560 = vmatpush3.bf16.msra.mxu1 %v20557_v22  ;;  %v8811_v37 = vld [vmem:[#allocation2 + $0x168] sm:$0xff]  ;;  %v20597_v7 = vpack.c.bf16 %v14073_v16, %v14072_v58  ;;  %v4001_v58 = vld [vmem:[#allocation2 + $0x91] sm:$0xff] }
 0x421   :  { %21360 = vmatpush3.bf16.msra.mxu0 %v20557_v22  ;;  %20562 = vmatprep.subr.bf16.mxu1 %v20561_v39  ;;  %v3790_v22 = vld [vmem:[#allocation2 + $0x78] sm:$0xff] }
 0x422   :  { %21362 = vmatprep.subr.bf16.mxu0 %v20561_v39  ;;  %17186 = vmatmul.mubr.f32.gmra.mrb[20].mxu1 %v3584_v52  ;;  %v8812_v52 = vld [vmem:[#allocation2 + $0x170] sm:$0xff] }
 0x423   :  { %18661 = vmatmul.mubr.f32.gmra.mrb[84].mxu0 %v8620_v35  ;;  %17188 = vmatprep.mubr.f32.mxu1 %v3585_v4  ;;  %v14074_v35 = vld [vmem:[%s27163_s5 + $0x600] sm:$0xff]  ;;  %v14075_v4 = vld [vmem:[%s27163_s5 + $0x608] sm:$0xff] }
 0x424   :  { %18663 = vmatprep.mubr.f32.mxu0 %v8621_v23  ;;  %20564 = vmatpush3.bf16.msra.mxu1 %v20561_v39  ;;  %v8813_v23 = vld [vmem:[#allocation2 + $0x178] sm:$0xff]  ;;  %v20601_v33 = vpack.c.bf16 %v14075_v4, %v14074_v35  ;;  %v4003_v4 = vld [vmem:[#allocation2 + $0xa1] sm:$0xff] }
 0x425   :  { %21364 = vmatpush3.bf16.msra.mxu0 %v20561_v39  ;;  %20566 = vmatprep.subr.bf16.mxu1 %v20565_v46  ;;  %v3792_v39 = vld [vmem:[#allocation2 + $0x88] sm:$0xff] }
 0x426   :  { %21366 = vmatprep.subr.bf16.mxu0 %v20565_v46  ;;  %17189 = vmatmul.mubr.f32.gmra.mrb[22].mxu1 %v3586_v18  ;;  %v8814_v18 = vld [vmem:[#allocation2 + $0x180] sm:$0xff] }
 0x427   :  { %18664 = vmatmul.mubr.f32.gmra.mrb[86].mxu0 %v8622_v57  ;;  %17191 = vmatprep.mubr.f32.mxu1 %v3587_v21  ;;  %v3796_v57 = vld [vmem:[#allocation2 + $0xa8] sm:$0xff] }
 0x428   :  { %18666 = vmatprep.mubr.f32.mxu0 %v8623_v30  ;;  %20568 = vmatpush3.bf16.msra.mxu1 %v20565_v46  ;;  %v3987_v21 = vld [vmem:[#allocation2 + $0x21] sm:$0xff] }
 0x429   :  { %21368 = vmatpush3.bf16.msra.mxu0 %v20565_v46  ;;  %20570 = vmatprep.subr.bf16.mxu1 %v20569_v15  ;;  %v3794_v46 = vld [vmem:[#allocation2 + $0x98] sm:$0xff]  ;;  %v8989_v30 = vld [vmem:[#allocation2 + $0x101] sm:$0xff] }
 0x42a   :  { %21370 = vmatprep.subr.bf16.mxu0 %v20569_v15  ;;  %17192 = vmatmul.mubr.f32.gmra.mrb[24].mxu1 %v3588_v32  ;;  %v14076_v32 = vld [vmem:[%s27163_s5 + $0x610] sm:$0xff] }
 0x42b   :  { %18667 = vmatmul.mubr.f32.gmra.mrb[88].mxu0 %v8624_v6  ;;  %17226 = vmatprep.mubr.f32.mxu1 %v3779_v31  ;;  %v14077_v6 = vld [vmem:[%s27163_s5 + $0x618] sm:$0xff] }
 0x42c   :  { %18701 = vmatprep.mubr.f32.mxu0 %v8798_v27  ;;  %v3988_v31 = vld [vmem:[#allocation2 + $0x29] sm:$0xff]  ;;  %v20605_v42 = vpack.c.bf16 %v14077_v6, %v14076_v32 }
 0x42d   :  { %v8990_v27 = vld [vmem:[#allocation2 + $0x109] sm:$0xff] }
 0x42e   :  { %17227 = vmatmul.mubr.f32.vlgmr.msra.gmra.mrb[8].mxu1 %v3780_v40  ;;  %v14079_v40 = vld [vmem:[%s27163_s5 + $0x628] sm:$0xff]  ;;  %v14094_v6 = vld [vmem:[%s27163_s5 + $0x6a0] sm:$0xff] }
 0x42f   :  { %18702 = vmatmul.mubr.f32.vlgmr.msra.gmra.mrb[72].mxu0 %v8799_v44  ;;  %20572 = vmatpush3.bf16.msra.mxu1 %v20569_v15  ;;  %v3989_v44 = vld [vmem:[#allocation2 + $0x31] sm:$0xff] }
 0x430   :  { %21372 = vmatpush3.bf16.msra.mxu0 %v20569_v15  ;;  %17229 = vmatprep.mubr.f32.mxu1 %v3781_v2  ;;  %v8815_v15 = vld [vmem:[#allocation2 + $0x188] sm:$0xff]  ;;  %v20609_v2 = vpack.c.bf16 %v14079_v40, %v14078_v28  ;;  %v4198_v28 = vld [vmem:[#allocation2 + $0x3a] sm:$0xff] }
 0x431   :  { %18704 = vmatprep.mubr.f32.mxu0 %v8800_v8  ;;  %20574 = vmatprep.subr.bf16.mxu1 %v20573_v47  ;;  %v3991_v8 = vld [vmem:[#allocation2 + $0x41] sm:$0xff] }
 0x432   :  { %21374 = vmatprep.subr.bf16.mxu0 %v20573_v47  ;;  %17230 = vmatmul.mubr.f32.gmra.mrb[10].mxu1 %v3782_v62  ;;  %v14080_v62 = vld [vmem:[%s27163_s5 + $0x630] sm:$0xff] }
 0x433   :  { %18705 = vmatmul.mubr.f32.gmra.mrb[74].mxu0 %v8801_v5  ;;  %17232 = vmatprep.mubr.f32.mxu1 %v3783_v48  ;;  %v14081_v5 = vld [vmem:[%s27163_s5 + $0x638] sm:$0xff]  ;;  %v9183_v40 = vld [vmem:[#allocation2 + $0x11a] sm:$0xff] }
 0x434   :  { %20576 = vmatpush3.bf16.msra.mxu1 %v20573_v47  ;;  %18707 = vmatprep.mubr.f32.mxu0 %v8802_v10  ;;  %v3992_v48 = vld [vmem:[#allocation2 + $0x49] sm:$0xff]  ;;  %v20613_v49 = vpack.c.bf16 %v14081_v5, %v14080_v62  ;;  %v3993_v10 = vld [vmem:[#allocation2 + $0x51] sm:$0xff] }
 0x435   :  { %21376 = vmatpush3.bf16.msra.mxu0 %v20573_v47  ;;  %20578 = vmatprep.subr.bf16.mxu1 %v20577_v53  ;;  %v8991_v47 = vld [vmem:[#allocation2 + $0x111] sm:$0xff] }
 0x436   :  { %21378 = vmatprep.subr.bf16.mxu0 %v20577_v53  ;;  %17233 = vmatmul.mubr.f32.gmra.mrb[12].mxu1 %v3784_v51  ;;  %v14082_v51 = vld [vmem:[%s27163_s5 + $0x640] sm:$0xff] }
 0x437   :  { %18708 = vmatmul.mubr.f32.gmra.mrb[76].mxu0 %v8803_v11  ;;  %17235 = vmatprep.mubr.f32.mxu1 %v3785_v3  ;;  %v14083_v11 = vld [vmem:[%s27163_s5 + $0x648] sm:$0xff]  ;;  %v9185_v62 = vld [vmem:[#allocation2 + $0x12a] sm:$0xff] }
 0x438   :  { %20580 = vmatpush3.bf16.msra.mxu1 %v20577_v53  ;;  %18710 = vmatprep.mubr.f32.mxu0 %v8804_v14  ;;  %v3994_v3 = vld [vmem:[#allocation2 + $0x59] sm:$0xff]  ;;  %v20617_v14 = vpack.c.bf16 %v14083_v11, %v14082_v51  ;;  %v4203_v11 = vld [vmem:[#allocation2 + $0x62] sm:$0xff] }
 0x439   :  { %21380 = vmatpush3.bf16.msra.mxu0 %v20577_v53  ;;  %20582 = vmatprep.subr.bf16.mxu1 %v20581_v34  ;;  %v8993_v53 = vld [vmem:[#allocation2 + $0x121] sm:$0xff] }
 0x43a   :  { %21382 = vmatprep.subr.bf16.mxu0 %v20581_v34  ;;  %17236 = vmatmul.mubr.f32.gmra.mrb[14].mxu1 %v3786_v59  ;;  %v8997_v59 = vld [vmem:[#allocation2 + $0x141] sm:$0xff] }
 0x43b   :  { %18711 = vmatmul.mubr.f32.gmra.mrb[78].mxu0 %v8805_v43  ;;  %17238 = vmatprep.mubr.f32.mxu1 %v3787_v63  ;;  %v14084_v43 = vld [vmem:[%s27163_s5 + $0x650] sm:$0xff]  ;;  %v14085_v63 = vld [vmem:[%s27163_s5 + $0x658] sm:$0xff] }
 0x43c   :  { %18713 = vmatprep.mubr.f32.mxu0 %v8806_v50  ;;  %20584 = vmatpush3.bf16.msra.mxu1 %v20581_v34  ;;  %v8998_v50 = vld [vmem:[#allocation2 + $0x149] sm:$0xff]  ;;  %v20621_v9 = vpack.c.bf16 %v14085_v63, %v14084_v43  ;;  %v9187_v51 = vld [vmem:[#allocation2 + $0x13a] sm:$0xff]  ;;  %v4205_v43 = vld [vmem:[#allocation2 + $0x72] sm:$0xff] }
 0x43d   :  { %21384 = vmatpush3.bf16.msra.mxu0 %v20581_v34  ;;  %20586 = vmatprep.subr.bf16.mxu1 %v20585_v17  ;;  %v8995_v34 = vld [vmem:[#allocation2 + $0x131] sm:$0xff] }
 0x43e   :  { %21386 = vmatprep.subr.bf16.mxu0 %v20585_v17  ;;  %17239 = vmatmul.mubr.f32.gmra.mrb[16].mxu1 %v3788_v41  ;;  %v8999_v41 = vld [vmem:[#allocation2 + $0x151] sm:$0xff] }
 0x43f   :  { %18714 = vmatmul.mubr.f32.gmra.mrb[80].mxu0 %v8807_v20  ;;  %17241 = vmatprep.mubr.f32.mxu1 %v3789_v12  ;;  %v14086_v20 = vld [vmem:[%s27163_s5 + $0x660] sm:$0xff]  ;;  %v14087_v12 = vld [vmem:[%s27163_s5 + $0x668] sm:$0xff] }
 0x440   :  { %18716 = vmatprep.mubr.f32.mxu0 %v8808_v19  ;;  %20588 = vmatpush3.bf16.msra.mxu1 %v20585_v17  ;;  %v9000_v19 = vld [vmem:[#allocation2 + $0x159] sm:$0xff]  ;;  %v20625_v38 = vpack.c.bf16 %v14087_v12, %v14086_v20  ;;  %v4207_v20 = vld [vmem:[#allocation2 + $0x82] sm:$0xff] }
 0x441   :  { %21388 = vmatpush3.bf16.msra.mxu0 %v20585_v17  ;;  %20590 = vmatprep.subr.bf16.mxu1 %v20589_v26  ;;  %v3996_v17 = vld [vmem:[#allocation2 + $0x69] sm:$0xff] }
 0x442   :  { %21390 = vmatprep.subr.bf16.mxu0 %v20589_v26  ;;  %17242 = vmatmul.mubr.f32.gmra.mrb[18].mxu1 %v3790_v22  ;;  %v9001_v22 = vld [vmem:[#allocation2 + $0x161] sm:$0xff] }
 0x443   :  { %18717 = vmatmul.mubr.f32.gmra.mrb[82].mxu0 %v8809_v29  ;;  %17244 = vmatprep.mubr.f32.mxu1 %v3791_v24  ;;  %v14088_v29 = vld [vmem:[%s27163_s5 + $0x670] sm:$0xff]  ;;  %v14089_v24 = vld [vmem:[%s27163_s5 + $0x678] sm:$0xff] }
 0x444   :  { %18719 = vmatprep.mubr.f32.mxu0 %v8810_v13  ;;  %20592 = vmatpush3.bf16.msra.mxu1 %v20589_v26  ;;  %v9002_v13 = vld [vmem:[#allocation2 + $0x169] sm:$0xff]  ;;  %v20629_v16 = vpack.c.bf16 %v14089_v24, %v14088_v29  ;;  %v4209_v29 = vld [vmem:[#allocation2 + $0x92] sm:$0xff] }
 0x445   :  { %21392 = vmatpush3.bf16.msra.mxu0 %v20589_v26  ;;  %20594 = vmatprep.subr.bf16.mxu1 %v20593_v60  ;;  %v3998_v26 = vld [vmem:[#allocation2 + $0x79] sm:$0xff] }
 0x446   :  { %21394 = vmatprep.subr.bf16.mxu0 %v20593_v60  ;;  %17245 = vmatmul.mubr.f32.gmra.mrb[20].mxu1 %v3792_v39  ;;  %v9003_v39 = vld [vmem:[#allocation2 + $0x171] sm:$0xff] }
 0x447   :  { %18720 = vmatmul.mubr.f32.gmra.mrb[84].mxu0 %v8811_v37  ;;  %17247 = vmatprep.mubr.f32.mxu1 %v3793_v25  ;;  %v14090_v37 = vld [vmem:[%s27163_s5 + $0x680] sm:$0xff]  ;;  %v14091_v25 = vld [vmem:[%s27163_s5 + $0x688] sm:$0xff] }
 0x448   :  { %18722 = vmatprep.mubr.f32.mxu0 %v8812_v52  ;;  %20596 = vmatpush3.bf16.msra.mxu1 %v20593_v60  ;;  %v9004_v52 = vld [vmem:[#allocation2 + $0x179] sm:$0xff]  ;;  %v20633_v35 = vpack.c.bf16 %v14091_v25, %v14090_v37  ;;  %v4211_v25 = vld [vmem:[#allocation2 + $0xa2] sm:$0xff] }
 0x449   :  { %21396 = vmatpush3.bf16.msra.mxu0 %v20593_v60  ;;  %20598 = vmatprep.subr.bf16.mxu1 %v20597_v7  ;;  %v4000_v60 = vld [vmem:[#allocation2 + $0x89] sm:$0xff] }
 0x44a   :  { %21398 = vmatprep.subr.bf16.mxu0 %v20597_v7  ;;  %17248 = vmatmul.mubr.f32.gmra.mrb[22].mxu1 %v3794_v46  ;;  %v9005_v46 = vld [vmem:[#allocation2 + $0x181] sm:$0xff] }
 0x44b   :  { %18723 = vmatmul.mubr.f32.gmra.mrb[86].mxu0 %v8813_v23  ;;  %17250 = vmatprep.mubr.f32.mxu1 %v3795_v0  ;;  %v4004_v23 = vld [vmem:[#allocation2 + $0xa9] sm:$0xff] }
 0x44c   :  { %18725 = vmatprep.mubr.f32.mxu0 %v8814_v18  ;;  %20600 = vmatpush3.bf16.msra.mxu1 %v20597_v7  ;;  %v4195_v0 = vld [vmem:[#allocation2 + $0x22] sm:$0xff] }
 0x44d   :  { %21400 = vmatpush3.bf16.msra.mxu0 %v20597_v7  ;;  %20602 = vmatprep.subr.bf16.mxu1 %v20601_v33  ;;  %v4002_v7 = vld [vmem:[#allocation2 + $0x99] sm:$0xff]  ;;  %v9180_v18 = vld [vmem:[#allocation2 + $0x102] sm:$0xff] }
 0x44e   :  { %21402 = vmatprep.subr.bf16.mxu0 %v20601_v33  ;;  %17251 = vmatmul.mubr.f32.gmra.mrb[24].mxu1 %v3796_v57  ;;  %v14092_v57 = vld [vmem:[%s27163_s5 + $0x690] sm:$0xff] }
 0x44f   :  { %18726 = vmatmul.mubr.f32.gmra.mrb[88].mxu0 %v8815_v15  ;;  %17285 = vmatprep.mubr.f32.mxu1 %v3987_v21  ;;  %v14093_v15 = vld [vmem:[%s27163_s5 + $0x698] sm:$0xff] }
 0x450   :  { %18760 = vmatprep.mubr.f32.mxu0 %v8989_v30  ;;  %v4196_v21 = vld [vmem:[#allocation2 + $0x2a] sm:$0xff]  ;;  %v20637_v32 = vpack.c.bf16 %v14093_v15, %v14092_v57 }
 0x451   :  { %v9181_v30 = vld [vmem:[#allocation2 + $0x10a] sm:$0xff] }
 0x452   :  { %17286 = vmatmul.mubr.f32.vlgmr.msra.gmra.mrb[8].mxu1 %v3988_v31  ;;  %v14095_v31 = vld [vmem:[%s27163_s5 + $0x6a8] sm:$0xff]  ;;  %v14110_v15 = vld [vmem:[%s27163_s5 + $0x720] sm:$0xff] }
 0x453   :  { %18761 = vmatmul.mubr.f32.vlgmr.msra.gmra.mrb[72].mxu0 %v8990_v27  ;;  %20604 = vmatpush3.bf16.msra.mxu1 %v20601_v33  ;;  %v4197_v27 = vld [vmem:[#allocation2 + $0x32] sm:$0xff] }
 0x454   :  { %21404 = vmatpush3.bf16.msra.mxu0 %v20601_v33  ;;  %17288 = vmatprep.mubr.f32.mxu1 %v3989_v44  ;;  %v9006_v33 = vld [vmem:[#allocation2 + $0x189] sm:$0xff]  ;;  %v20641_v44 = vpack.c.bf16 %v14095_v31, %v14094_v6  ;;  %v4406_v6 = vld [vmem:[#allocation2 + $0x3b] sm:$0xff] }
 0x455   :  { %18763 = vmatprep.mubr.f32.mxu0 %v8991_v47  ;;  %20606 = vmatprep.subr.bf16.mxu1 %v20605_v42  ;;  %v4199_v47 = vld [vmem:[#allocation2 + $0x42] sm:$0xff] }
 0x456   :  { %21406 = vmatprep.subr.bf16.mxu0 %v20605_v42  ;;  %17289 = vmatmul.mubr.f32.gmra.mrb[10].mxu1 %v3990_v45  ;;  %v14096_v45 = vld [vmem:[%s27163_s5 + $0x6b0] sm:$0xff] }
 0x457   :  { %18764 = vmatmul.mubr.f32.gmra.mrb[74].mxu0 %v8992_v61  ;;  %17291 = vmatprep.mubr.f32.mxu1 %v3991_v8  ;;  %v14097_v61 = vld [vmem:[%s27163_s5 + $0x6b8] sm:$0xff]  ;;  %v9374_v31 = vld [vmem:[#allocation2 + $0x11b] sm:$0xff] }
 0x458   :  { %20608 = vmatpush3.bf16.msra.mxu1 %v20605_v42  ;;  %18766 = vmatprep.mubr.f32.mxu0 %v8993_v53  ;;  %v4200_v8 = vld [vmem:[#allocation2 + $0x4a] sm:$0xff]  ;;  %v20645_v5 = vpack.c.bf16 %v14097_v61, %v14096_v45  ;;  %v4201_v53 = vld [vmem:[#allocation2 + $0x52] sm:$0xff] }
 0x459   :  { %21408 = vmatpush3.bf16.msra.mxu0 %v20605_v42  ;;  %20610 = vmatprep.subr.bf16.mxu1 %v20609_v2  ;;  %v9182_v42 = vld [vmem:[#allocation2 + $0x112] sm:$0xff] }
 0x45a   :  { %21410 = vmatprep.subr.bf16.mxu0 %v20609_v2  ;;  %17292 = vmatmul.mubr.f32.gmra.mrb[12].mxu1 %v3992_v48  ;;  %v14098_v48 = vld [vmem:[%s27163_s5 + $0x6c0] sm:$0xff] }
 0x45b   :  { %18767 = vmatmul.mubr.f32.gmra.mrb[76].mxu0 %v8994_v1  ;;  %17294 = vmatprep.mubr.f32.mxu1 %v3993_v10  ;;  %v14099_v1 = vld [vmem:[%s27163_s5 + $0x6c8] sm:$0xff]  ;;  %v9376_v45 = vld [vmem:[#allocation2 + $0x12b] sm:$0xff] }
 0x45c   :  { %20612 = vmatpush3.bf16.msra.mxu1 %v20609_v2  ;;  %18769 = vmatprep.mubr.f32.mxu0 %v8995_v34  ;;  %v4202_v10 = vld [vmem:[#allocation2 + $0x5a] sm:$0xff]  ;;  %v20649_v34 = vpack.c.bf16 %v14099_v1, %v14098_v48  ;;  %v4411_v1 = vld [vmem:[#allocation2 + $0x63] sm:$0xff] }
 0x45d   :  { %21412 = vmatpush3.bf16.msra.mxu0 %v20609_v2  ;;  %20614 = vmatprep.subr.bf16.mxu1 %v20613_v49  ;;  %v9184_v2 = vld [vmem:[#allocation2 + $0x122] sm:$0xff] }
 0x45e   :  { %21414 = vmatprep.subr.bf16.mxu0 %v20613_v49  ;;  %17295 = vmatmul.mubr.f32.gmra.mrb[14].mxu1 %v3994_v3  ;;  %v9188_v3 = vld [vmem:[#allocation2 + $0x142] sm:$0xff] }
 0x45f   :  { %18770 = vmatmul.mubr.f32.gmra.mrb[78].mxu0 %v8996_v54  ;;  %17297 = vmatprep.mubr.f32.mxu1 %v3995_v55  ;;  %v14100_v54 = vld [vmem:[%s27163_s5 + $0x6d0] sm:$0xff]  ;;  %v14101_v55 = vld [vmem:[%s27163_s5 + $0x6d8] sm:$0xff] }
 0x460   :  { %18772 = vmatprep.mubr.f32.mxu0 %v8997_v59  ;;  %20616 = vmatpush3.bf16.msra.mxu1 %v20613_v49  ;;  %v9189_v59 = vld [vmem:[#allocation2 + $0x14a] sm:$0xff]  ;;  %v20653_v63 = vpack.c.bf16 %v14101_v55, %v14100_v54  ;;  %v9378_v48 = vld [vmem:[#allocation2 + $0x13b] sm:$0xff]  ;;  %v4413_v54 = vld [vmem:[#allocation2 + $0x73] sm:$0xff] }
 0x461   :  { %21416 = vmatpush3.bf16.msra.mxu0 %v20613_v49  ;;  %20618 = vmatprep.subr.bf16.mxu1 %v20617_v14  ;;  %v9186_v49 = vld [vmem:[#allocation2 + $0x132] sm:$0xff] }
 0x462   :  { %21418 = vmatprep.subr.bf16.mxu0 %v20617_v14  ;;  %17298 = vmatmul.mubr.f32.gmra.mrb[16].mxu1 %v3996_v17  ;;  %v9190_v17 = vld [vmem:[#allocation2 + $0x152] sm:$0xff] }
 0x463   :  { %18773 = vmatmul.mubr.f32.gmra.mrb[80].mxu0 %v8998_v50  ;;  %17300 = vmatprep.mubr.f32.mxu1 %v3997_v36  ;;  %v14102_v50 = vld [vmem:[%s27163_s5 + $0x6e0] sm:$0xff]  ;;  %v14103_v36 = vld [vmem:[%s27163_s5 + $0x6e8] sm:$0xff] }
 0x464   :  { %18775 = vmatprep.mubr.f32.mxu0 %v8999_v41  ;;  %20620 = vmatpush3.bf16.msra.mxu1 %v20617_v14  ;;  %v9191_v41 = vld [vmem:[#allocation2 + $0x15a] sm:$0xff]  ;;  %v20657_v12 = vpack.c.bf16 %v14103_v36, %v14102_v50  ;;  %v4415_v50 = vld [vmem:[#allocation2 + $0x83] sm:$0xff] }
 0x465   :  { %21420 = vmatpush3.bf16.msra.mxu0 %v20617_v14  ;;  %20622 = vmatprep.subr.bf16.mxu1 %v20621_v9  ;;  %v4204_v14 = vld [vmem:[#allocation2 + $0x6a] sm:$0xff] }
 0x466   :  { %21422 = vmatprep.subr.bf16.mxu0 %v20621_v9  ;;  %17301 = vmatmul.mubr.f32.gmra.mrb[18].mxu1 %v3998_v26  ;;  %v9192_v26 = vld [vmem:[#allocation2 + $0x162] sm:$0xff] }
 0x467   :  { %18776 = vmatmul.mubr.f32.gmra.mrb[82].mxu0 %v9000_v19  ;;  %17303 = vmatprep.mubr.f32.mxu1 %v3999_v56  ;;  %v14104_v19 = vld [vmem:[%s27163_s5 + $0x6f0] sm:$0xff]  ;;  %v14105_v56 = vld [vmem:[%s27163_s5 + $0x6f8] sm:$0xff] }
 0x468   :  { %18778 = vmatprep.mubr.f32.mxu0 %v9001_v22  ;;  %20624 = vmatpush3.bf16.msra.mxu1 %v20621_v9  ;;  %v9193_v22 = vld [vmem:[#allocation2 + $0x16a] sm:$0xff]  ;;  %v20661_v24 = vpack.c.bf16 %v14105_v56, %v14104_v19  ;;  %v4417_v19 = vld [vmem:[#allocation2 + $0x93] sm:$0xff] }
 0x469   :  { %21424 = vmatpush3.bf16.msra.mxu0 %v20621_v9  ;;  %20626 = vmatprep.subr.bf16.mxu1 %v20625_v38  ;;  %v4206_v9 = vld [vmem:[#allocation2 + $0x7a] sm:$0xff] }
 0x46a   :  { %21426 = vmatprep.subr.bf16.mxu0 %v20625_v38  ;;  %17304 = vmatmul.mubr.f32.gmra.mrb[20].mxu1 %v4000_v60  ;;  %v9194_v60 = vld [vmem:[#allocation2 + $0x172] sm:$0xff] }
 0x46b   :  { %18779 = vmatmul.mubr.f32.gmra.mrb[84].mxu0 %v9002_v13  ;;  %17306 = vmatprep.mubr.f32.mxu1 %v4001_v58  ;;  %v14106_v13 = vld [vmem:[%s27163_s5 + $0x700] sm:$0xff]  ;;  %v14107_v58 = vld [vmem:[%s27163_s5 + $0x708] sm:$0xff] }
 0x46c   :  { %18781 = vmatprep.mubr.f32.mxu0 %v9003_v39  ;;  %20628 = vmatpush3.bf16.msra.mxu1 %v20625_v38  ;;  %v9195_v39 = vld [vmem:[#allocation2 + $0x17a] sm:$0xff]  ;;  %v20665_v37 = vpack.c.bf16 %v14107_v58, %v14106_v13  ;;  %v4419_v58 = vld [vmem:[#allocation2 + $0xa3] sm:$0xff] }
 0x46d   :  { %21428 = vmatpush3.bf16.msra.mxu0 %v20625_v38  ;;  %20630 = vmatprep.subr.bf16.mxu1 %v20629_v16  ;;  %v4208_v38 = vld [vmem:[#allocation2 + $0x8a] sm:$0xff] }
 0x46e   :  { %21430 = vmatprep.subr.bf16.mxu0 %v20629_v16  ;;  %17307 = vmatmul.mubr.f32.gmra.mrb[22].mxu1 %v4002_v7  ;;  %v9196_v7 = vld [vmem:[#allocation2 + $0x182] sm:$0xff] }
 0x46f   :  { %18782 = vmatmul.mubr.f32.gmra.mrb[86].mxu0 %v9004_v52  ;;  %17309 = vmatprep.mubr.f32.mxu1 %v4003_v4  ;;  %v9197_v52 = vld [vmem:[#allocation2 + $0x18a] sm:$0xff] }
 0x470   :  { %18784 = vmatprep.mubr.f32.mxu0 %v9005_v46  ;;  %20632 = vmatpush3.bf16.msra.mxu1 %v20629_v16  ;;  %v23131_v4 = vld [vmem:[#allocation2 + $0xaa] sm:$0xff] }
 0x471   :  { %21432 = vmatpush3.bf16.msra.mxu0 %v20629_v16  ;;  %20634 = vmatprep.subr.bf16.mxu1 %v20633_v35  ;;  %v4210_v16 = vld [vmem:[#allocation2 + $0x9a] sm:$0xff]  ;;  %v9371_v46 = vld [vmem:[#allocation2 + $0x103] sm:$0xff] }
 0x472   :  { %21434 = vmatprep.subr.bf16.mxu0 %v20633_v35  ;;  %17310 = vmatmul.mubr.f32.gmra.mrb[24].mxu1 %v4004_v23  ;;  %v14108_v23 = vld [vmem:[%s27163_s5 + $0x710] sm:$0xff] }
 0x473   :  { %18785 = vmatmul.mubr.f32.gmra.mrb[88].mxu0 %v9006_v33  ;;  %17344 = vmatprep.mubr.f32.mxu1 %v4195_v0  ;;  %v14109_v33 = vld [vmem:[%s27163_s5 + $0x718] sm:$0xff] }
 0x474   :  { %18819 = vmatprep.mubr.f32.mxu0 %v9180_v18  ;;  %v4404_v0 = vld [vmem:[#allocation2 + $0x2b] sm:$0xff]  ;;  %v20669_v57 = vpack.c.bf16 %v14109_v33, %v14108_v23 }
 0x475   :  { %v9372_v18 = vld [vmem:[#allocation2 + $0x10b] sm:$0xff] }
 0x476   :  { %17345 = vmatmul.mubr.f32.vlgmr.msra.gmra.mrb[8].mxu1 %v4196_v21  ;;  %v14111_v21 = vld [vmem:[%s27163_s5 + $0x728] sm:$0xff]  ;;  %v14126_v33 = vld [vmem:[%s27163_s5 + $0x7a0] sm:$0xff] }
 0x477   :  { %18820 = vmatmul.mubr.f32.vlgmr.msra.gmra.mrb[72].mxu0 %v9181_v30  ;;  %20636 = vmatpush3.bf16.msra.mxu1 %v20633_v35  ;;  %v4405_v30 = vld [vmem:[#allocation2 + $0x33] sm:$0xff] }
 0x478   :  { %21436 = vmatpush3.bf16.msra.mxu0 %v20633_v35  ;;  %17347 = vmatprep.mubr.f32.mxu1 %v4197_v27  ;;  %v4403_v35 = vld [vmem:[#allocation2 + $0x23] sm:$0xff]  ;;  %v20673_v27 = vpack.c.bf16 %v14111_v21, %v14110_v15 }
 0x479   :  { %18822 = vmatprep.mubr.f32.mxu0 %v9182_v42  ;;  %20638 = vmatprep.subr.bf16.mxu1 %v20637_v32  ;;  %v4407_v42 = vld [vmem:[#allocation2 + $0x43] sm:$0xff] }
 0x47a   :  { %21438 = vmatprep.subr.bf16.mxu0 %v20637_v32  ;;  %17348 = vmatmul.mubr.f32.gmra.mrb[10].mxu1 %v4198_v28  ;;  %v14112_v28 = vld [vmem:[%s27163_s5 + $0x730] sm:$0xff] }
 0x47b   :  { %18823 = vmatmul.mubr.f32.gmra.mrb[74].mxu0 %v9183_v40  ;;  %17350 = vmatprep.mubr.f32.mxu1 %v4199_v47  ;;  %v14113_v40 = vld [vmem:[%s27163_s5 + $0x738] sm:$0xff]  ;;  %v4614_v15 = vld [vmem:[#allocation2 + $0x3c] sm:$0xff] }
 0x47c   :  { %20640 = vmatpush3.bf16.msra.mxu1 %v20637_v32  ;;  %18825 = vmatprep.mubr.f32.mxu0 %v9184_v2  ;;  %v4408_v47 = vld [vmem:[#allocation2 + $0x4b] sm:$0xff]  ;;  %v20677_v61 = vpack.c.bf16 %v14113_v40, %v14112_v28  ;;  %v4409_v2 = vld [vmem:[#allocation2 + $0x53] sm:$0xff]  ;;  %v9565_v21 = vld [vmem:[#allocation2 + $0x11c] sm:$0xff] }
 0x47d   :  { %21440 = vmatpush3.bf16.msra.mxu0 %v20637_v32  ;;  %20642 = vmatprep.subr.bf16.mxu1 %v20641_v44  ;;  %v9373_v32 = vld [vmem:[#allocation2 + $0x113] sm:$0xff] }
 0x47e   :  { %21442 = vmatprep.subr.bf16.mxu0 %v20641_v44  ;;  %17351 = vmatmul.mubr.f32.gmra.mrb[12].mxu1 %v4200_v8  ;;  %v14114_v8 = vld [vmem:[%s27163_s5 + $0x740] sm:$0xff] }
 0x47f   :  { %18826 = vmatmul.mubr.f32.gmra.mrb[76].mxu0 %v9185_v62  ;;  %17353 = vmatprep.mubr.f32.mxu1 %v4201_v53  ;;  %v14115_v62 = vld [vmem:[%s27163_s5 + $0x748] sm:$0xff]  ;;  %v9567_v28 = vld [vmem:[#allocation2 + $0x12c] sm:$0xff] }
 0x480   :  { %20644 = vmatpush3.bf16.msra.mxu1 %v20641_v44  ;;  %18828 = vmatprep.mubr.f32.mxu0 %v9186_v49  ;;  %v4410_v53 = vld [vmem:[#allocation2 + $0x5b] sm:$0xff]  ;;  %v20681_v49 = vpack.c.bf16 %v14115_v62, %v14114_v8  ;;  %v4619_v62 = vld [vmem:[#allocation2 + $0x64] sm:$0xff] }
 0x481   :  { %21444 = vmatpush3.bf16.msra.mxu0 %v20641_v44  ;;  %20646 = vmatprep.subr.bf16.mxu1 %v20645_v5  ;;  %v9375_v44 = vld [vmem:[#allocation2 + $0x123] sm:$0xff] }
 0x482   :  { %21446 = vmatprep.subr.bf16.mxu0 %v20645_v5  ;;  %17354 = vmatmul.mubr.f32.gmra.mrb[14].mxu1 %v4202_v10  ;;  %v9379_v10 = vld [vmem:[#allocation2 + $0x143] sm:$0xff] }
 0x483   :  { %18829 = vmatmul.mubr.f32.gmra.mrb[78].mxu0 %v9187_v51  ;;  %17356 = vmatprep.mubr.f32.mxu1 %v4203_v11  ;;  %v14116_v51 = vld [vmem:[%s27163_s5 + $0x750] sm:$0xff]  ;;  %v14117_v11 = vld [vmem:[%s27163_s5 + $0x758] sm:$0xff] }
 0x484   :  { %18831 = vmatprep.mubr.f32.mxu0 %v9188_v3  ;;  %20648 = vmatpush3.bf16.msra.mxu1 %v20645_v5  ;;  %v9380_v3 = vld [vmem:[#allocation2 + $0x14b] sm:$0xff]  ;;  %v20685_v55 = vpack.c.bf16 %v14117_v11, %v14116_v51  ;;  %v9569_v8 = vld [vmem:[#allocation2 + $0x13c] sm:$0xff]  ;;  %v4621_v51 = vld [vmem:[#allocation2 + $0x74] sm:$0xff] }
 0x485   :  { %21448 = vmatpush3.bf16.msra.mxu0 %v20645_v5  ;;  %20650 = vmatprep.subr.bf16.mxu1 %v20649_v34  ;;  %v9377_v5 = vld [vmem:[#allocation2 + $0x133] sm:$0xff] }
 0x486   :  { %21450 = vmatprep.subr.bf16.mxu0 %v20649_v34  ;;  %17357 = vmatmul.mubr.f32.gmra.mrb[16].mxu1 %v4204_v14  ;;  %v9381_v14 = vld [vmem:[#allocation2 + $0x153] sm:$0xff] }
 0x487   :  { %18832 = vmatmul.mubr.f32.gmra.mrb[80].mxu0 %v9189_v59  ;;  %17359 = vmatprep.mubr.f32.mxu1 %v4205_v43  ;;  %v14118_v59 = vld [vmem:[%s27163_s5 + $0x760] sm:$0xff]  ;;  %v14119_v43 = vld [vmem:[%s27163_s5 + $0x768] sm:$0xff] }
 0x488   :  { %18834 = vmatprep.mubr.f32.mxu0 %v9190_v17  ;;  %20652 = vmatpush3.bf16.msra.mxu1 %v20649_v34  ;;  %v9382_v17 = vld [vmem:[#allocation2 + $0x15b] sm:$0xff]  ;;  %v20689_v36 = vpack.c.bf16 %v14119_v43, %v14118_v59  ;;  %v4623_v59 = vld [vmem:[#allocation2 + $0x84] sm:$0xff] }
 0x489   :  { %21452 = vmatpush3.bf16.msra.mxu0 %v20649_v34  ;;  %20654 = vmatprep.subr.bf16.mxu1 %v20653_v63  ;;  %v4412_v34 = vld [vmem:[#allocation2 + $0x6b] sm:$0xff] }
 0x48a   :  { %21454 = vmatprep.subr.bf16.mxu0 %v20653_v63  ;;  %17360 = vmatmul.mubr.f32.gmra.mrb[18].mxu1 %v4206_v9  ;;  %v9383_v9 = vld [vmem:[#allocation2 + $0x163] sm:$0xff] }
 0x48b   :  { %18835 = vmatmul.mubr.f32.gmra.mrb[82].mxu0 %v9191_v41  ;;  %17362 = vmatprep.mubr.f32.mxu1 %v4207_v20  ;;  %v14120_v41 = vld [vmem:[%s27163_s5 + $0x770] sm:$0xff]  ;;  %v14121_v20 = vld [vmem:[%s27163_s5 + $0x778] sm:$0xff] }
 0x48c   :  { %18837 = vmatprep.mubr.f32.mxu0 %v9192_v26  ;;  %20656 = vmatpush3.bf16.msra.mxu1 %v20653_v63  ;;  %v9384_v26 = vld [vmem:[#allocation2 + $0x16b] sm:$0xff]  ;;  %v20693_v56 = vpack.c.bf16 %v14121_v20, %v14120_v41  ;;  %v4625_v41 = vld [vmem:[#allocation2 + $0x94] sm:$0xff] }
 0x48d   :  { %21456 = vmatpush3.bf16.msra.mxu0 %v20653_v63  ;;  %20658 = vmatprep.subr.bf16.mxu1 %v20657_v12  ;;  %v4414_v63 = vld [vmem:[#allocation2 + $0x7b] sm:$0xff] }
 0x48e   :  { %21458 = vmatprep.subr.bf16.mxu0 %v20657_v12  ;;  %17363 = vmatmul.mubr.f32.gmra.mrb[20].mxu1 %v4208_v38  ;;  %v9385_v38 = vld [vmem:[#allocation2 + $0x173] sm:$0xff] }
 0x48f   :  { %18838 = vmatmul.mubr.f32.gmra.mrb[84].mxu0 %v9193_v22  ;;  %17365 = vmatprep.mubr.f32.mxu1 %v4209_v29  ;;  %v14122_v22 = vld [vmem:[%s27163_s5 + $0x780] sm:$0xff]  ;;  %v14123_v29 = vld [vmem:[%s27163_s5 + $0x788] sm:$0xff] }
 0x490   :  { %18840 = vmatprep.mubr.f32.mxu0 %v9194_v60  ;;  %20660 = vmatpush3.bf16.msra.mxu1 %v20657_v12  ;;  %v9386_v60 = vld [vmem:[#allocation2 + $0x17b] sm:$0xff]  ;;  %v20697_v13 = vpack.c.bf16 %v14123_v29, %v14122_v22  ;;  %v4627_v29 = vld [vmem:[#allocation2 + $0xa4] sm:$0xff] }
 0x491   :  { %21460 = vmatpush3.bf16.msra.mxu0 %v20657_v12  ;;  %20662 = vmatprep.subr.bf16.mxu1 %v20661_v24  ;;  %v4416_v12 = vld [vmem:[#allocation2 + $0x8b] sm:$0xff] }
 0x492   :  { %21462 = vmatprep.subr.bf16.mxu0 %v20661_v24  ;;  %17366 = vmatmul.mubr.f32.gmra.mrb[22].mxu1 %v4210_v16  ;;  %v9387_v16 = vld [vmem:[#allocation2 + $0x183] sm:$0xff] }
 0x493   :  { %18841 = vmatmul.mubr.f32.gmra.mrb[86].mxu0 %v9195_v39  ;;  %17368 = vmatprep.mubr.f32.mxu1 %v4211_v25  ;;  %v4420_v39 = vld [vmem:[#allocation2 + $0xab] sm:$0xff] }
 0x494   :  { %18843 = vmatprep.mubr.f32.mxu0 %v9196_v7  ;;  %20664 = vmatpush3.bf16.msra.mxu1 %v20661_v24  ;;  %v4611_v25 = vld [vmem:[#allocation2 + $0x24] sm:$0xff] }
 0x495   :  { %21464 = vmatpush3.bf16.msra.mxu0 %v20661_v24  ;;  %20666 = vmatprep.subr.bf16.mxu1 %v20665_v37  ;;  %v4418_v24 = vld [vmem:[#allocation2 + $0x9b] sm:$0xff]  ;;  %v9562_v7 = vld [vmem:[#allocation2 + $0x104] sm:$0xff] }
 0x496   :  { %21466 = vmatprep.subr.bf16.mxu0 %v20665_v37  ;;  %17369 = vmatmul.mubr.f32.gmra.mrb[24].mxu1 %v23131_v4  ;;  %v4612_v4 = vld [vmem:[#allocation2 + $0x2c] sm:$0xff] }
 0x497   :  { %18844 = vmatmul.mubr.f32.gmra.mrb[88].mxu0 %v9197_v52  ;;  %17403 = vmatprep.mubr.f32.mxu1 %v4403_v35  ;;  %v14124_v52 = vld [vmem:[%s27163_s5 + $0x790] sm:$0xff]  ;;  %v14125_v35 = vld [vmem:[%s27163_s5 + $0x798] sm:$0xff] }
 0x498   :  { %18878 = vmatprep.mubr.f32.mxu0 %v9371_v46  ;;  %v9563_v46 = vld [vmem:[#allocation2 + $0x10c] sm:$0xff]  ;;  %v20701_v23 = vpack.c.bf16 %v14125_v35, %v14124_v52 }
 0x499   :  { %v14142_v35 = vld [vmem:[%s27163_s5 + $0x820] sm:$0xff] }
 0x49a   :  { %17404 = vmatmul.mubr.f32.vlgmr.msra.gmra.mrb[8].mxu1 %v4404_v0  ;;  %v14127_v0 = vld [vmem:[%s27163_s5 + $0x7a8] sm:$0xff] }
 0x49b   :  { %18879 = vmatmul.mubr.f32.vlgmr.msra.gmra.mrb[72].mxu0 %v9372_v18  ;;  %20668 = vmatpush3.bf16.msra.mxu1 %v20665_v37  ;;  %v4613_v18 = vld [vmem:[#allocation2 + $0x34] sm:$0xff] }
 0x49c   :  { %21468 = vmatpush3.bf16.msra.mxu0 %v20665_v37  ;;  %17406 = vmatprep.mubr.f32.mxu1 %v4405_v30  ;;  %v9388_v37 = vld [vmem:[#allocation2 + $0x18b] sm:$0xff]  ;;  %v20705_v30 = vpack.c.bf16 %v14127_v0, %v14126_v33 }
 0x49d   :  { %18881 = vmatprep.mubr.f32.mxu0 %v9373_v32  ;;  %20670 = vmatprep.subr.bf16.mxu1 %v20669_v57  ;;  %v4615_v32 = vld [vmem:[#allocation2 + $0x44] sm:$0xff] }
 0x49e   :  { %21470 = vmatprep.subr.bf16.mxu0 %v20669_v57  ;;  %17407 = vmatmul.mubr.f32.gmra.mrb[10].mxu1 %v4406_v6  ;;  %v14128_v6 = vld [vmem:[%s27163_s5 + $0x7b0] sm:$0xff]  ;;  %v4822_v33 = vld [vmem:[#allocation2 + $0x48] sm:$0xff] }
 0x49f   :  { %18882 = vmatmul.mubr.f32.gmra.mrb[74].mxu0 %v9374_v31  ;;  %17409 = vmatprep.mubr.f32.mxu1 %v4407_v42  ;;  %v14129_v31 = vld [vmem:[%s27163_s5 + $0x7b8] sm:$0xff] }
 0x4a0   :  { %20672 = vmatpush3.bf16.msra.mxu1 %v20669_v57  ;;  %18884 = vmatprep.mubr.f32.mxu0 %v9375_v44  ;;  %v4616_v42 = vld [vmem:[#allocation2 + $0x4c] sm:$0xff]  ;;  %v20709_v40 = vpack.c.bf16 %v14129_v31, %v14128_v6  ;;  %v4617_v44 = vld [vmem:[#allocation2 + $0x54] sm:$0xff] }
 0x4a1   :  { %21472 = vmatpush3.bf16.msra.mxu0 %v20669_v57  ;;  %20674 = vmatprep.subr.bf16.mxu1 %v20673_v27  ;;  %v9564_v57 = vld [vmem:[#allocation2 + $0x114] sm:$0xff]  ;;  %v9756_v0 = vld [vmem:[#allocation2 + $0x128] sm:$0xff] }
 0x4a2   :  { %21474 = vmatprep.subr.bf16.mxu0 %v20673_v27  ;;  %17410 = vmatmul.mubr.f32.gmra.mrb[12].mxu1 %v4408_v47  ;;  %v14130_v47 = vld [vmem:[%s27163_s5 + $0x7c0] sm:$0xff]  ;;  %v9758_v6 = vld [vmem:[#allocation2 + $0x138] sm:$0xff] }
 0x4a3   :  { %18885 = vmatmul.mubr.f32.gmra.mrb[76].mxu0 %v9376_v45  ;;  %17412 = vmatprep.mubr.f32.mxu1 %v4409_v2  ;;  %v14131_v45 = vld [vmem:[%s27163_s5 + $0x7c8] sm:$0xff] }
 0x4a4   :  { %20676 = vmatpush3.bf16.msra.mxu1 %v20673_v27  ;;  %18887 = vmatprep.mubr.f32.mxu0 %v9377_v5  ;;  %v4618_v2 = vld [vmem:[#allocation2 + $0x5c] sm:$0xff]  ;;  %v20713_v5 = vpack.c.bf16 %v14131_v45, %v14130_v47  ;;  %v9760_v47 = vld [vmem:[#allocation2 + $0x148] sm:$0xff]  ;;  %v4827_v45 = vld [vmem:[#allocation2 + $0x70] sm:$0xff] }
 0x4a5   :  { %21476 = vmatpush3.bf16.msra.mxu0 %v20673_v27  ;;  %20678 = vmatprep.subr.bf16.mxu1 %v20677_v61  ;;  %v9566_v27 = vld [vmem:[#allocation2 + $0x124] sm:$0xff] }
 0x4a6   :  { %21478 = vmatprep.subr.bf16.mxu0 %v20677_v61  ;;  %17413 = vmatmul.mubr.f32.gmra.mrb[14].mxu1 %v4410_v53  ;;  %v9570_v53 = vld [vmem:[#allocation2 + $0x144] sm:$0xff] }
 0x4a7   :  { %18888 = vmatmul.mubr.f32.gmra.mrb[78].mxu0 %v9378_v48  ;;  %17415 = vmatprep.mubr.f32.mxu1 %v4411_v1  ;;  %v14132_v48 = vld [vmem:[%s27163_s5 + $0x7d0] sm:$0xff]  ;;  %v14133_v1 = vld [vmem:[%s27163_s5 + $0x7d8] sm:$0xff] }
 0x4a8   :  { %18890 = vmatprep.mubr.f32.mxu0 %v9379_v10  ;;  %20680 = vmatpush3.bf16.msra.mxu1 %v20677_v61  ;;  %v9571_v10 = vld [vmem:[#allocation2 + $0x14c] sm:$0xff]  ;;  %v20717_v11 = vpack.c.bf16 %v14133_v1, %v14132_v48  ;;  %v4829_v48 = vld [vmem:[#allocation2 + $0x80] sm:$0xff] }
 0x4a9   :  { %21480 = vmatpush3.bf16.msra.mxu0 %v20677_v61  ;;  %20682 = vmatprep.subr.bf16.mxu1 %v20681_v49  ;;  %v9568_v61 = vld [vmem:[#allocation2 + $0x134] sm:$0xff] }
 0x4aa   :  { %21482 = vmatprep.subr.bf16.mxu0 %v20681_v49  ;;  %17416 = vmatmul.mubr.f32.gmra.mrb[16].mxu1 %v4412_v34  ;;  %v9572_v34 = vld [vmem:[#allocation2 + $0x154] sm:$0xff] }
 0x4ab   :  { %18891 = vmatmul.mubr.f32.gmra.mrb[80].mxu0 %v9380_v3  ;;  %17418 = vmatprep.mubr.f32.mxu1 %v4413_v54  ;;  %v14134_v3 = vld [vmem:[%s27163_s5 + $0x7e0] sm:$0xff]  ;;  %v14135_v54 = vld [vmem:[%s27163_s5 + $0x7e8] sm:$0xff] }
 0x4ac   :  { %18893 = vmatprep.mubr.f32.mxu0 %v9381_v14  ;;  %20684 = vmatpush3.bf16.msra.mxu1 %v20681_v49  ;;  %v9573_v14 = vld [vmem:[#allocation2 + $0x15c] sm:$0xff]  ;;  %v20721_v43 = vpack.c.bf16 %v14135_v54, %v14134_v3  ;;  %v4831_v3 = vld [vmem:[#allocation2 + $0x90] sm:$0xff] }
 0x4ad   :  { %21484 = vmatpush3.bf16.msra.mxu0 %v20681_v49  ;;  %20686 = vmatprep.subr.bf16.mxu1 %v20685_v55  ;;  %v4620_v49 = vld [vmem:[#allocation2 + $0x6c] sm:$0xff] }
 0x4ae   :  { %21486 = vmatprep.subr.bf16.mxu0 %v20685_v55  ;;  %17419 = vmatmul.mubr.f32.gmra.mrb[18].mxu1 %v4414_v63  ;;  %v9574_v63 = vld [vmem:[#allocation2 + $0x164] sm:$0xff] }
 0x4af   :  { %18894 = vmatmul.mubr.f32.gmra.mrb[82].mxu0 %v9382_v17  ;;  %17421 = vmatprep.mubr.f32.mxu1 %v4415_v50  ;;  %v14136_v17 = vld [vmem:[%s27163_s5 + $0x7f0] sm:$0xff]  ;;  %v14137_v50 = vld [vmem:[%s27163_s5 + $0x7f8] sm:$0xff] }
 0x4b0   :  { %18896 = vmatprep.mubr.f32.mxu0 %v9383_v9  ;;  %20688 = vmatpush3.bf16.msra.mxu1 %v20685_v55  ;;  %v9575_v9 = vld [vmem:[#allocation2 + $0x16c] sm:$0xff]  ;;  %v20725_v20 = vpack.c.bf16 %v14137_v50, %v14136_v17  ;;  %v4833_v17 = vld [vmem:[#allocation2 + $0xa0] sm:$0xff] }
 0x4b1   :  { %21488 = vmatpush3.bf16.msra.mxu0 %v20685_v55  ;;  %20690 = vmatprep.subr.bf16.mxu1 %v20689_v36  ;;  %v4622_v55 = vld [vmem:[#allocation2 + $0x7c] sm:$0xff] }
 0x4b2   :  { %21490 = vmatprep.subr.bf16.mxu0 %v20689_v36  ;;  %17422 = vmatmul.mubr.f32.gmra.mrb[20].mxu1 %v4416_v12  ;;  %v9576_v12 = vld [vmem:[#allocation2 + $0x174] sm:$0xff] }
 0x4b3   :  { %18897 = vmatmul.mubr.f32.gmra.mrb[84].mxu0 %v9384_v26  ;;  %17424 = vmatprep.mubr.f32.mxu1 %v4417_v19  ;;  %v14138_v26 = vld [vmem:[%s27163_s5 + $0x800] sm:$0xff]  ;;  %v14139_v19 = vld [vmem:[%s27163_s5 + $0x808] sm:$0xff] }
 0x4b4   :  { %18899 = vmatprep.mubr.f32.mxu0 %v9385_v38  ;;  %20692 = vmatpush3.bf16.msra.mxu1 %v20689_v36  ;;  %v9577_v38 = vld [vmem:[#allocation2 + $0x17c] sm:$0xff]  ;;  %v20729_v22 = vpack.c.bf16 %v14139_v19, %v14138_v26  ;;  %v4835_v19 = vld [vmem:[#allocation2 + $0xb0] sm:$0xff] }
 0x4b5   :  { %21492 = vmatpush3.bf16.msra.mxu0 %v20689_v36  ;;  %20694 = vmatprep.subr.bf16.mxu1 %v20693_v56  ;;  %v4624_v36 = vld [vmem:[#allocation2 + $0x8c] sm:$0xff] }
 0x4b6   :  { %21494 = vmatprep.subr.bf16.mxu0 %v20693_v56  ;;  %17425 = vmatmul.mubr.f32.gmra.mrb[22].mxu1 %v4418_v24  ;;  %v9578_v24 = vld [vmem:[#allocation2 + $0x184] sm:$0xff] }
 0x4b7   :  { %18900 = vmatmul.mubr.f32.gmra.mrb[86].mxu0 %v9386_v60  ;;  %17427 = vmatprep.mubr.f32.mxu1 %v4419_v58  ;;  %v4628_v60 = vld [vmem:[#allocation2 + $0xac] sm:$0xff] }
 0x4b8   :  { %18902 = vmatprep.mubr.f32.mxu0 %v9387_v16  ;;  %20696 = vmatpush3.bf16.msra.mxu1 %v20693_v56  ;;  %v4819_v58 = vld [vmem:[#allocation2 + $0x30] sm:$0xff] }
 0x4b9   :  { %21496 = vmatpush3.bf16.msra.mxu0 %v20693_v56  ;;  %20698 = vmatprep.subr.bf16.mxu1 %v20697_v13  ;;  %v4626_v56 = vld [vmem:[#allocation2 + $0x9c] sm:$0xff]  ;;  %v9753_v16 = vld [vmem:[#allocation2 + $0x110] sm:$0xff] }
 0x4ba   :  { %21498 = vmatprep.subr.bf16.mxu0 %v20697_v13  ;;  %17428 = vmatmul.mubr.f32.gmra.mrb[24].mxu1 %v4420_v39  ;;  %v14140_v39 = vld [vmem:[%s27163_s5 + $0x810] sm:$0xff] }
 0x4bb   :  { %18903 = vmatmul.mubr.f32.gmra.mrb[88].mxu0 %v9388_v37  ;;  %17462 = vmatprep.mubr.f32.mxu1 %v4611_v25  ;;  %v14141_v37 = vld [vmem:[%s27163_s5 + $0x818] sm:$0xff]  ;;  %v4820_v25 = vld [vmem:[#allocation2 + $0x38] sm:$0xff] }
 0x4bc   :  { %18937 = vmatprep.mubr.f32.mxu0 %v9562_v7  ;;  %v9754_v7 = vld [vmem:[#allocation2 + $0x118] sm:$0xff]  ;;  %v20733_v52 = vpack.c.bf16 %v14141_v37, %v14140_v39  ;;  %v14158_v39 = vld [vmem:[%s27163_s5 + $0x8a0] sm:$0xff] }
 0x4bd   :  { %v14159_v37 = vld [vmem:[%s27163_s5 + $0x8a8] sm:$0xff] }
 0x4be   :  { %17463 = vmatmul.mubr.f32.vlgmr.msra.gmra.mrb[8].mxu1 %v4612_v4  ;;  %v14143_v4 = vld [vmem:[%s27163_s5 + $0x828] sm:$0xff] }
 0x4bf   :  { %18938 = vmatmul.mubr.f32.vlgmr.msra.gmra.mrb[72].mxu0 %v9563_v46  ;;  %20700 = vmatpush3.bf16.msra.mxu1 %v20697_v13  ;;  %v4821_v46 = vld [vmem:[#allocation2 + $0x40] sm:$0xff] }
 0x4c0   :  { %21500 = vmatpush3.bf16.msra.mxu0 %v20697_v13  ;;  %17465 = vmatprep.mubr.f32.mxu1 %v4613_v18  ;;  %v9579_v13 = vld [vmem:[#allocation2 + $0x18c] sm:$0xff]  ;;  %v20737_v18 = vpack.c.bf16 %v14143_v4, %v14142_v35  ;;  %v20769_v4 = vpack.c.bf16 %v14159_v37, %v14158_v39 }
 0x4c1   :  { %18940 = vmatprep.mubr.f32.mxu0 %v9564_v57  ;;  %20702 = vmatprep.subr.bf16.mxu1 %v20701_v23  ;;  %v4823_v57 = vld [vmem:[#allocation2 + $0x50] sm:$0xff] }
 0x4c2   :  { %21502 = vmatprep.subr.bf16.mxu0 %v20701_v23  ;;  %17466 = vmatmul.mubr.f32.gmra.mrb[10].mxu1 %v4614_v15  ;;  %v14144_v15 = vld [vmem:[%s27163_s5 + $0x830] sm:$0xff]  ;;  %v9947_v35 = vld [vmem:[#allocation2 + $0x129] sm:$0xff] }
 0x4c3   :  { %18941 = vmatmul.mubr.f32.gmra.mrb[74].mxu0 %v9565_v21  ;;  %17468 = vmatprep.mubr.f32.mxu1 %v4615_v32  ;;  %v14145_v21 = vld [vmem:[%s27163_s5 + $0x838] sm:$0xff]  ;;  %v4824_v32 = vld [vmem:[#allocation2 + $0x58] sm:$0xff] }
 0x4c4   :  { %20704 = vmatpush3.bf16.msra.mxu1 %v20701_v23  ;;  %18943 = vmatprep.mubr.f32.mxu0 %v9566_v27  ;;  %v20741_v31 = vpack.c.bf16 %v14145_v21, %v14144_v15  ;;  %v4825_v27 = vld [vmem:[#allocation2 + $0x60] sm:$0xff]  ;;  %v5238_v39 = vld [vmem:[#allocation2 + $0x4a] sm:$0xff] }
 0x4c5   :  { %21504 = vmatpush3.bf16.msra.mxu0 %v20701_v23  ;;  %20706 = vmatprep.subr.bf16.mxu1 %v20705_v30  ;;  %v9755_v23 = vld [vmem:[#allocation2 + $0x120] sm:$0xff]  ;;  %v10138_v37 = vld [vmem:[#allocation2 + $0x12a] sm:$0xff] }
 0x4c6   :  { %21506 = vmatprep.subr.bf16.mxu0 %v20705_v30  ;;  %17469 = vmatmul.mubr.f32.gmra.mrb[12].mxu1 %v4616_v42  ;;  %v14146_v42 = vld [vmem:[%s27163_s5 + $0x840] sm:$0xff]  ;;  %v5033_v21 = vld [vmem:[#allocation2 + $0x61] sm:$0xff] }
 0x4c7   :  { %18944 = vmatmul.mubr.f32.gmra.mrb[76].mxu0 %v9567_v28  ;;  %17471 = vmatprep.mubr.f32.mxu1 %v4617_v44  ;;  %v14147_v28 = vld [vmem:[%s27163_s5 + $0x848] sm:$0xff]  ;;  %v4826_v44 = vld [vmem:[#allocation2 + $0x68] sm:$0xff] }
 0x4c8   :  { %20708 = vmatpush3.bf16.msra.mxu1 %v20705_v30  ;;  %18946 = vmatprep.mubr.f32.mxu0 %v9568_v61  ;;  %v20745_v61 = vpack.c.bf16 %v14147_v28, %v14146_v42  ;;  %v5035_v42 = vld [vmem:[#allocation2 + $0x71] sm:$0xff] }
 0x4c9   :  { %21508 = vmatpush3.bf16.msra.mxu0 %v20705_v30  ;;  %20710 = vmatprep.subr.bf16.mxu1 %v20709_v40  ;;  %v9757_v30 = vld [vmem:[#allocation2 + $0x130] sm:$0xff] }
 0x4ca   :  { %21510 = vmatprep.subr.bf16.mxu0 %v20709_v40  ;;  %17472 = vmatmul.mubr.f32.gmra.mrb[14].mxu1 %v4618_v2  ;;  %v9761_v2 = vld [vmem:[#allocation2 + $0x150] sm:$0xff] }
 0x4cb   :  { %18947 = vmatmul.mubr.f32.gmra.mrb[78].mxu0 %v9569_v8  ;;  %17474 = vmatprep.mubr.f32.mxu1 %v4619_v62  ;;  %v14148_v8 = vld [vmem:[%s27163_s5 + $0x850] sm:$0xff]  ;;  %v14149_v62 = vld [vmem:[%s27163_s5 + $0x858] sm:$0xff] }
 0x4cc   :  { %18949 = vmatprep.mubr.f32.mxu0 %v9570_v53  ;;  %20712 = vmatpush3.bf16.msra.mxu1 %v20709_v40  ;;  %v9762_v53 = vld [vmem:[#allocation2 + $0x158] sm:$0xff]  ;;  %v20749_v1 = vpack.c.bf16 %v14149_v62, %v14148_v8  ;;  %v9954_v62 = vld [vmem:[#allocation2 + $0x161] sm:$0xff] }
 0x4cd   :  { %21512 = vmatpush3.bf16.msra.mxu0 %v20709_v40  ;;  %20714 = vmatprep.subr.bf16.mxu1 %v20713_v5  ;;  %v9759_v40 = vld [vmem:[#allocation2 + $0x140] sm:$0xff] }
 0x4ce   :  { %21514 = vmatprep.subr.bf16.mxu0 %v20713_v5  ;;  %17475 = vmatmul.mubr.f32.gmra.mrb[16].mxu1 %v4620_v49  ;;  %v9763_v49 = vld [vmem:[#allocation2 + $0x160] sm:$0xff] }
 0x4cf   :  { %18950 = vmatmul.mubr.f32.gmra.mrb[80].mxu0 %v9571_v10  ;;  %17477 = vmatprep.mubr.f32.mxu1 %v4621_v51  ;;  %v14150_v10 = vld [vmem:[%s27163_s5 + $0x860] sm:$0xff]  ;;  %v14151_v51 = vld [vmem:[%s27163_s5 + $0x868] sm:$0xff] }
 0x4d0   :  { %18952 = vmatprep.mubr.f32.mxu0 %v9572_v34  ;;  %20716 = vmatpush3.bf16.msra.mxu1 %v20713_v5  ;;  %v9764_v34 = vld [vmem:[#allocation2 + $0x168] sm:$0xff]  ;;  %v20753_v54 = vpack.c.bf16 %v14151_v51, %v14150_v10  ;;  %v9956_v51 = vld [vmem:[#allocation2 + $0x171] sm:$0xff] }
 0x4d1   :  { %21516 = vmatpush3.bf16.msra.mxu0 %v20713_v5  ;;  %20718 = vmatprep.subr.bf16.mxu1 %v20717_v11  ;;  %v4828_v5 = vld [vmem:[#allocation2 + $0x78] sm:$0xff] }
 0x4d2   :  { %21518 = vmatprep.subr.bf16.mxu0 %v20717_v11  ;;  %17478 = vmatmul.mubr.f32.gmra.mrb[18].mxu1 %v4622_v55  ;;  %v9765_v55 = vld [vmem:[#allocation2 + $0x170] sm:$0xff] }
 0x4d3   :  { %18953 = vmatmul.mubr.f32.gmra.mrb[82].mxu0 %v9573_v14  ;;  %17480 = vmatprep.mubr.f32.mxu1 %v4623_v59  ;;  %v14152_v14 = vld [vmem:[%s27163_s5 + $0x870] sm:$0xff]  ;;  %v14153_v59 = vld [vmem:[%s27163_s5 + $0x878] sm:$0xff] }
 0x4d4   :  { %18955 = vmatprep.mubr.f32.mxu0 %v9574_v63  ;;  %20720 = vmatpush3.bf16.msra.mxu1 %v20717_v11  ;;  %v9766_v63 = vld [vmem:[#allocation2 + $0x178] sm:$0xff]  ;;  %v20757_v50 = vpack.c.bf16 %v14153_v59, %v14152_v14  ;;  %v9958_v59 = vld [vmem:[#allocation2 + $0x181] sm:$0xff] }
 0x4d5   :  { %21520 = vmatpush3.bf16.msra.mxu0 %v20717_v11  ;;  %20722 = vmatprep.subr.bf16.mxu1 %v20721_v43  ;;  %v4830_v11 = vld [vmem:[#allocation2 + $0x88] sm:$0xff] }
 0x4d6   :  { %21522 = vmatprep.subr.bf16.mxu0 %v20721_v43  ;;  %17481 = vmatmul.mubr.f32.gmra.mrb[20].mxu1 %v4624_v36  ;;  %v9767_v36 = vld [vmem:[#allocation2 + $0x180] sm:$0xff] }
 0x4d7   :  { %18956 = vmatmul.mubr.f32.gmra.mrb[84].mxu0 %v9575_v9  ;;  %17483 = vmatprep.mubr.f32.mxu1 %v4625_v41  ;;  %v14154_v9 = vld [vmem:[%s27163_s5 + $0x880] sm:$0xff]  ;;  %v14155_v41 = vld [vmem:[%s27163_s5 + $0x888] sm:$0xff] }
 0x4d8   :  { %18958 = vmatprep.mubr.f32.mxu0 %v9576_v12  ;;  %20724 = vmatpush3.bf16.msra.mxu1 %v20721_v43  ;;  %v9768_v12 = vld [vmem:[#allocation2 + $0x188] sm:$0xff]  ;;  %v20761_v26 = vpack.c.bf16 %v14155_v41, %v14154_v9  ;;  %v5043_v9 = vld [vmem:[#allocation2 + $0xb1] sm:$0xff] }
 0x4d9   :  { %21524 = vmatpush3.bf16.msra.mxu0 %v20721_v43  ;;  %20726 = vmatprep.subr.bf16.mxu1 %v20725_v20  ;;  %v4832_v43 = vld [vmem:[#allocation2 + $0x98] sm:$0xff] }
 0x4da   :  { %21526 = vmatprep.subr.bf16.mxu0 %v20725_v20  ;;  %17484 = vmatmul.mubr.f32.gmra.mrb[22].mxu1 %v4626_v56  ;;  %v9769_v56 = vld [vmem:[#allocation2 + $0x190] sm:$0xff] }
 0x4db   :  { %18959 = vmatmul.mubr.f32.gmra.mrb[86].mxu0 %v9577_v38  ;;  %17486 = vmatprep.mubr.f32.mxu1 %v4627_v29  ;;  %v5027_v38 = vld [vmem:[#allocation2 + $0x31] sm:$0xff] }
 0x4dc   :  { %18961 = vmatprep.mubr.f32.mxu0 %v9578_v24  ;;  %20728 = vmatpush3.bf16.msra.mxu1 %v20725_v20  ;;  %v9944_v29 = vld [vmem:[#allocation2 + $0x111] sm:$0xff]  ;;  %v14156_v24 = vld [vmem:[%s27163_s5 + $0x890] sm:$0xff] }
 0x4dd   :  { %21528 = vmatpush3.bf16.msra.mxu0 %v20725_v20  ;;  %20730 = vmatprep.subr.bf16.mxu1 %v20729_v22  ;;  %v4834_v20 = vld [vmem:[#allocation2 + $0xa8] sm:$0xff]  ;;  %v9960_v41 = vld [vmem:[#allocation2 + $0x191] sm:$0xff] }
 0x4de   :  { %21530 = vmatprep.subr.bf16.mxu0 %v20729_v22  ;;  %17487 = vmatmul.mubr.f32.gmra.mrb[24].mxu1 %v4628_v60  ;;  %v14157_v60 = vld [vmem:[%s27163_s5 + $0x898] sm:$0xff] }
 0x4df   :  { %18962 = vmatmul.mubr.f32.gmra.mrb[88].mxu0 %v9579_v13  ;;  %17521 = vmatprep.mubr.f32.mxu1 %v4819_v58  ;;  %v5028_v13 = vld [vmem:[#allocation2 + $0x39] sm:$0xff] }
 0x4e0   :  { %18996 = vmatprep.mubr.f32.mxu0 %v9753_v16  ;;  %v9945_v58 = vld [vmem:[#allocation2 + $0x119] sm:$0xff]  ;;  %v20765_v16 = vpack.c.bf16 %v14157_v60, %v14156_v24  ;;  %v14174_v60 = vld [vmem:[%s27163_s5 + $0x920] sm:$0xff] }
 0x4e2   :  { %17522 = vmatmul.mubr.f32.vlgmr.msra.gmra.mrb[8].mxu1 %v4820_v25  ;;  %v5029_v25 = vld [vmem:[#allocation2 + $0x41] sm:$0xff] }
 0x4e3   :  { %18997 = vmatmul.mubr.f32.vlgmr.msra.gmra.mrb[72].mxu0 %v9754_v7  ;;  %20732 = vmatpush3.bf16.msra.mxu1 %v20729_v22  ;;  %v9946_v7 = vld [vmem:[#allocation2 + $0x121] sm:$0xff] }
 0x4e4   :  { %21532 = vmatpush3.bf16.msra.mxu0 %v20729_v22  ;;  %17524 = vmatprep.mubr.f32.mxu1 %v4821_v46  ;;  %v23132_v22 = vld [vmem:[#allocation2] sm:$0xff]  ;;  %v5031_v46 = vld [vmem:[#allocation2 + $0x51] sm:$0xff] }
 0x4e5   :  { %18999 = vmatprep.mubr.f32.mxu0 %v9755_v23  ;;  %20734 = vmatprep.subr.bf16.mxu1 %v20733_v52  ;;  %v14160_v23 = vld [vmem:[%s27163_s5 + $0x8b0] sm:$0xff] }
 0x4e6   :  { %21534 = vmatprep.subr.bf16.mxu0 %v20733_v52  ;;  %17525 = vmatmul.mubr.f32.gmra.mrb[10].mxu1 %v4822_v33  ;;  %v14161_v33 = vld [vmem:[%s27163_s5 + $0x8b8] sm:$0xff] }
 0x4e7   :  { %19000 = vmatmul.mubr.f32.gmra.mrb[74].mxu0 %v9756_v0  ;;  %17527 = vmatprep.mubr.f32.mxu1 %v4823_v57  ;;  %v9948_v0 = vld [vmem:[#allocation2 + $0x131] sm:$0xff]  ;;  %v9949_v57 = vld [vmem:[#allocation2 + $0x139] sm:$0xff]  ;;  %v20773_v15 = vpack.c.bf16 %v14161_v33, %v14160_v23 }
 0x4e8   :  { %20736 = vmatpush3.bf16.msra.mxu1 %v20733_v52  ;;  %19002 = vmatprep.mubr.f32.mxu0 %v9757_v30  ;;  %v14162_v30 = vld [vmem:[%s27163_s5 + $0x8c0] sm:$0xff]  ;;  %v10140_v23 = vld [vmem:[#allocation2 + $0x13a] sm:$0xff] }
 0x4e9   :  { %21536 = vmatpush3.bf16.msra.mxu0 %v20733_v52  ;;  %20738 = vmatprep.subr.bf16.mxu1 %v20737_v18  ;;  %v5030_v52 = vld [vmem:[#allocation2 + $0x49] sm:$0xff] }
 0x4ea   :  { %21538 = vmatprep.subr.bf16.mxu0 %v20737_v18  ;;  %17528 = vmatmul.mubr.f32.gmra.mrb[12].mxu1 %v4824_v32  ;;  %v14163_v32 = vld [vmem:[%s27163_s5 + $0x8c8] sm:$0xff] }
 0x4eb   :  { %19003 = vmatmul.mubr.f32.gmra.mrb[76].mxu0 %v9758_v6  ;;  %17530 = vmatprep.mubr.f32.mxu1 %v4825_v27  ;;  %v9950_v6 = vld [vmem:[#allocation2 + $0x141] sm:$0xff]  ;;  %v9951_v27 = vld [vmem:[#allocation2 + $0x149] sm:$0xff]  ;;  %v20777_v28 = vpack.c.bf16 %v14163_v32, %v14162_v30  ;;  %v5243_v32 = vld [vmem:[#allocation2 + $0x72] sm:$0xff] }
 0x4ec   :  { %20740 = vmatpush3.bf16.msra.mxu1 %v20737_v18  ;;  %19005 = vmatprep.mubr.f32.mxu0 %v9759_v40  ;;  %v9952_v40 = vld [vmem:[#allocation2 + $0x151] sm:$0xff] }
 0x4ed   :  { %21540 = vmatpush3.bf16.msra.mxu0 %v20737_v18  ;;  %20742 = vmatprep.subr.bf16.mxu1 %v20741_v31  ;;  %v5032_v18 = vld [vmem:[#allocation2 + $0x59] sm:$0xff]  ;;  %v10142_v30 = vld [vmem:[#allocation2 + $0x14a] sm:$0xff] }
 0x4ee   :  { %21542 = vmatprep.subr.bf16.mxu0 %v20741_v31  ;;  %17531 = vmatmul.mubr.f32.gmra.mrb[14].mxu1 %v4826_v44  ;;  %v14164_v44 = vld [vmem:[%s27163_s5 + $0x8d0] sm:$0xff] }
 0x4ef   :  { %19006 = vmatmul.mubr.f32.gmra.mrb[78].mxu0 %v9760_v47  ;;  %17533 = vmatprep.mubr.f32.mxu1 %v4827_v45  ;;  %v14165_v47 = vld [vmem:[%s27163_s5 + $0x8d8] sm:$0xff]  ;;  %v5036_v45 = vld [vmem:[#allocation2 + $0x79] sm:$0xff] }
 0x4f0   :  { %19008 = vmatprep.mubr.f32.mxu0 %v9761_v2  ;;  %20744 = vmatpush3.bf16.msra.mxu1 %v20741_v31  ;;  %v5037_v2 = vld [vmem:[#allocation2 + $0x81] sm:$0xff]  ;;  %v20781_v8 = vpack.c.bf16 %v14165_v47, %v14164_v44 }
 0x4f1   :  { %21544 = vmatpush3.bf16.msra.mxu0 %v20741_v31  ;;  %20746 = vmatprep.subr.bf16.mxu1 %v20745_v61  ;;  %v5034_v31 = vld [vmem:[#allocation2 + $0x69] sm:$0xff] }
 0x4f2   :  { %21546 = vmatprep.subr.bf16.mxu0 %v20745_v61  ;;  %17534 = vmatmul.mubr.f32.gmra.mrb[16].mxu1 %v4828_v5  ;;  %v14166_v5 = vld [vmem:[%s27163_s5 + $0x8e0] sm:$0xff]  ;;  %v5245_v44 = vld [vmem:[#allocation2 + $0x82] sm:$0xff] }
 0x4f3   :  { %19009 = vmatmul.mubr.f32.gmra.mrb[80].mxu0 %v9762_v53  ;;  %17536 = vmatprep.mubr.f32.mxu1 %v4829_v48  ;;  %v14167_v53 = vld [vmem:[%s27163_s5 + $0x8e8] sm:$0xff]  ;;  %v5038_v48 = vld [vmem:[#allocation2 + $0x89] sm:$0xff] }
 0x4f4   :  { %19011 = vmatprep.mubr.f32.mxu0 %v9763_v49  ;;  %20748 = vmatpush3.bf16.msra.mxu1 %v20745_v61  ;;  %v5039_v49 = vld [vmem:[#allocation2 + $0x91] sm:$0xff]  ;;  %v20785_v10 = vpack.c.bf16 %v14167_v53, %v14166_v5 }
 0x4f5   :  { %21548 = vmatpush3.bf16.msra.mxu0 %v20745_v61  ;;  %20750 = vmatprep.subr.bf16.mxu1 %v20749_v1  ;;  %v9953_v61 = vld [vmem:[#allocation2 + $0x159] sm:$0xff] }
 0x4f6   :  { %21550 = vmatprep.subr.bf16.mxu0 %v20749_v1  ;;  %17537 = vmatmul.mubr.f32.gmra.mrb[18].mxu1 %v4830_v11  ;;  %v14168_v11 = vld [vmem:[%s27163_s5 + $0x8f0] sm:$0xff]  ;;  %v5247_v5 = vld [vmem:[#allocation2 + $0x92] sm:$0xff] }
 0x4f7   :  { %19012 = vmatmul.mubr.f32.gmra.mrb[82].mxu0 %v9764_v34  ;;  %17539 = vmatprep.mubr.f32.mxu1 %v4831_v3  ;;  %v14169_v34 = vld [vmem:[%s27163_s5 + $0x8f8] sm:$0xff]  ;;  %v5040_v3 = vld [vmem:[#allocation2 + $0x99] sm:$0xff] }
 0x4f8   :  { %19014 = vmatprep.mubr.f32.mxu0 %v9765_v55  ;;  %20752 = vmatpush3.bf16.msra.mxu1 %v20749_v1  ;;  %v5041_v55 = vld [vmem:[#allocation2 + $0xa1] sm:$0xff]  ;;  %v20789_v14 = vpack.c.bf16 %v14169_v34, %v14168_v11 }
 0x4f9   :  { %21552 = vmatpush3.bf16.msra.mxu0 %v20749_v1  ;;  %20754 = vmatprep.subr.bf16.mxu1 %v20753_v54  ;;  %v9955_v1 = vld [vmem:[#allocation2 + $0x169] sm:$0xff] }
 0x4fa   :  { %21554 = vmatprep.subr.bf16.mxu0 %v20753_v54  ;;  %17540 = vmatmul.mubr.f32.gmra.mrb[20].mxu1 %v4832_v43  ;;  %v14170_v43 = vld [vmem:[%s27163_s5 + $0x900] sm:$0xff]  ;;  %v5249_v11 = vld [vmem:[#allocation2 + $0xa2] sm:$0xff] }
 0x4fb   :  { %19015 = vmatmul.mubr.f32.gmra.mrb[84].mxu0 %v9766_v63  ;;  %17542 = vmatprep.mubr.f32.mxu1 %v4833_v17  ;;  %v14171_v63 = vld [vmem:[%s27163_s5 + $0x908] sm:$0xff]  ;;  %v5042_v17 = vld [vmem:[#allocation2 + $0xa9] sm:$0xff] }
 0x4fc   :  { %19017 = vmatprep.mubr.f32.mxu0 %v9767_v36  ;;  %20756 = vmatpush3.bf16.msra.mxu1 %v20753_v54  ;;  %v20793_v36 = vpack.c.bf16 %v14171_v63, %v14170_v43  ;;  %v5250_v43 = vld [vmem:[#allocation2 + $0xaa] sm:$0xff] }
 0x4fd   :  { %21556 = vmatpush3.bf16.msra.mxu0 %v20753_v54  ;;  %20758 = vmatprep.subr.bf16.mxu1 %v20757_v50  ;;  %v9957_v54 = vld [vmem:[#allocation2 + $0x179] sm:$0xff]  ;;  %v10150_v63 = vld [vmem:[#allocation2 + $0x18a] sm:$0xff] }
 0x4fe   :  { %21558 = vmatprep.subr.bf16.mxu0 %v20757_v50  ;;  %17543 = vmatmul.mubr.f32.gmra.mrb[22].mxu1 %v4834_v20  ;;  %v5044_v20 = vld [vmem:[#allocation2 + $0xb9] sm:$0xff] }
 0x4ff   :  { %19018 = vmatmul.mubr.f32.gmra.mrb[86].mxu0 %v9768_v12  ;;  %17545 = vmatprep.mubr.f32.mxu1 %v4835_v19  ;;  %v9961_v12 = vld [vmem:[#allocation2 + $0x199] sm:$0xff] }
 0x500   :  { %19020 = vmatprep.mubr.f32.mxu0 %v9769_v56  ;;  %20760 = vmatpush3.bf16.msra.mxu1 %v20757_v50  ;;  %v10135_v19 = vld [vmem:[#allocation2 + $0x112] sm:$0xff]  ;;  %v14172_v56 = vld [vmem:[%s27163_s5 + $0x910] sm:$0xff] }
 0x501   :  { %21560 = vmatpush3.bf16.msra.mxu0 %v20757_v50  ;;  %20762 = vmatprep.subr.bf16.mxu1 %v20761_v26  ;;  %v9959_v50 = vld [vmem:[#allocation2 + $0x189] sm:$0xff] }
 0x502   :  { %21562 = vmatprep.subr.bf16.mxu0 %v20761_v26  ;;  %17546 = vmatmul.mubr.f32.gmra.mrb[24].mxu1 %v23132_v22 }
 0x503   :  { %19021 = vmatmul.mubr.f32.gmra.mrb[88].mxu0 %v23132_v22  ;;  %17580 = vmatprep.mubr.f32.mxu1 %v5027_v38  ;;  %v14173_v38 = vld [vmem:[%s27163_s5 + $0x918] sm:$0xff]  ;;  %v5236_v22 = vld [vmem:[#allocation2 + $0x3a] sm:$0xff] }
 0x504   :  { %19055 = vmatprep.mubr.f32.mxu0 %v9944_v29  ;;  %v10136_v29 = vld [vmem:[#allocation2 + $0x11a] sm:$0xff]  ;;  %v20797_v24 = vpack.c.bf16 %v14173_v38, %v14172_v56  ;;  %v14190_v38 = vld [vmem:[%s27163_s5 + $0x9a0] sm:$0xff] }
 0x506   :  { %17581 = vmatmul.mubr.f32.vlgmr.msra.gmra.mrb[8].mxu1 %v5028_v13  ;;  %v14175_v13 = vld [vmem:[%s27163_s5 + $0x928] sm:$0xff] }
 0x507   :  { %19056 = vmatmul.mubr.f32.vlgmr.msra.gmra.mrb[72].mxu0 %v9945_v58  ;;  %20764 = vmatpush3.bf16.msra.mxu1 %v20761_v26  ;;  %v5237_v58 = vld [vmem:[#allocation2 + $0x42] sm:$0xff] }
 0x508   :  { %21564 = vmatpush3.bf16.msra.mxu0 %v20761_v26  ;;  %17583 = vmatprep.mubr.f32.mxu1 %v5029_v25  ;;  %v5235_v26 = vld [vmem:[#allocation2 + $0x32] sm:$0xff]  ;;  %v20801_v25 = vpack.c.bf16 %v14175_v13, %v14174_v60 }
 0x509   :  { %19058 = vmatprep.mubr.f32.mxu0 %v9946_v7  ;;  %20766 = vmatprep.subr.bf16.mxu1 %v20765_v16  ;;  %v5239_v7 = vld [vmem:[#allocation2 + $0x52] sm:$0xff] }
 0x50a   :  { %21566 = vmatprep.subr.bf16.mxu0 %v20765_v16  ;;  %17584 = vmatmul.mubr.f32.gmra.mrb[10].mxu1 %v5030_v52  ;;  %v14176_v52 = vld [vmem:[%s27163_s5 + $0x930] sm:$0xff]  ;;  %v5446_v60 = vld [vmem:[#allocation2 + $0x4b] sm:$0xff] }
 0x50b   :  { %19059 = vmatmul.mubr.f32.gmra.mrb[74].mxu0 %v9947_v35  ;;  %17586 = vmatprep.mubr.f32.mxu1 %v5031_v46  ;;  %v14177_v35 = vld [vmem:[%s27163_s5 + $0x938] sm:$0xff]  ;;  %v5240_v46 = vld [vmem:[#allocation2 + $0x5a] sm:$0xff] }
 0x50c   :  { %20768 = vmatpush3.bf16.msra.mxu1 %v20765_v16  ;;  %19061 = vmatprep.mubr.f32.mxu0 %v9948_v0  ;;  %v20805_v33 = vpack.c.bf16 %v14177_v35, %v14176_v52  ;;  %v5241_v0 = vld [vmem:[#allocation2 + $0x62] sm:$0xff]  ;;  %v10329_v13 = vld [vmem:[#allocation2 + $0x12b] sm:$0xff] }
 0x50d   :  { %21568 = vmatpush3.bf16.msra.mxu0 %v20765_v16  ;;  %20770 = vmatprep.subr.bf16.mxu1 %v20769_v4  ;;  %v10137_v16 = vld [vmem:[#allocation2 + $0x122] sm:$0xff] }
 0x50e   :  { %21570 = vmatprep.subr.bf16.mxu0 %v20769_v4  ;;  %17587 = vmatmul.mubr.f32.gmra.mrb[12].mxu1 %v5032_v18  ;;  %v14178_v18 = vld [vmem:[%s27163_s5 + $0x940] sm:$0xff]  ;;  %v10331_v52 = vld [vmem:[#allocation2 + $0x13b] sm:$0xff] }
 0x50f   :  { %19062 = vmatmul.mubr.f32.gmra.mrb[76].mxu0 %v9949_v57  ;;  %17589 = vmatprep.mubr.f32.mxu1 %v5033_v21  ;;  %v14179_v57 = vld [vmem:[%s27163_s5 + $0x948] sm:$0xff]  ;;  %v5242_v21 = vld [vmem:[#allocation2 + $0x6a] sm:$0xff] }
 0x510   :  { %20772 = vmatpush3.bf16.msra.mxu1 %v20769_v4  ;;  %19064 = vmatprep.mubr.f32.mxu0 %v9950_v6  ;;  %v20809_v6 = vpack.c.bf16 %v14179_v57, %v14178_v18  ;;  %v10333_v18 = vld [vmem:[#allocation2 + $0x14b] sm:$0xff]  ;;  %v5451_v57 = vld [vmem:[#allocation2 + $0x73] sm:$0xff] }
 0x511   :  { %21572 = vmatpush3.bf16.msra.mxu0 %v20769_v4  ;;  %20774 = vmatprep.subr.bf16.mxu1 %v20773_v15  ;;  %v10139_v4 = vld [vmem:[#allocation2 + $0x132] sm:$0xff] }
 0x512   :  { %21574 = vmatprep.subr.bf16.mxu0 %v20773_v15  ;;  %17590 = vmatmul.mubr.f32.gmra.mrb[14].mxu1 %v5034_v31  ;;  %v10143_v31 = vld [vmem:[#allocation2 + $0x152] sm:$0xff] }
 0x513   :  { %19065 = vmatmul.mubr.f32.gmra.mrb[78].mxu0 %v9951_v27  ;;  %17592 = vmatprep.mubr.f32.mxu1 %v5035_v42  ;;  %v14180_v27 = vld [vmem:[%s27163_s5 + $0x950] sm:$0xff]  ;;  %v14181_v42 = vld [vmem:[%s27163_s5 + $0x958] sm:$0xff] }
 0x514   :  { %19067 = vmatprep.mubr.f32.mxu0 %v9952_v40  ;;  %20776 = vmatpush3.bf16.msra.mxu1 %v20773_v15  ;;  %v10144_v40 = vld [vmem:[#allocation2 + $0x15a] sm:$0xff]  ;;  %v20813_v47 = vpack.c.bf16 %v14181_v42, %v14180_v27  ;;  %v5453_v27 = vld [vmem:[#allocation2 + $0x83] sm:$0xff] }
 0x515   :  { %21576 = vmatpush3.bf16.msra.mxu0 %v20773_v15  ;;  %20778 = vmatprep.subr.bf16.mxu1 %v20777_v28  ;;  %v10141_v15 = vld [vmem:[#allocation2 + $0x142] sm:$0xff] }
 0x516   :  { %21578 = vmatprep.subr.bf16.mxu0 %v20777_v28  ;;  %17593 = vmatmul.mubr.f32.gmra.mrb[16].mxu1 %v5036_v45  ;;  %v10145_v45 = vld [vmem:[#allocation2 + $0x162] sm:$0xff] }
 0x517   :  { %19068 = vmatmul.mubr.f32.gmra.mrb[80].mxu0 %v9953_v61  ;;  %17595 = vmatprep.mubr.f32.mxu1 %v5037_v2  ;;  %v14182_v61 = vld [vmem:[%s27163_s5 + $0x960] sm:$0xff]  ;;  %v14183_v2 = vld [vmem:[%s27163_s5 + $0x968] sm:$0xff] }
 0x518   :  { %19070 = vmatprep.mubr.f32.mxu0 %v9954_v62  ;;  %20780 = vmatpush3.bf16.msra.mxu1 %v20777_v28  ;;  %v10146_v62 = vld [vmem:[#allocation2 + $0x16a] sm:$0xff]  ;;  %v20817_v53 = vpack.c.bf16 %v14183_v2, %v14182_v61  ;;  %v5455_v61 = vld [vmem:[#allocation2 + $0x93] sm:$0xff] }
 0x519   :  { %21580 = vmatpush3.bf16.msra.mxu0 %v20777_v28  ;;  %20782 = vmatprep.subr.bf16.mxu1 %v20781_v8  ;;  %v5244_v28 = vld [vmem:[#allocation2 + $0x7a] sm:$0xff] }
 0x51a   :  { %21582 = vmatprep.subr.bf16.mxu0 %v20781_v8  ;;  %17596 = vmatmul.mubr.f32.gmra.mrb[18].mxu1 %v5038_v48  ;;  %v10147_v48 = vld [vmem:[#allocation2 + $0x172] sm:$0xff] }
 0x51b   :  { %19071 = vmatmul.mubr.f32.gmra.mrb[82].mxu0 %v9955_v1  ;;  %17598 = vmatprep.mubr.f32.mxu1 %v5039_v49  ;;  %v14184_v1 = vld [vmem:[%s27163_s5 + $0x970] sm:$0xff]  ;;  %v14185_v49 = vld [vmem:[%s27163_s5 + $0x978] sm:$0xff] }
 0x51c   :  { %19073 = vmatprep.mubr.f32.mxu0 %v9956_v51  ;;  %20784 = vmatpush3.bf16.msra.mxu1 %v20781_v8  ;;  %v10148_v51 = vld [vmem:[#allocation2 + $0x17a] sm:$0xff]  ;;  %v20821_v34 = vpack.c.bf16 %v14185_v49, %v14184_v1  ;;  %v5457_v1 = vld [vmem:[#allocation2 + $0xa3] sm:$0xff] }
 0x51d   :  { %21584 = vmatpush3.bf16.msra.mxu0 %v20781_v8  ;;  %20786 = vmatprep.subr.bf16.mxu1 %v20785_v10  ;;  %v5246_v8 = vld [vmem:[#allocation2 + $0x8a] sm:$0xff] }
 0x51e   :  { %21586 = vmatprep.subr.bf16.mxu0 %v20785_v10  ;;  %17599 = vmatmul.mubr.f32.gmra.mrb[20].mxu1 %v5040_v3  ;;  %v10149_v3 = vld [vmem:[#allocation2 + $0x182] sm:$0xff] }
 0x51f   :  { %19074 = vmatmul.mubr.f32.gmra.mrb[84].mxu0 %v9957_v54  ;;  %17601 = vmatprep.mubr.f32.mxu1 %v5041_v55  ;;  %v14186_v54 = vld [vmem:[%s27163_s5 + $0x980] sm:$0xff]  ;;  %v14187_v55 = vld [vmem:[%s27163_s5 + $0x988] sm:$0xff] }
 0x520   :  { %19076 = vmatprep.mubr.f32.mxu0 %v9958_v59  ;;  %20788 = vmatpush3.bf16.msra.mxu1 %v20785_v10  ;;  %v10151_v59 = vld [vmem:[#allocation2 + $0x192] sm:$0xff] }
 0x521   :  { %21588 = vmatpush3.bf16.msra.mxu0 %v20785_v10  ;;  %20790 = vmatprep.subr.bf16.mxu1 %v20789_v14  ;;  %v5248_v10 = vld [vmem:[#allocation2 + $0x9a] sm:$0xff] }
 0x522   :  { %21590 = vmatprep.subr.bf16.mxu0 %v20789_v14  ;;  %17602 = vmatmul.mubr.f32.gmra.mrb[22].mxu1 %v5042_v17  ;;  %v20825_v17 = vpack.c.bf16 %v14187_v55, %v14186_v54  ;;  %v5458_v54 = vld [vmem:[#allocation2 + $0xab] sm:$0xff] }
 0x523   :  { %19077 = vmatmul.mubr.f32.gmra.mrb[86].mxu0 %v9959_v50  ;;  %17604 = vmatprep.mubr.f32.mxu1 %v5043_v9  ;;  %v5252_v50 = vld [vmem:[#allocation2 + $0xba] sm:$0xff]  ;;  %v10341_v55 = vld [vmem:[#allocation2 + $0x18b] sm:$0xff] }
 0x524   :  { %19079 = vmatprep.mubr.f32.mxu0 %v9960_v41  ;;  %20792 = vmatpush3.bf16.msra.mxu1 %v20789_v14  ;;  %v5443_v9 = vld [vmem:[#allocation2 + $0x33] sm:$0xff] }
 0x525   :  { %21592 = vmatpush3.bf16.msra.mxu0 %v20789_v14  ;;  %20794 = vmatprep.subr.bf16.mxu1 %v20793_v36  ;;  %v5251_v14 = vld [vmem:[#allocation2 + $0xb2] sm:$0xff] }
 0x526   :  { %21594 = vmatprep.subr.bf16.mxu0 %v20793_v36  ;;  %17605 = vmatmul.mubr.f32.gmra.mrb[24].mxu1 %v5044_v20  ;;  %v10326_v41 = vld [vmem:[#allocation2 + $0x113] sm:$0xff]  ;;  %v14188_v20 = vld [vmem:[%s27163_s5 + $0x990] sm:$0xff] }
 0x527   :  { %19080 = vmatmul.mubr.f32.gmra.mrb[88].mxu0 %v9961_v12  ;;  %17639 = vmatprep.mubr.f32.mxu1 %v5235_v26  ;;  %v14189_v12 = vld [vmem:[%s27163_s5 + $0x998] sm:$0xff]  ;;  %v5444_v26 = vld [vmem:[#allocation2 + $0x3b] sm:$0xff] }
 0x528   :  { %19114 = vmatprep.mubr.f32.mxu0 %v10135_v19  ;;  %v10327_v19 = vld [vmem:[#allocation2 + $0x11b] sm:$0xff]  ;;  %v20829_v56 = vpack.c.bf16 %v14189_v12, %v14188_v20  ;;  %v14206_v12 = vld [vmem:[%s27163_s5 + $0xa20] sm:$0xff] }
 0x52a   :  { %17640 = vmatmul.mubr.f32.vlgmr.msra.gmra.mrb[8].mxu1 %v5236_v22  ;;  %v14191_v22 = vld [vmem:[%s27163_s5 + $0x9a8] sm:$0xff] }
 0x52b   :  { %19115 = vmatmul.mubr.f32.vlgmr.msra.gmra.mrb[72].mxu0 %v10136_v29  ;;  %20796 = vmatpush3.bf16.msra.mxu1 %v20793_v36  ;;  %v5445_v29 = vld [vmem:[#allocation2 + $0x43] sm:$0xff] }
 0x52c   :  { %21596 = vmatpush3.bf16.msra.mxu0 %v20793_v36  ;;  %17642 = vmatprep.mubr.f32.mxu1 %v5237_v58  ;;  %v10152_v36 = vld [vmem:[#allocation2 + $0x19a] sm:$0xff]  ;;  %v20833_v58 = vpack.c.bf16 %v14191_v22, %v14190_v38  ;;  %v5654_v38 = vld [vmem:[#allocation2 + $0x4c] sm:$0xff] }
 0x52d   :  { %19117 = vmatprep.mubr.f32.mxu0 %v10137_v16  ;;  %20798 = vmatprep.subr.bf16.mxu1 %v20797_v24  ;;  %v5447_v16 = vld [vmem:[#allocation2 + $0x53] sm:$0xff] }
 0x52e   :  { %21598 = vmatprep.subr.bf16.mxu0 %v20797_v24  ;;  %17643 = vmatmul.mubr.f32.gmra.mrb[10].mxu1 %v5238_v39  ;;  %v14192_v39 = vld [vmem:[%s27163_s5 + $0x9b0] sm:$0xff]  ;;  %v10520_v22 = vld [vmem:[#allocation2 + $0x12c] sm:$0xff] }
 0x52f   :  { %19118 = vmatmul.mubr.f32.gmra.mrb[74].mxu0 %v10138_v37  ;;  %17645 = vmatprep.mubr.f32.mxu1 %v5239_v7  ;;  %v14193_v37 = vld [vmem:[%s27163_s5 + $0x9b8] sm:$0xff]  ;;  %v5448_v7 = vld [vmem:[#allocation2 + $0x5b] sm:$0xff] }
 0x530   :  { %20800 = vmatpush3.bf16.msra.mxu1 %v20797_v24  ;;  %19120 = vmatprep.mubr.f32.mxu0 %v10139_v4  ;;  %v20837_v35 = vpack.c.bf16 %v14193_v37, %v14192_v39  ;;  %v5449_v4 = vld [vmem:[#allocation2 + $0x63] sm:$0xff] }
 0x531   :  { %21600 = vmatpush3.bf16.msra.mxu0 %v20797_v24  ;;  %20802 = vmatprep.subr.bf16.mxu1 %v20801_v25  ;;  %v10328_v24 = vld [vmem:[#allocation2 + $0x123] sm:$0xff] }
 0x532   :  { %21602 = vmatprep.subr.bf16.mxu0 %v20801_v25  ;;  %17646 = vmatmul.mubr.f32.gmra.mrb[12].mxu1 %v5240_v46  ;;  %v14194_v46 = vld [vmem:[%s27163_s5 + $0x9c0] sm:$0xff]  ;;  %v10522_v39 = vld [vmem:[#allocation2 + $0x13c] sm:$0xff] }
 0x533   :  { %19121 = vmatmul.mubr.f32.gmra.mrb[76].mxu0 %v10140_v23  ;;  %17648 = vmatprep.mubr.f32.mxu1 %v5241_v0  ;;  %v14195_v23 = vld [vmem:[%s27163_s5 + $0x9c8] sm:$0xff]  ;;  %v5450_v0 = vld [vmem:[#allocation2 + $0x6b] sm:$0xff] }
 0x534   :  { %20804 = vmatpush3.bf16.msra.mxu1 %v20801_v25  ;;  %19123 = vmatprep.mubr.f32.mxu0 %v10141_v15  ;;  %v20841_v15 = vpack.c.bf16 %v14195_v23, %v14194_v46  ;;  %v10524_v46 = vld [vmem:[#allocation2 + $0x14c] sm:$0xff]  ;;  %v5659_v23 = vld [vmem:[#allocation2 + $0x74] sm:$0xff] }
 0x535   :  { %21604 = vmatpush3.bf16.msra.mxu0 %v20801_v25  ;;  %20806 = vmatprep.subr.bf16.mxu1 %v20805_v33  ;;  %v10330_v25 = vld [vmem:[#allocation2 + $0x133] sm:$0xff] }
 0x536   :  { %21606 = vmatprep.subr.bf16.mxu0 %v20805_v33  ;;  %17649 = vmatmul.mubr.f32.gmra.mrb[14].mxu1 %v5242_v21  ;;  %v10334_v21 = vld [vmem:[#allocation2 + $0x153] sm:$0xff] }
 0x537   :  { %19124 = vmatmul.mubr.f32.gmra.mrb[78].mxu0 %v10142_v30  ;;  %17651 = vmatprep.mubr.f32.mxu1 %v5243_v32  ;;  %v14196_v30 = vld [vmem:[%s27163_s5 + $0x9d0] sm:$0xff]  ;;  %v14197_v32 = vld [vmem:[%s27163_s5 + $0x9d8] sm:$0xff] }
 0x538   :  { %19126 = vmatprep.mubr.f32.mxu0 %v10143_v31  ;;  %20808 = vmatpush3.bf16.msra.mxu1 %v20805_v33  ;;  %v10335_v31 = vld [vmem:[#allocation2 + $0x15b] sm:$0xff]  ;;  %v20845_v42 = vpack.c.bf16 %v14197_v32, %v14196_v30  ;;  %v5661_v30 = vld [vmem:[#allocation2 + $0x84] sm:$0xff] }
 0x539   :  { %21608 = vmatpush3.bf16.msra.mxu0 %v20805_v33  ;;  %20810 = vmatprep.subr.bf16.mxu1 %v20809_v6  ;;  %v10332_v33 = vld [vmem:[#allocation2 + $0x143] sm:$0xff] }
 0x53a   :  { %21610 = vmatprep.subr.bf16.mxu0 %v20809_v6  ;;  %17652 = vmatmul.mubr.f32.gmra.mrb[16].mxu1 %v5244_v28  ;;  %v10336_v28 = vld [vmem:[#allocation2 + $0x163] sm:$0xff] }
 0x53b   :  { %19127 = vmatmul.mubr.f32.gmra.mrb[80].mxu0 %v10144_v40  ;;  %17654 = vmatprep.mubr.f32.mxu1 %v5245_v44  ;;  %v14198_v40 = vld [vmem:[%s27163_s5 + $0x9e0] sm:$0xff]  ;;  %v14199_v44 = vld [vmem:[%s27163_s5 + $0x9e8] sm:$0xff] }
 0x53c   :  { %19129 = vmatprep.mubr.f32.mxu0 %v10145_v45  ;;  %20812 = vmatpush3.bf16.msra.mxu1 %v20809_v6  ;;  %v10337_v45 = vld [vmem:[#allocation2 + $0x16b] sm:$0xff]  ;;  %v20849_v2 = vpack.c.bf16 %v14199_v44, %v14198_v40  ;;  %v5663_v40 = vld [vmem:[#allocation2 + $0x94] sm:$0xff] }
 0x53d   :  { %21612 = vmatpush3.bf16.msra.mxu0 %v20809_v6  ;;  %20814 = vmatprep.subr.bf16.mxu1 %v20813_v47  ;;  %v5452_v6 = vld [vmem:[#allocation2 + $0x7b] sm:$0xff] }
 0x53e   :  { %21614 = vmatprep.subr.bf16.mxu0 %v20813_v47  ;;  %17655 = vmatmul.mubr.f32.gmra.mrb[18].mxu1 %v5246_v8  ;;  %v10338_v8 = vld [vmem:[#allocation2 + $0x173] sm:$0xff] }
 0x53f   :  { %19130 = vmatmul.mubr.f32.gmra.mrb[82].mxu0 %v10146_v62  ;;  %17657 = vmatprep.mubr.f32.mxu1 %v5247_v5  ;;  %v14200_v62 = vld [vmem:[%s27163_s5 + $0x9f0] sm:$0xff]  ;;  %v14201_v5 = vld [vmem:[%s27163_s5 + $0x9f8] sm:$0xff] }
 0x540   :  { %19132 = vmatprep.mubr.f32.mxu0 %v10147_v48  ;;  %20816 = vmatpush3.bf16.msra.mxu1 %v20813_v47  ;;  %v10339_v48 = vld [vmem:[#allocation2 + $0x17b] sm:$0xff]  ;;  %v20853_v49 = vpack.c.bf16 %v14201_v5, %v14200_v62  ;;  %v5665_v62 = vld [vmem:[#allocation2 + $0xa4] sm:$0xff] }
 0x541   :  { %21616 = vmatpush3.bf16.msra.mxu0 %v20813_v47  ;;  %20818 = vmatprep.subr.bf16.mxu1 %v20817_v53  ;;  %v5454_v47 = vld [vmem:[#allocation2 + $0x8b] sm:$0xff] }
 0x542   :  { %21618 = vmatprep.subr.bf16.mxu0 %v20817_v53  ;;  %17658 = vmatmul.mubr.f32.gmra.mrb[20].mxu1 %v5248_v10  ;;  %v10340_v10 = vld [vmem:[#allocation2 + $0x183] sm:$0xff] }
 0x543   :  { %19133 = vmatmul.mubr.f32.gmra.mrb[84].mxu0 %v10148_v51  ;;  %17660 = vmatprep.mubr.f32.mxu1 %v5249_v11  ;;  %v14202_v51 = vld [vmem:[%s27163_s5 + $0xa00] sm:$0xff]  ;;  %v14203_v11 = vld [vmem:[%s27163_s5 + $0xa08] sm:$0xff] }
 0x544   :  { %19135 = vmatprep.mubr.f32.mxu0 %v10149_v3  ;;  %20820 = vmatpush3.bf16.msra.mxu1 %v20817_v53  ;;  %v10342_v3 = vld [vmem:[#allocation2 + $0x193] sm:$0xff] }
 0x545   :  { %21620 = vmatpush3.bf16.msra.mxu0 %v20817_v53  ;;  %20822 = vmatprep.subr.bf16.mxu1 %v20821_v34  ;;  %v5456_v53 = vld [vmem:[#allocation2 + $0x9b] sm:$0xff] }
 0x546   :  { %21622 = vmatprep.subr.bf16.mxu0 %v20821_v34  ;;  %17661 = vmatmul.mubr.f32.gmra.mrb[22].mxu1 %v5250_v43  ;;  %v10343_v43 = vld [vmem:[#allocation2 + $0x19b] sm:$0xff] }
 0x547   :  { %19136 = vmatmul.mubr.f32.gmra.mrb[86].mxu0 %v10150_v63  ;;  %17663 = vmatprep.mubr.f32.mxu1 %v5251_v14  ;;  %v20857_v14 = vpack.c.bf16 %v14203_v11, %v14202_v51  ;;  %v5651_v63 = vld [vmem:[#allocation2 + $0x34] sm:$0xff]  ;;  %v5666_v51 = vld [vmem:[#allocation2 + $0xac] sm:$0xff] }
 0x548   :  { %19138 = vmatprep.mubr.f32.mxu0 %v10151_v59  ;;  %20824 = vmatpush3.bf16.msra.mxu1 %v20821_v34  ;;  %v5460_v59 = vld [vmem:[#allocation2 + $0xbb] sm:$0xff]  ;;  %v10532_v11 = vld [vmem:[#allocation2 + $0x18c] sm:$0xff] }
 0x549   :  { %21624 = vmatpush3.bf16.msra.mxu0 %v20821_v34  ;;  %20826 = vmatprep.subr.bf16.mxu1 %v20825_v17  ;;  %v5459_v34 = vld [vmem:[#allocation2 + $0xb3] sm:$0xff] }
 0x54a   :  { %21626 = vmatprep.subr.bf16.mxu0 %v20825_v17  ;;  %17664 = vmatmul.mubr.f32.gmra.mrb[24].mxu1 %v5252_v50  ;;  %v14204_v50 = vld [vmem:[%s27163_s5 + $0xa10] sm:$0xff] }
 0x54b   :  { %19139 = vmatmul.mubr.f32.gmra.mrb[88].mxu0 %v10152_v36  ;;  %17698 = vmatprep.mubr.f32.mxu1 %v5443_v9  ;;  %v14205_v36 = vld [vmem:[%s27163_s5 + $0xa18] sm:$0xff]  ;;  %v5652_v9 = vld [vmem:[#allocation2 + $0x3c] sm:$0xff] }
 0x54c   :  { %19173 = vmatprep.mubr.f32.mxu0 %v10326_v41  ;;  %v10518_v41 = vld [vmem:[#allocation2 + $0x11c] sm:$0xff]  ;;  %v20861_v20 = vpack.c.bf16 %v14205_v36, %v14204_v50  ;;  %v14222_v36 = vld [vmem:[%s27163_s5 + $0xaa0] sm:$0xff] }
 0x54e   :  { %17699 = vmatmul.mubr.f32.vlgmr.msra.gmra.mrb[8].mxu1 %v5444_v26  ;;  %v14207_v26 = vld [vmem:[%s27163_s5 + $0xa28] sm:$0xff] }
 0x54f   :  { %19174 = vmatmul.mubr.f32.vlgmr.msra.gmra.mrb[72].mxu0 %v10327_v19  ;;  %20828 = vmatpush3.bf16.msra.mxu1 %v20825_v17  ;;  %v5653_v19 = vld [vmem:[#allocation2 + $0x44] sm:$0xff] }
 0x550   :  { %21628 = vmatpush3.bf16.msra.mxu0 %v20825_v17  ;;  %17701 = vmatprep.mubr.f32.mxu1 %v5445_v29  ;;  %v10517_v17 = vld [vmem:[#allocation2 + $0x114] sm:$0xff]  ;;  %v20865_v29 = vpack.c.bf16 %v14207_v26, %v14206_v12 }
 0x551   :  { %19176 = vmatprep.mubr.f32.mxu0 %v10328_v24  ;;  %20830 = vmatprep.subr.bf16.mxu1 %v20829_v56  ;;  %v5655_v24 = vld [vmem:[#allocation2 + $0x54] sm:$0xff] }
 0x552   :  { %21630 = vmatprep.subr.bf16.mxu0 %v20829_v56  ;;  %17702 = vmatmul.mubr.f32.gmra.mrb[10].mxu1 %v5446_v60  ;;  %v14208_v60 = vld [vmem:[%s27163_s5 + $0xa30] sm:$0xff]  ;;  %v5862_v12 = vld [vmem:[#allocation2 + $0x58] sm:$0xff] }
 0x553   :  { %19177 = vmatmul.mubr.f32.gmra.mrb[74].mxu0 %v10329_v13  ;;  %17704 = vmatprep.mubr.f32.mxu1 %v5447_v16  ;;  %v14209_v13 = vld [vmem:[%s27163_s5 + $0xa38] sm:$0xff]  ;;  %v5656_v16 = vld [vmem:[#allocation2 + $0x5c] sm:$0xff] }
 0x554   :  { %20832 = vmatpush3.bf16.msra.mxu1 %v20829_v56  ;;  %19179 = vmatprep.mubr.f32.mxu0 %v10330_v25  ;;  %v20869_v37 = vpack.c.bf16 %v14209_v13, %v14208_v60  ;;  %v5657_v25 = vld [vmem:[#allocation2 + $0x64] sm:$0xff]  ;;  %v10711_v26 = vld [vmem:[#allocation2 + $0x138] sm:$0xff] }
 0x555   :  { %21632 = vmatpush3.bf16.msra.mxu0 %v20829_v56  ;;  %20834 = vmatprep.subr.bf16.mxu1 %v20833_v58  ;;  %v10519_v56 = vld [vmem:[#allocation2 + $0x124] sm:$0xff] }
 0x556   :  { %21634 = vmatprep.subr.bf16.mxu0 %v20833_v58  ;;  %17705 = vmatmul.mubr.f32.gmra.mrb[12].mxu1 %v5448_v7  ;;  %v14210_v7 = vld [vmem:[%s27163_s5 + $0xa40] sm:$0xff]  ;;  %v10713_v60 = vld [vmem:[#allocation2 + $0x148] sm:$0xff] }
 0x557   :  { %19180 = vmatmul.mubr.f32.gmra.mrb[76].mxu0 %v10331_v52  ;;  %17707 = vmatprep.mubr.f32.mxu1 %v5449_v4  ;;  %v14211_v52 = vld [vmem:[%s27163_s5 + $0xa48] sm:$0xff]  ;;  %v5658_v4 = vld [vmem:[#allocation2 + $0x6c] sm:$0xff] }
 0x558   :  { %20836 = vmatpush3.bf16.msra.mxu1 %v20833_v58  ;;  %19182 = vmatprep.mubr.f32.mxu0 %v10332_v33  ;;  %v20873_v33 = vpack.c.bf16 %v14211_v52, %v14210_v7  ;;  %v10715_v7 = vld [vmem:[#allocation2 + $0x158] sm:$0xff]  ;;  %v5867_v52 = vld [vmem:[#allocation2 + $0x80] sm:$0xff] }
 0x559   :  { %21636 = vmatpush3.bf16.msra.mxu0 %v20833_v58  ;;  %20838 = vmatprep.subr.bf16.mxu1 %v20837_v35  ;;  %v10521_v58 = vld [vmem:[#allocation2 + $0x134] sm:$0xff] }
 0x55a   :  { %21638 = vmatprep.subr.bf16.mxu0 %v20837_v35  ;;  %17708 = vmatmul.mubr.f32.gmra.mrb[14].mxu1 %v5450_v0  ;;  %v10525_v0 = vld [vmem:[#allocation2 + $0x154] sm:$0xff] }
 0x55b   :  { %19183 = vmatmul.mubr.f32.gmra.mrb[78].mxu0 %v10333_v18  ;;  %17710 = vmatprep.mubr.f32.mxu1 %v5451_v57  ;;  %v14212_v18 = vld [vmem:[%s27163_s5 + $0xa50] sm:$0xff]  ;;  %v14213_v57 = vld [vmem:[%s27163_s5 + $0xa58] sm:$0xff] }
 0x55c   :  { %19185 = vmatprep.mubr.f32.mxu0 %v10334_v21  ;;  %20840 = vmatpush3.bf16.msra.mxu1 %v20837_v35  ;;  %v10526_v21 = vld [vmem:[#allocation2 + $0x15c] sm:$0xff]  ;;  %v20877_v32 = vpack.c.bf16 %v14213_v57, %v14212_v18  ;;  %v5869_v18 = vld [vmem:[#allocation2 + $0x90] sm:$0xff] }
 0x55d   :  { %21640 = vmatpush3.bf16.msra.mxu0 %v20837_v35  ;;  %20842 = vmatprep.subr.bf16.mxu1 %v20841_v15  ;;  %v10523_v35 = vld [vmem:[#allocation2 + $0x144] sm:$0xff] }
 0x55e   :  { %21642 = vmatprep.subr.bf16.mxu0 %v20841_v15  ;;  %17711 = vmatmul.mubr.f32.gmra.mrb[16].mxu1 %v5452_v6  ;;  %v10527_v6 = vld [vmem:[#allocation2 + $0x164] sm:$0xff] }
 0x55f   :  { %19186 = vmatmul.mubr.f32.gmra.mrb[80].mxu0 %v10335_v31  ;;  %17713 = vmatprep.mubr.f32.mxu1 %v5453_v27  ;;  %v14214_v31 = vld [vmem:[%s27163_s5 + $0xa60] sm:$0xff]  ;;  %v14215_v27 = vld [vmem:[%s27163_s5 + $0xa68] sm:$0xff] }
 0x560   :  { %19188 = vmatprep.mubr.f32.mxu0 %v10336_v28  ;;  %20844 = vmatpush3.bf16.msra.mxu1 %v20841_v15  ;;  %v10528_v28 = vld [vmem:[#allocation2 + $0x16c] sm:$0xff]  ;;  %v20881_v44 = vpack.c.bf16 %v14215_v27, %v14214_v31  ;;  %v5871_v31 = vld [vmem:[#allocation2 + $0xa0] sm:$0xff] }
 0x561   :  { %21644 = vmatpush3.bf16.msra.mxu0 %v20841_v15  ;;  %20846 = vmatprep.subr.bf16.mxu1 %v20845_v42  ;;  %v5660_v15 = vld [vmem:[#allocation2 + $0x7c] sm:$0xff] }
 0x562   :  { %21646 = vmatprep.subr.bf16.mxu0 %v20845_v42  ;;  %17714 = vmatmul.mubr.f32.gmra.mrb[18].mxu1 %v5454_v47  ;;  %v10529_v47 = vld [vmem:[#allocation2 + $0x174] sm:$0xff] }
 0x563   :  { %19189 = vmatmul.mubr.f32.gmra.mrb[82].mxu0 %v10337_v45  ;;  %17716 = vmatprep.mubr.f32.mxu1 %v5455_v61  ;;  %v14216_v45 = vld [vmem:[%s27163_s5 + $0xa70] sm:$0xff]  ;;  %v14217_v61 = vld [vmem:[%s27163_s5 + $0xa78] sm:$0xff] }
 0x564   :  { %19191 = vmatprep.mubr.f32.mxu0 %v10338_v8  ;;  %20848 = vmatpush3.bf16.msra.mxu1 %v20845_v42  ;;  %v10530_v8 = vld [vmem:[#allocation2 + $0x17c] sm:$0xff]  ;;  %v20885_v5 = vpack.c.bf16 %v14217_v61, %v14216_v45  ;;  %v5873_v45 = vld [vmem:[#allocation2 + $0xb0] sm:$0xff] }
 0x565   :  { %21648 = vmatpush3.bf16.msra.mxu0 %v20845_v42  ;;  %20850 = vmatprep.subr.bf16.mxu1 %v20849_v2  ;;  %v5662_v42 = vld [vmem:[#allocation2 + $0x8c] sm:$0xff] }
 0x566   :  { %21650 = vmatprep.subr.bf16.mxu0 %v20849_v2  ;;  %17717 = vmatmul.mubr.f32.gmra.mrb[20].mxu1 %v5456_v53  ;;  %v10531_v53 = vld [vmem:[#allocation2 + $0x184] sm:$0xff] }
 0x567   :  { %19192 = vmatmul.mubr.f32.gmra.mrb[84].mxu0 %v10339_v48  ;;  %17719 = vmatprep.mubr.f32.mxu1 %v5457_v1  ;;  %v14218_v48 = vld [vmem:[%s27163_s5 + $0xa80] sm:$0xff]  ;;  %v14219_v1 = vld [vmem:[%s27163_s5 + $0xa88] sm:$0xff] }
 0x568   :  { %19194 = vmatprep.mubr.f32.mxu0 %v10340_v10  ;;  %20852 = vmatpush3.bf16.msra.mxu1 %v20849_v2  ;;  %v10533_v10 = vld [vmem:[#allocation2 + $0x194] sm:$0xff] }
 0x569   :  { %21652 = vmatpush3.bf16.msra.mxu0 %v20849_v2  ;;  %20854 = vmatprep.subr.bf16.mxu1 %v20853_v49  ;;  %v5664_v2 = vld [vmem:[#allocation2 + $0x9c] sm:$0xff] }
 0x56a   :  { %21654 = vmatprep.subr.bf16.mxu0 %v20853_v49  ;;  %17720 = vmatmul.mubr.f32.gmra.mrb[22].mxu1 %v5458_v54  ;;  %v10534_v54 = vld [vmem:[#allocation2 + $0x19c] sm:$0xff] }
 0x56b   :  { %19195 = vmatmul.mubr.f32.gmra.mrb[86].mxu0 %v10341_v55  ;;  %17722 = vmatprep.mubr.f32.mxu1 %v5459_v34  ;;  %v20889_v34 = vpack.c.bf16 %v14219_v1, %v14218_v48  ;;  %v5859_v55 = vld [vmem:[#allocation2 + $0x40] sm:$0xff] }
 0x56c   :  { %19197 = vmatprep.mubr.f32.mxu0 %v10342_v3  ;;  %20856 = vmatpush3.bf16.msra.mxu1 %v20853_v49  ;;  %v5668_v3 = vld [vmem:[#allocation2 + $0xbc] sm:$0xff] }
 0x56d   :  { %21656 = vmatpush3.bf16.msra.mxu0 %v20853_v49  ;;  %20858 = vmatprep.subr.bf16.mxu1 %v20857_v14  ;;  %v5667_v49 = vld [vmem:[#allocation2 + $0xb4] sm:$0xff]  ;;  %v6067_v48 = vld [vmem:[#allocation2 + $0x41] sm:$0xff] }
 0x56e   :  { %21658 = vmatprep.subr.bf16.mxu0 %v20857_v14  ;;  %17723 = vmatmul.mubr.f32.gmra.mrb[24].mxu1 %v5460_v59  ;;  %v14220_v59 = vld [vmem:[%s27163_s5 + $0xa90] sm:$0xff] }
 0x56f   :  { %19198 = vmatmul.mubr.f32.gmra.mrb[88].mxu0 %v10343_v43  ;;  %17757 = vmatprep.mubr.f32.mxu1 %v5651_v63  ;;  %v14221_v43 = vld [vmem:[%s27163_s5 + $0xa98] sm:$0xff] }
 0x570   :  { %19232 = vmatprep.mubr.f32.mxu0 %v10517_v17  ;;  %v5860_v63 = vld [vmem:[#allocation2 + $0x48] sm:$0xff]  ;;  %v20893_v50 = vpack.c.bf16 %v14221_v43, %v14220_v59  ;;  %v6070_v59 = vld [vmem:[#allocation2 + $0x59] sm:$0xff] }
 0x571   :  { %v10709_v17 = vld [vmem:[#allocation2 + $0x128] sm:$0xff]  ;;  %v10902_v43 = vld [vmem:[#allocation2 + $0x139] sm:$0xff] }
 0x572   :  { %17758 = vmatmul.mubr.f32.vlgmr.msra.gmra.mrb[8].mxu1 %v5652_v9  ;;  %v14223_v9 = vld [vmem:[%s27163_s5 + $0xaa8] sm:$0xff]  ;;  %v10899_v1 = vld [vmem:[#allocation2 + $0x121] sm:$0xff] }
 0x573   :  { %19233 = vmatmul.mubr.f32.vlgmr.msra.gmra.mrb[72].mxu0 %v10518_v41  ;;  %20860 = vmatpush3.bf16.msra.mxu1 %v20857_v14  ;;  %v5861_v41 = vld [vmem:[#allocation2 + $0x50] sm:$0xff] }
 0x574   :  { %21660 = vmatpush3.bf16.msra.mxu0 %v20857_v14  ;;  %17760 = vmatprep.mubr.f32.mxu1 %v5653_v19  ;;  %v10708_v14 = vld [vmem:[#allocation2 + $0x120] sm:$0xff]  ;;  %v20897_v19 = vpack.c.bf16 %v14223_v9, %v14222_v36  ;;  %v14241_v36 = vld [vmem:[%s27163_s5 + $0xb38] sm:$0xff] }
 0x575   :  { %19235 = vmatprep.mubr.f32.mxu0 %v10519_v56  ;;  %20862 = vmatprep.subr.bf16.mxu1 %v20861_v20  ;;  %v5863_v56 = vld [vmem:[#allocation2 + $0x60] sm:$0xff] }
 0x576   :  { %21662 = vmatprep.subr.bf16.mxu0 %v20861_v20  ;;  %17761 = vmatmul.mubr.f32.gmra.mrb[10].mxu1 %v5654_v38  ;;  %v14224_v38 = vld [vmem:[%s27163_s5 + $0xab0] sm:$0xff] }
 0x577   :  { %19236 = vmatmul.mubr.f32.gmra.mrb[74].mxu0 %v10520_v22  ;;  %17763 = vmatprep.mubr.f32.mxu1 %v5655_v24  ;;  %v14225_v22 = vld [vmem:[%s27163_s5 + $0xab8] sm:$0xff] }
 0x578   :  { %20864 = vmatpush3.bf16.msra.mxu1 %v20861_v20  ;;  %19238 = vmatprep.mubr.f32.mxu0 %v10521_v58  ;;  %v5864_v24 = vld [vmem:[#allocation2 + $0x68] sm:$0xff]  ;;  %v20901_v13 = vpack.c.bf16 %v14225_v22, %v14224_v38  ;;  %v5865_v58 = vld [vmem:[#allocation2 + $0x70] sm:$0xff]  ;;  %v6074_v22 = vld [vmem:[#allocation2 + $0x79] sm:$0xff] }
 0x579   :  { %21664 = vmatpush3.bf16.msra.mxu0 %v20861_v20  ;;  %20866 = vmatprep.subr.bf16.mxu1 %v20865_v29  ;;  %v10710_v20 = vld [vmem:[#allocation2 + $0x130] sm:$0xff]  ;;  %v10903_v9 = vld [vmem:[#allocation2 + $0x141] sm:$0xff] }
 0x57a   :  { %21666 = vmatprep.subr.bf16.mxu0 %v20865_v29  ;;  %17764 = vmatmul.mubr.f32.gmra.mrb[12].mxu1 %v5656_v16  ;;  %v14226_v16 = vld [vmem:[%s27163_s5 + $0xac0] sm:$0xff] }
 0x57b   :  { %19239 = vmatmul.mubr.f32.gmra.mrb[76].mxu0 %v10522_v39  ;;  %17766 = vmatprep.mubr.f32.mxu1 %v5657_v25  ;;  %v14227_v39 = vld [vmem:[%s27163_s5 + $0xac8] sm:$0xff] }
 0x57c   :  { %20868 = vmatpush3.bf16.msra.mxu1 %v20865_v29  ;;  %19241 = vmatprep.mubr.f32.mxu0 %v10523_v35  ;;  %v5866_v25 = vld [vmem:[#allocation2 + $0x78] sm:$0xff]  ;;  %v20905_v35 = vpack.c.bf16 %v14227_v39, %v14226_v16  ;;  %v14245_v16 = vld [vmem:[%s27163_s5 + $0xb58] sm:$0xff] }
 0x57d   :  { %21668 = vmatpush3.bf16.msra.mxu0 %v20865_v29  ;;  %20870 = vmatprep.subr.bf16.mxu1 %v20869_v37  ;;  %v10712_v29 = vld [vmem:[#allocation2 + $0x140] sm:$0xff]  ;;  %v10905_v38 = vld [vmem:[#allocation2 + $0x151] sm:$0xff]  ;;  %v6076_v39 = vld [vmem:[#allocation2 + $0x89] sm:$0xff] }
 0x57e   :  { %21670 = vmatprep.subr.bf16.mxu0 %v20869_v37  ;;  %17767 = vmatmul.mubr.f32.gmra.mrb[14].mxu1 %v5658_v4  ;;  %v10716_v4 = vld [vmem:[#allocation2 + $0x160] sm:$0xff] }
 0x57f   :  { %19242 = vmatmul.mubr.f32.gmra.mrb[78].mxu0 %v10524_v46  ;;  %17769 = vmatprep.mubr.f32.mxu1 %v5659_v23  ;;  %v14228_v46 = vld [vmem:[%s27163_s5 + $0xad0] sm:$0xff]  ;;  %v14229_v23 = vld [vmem:[%s27163_s5 + $0xad8] sm:$0xff] }
 0x580   :  { %19244 = vmatprep.mubr.f32.mxu0 %v10525_v0  ;;  %20872 = vmatpush3.bf16.msra.mxu1 %v20869_v37  ;;  %v10717_v0 = vld [vmem:[#allocation2 + $0x168] sm:$0xff]  ;;  %v20909_v57 = vpack.c.bf16 %v14229_v23, %v14228_v46  ;;  %v6078_v46 = vld [vmem:[#allocation2 + $0x99] sm:$0xff] }
 0x581   :  { %21672 = vmatpush3.bf16.msra.mxu0 %v20869_v37  ;;  %20874 = vmatprep.subr.bf16.mxu1 %v20873_v33  ;;  %v10714_v37 = vld [vmem:[#allocation2 + $0x150] sm:$0xff]  ;;  %v10910_v23 = vld [vmem:[#allocation2 + $0x179] sm:$0xff] }
 0x582   :  { %21674 = vmatprep.subr.bf16.mxu0 %v20873_v33  ;;  %17770 = vmatmul.mubr.f32.gmra.mrb[16].mxu1 %v5660_v15  ;;  %v10718_v15 = vld [vmem:[#allocation2 + $0x170] sm:$0xff] }
 0x583   :  { %19245 = vmatmul.mubr.f32.gmra.mrb[80].mxu0 %v10526_v21  ;;  %17772 = vmatprep.mubr.f32.mxu1 %v5661_v30  ;;  %v14230_v21 = vld [vmem:[%s27163_s5 + $0xae0] sm:$0xff]  ;;  %v14231_v30 = vld [vmem:[%s27163_s5 + $0xae8] sm:$0xff] }
 0x584   :  { %19247 = vmatprep.mubr.f32.mxu0 %v10527_v6  ;;  %20876 = vmatpush3.bf16.msra.mxu1 %v20873_v33  ;;  %v10719_v6 = vld [vmem:[#allocation2 + $0x178] sm:$0xff]  ;;  %v20913_v27 = vpack.c.bf16 %v14231_v30, %v14230_v21  ;;  %v6080_v21 = vld [vmem:[#allocation2 + $0xa9] sm:$0xff] }
 0x585   :  { %21676 = vmatpush3.bf16.msra.mxu0 %v20873_v33  ;;  %20878 = vmatprep.subr.bf16.mxu1 %v20877_v32  ;;  %v5868_v33 = vld [vmem:[#allocation2 + $0x88] sm:$0xff] }
 0x586   :  { %21678 = vmatprep.subr.bf16.mxu0 %v20877_v32  ;;  %17773 = vmatmul.mubr.f32.gmra.mrb[18].mxu1 %v5662_v42  ;;  %v10720_v42 = vld [vmem:[#allocation2 + $0x180] sm:$0xff]  ;;  %v10912_v30 = vld [vmem:[#allocation2 + $0x189] sm:$0xff] }
 0x587   :  { %19248 = vmatmul.mubr.f32.gmra.mrb[82].mxu0 %v10528_v28  ;;  %17775 = vmatprep.mubr.f32.mxu1 %v5663_v40  ;;  %v14232_v28 = vld [vmem:[%s27163_s5 + $0xaf0] sm:$0xff]  ;;  %v14233_v40 = vld [vmem:[%s27163_s5 + $0xaf8] sm:$0xff] }
 0x588   :  { %19250 = vmatprep.mubr.f32.mxu0 %v10529_v47  ;;  %20880 = vmatpush3.bf16.msra.mxu1 %v20877_v32  ;;  %v10721_v47 = vld [vmem:[#allocation2 + $0x188] sm:$0xff]  ;;  %v20917_v61 = vpack.c.bf16 %v14233_v40, %v14232_v28  ;;  %v6082_v28 = vld [vmem:[#allocation2 + $0xb9] sm:$0xff] }
 0x589   :  { %21680 = vmatpush3.bf16.msra.mxu0 %v20877_v32  ;;  %20882 = vmatprep.subr.bf16.mxu1 %v20881_v44  ;;  %v5870_v32 = vld [vmem:[#allocation2 + $0x98] sm:$0xff] }
 0x58a   :  { %21682 = vmatprep.subr.bf16.mxu0 %v20881_v44  ;;  %17776 = vmatmul.mubr.f32.gmra.mrb[20].mxu1 %v5664_v2  ;;  %v10722_v2 = vld [vmem:[#allocation2 + $0x190] sm:$0xff]  ;;  %v10914_v40 = vld [vmem:[#allocation2 + $0x199] sm:$0xff] }
 0x58b   :  { %19251 = vmatmul.mubr.f32.gmra.mrb[84].mxu0 %v10530_v8  ;;  %17778 = vmatprep.mubr.f32.mxu1 %v5665_v62  ;;  %v14234_v8 = vld [vmem:[%s27163_s5 + $0xb00] sm:$0xff]  ;;  %v14235_v62 = vld [vmem:[%s27163_s5 + $0xb08] sm:$0xff] }
 0x58c   :  { %19253 = vmatprep.mubr.f32.mxu0 %v10531_v53  ;;  %20884 = vmatpush3.bf16.msra.mxu1 %v20881_v44  ;;  %v25711_v53 = vld [vmem:[#allocation2] sm:$0xff] }
 0x58d   :  { %21684 = vmatpush3.bf16.msra.mxu0 %v20881_v44  ;;  %20886 = vmatprep.subr.bf16.mxu1 %v20885_v5  ;;  %v5872_v44 = vld [vmem:[#allocation2 + $0xa8] sm:$0xff] }
 0x58e   :  { %21686 = vmatprep.subr.bf16.mxu0 %v20885_v5  ;;  %17779 = vmatmul.mubr.f32.gmra.mrb[22].mxu1 %v5666_v51  ;;  %v6068_v51 = vld [vmem:[#allocation2 + $0x49] sm:$0xff] }
 0x58f   :  { %19254 = vmatmul.mubr.f32.gmra.mrb[86].mxu0 %v10532_v11  ;;  %17781 = vmatprep.mubr.f32.mxu1 %v5667_v49  ;;  %v14236_v49 = vld [vmem:[%s27163_s5 + $0xb10] sm:$0xff]  ;;  %v10900_v11 = vld [vmem:[#allocation2 + $0x129] sm:$0xff] }
 0x590   :  { %19256 = vmatprep.mubr.f32.mxu0 %v10533_v10  ;;  %20888 = vmatpush3.bf16.msra.mxu1 %v20885_v5  ;;  %v14237_v10 = vld [vmem:[%s27163_s5 + $0xb18] sm:$0xff] }
 0x591   :  { %21688 = vmatpush3.bf16.msra.mxu0 %v20885_v5  ;;  %20890 = vmatprep.subr.bf16.mxu1 %v20889_v34  ;;  %v20921_v5 = vpack.c.bf16 %v14235_v62, %v14234_v8  ;;  %v6275_v8 = vld [vmem:[#allocation2 + $0x42] sm:$0xff] }
 0x592   :  { %21690 = vmatprep.subr.bf16.mxu0 %v20889_v34  ;;  %17782 = vmatmul.mubr.f32.gmra.mrb[24].mxu1 %v5668_v3  ;;  %v14238_v3 = vld [vmem:[%s27163_s5 + $0xb20] sm:$0xff]  ;;  %v11090_v62 = vld [vmem:[#allocation2 + $0x122] sm:$0xff] }
 0x593   :  { %19257 = vmatmul.mubr.f32.gmra.mrb[88].mxu0 %v10534_v54  ;;  %17816 = vmatprep.mubr.f32.mxu1 %v5859_v55  ;;  %v14239_v54 = vld [vmem:[%s27163_s5 + $0xb28] sm:$0xff] }
 0x594   :  { %19291 = vmatprep.mubr.f32.mxu0 %v10708_v14  ;;  %v6069_v55 = vld [vmem:[#allocation2 + $0x51] sm:$0xff] }
 0x595   :  { %v10901_v14 = vld [vmem:[#allocation2 + $0x131] sm:$0xff] }
 0x596   :  { %17817 = vmatmul.mubr.f32.vlgmr.msra.gmra.mrb[8].mxu1 %v5860_v63  ;;  %v20929_v63 = vpack.c.bf16 %v14239_v54, %v14238_v3  ;;  %v11092_v3 = vld [vmem:[#allocation2 + $0x132] sm:$0xff]  ;;  %v6278_v54 = vld [vmem:[#allocation2 + $0x5a] sm:$0xff] }
 0x597   :  { %19292 = vmatmul.mubr.f32.vlgmr.msra.gmra.mrb[72].mxu0 %v10709_v17  ;;  %20892 = vmatpush3.bf16.msra.mxu1 %v20889_v34  ;;  %v6071_v17 = vld [vmem:[#allocation2 + $0x61] sm:$0xff] }
 0x598   :  { %21692 = vmatpush3.bf16.msra.mxu0 %v20889_v34  ;;  %17819 = vmatprep.mubr.f32.mxu1 %v5861_v41  ;;  %v20925_v34 = vpack.c.bf16 %v14237_v10, %v14236_v49  ;;  %v6072_v41 = vld [vmem:[#allocation2 + $0x69] sm:$0xff] }
 0x599   :  { %19294 = vmatprep.mubr.f32.mxu0 %v10710_v20  ;;  %20894 = vmatprep.subr.bf16.mxu1 %v20893_v50  ;;  %v10904_v20 = vld [vmem:[#allocation2 + $0x149] sm:$0xff] }
 0x59a   :  { %21694 = vmatprep.subr.bf16.mxu0 %v20893_v50  ;;  %17820 = vmatmul.mubr.f32.gmra.mrb[10].mxu1 %v5862_v12  ;;  %v11091_v49 = vld [vmem:[#allocation2 + $0x12a] sm:$0xff] }
 0x59b   :  { %19295 = vmatmul.mubr.f32.gmra.mrb[74].mxu0 %v10711_v26  ;;  %17822 = vmatprep.mubr.f32.mxu1 %v5863_v56  ;;  %v6073_v26 = vld [vmem:[#allocation2 + $0x71] sm:$0xff] }
 0x59c   :  { %20896 = vmatpush3.bf16.msra.mxu1 %v20893_v50  ;;  %19297 = vmatprep.mubr.f32.mxu0 %v10712_v29  ;;  %v14243_v56 = vld [vmem:[%s27163_s5 + $0xb48] sm:$0xff] }
 0x59d   :  { %21696 = vmatpush3.bf16.msra.mxu0 %v20893_v50  ;;  %20898 = vmatprep.subr.bf16.mxu1 %v20897_v19  ;;  %v14240_v50 = vld [vmem:[%s27163_s5 + $0xb30] sm:$0xff] }
 0x59e   :  { %21698 = vmatprep.subr.bf16.mxu0 %v20897_v19  ;;  %17823 = vmatmul.mubr.f32.gmra.mrb[12].mxu1 %v5864_v24  ;;  %v20933_v12 = vpack.c.bf16 %v14241_v36, %v14240_v50  ;;  %v10906_v29 = vld [vmem:[#allocation2 + $0x159] sm:$0xff]  ;;  %v6075_v24 = vld [vmem:[#allocation2 + $0x81] sm:$0xff]  ;;  %v6280_v50 = vld [vmem:[#allocation2 + $0x6a] sm:$0xff] }
 0x59f   :  { %19298 = vmatmul.mubr.f32.gmra.mrb[76].mxu0 %v10713_v60  ;;  %17825 = vmatprep.mubr.f32.mxu1 %v5865_v58  ;;  %v14244_v58 = vld [vmem:[%s27163_s5 + $0xb50] sm:$0xff]  ;;  %v11095_v36 = vld [vmem:[#allocation2 + $0x14a] sm:$0xff] }
 0x5a0   :  { %20900 = vmatpush3.bf16.msra.mxu1 %v20897_v19  ;;  %19300 = vmatprep.mubr.f32.mxu0 %v10714_v37  ;;  %v10908_v37 = vld [vmem:[#allocation2 + $0x169] sm:$0xff] }
 0x5a1   :  { %21700 = vmatpush3.bf16.msra.mxu0 %v20897_v19  ;;  %20902 = vmatprep.subr.bf16.mxu1 %v20901_v13  ;;  %v14242_v19 = vld [vmem:[%s27163_s5 + $0xb40] sm:$0xff] }
 0x5a2   :  { %21702 = vmatprep.subr.bf16.mxu0 %v20901_v13  ;;  %17826 = vmatmul.mubr.f32.gmra.mrb[14].mxu1 %v5866_v25  ;;  %v20937_v60 = vpack.c.bf16 %v14243_v56, %v14242_v19  ;;  %v6077_v25 = vld [vmem:[#allocation2 + $0x91] sm:$0xff]  ;;  %v6282_v19 = vld [vmem:[#allocation2 + $0x7a] sm:$0xff] }
 0x5a3   :  { %19301 = vmatmul.mubr.f32.gmra.mrb[78].mxu0 %v10715_v7  ;;  %17828 = vmatprep.mubr.f32.mxu1 %v5867_v52  ;;  %v20941_v7 = vpack.c.bf16 %v14245_v16, %v14244_v58  ;;  %v10909_v52 = vld [vmem:[#allocation2 + $0x171] sm:$0xff]  ;;  %v11097_v56 = vld [vmem:[#allocation2 + $0x15a] sm:$0xff] }
 0x5a4   :  { %19303 = vmatprep.mubr.f32.mxu0 %v10716_v4  ;;  %20904 = vmatpush3.bf16.msra.mxu1 %v20901_v13  ;;  %v14247_v4 = vld [vmem:[%s27163_s5 + $0xb68] sm:$0xff]  ;;  %v11099_v58 = vld [vmem:[#allocation2 + $0x16a] sm:$0xff] }
 0x5a5   :  { %21704 = vmatpush3.bf16.msra.mxu0 %v20901_v13  ;;  %20906 = vmatprep.subr.bf16.mxu1 %v20905_v35  ;;  %v10907_v13 = vld [vmem:[#allocation2 + $0x161] sm:$0xff]  ;;  %v6285_v16 = vld [vmem:[#allocation2 + $0x92] sm:$0xff] }
 0x5a6   :  { %21706 = vmatprep.subr.bf16.mxu0 %v20905_v35  ;;  %17829 = vmatmul.mubr.f32.gmra.mrb[16].mxu1 %v5868_v33  ;;  %v6079_v33 = vld [vmem:[#allocation2 + $0xa1] sm:$0xff] }
 0x5a7   :  { %19304 = vmatmul.mubr.f32.gmra.mrb[80].mxu0 %v10717_v0  ;;  %17831 = vmatprep.mubr.f32.mxu1 %v5869_v18  ;;  %v10911_v18 = vld [vmem:[#allocation2 + $0x181] sm:$0xff] }
 0x5a8   :  { %19306 = vmatprep.mubr.f32.mxu0 %v10718_v15  ;;  %20908 = vmatpush3.bf16.msra.mxu1 %v20905_v35  ;;  %v14249_v15 = vld [vmem:[%s27163_s5 + $0xb78] sm:$0xff] }
 0x5a9   :  { %21708 = vmatpush3.bf16.msra.mxu0 %v20905_v35  ;;  %20910 = vmatprep.subr.bf16.mxu1 %v20909_v57  ;;  %v14246_v35 = vld [vmem:[%s27163_s5 + $0xb60] sm:$0xff] }
 0x5aa   :  { %21710 = vmatprep.subr.bf16.mxu0 %v20909_v57  ;;  %17832 = vmatmul.mubr.f32.gmra.mrb[18].mxu1 %v5870_v32  ;;  %v20945_v0 = vpack.c.bf16 %v14247_v4, %v14246_v35  ;;  %v6081_v32 = vld [vmem:[#allocation2 + $0xb1] sm:$0xff]  ;;  %v11101_v35 = vld [vmem:[#allocation2 + $0x17a] sm:$0xff]  ;;  %v6287_v4 = vld [vmem:[#allocation2 + $0xa2] sm:$0xff] }
 0x5ab   :  { %19307 = vmatmul.mubr.f32.gmra.mrb[82].mxu0 %v10719_v6  ;;  %17834 = vmatprep.mubr.f32.mxu1 %v5871_v31  ;;  %v10913_v31 = vld [vmem:[#allocation2 + $0x191] sm:$0xff] }
 0x5ac   :  { %19309 = vmatprep.mubr.f32.mxu0 %v10720_v42  ;;  %20912 = vmatpush3.bf16.msra.mxu1 %v20909_v57  ;;  %v14251_v42 = vld [vmem:[%s27163_s5 + $0xb88] sm:$0xff] }
 0x5ad   :  { %21712 = vmatpush3.bf16.msra.mxu0 %v20909_v57  ;;  %20914 = vmatprep.subr.bf16.mxu1 %v20913_v27  ;;  %v14248_v57 = vld [vmem:[%s27163_s5 + $0xb70] sm:$0xff] }
 0x5ae   :  { %21714 = vmatprep.subr.bf16.mxu0 %v20913_v27  ;;  %17835 = vmatmul.mubr.f32.gmra.mrb[20].mxu1 %v5872_v44  ;;  %v20949_v6 = vpack.c.bf16 %v14249_v15, %v14248_v57  ;;  %v6083_v44 = vld [vmem:[#allocation2 + $0xc1] sm:$0xff]  ;;  %v11104_v57 = vld [vmem:[#allocation2 + $0x192] sm:$0xff]  ;;  %v6288_v15 = vld [vmem:[#allocation2 + $0xaa] sm:$0xff] }
 0x5af   :  { %19310 = vmatmul.mubr.f32.gmra.mrb[84].mxu0 %v10721_v47  ;;  %17837 = vmatprep.mubr.f32.mxu1 %v5873_v45  ;;  %v10915_v47 = vld [vmem:[#allocation2 + $0x1a1] sm:$0xff] }
 0x5b0   :  { %19312 = vmatprep.mubr.f32.mxu0 %v10722_v2  ;;  %20916 = vmatpush3.bf16.msra.mxu1 %v20913_v27  ;;  %v10916_v2 = vld [vmem:[#allocation2 + $0x1a9] sm:$0xff] }
 0x5b1   :  { %21716 = vmatpush3.bf16.msra.mxu0 %v20913_v27  ;;  %20918 = vmatprep.subr.bf16.mxu1 %v20917_v61  ;;  %v14250_v27 = vld [vmem:[%s27163_s5 + $0xb80] sm:$0xff] }
 0x5b2   :  { %21718 = vmatprep.subr.bf16.mxu0 %v20917_v61  ;;  %17838 = vmatmul.mubr.f32.gmra.mrb[22].mxu1 %v25711_v53  ;;  %v20953_v45 = vpack.c.bf16 %v14251_v42, %v14250_v27  ;;  %v11105_v27 = vld [vmem:[#allocation2 + $0x19a] sm:$0xff]  ;;  %v6291_v42 = vld [vmem:[#allocation2 + $0xc2] sm:$0xff] }
 0x5b3   :  { %19313 = vmatmul.mubr.f32.gmra.mrb[86].mxu0 %v25711_v53  ;;  %17840 = vmatprep.mubr.f32.mxu1 %v25711_v53 }
 0x5b4   :  { %19315 = vmatprep.mubr.f32.mxu0 %v25711_v53  ;;  %20920 = vmatpush3.bf16.msra.mxu1 %v20917_v61 }
 0x5b5   :  { %21720 = vmatpush3.bf16.msra.mxu0 %v20917_v61  ;;  %20922 = vmatprep.subr.bf16.mxu1 %v20921_v5  ;;  %v6084_v61 = vld [vmem:[#allocation2 + $0xc9] sm:$0xff] }
 0x5b6   :  { %21722 = vmatprep.subr.bf16.mxu0 %v20921_v5  ;;  %17841 = vmatmul.mubr.f32.gmra.mrb[24].mxu1 %v25711_v53 }
 0x5b7   :  { %19316 = vmatmul.mubr.f32.gmra.mrb[88].mxu0 %v25711_v53  ;;  %17875 = vmatprep.mubr.f32.mxu1 %v6067_v48  ;;  %v14253_v48 = vld [vmem:[%s27163_s5 + $0xb98] sm:$0xff] }
 0x5b8   :  { %19350 = vmatprep.mubr.f32.mxu0 %v10899_v1  ;;  %v6276_v1 = vld [vmem:[#allocation2 + $0x4a] sm:$0xff] }
 0x5ba   :  { %17876 = vmatmul.mubr.f32.vlgmr.msra.gmra.mrb[8].mxu1 %v6068_v51  ;;  %v14254_v51 = vld [vmem:[%s27163_s5 + $0xba0] sm:$0xff] }
 0x5bb   :  { %19351 = vmatmul.mubr.f32.vlgmr.msra.gmra.mrb[72].mxu0 %v10900_v11  ;;  %20924 = vmatpush3.bf16.msra.mxu1 %v20921_v5  ;;  %v14255_v11 = vld [vmem:[%s27163_s5 + $0xba8] sm:$0xff] }
 0x5bc   :  { %21724 = vmatpush3.bf16.msra.mxu0 %v20921_v5  ;;  %17878 = vmatprep.mubr.f32.mxu1 %v6069_v55  ;;  %v14252_v5 = vld [vmem:[%s27163_s5 + $0xb90] sm:$0xff] }
 0x5bd   :  { %19353 = vmatprep.mubr.f32.mxu0 %v10901_v14  ;;  %20926 = vmatprep.subr.bf16.mxu1 %v20925_v34  ;;  %v20957_v10 = vpack.c.bf16 %v14253_v48, %v14252_v5  ;;  %v11093_v55 = vld [vmem:[#allocation2 + $0x13a] sm:$0xff]  ;;  %v20961_v14 = vpack.c.bf16 %v14255_v11, %v14254_v51  ;;  %v11282_v5 = vld [vmem:[#allocation2 + $0x12b] sm:$0xff] }
 0x5be   :  { %21726 = vmatprep.subr.bf16.mxu0 %v20925_v34  ;;  %17879 = vmatmul.mubr.f32.gmra.mrb[10].mxu1 %v6070_v59  ;;  %v6279_v59 = vld [vmem:[#allocation2 + $0x62] sm:$0xff]  ;;  %v11283_v51 = vld [vmem:[#allocation2 + $0x133] sm:$0xff] }
 0x5bf   :  { %19354 = vmatmul.mubr.f32.gmra.mrb[74].mxu0 %v10902_v43  ;;  %17881 = vmatprep.mubr.f32.mxu1 %v6071_v17  ;;  %v14256_v43 = vld [vmem:[%s27163_s5 + $0xbb0] sm:$0xff] }
 0x5c0   :  { %20928 = vmatpush3.bf16.msra.mxu1 %v20925_v34  ;;  %19356 = vmatprep.mubr.f32.mxu0 %v10903_v9  ;;  %v11094_v17 = vld [vmem:[#allocation2 + $0x142] sm:$0xff] }
 0x5c1   :  { %21728 = vmatpush3.bf16.msra.mxu0 %v20925_v34  ;;  %20930 = vmatprep.subr.bf16.mxu1 %v20929_v63  ;;  %v6277_v34 = vld [vmem:[#allocation2 + $0x52] sm:$0xff]  ;;  %v6486_v11 = vld [vmem:[#allocation2 + $0x5b] sm:$0xff] }
 0x5c2   :  { %21730 = vmatprep.subr.bf16.mxu0 %v20929_v63  ;;  %17882 = vmatmul.mubr.f32.gmra.mrb[12].mxu1 %v6072_v41  ;;  %v6281_v41 = vld [vmem:[#allocation2 + $0x72] sm:$0xff] }
 0x5c3   :  { %19357 = vmatmul.mubr.f32.gmra.mrb[76].mxu0 %v10904_v20  ;;  %17884 = vmatprep.mubr.f32.mxu1 %v6073_v26  ;;  %v14258_v20 = vld [vmem:[%s27163_s5 + $0xbc0] sm:$0xff] }
 0x5c4   :  { %20932 = vmatpush3.bf16.msra.mxu1 %v20929_v63  ;;  %19359 = vmatprep.mubr.f32.mxu0 %v10905_v38  ;;  %v11096_v26 = vld [vmem:[#allocation2 + $0x152] sm:$0xff]  ;;  %v6283_v38 = vld [vmem:[#allocation2 + $0x82] sm:$0xff] }
 0x5c5   :  { %21732 = vmatpush3.bf16.msra.mxu0 %v20929_v63  ;;  %20934 = vmatprep.subr.bf16.mxu1 %v20933_v12  ;;  %v14257_v63 = vld [vmem:[%s27163_s5 + $0xbb8] sm:$0xff] }
 0x5c6   :  { %21734 = vmatprep.subr.bf16.mxu0 %v20933_v12  ;;  %17885 = vmatmul.mubr.f32.gmra.mrb[14].mxu1 %v6074_v22  ;;  %v20965_v9 = vpack.c.bf16 %v14257_v63, %v14256_v43  ;;  %v6488_v43 = vld [vmem:[#allocation2 + $0x6b] sm:$0xff] }
 0x5c7   :  { %19360 = vmatmul.mubr.f32.gmra.mrb[78].mxu0 %v10906_v29  ;;  %17887 = vmatprep.mubr.f32.mxu1 %v6075_v24  ;;  %v11098_v29 = vld [vmem:[#allocation2 + $0x162] sm:$0xff]  ;;  %v11286_v63 = vld [vmem:[#allocation2 + $0x14b] sm:$0xff] }
 0x5c8   :  { %19362 = vmatprep.mubr.f32.mxu0 %v10907_v13  ;;  %20936 = vmatpush3.bf16.msra.mxu1 %v20933_v12  ;;  %v14260_v24 = vld [vmem:[%s27163_s5 + $0xbd0] sm:$0xff]  ;;  %v6284_v13 = vld [vmem:[#allocation2 + $0x8a] sm:$0xff] }
 0x5c9   :  { %21736 = vmatpush3.bf16.msra.mxu0 %v20933_v12  ;;  %20938 = vmatprep.subr.bf16.mxu1 %v20937_v60  ;;  %v14259_v12 = vld [vmem:[%s27163_s5 + $0xbc8] sm:$0xff] }
 0x5ca   :  { %21738 = vmatprep.subr.bf16.mxu0 %v20937_v60  ;;  %17888 = vmatmul.mubr.f32.gmra.mrb[16].mxu1 %v6076_v39  ;;  %v20969_v22 = vpack.c.bf16 %v14259_v12, %v14258_v20  ;;  %v6490_v20 = vld [vmem:[#allocation2 + $0x7b] sm:$0xff] }
 0x5cb   :  { %19363 = vmatmul.mubr.f32.gmra.mrb[80].mxu0 %v10908_v37  ;;  %17890 = vmatprep.mubr.f32.mxu1 %v6077_v25  ;;  %v11100_v37 = vld [vmem:[#allocation2 + $0x172] sm:$0xff]  ;;  %v11288_v12 = vld [vmem:[#allocation2 + $0x15b] sm:$0xff] }
 0x5cc   :  { %19365 = vmatprep.mubr.f32.mxu0 %v10909_v52  ;;  %20940 = vmatpush3.bf16.msra.mxu1 %v20937_v60  ;;  %v14262_v25 = vld [vmem:[%s27163_s5 + $0xbe0] sm:$0xff]  ;;  %v6286_v52 = vld [vmem:[#allocation2 + $0x9a] sm:$0xff] }
 0x5cd   :  { %21740 = vmatpush3.bf16.msra.mxu0 %v20937_v60  ;;  %20942 = vmatprep.subr.bf16.mxu1 %v20941_v7  ;;  %v14261_v60 = vld [vmem:[%s27163_s5 + $0xbd8] sm:$0xff] }
 0x5ce   :  { %21742 = vmatprep.subr.bf16.mxu0 %v20941_v7  ;;  %17891 = vmatmul.mubr.f32.gmra.mrb[18].mxu1 %v6078_v46  ;;  %v20973_v39 = vpack.c.bf16 %v14261_v60, %v14260_v24  ;;  %v11290_v24 = vld [vmem:[#allocation2 + $0x16b] sm:$0xff]  ;;  %v6493_v60 = vld [vmem:[#allocation2 + $0x93] sm:$0xff] }
 0x5cf   :  { %19366 = vmatmul.mubr.f32.gmra.mrb[82].mxu0 %v10910_v23  ;;  %17893 = vmatprep.mubr.f32.mxu1 %v6079_v33  ;;  %v11102_v23 = vld [vmem:[#allocation2 + $0x182] sm:$0xff] }
 0x5d0   :  { %19368 = vmatprep.mubr.f32.mxu0 %v10911_v18  ;;  %20944 = vmatpush3.bf16.msra.mxu1 %v20941_v7  ;;  %v14264_v33 = vld [vmem:[%s27163_s5 + $0xbf0] sm:$0xff]  ;;  %v6289_v18 = vld [vmem:[#allocation2 + $0xb2] sm:$0xff] }
 0x5d1   :  { %21744 = vmatpush3.bf16.msra.mxu0 %v20941_v7  ;;  %20946 = vmatprep.subr.bf16.mxu1 %v20945_v0  ;;  %v14263_v7 = vld [vmem:[%s27163_s5 + $0xbe8] sm:$0xff] }
 0x5d2   :  { %21746 = vmatprep.subr.bf16.mxu0 %v20945_v0  ;;  %17894 = vmatmul.mubr.f32.gmra.mrb[20].mxu1 %v6080_v21  ;;  %v20977_v46 = vpack.c.bf16 %v14263_v7, %v14262_v25  ;;  %v11103_v21 = vld [vmem:[#allocation2 + $0x18a] sm:$0xff]  ;;  %v11292_v25 = vld [vmem:[#allocation2 + $0x17b] sm:$0xff] }
 0x5d3   :  { %19369 = vmatmul.mubr.f32.gmra.mrb[84].mxu0 %v10912_v30  ;;  %17896 = vmatprep.mubr.f32.mxu1 %v6081_v32  ;;  %v14266_v32 = vld [vmem:[%s27163_s5 + $0xc00] sm:$0xff]  ;;  %v6495_v7 = vld [vmem:[#allocation2 + $0xa3] sm:$0xff] }
 0x5d4   :  { %19371 = vmatprep.mubr.f32.mxu0 %v10913_v31  ;;  %20948 = vmatpush3.bf16.msra.mxu1 %v20945_v0  ;;  %v6290_v31 = vld [vmem:[#allocation2 + $0xba] sm:$0xff] }
 0x5d5   :  { %21748 = vmatpush3.bf16.msra.mxu0 %v20945_v0  ;;  %20950 = vmatprep.subr.bf16.mxu1 %v20949_v6  ;;  %v14265_v0 = vld [vmem:[%s27163_s5 + $0xbf8] sm:$0xff] }
 0x5d6   :  { %21750 = vmatprep.subr.bf16.mxu0 %v20949_v6  ;;  %17897 = vmatmul.mubr.f32.gmra.mrb[22].mxu1 %v6082_v28  ;;  %v20981_v30 = vpack.c.bf16 %v14265_v0, %v14264_v33  ;;  %v11106_v28 = vld [vmem:[#allocation2 + $0x1a2] sm:$0xff]  ;;  %v11295_v33 = vld [vmem:[#allocation2 + $0x193] sm:$0xff]  ;;  %v6496_v0 = vld [vmem:[#allocation2 + $0xab] sm:$0xff] }
 0x5d7   :  { %19372 = vmatmul.mubr.f32.gmra.mrb[86].mxu0 %v10914_v40  ;;  %17899 = vmatprep.mubr.f32.mxu1 %v6083_v44  ;;  %v6292_v44 = vld [vmem:[#allocation2 + $0xca] sm:$0xff] }
 0x5d8   :  { %19374 = vmatprep.mubr.f32.mxu0 %v10915_v47  ;;  %20952 = vmatpush3.bf16.msra.mxu1 %v20949_v6  ;;  %v11107_v47 = vld [vmem:[#allocation2 + $0x1aa] sm:$0xff] }
 0x5d9   :  { %21752 = vmatpush3.bf16.msra.mxu0 %v20949_v6  ;;  %20954 = vmatprep.subr.bf16.mxu1 %v20953_v45  ;;  %v14267_v6 = vld [vmem:[%s27163_s5 + $0xc08] sm:$0xff] }
 0x5da   :  { %21754 = vmatprep.subr.bf16.mxu0 %v20953_v45  ;;  %17900 = vmatmul.mubr.f32.gmra.mrb[24].mxu1 %v6084_v61  ;;  %v20985_v40 = vpack.c.bf16 %v14267_v6, %v14266_v32  ;;  %v11281_v61 = vld [vmem:[#allocation2 + $0x123] sm:$0xff]  ;;  %v6500_v6 = vld [vmem:[#allocation2 + $0xcb] sm:$0xff] }
 0x5db   :  { %19375 = vmatmul.mubr.f32.gmra.mrb[88].mxu0 %v10916_v2  ;;  %17934 = vmatprep.mubr.f32.mxu1 %v6275_v8  ;;  %v14268_v2 = vld [vmem:[%s27163_s5 + $0xc10] sm:$0xff]  ;;  %v14269_v8 = vld [vmem:[%s27163_s5 + $0xc18] sm:$0xff] }
 0x5dc   :  { %19409 = vmatprep.mubr.f32.mxu0 %v11090_v62  ;;  %v6484_v62 = vld [vmem:[#allocation2 + $0x4b] sm:$0xff]  ;;  %v20989_v48 = vpack.c.bf16 %v14269_v8, %v14268_v2  ;;  %v11297_v32 = vld [vmem:[#allocation2 + $0x1a3] sm:$0xff] }
 0x5dd   :  { %v11475_v2 = vld [vmem:[#allocation2 + $0x13c] sm:$0xff]  ;;  %v6695_v8 = vld [vmem:[#allocation2 + $0x64] sm:$0xff] }
 0x5de   :  { %17935 = vmatmul.mubr.f32.vlgmr.msra.gmra.mrb[8].mxu1 %v6276_v1  ;;  %v14270_v1 = vld [vmem:[%s27163_s5 + $0xc20] sm:$0xff] }
 0x5df   :  { %19410 = vmatmul.mubr.f32.vlgmr.msra.gmra.mrb[72].mxu0 %v11091_v49  ;;  %20956 = vmatpush3.bf16.msra.mxu1 %v20953_v45  ;;  %v14271_v49 = vld [vmem:[%s27163_s5 + $0xc28] sm:$0xff] }
 0x5e0   :  { %21756 = vmatpush3.bf16.msra.mxu0 %v20953_v45  ;;  %17937 = vmatprep.mubr.f32.mxu1 %v6277_v34  ;;  %v6483_v45 = vld [vmem:[#allocation2 + $0x43] sm:$0xff]  ;;  %v11284_v34 = vld [vmem:[#allocation2 + $0x13b] sm:$0xff] }
 0x5e1   :  { %19412 = vmatprep.mubr.f32.mxu0 %v11092_v3  ;;  %20958 = vmatprep.subr.bf16.mxu1 %v20957_v10  ;;  %v20993_v3 = vpack.c.bf16 %v14271_v49, %v14270_v1  ;;  %v6697_v1 = vld [vmem:[#allocation2 + $0x74] sm:$0xff] }
 0x5e2   :  { %21758 = vmatprep.subr.bf16.mxu0 %v20957_v10  ;;  %17938 = vmatmul.mubr.f32.gmra.mrb[10].mxu1 %v6278_v54  ;;  %v6487_v54 = vld [vmem:[#allocation2 + $0x63] sm:$0xff]  ;;  %v11478_v49 = vld [vmem:[#allocation2 + $0x154] sm:$0xff] }
 0x5e3   :  { %19413 = vmatmul.mubr.f32.gmra.mrb[74].mxu0 %v11093_v55  ;;  %17940 = vmatprep.mubr.f32.mxu1 %v6279_v59  ;;  %v14272_v55 = vld [vmem:[%s27163_s5 + $0xc30] sm:$0xff] }
 0x5e4   :  { %20960 = vmatpush3.bf16.msra.mxu1 %v20957_v10  ;;  %19415 = vmatprep.mubr.f32.mxu0 %v11094_v17  ;;  %v11285_v59 = vld [vmem:[#allocation2 + $0x143] sm:$0xff] }
 0x5e5   :  { %21760 = vmatpush3.bf16.msra.mxu0 %v20957_v10  ;;  %20962 = vmatprep.subr.bf16.mxu1 %v20961_v14  ;;  %v6485_v10 = vld [vmem:[#allocation2 + $0x53] sm:$0xff] }
 0x5e6   :  { %21762 = vmatprep.subr.bf16.mxu0 %v20961_v14  ;;  %17941 = vmatmul.mubr.f32.gmra.mrb[12].mxu1 %v6280_v50  ;;  %v6489_v50 = vld [vmem:[#allocation2 + $0x73] sm:$0xff] }
 0x5e7   :  { %19416 = vmatmul.mubr.f32.gmra.mrb[76].mxu0 %v11095_v36  ;;  %17943 = vmatprep.mubr.f32.mxu1 %v6281_v41  ;;  %v14274_v36 = vld [vmem:[%s27163_s5 + $0xc40] sm:$0xff] }
 0x5e8   :  { %20964 = vmatpush3.bf16.msra.mxu1 %v20961_v14  ;;  %19418 = vmatprep.mubr.f32.mxu0 %v11096_v26  ;;  %v11287_v41 = vld [vmem:[#allocation2 + $0x153] sm:$0xff]  ;;  %v6491_v26 = vld [vmem:[#allocation2 + $0x83] sm:$0xff] }
 0x5e9   :  { %21764 = vmatpush3.bf16.msra.mxu0 %v20961_v14  ;;  %20966 = vmatprep.subr.bf16.mxu1 %v20965_v9  ;;  %v14273_v14 = vld [vmem:[%s27163_s5 + $0xc38] sm:$0xff] }
 0x5ea   :  { %21766 = vmatprep.subr.bf16.mxu0 %v20965_v9  ;;  %17944 = vmatmul.mubr.f32.gmra.mrb[14].mxu1 %v6282_v19  ;;  %v20997_v17 = vpack.c.bf16 %v14273_v14, %v14272_v55  ;;  %v6701_v55 = vld [vmem:[#allocation2 + $0x94] sm:$0xff] }
 0x5eb   :  { %19419 = vmatmul.mubr.f32.gmra.mrb[78].mxu0 %v11097_v56  ;;  %17946 = vmatprep.mubr.f32.mxu1 %v6283_v38  ;;  %v11289_v56 = vld [vmem:[#allocation2 + $0x163] sm:$0xff]  ;;  %v11482_v14 = vld [vmem:[#allocation2 + $0x174] sm:$0xff] }
 0x5ec   :  { %19421 = vmatprep.mubr.f32.mxu0 %v11098_v29  ;;  %20968 = vmatpush3.bf16.msra.mxu1 %v20965_v9  ;;  %v14276_v38 = vld [vmem:[%s27163_s5 + $0xc50] sm:$0xff]  ;;  %v6492_v29 = vld [vmem:[#allocation2 + $0x8b] sm:$0xff] }
 0x5ed   :  { %21768 = vmatpush3.bf16.msra.mxu0 %v20965_v9  ;;  %20970 = vmatprep.subr.bf16.mxu1 %v20969_v22  ;;  %v14275_v9 = vld [vmem:[%s27163_s5 + $0xc48] sm:$0xff] }
 0x5ee   :  { %21770 = vmatprep.subr.bf16.mxu0 %v20969_v22  ;;  %17947 = vmatmul.mubr.f32.gmra.mrb[16].mxu1 %v6284_v13  ;;  %v21001_v19 = vpack.c.bf16 %v14275_v9, %v14274_v36  ;;  %v11486_v36 = vld [vmem:[#allocation2 + $0x194] sm:$0xff]  ;;  %v6704_v9 = vld [vmem:[#allocation2 + $0xac] sm:$0xff] }
 0x5ef   :  { %19422 = vmatmul.mubr.f32.gmra.mrb[80].mxu0 %v11099_v58  ;;  %17949 = vmatprep.mubr.f32.mxu1 %v6285_v16  ;;  %v11291_v58 = vld [vmem:[#allocation2 + $0x173] sm:$0xff] }
 0x5f0   :  { %19424 = vmatprep.mubr.f32.mxu0 %v11100_v37  ;;  %20972 = vmatpush3.bf16.msra.mxu1 %v20969_v22  ;;  %v14278_v16 = vld [vmem:[%s27163_s5 + $0xc60] sm:$0xff]  ;;  %v6494_v37 = vld [vmem:[#allocation2 + $0x9b] sm:$0xff] }
 0x5f1   :  { %21772 = vmatpush3.bf16.msra.mxu0 %v20969_v22  ;;  %20974 = vmatprep.subr.bf16.mxu1 %v20973_v39  ;;  %v14277_v22 = vld [vmem:[%s27163_s5 + $0xc58] sm:$0xff] }
 0x5f2   :  { %21774 = vmatprep.subr.bf16.mxu0 %v20973_v39  ;;  %17950 = vmatmul.mubr.f32.gmra.mrb[18].mxu1 %v6286_v52  ;;  %v21005_v13 = vpack.c.bf16 %v14277_v22, %v14276_v38  ;;  %v11489_v38 = vld [vmem:[#allocation2 + $0x1ac] sm:$0xff]  ;;  %v27402_v22 = vld [vmem:[#allocation7_spill] sm:$0xff] }
 0x5f3   :  { %19425 = vmatmul.mubr.f32.gmra.mrb[82].mxu0 %v11101_v35  ;;  %17952 = vmatprep.mubr.f32.mxu1 %v6287_v4  ;;  %v11293_v35 = vld [vmem:[#allocation2 + $0x183] sm:$0xff]  ;;  %vm27403_vm2 = vnez %v27402_v22 }
 0x5f4   :  { %19427 = vmatprep.mubr.f32.mxu0 %v11102_v23  ;;  %20976 = vmatpush3.bf16.msra.mxu1 %v20973_v39  ;;  %v14280_v4 = vld [vmem:[%s27163_s5 + $0xc70] sm:$0xff]  ;;  %v6497_v23 = vld [vmem:[#allocation2 + $0xb3] sm:$0xff] }
 0x5f5   :  { %21776 = vmatpush3.bf16.msra.mxu0 %v20973_v39  ;;  %20978 = vmatprep.subr.bf16.mxu1 %v20977_v46  ;;  %v14279_v39 = vld [vmem:[%s27163_s5 + $0xc68] sm:$0xff] }
 0x5f6   :  { %21778 = vmatprep.subr.bf16.mxu0 %v20977_v46  ;;  %17953 = vmatmul.mubr.f32.gmra.mrb[20].mxu1 %v6288_v15  ;;  %v21009_v52 = vpack.c.bf16 %v14279_v39, %v14278_v16  ;;  %v6498_v15 = vld [vmem:[#allocation2 + $0xbb] sm:$0xff] }
 0x5f7   :  { %19428 = vmatmul.mubr.f32.gmra.mrb[84].mxu0 %v11103_v21  ;;  %17955 = vmatprep.mubr.f32.mxu1 %v6289_v18  ;;  %v11294_v18 = vld [vmem:[#allocation2 + $0x18b] sm:$0xff]  ;;  %v11296_v21 = vld [vmem:[#allocation2 + $0x19b] sm:$0xff] }
 0x5f8   :  { %19430 = vmatprep.mubr.f32.mxu0 %v11104_v57  ;;  %20980 = vmatpush3.bf16.msra.mxu1 %v20977_v46 }
 0x5f9   :  { %21780 = vmatpush3.bf16.msra.mxu0 %v20977_v46  ;;  %20982 = vmatprep.subr.bf16.mxu1 %v20981_v30  ;;  %v14281_v46 = vld [vmem:[%s27163_s5 + $0xc78] sm:$0xff] }
 0x5fa   :  { %21782 = vmatprep.subr.bf16.mxu0 %v20981_v30  ;;  %17956 = vmatmul.mubr.f32.gmra.mrb[22].mxu1 %v6290_v31  ;;  %v21013_v57 = vpack.c.bf16 %v14281_v46, %v14280_v4  ;;  %v11298_v31 = vld [vmem:[#allocation2 + $0x1ab] sm:$0xff] }
 0x5fb   :  { %19431 = vmatmul.mubr.f32.gmra.mrb[86].mxu0 %v11105_v27  ;;  %17958 = vmatprep.mubr.f32.mxu1 %v6291_v42  ;;  %v27400_v27 = vmov 0.0|0.0   ;;  %v6691_v42 = vld [vmem:[#allocation2 + $0x44] sm:$0xff] }
 0x5fc   :  { %19433 = vmatprep.mubr.f32.mxu0 %v11106_v28  ;;  %20984 = vmatpush3.bf16.msra.mxu1 %v20981_v30  ;;  %v11472_v28 = vld [vmem:[#allocation2 + $0x124] sm:$0xff] }
 0x5fd   :  { %21784 = vmatpush3.bf16.msra.mxu0 %v20981_v30  ;;  %20986 = vmatprep.subr.bf16.mxu1 %v20985_v40  ;;  %v6499_v30 = vld [vmem:[#allocation2 + $0xc3] sm:$0xff] }
 0x5fe   :  { %21786 = vmatprep.subr.bf16.mxu0 %v20985_v40  ;;  %17959 = vmatmul.mubr.f32.gmra.mrb[24].mxu1 %v6292_v44  ;;  %v11473_v44 = vld [vmem:[#allocation2 + $0x12c] sm:$0xff] }
 0x5ff   :  { %19434 = vmatmul.mubr.f32.gmra.mrb[88].mxu0 %v11107_v47  ;;  %17993 = vmatprep.mubr.f32.mxu1 %v6483_v45  ;;  %v6693_v47 = vld [vmem:[#allocation2 + $0x54] sm:$0xff] }
 0x600   :  { %19468 = vmatprep.mubr.f32.mxu0 %v11281_v61  ;;  %v11474_v45 = vld [vmem:[#allocation2 + $0x134] sm:$0xff]  ;;  %v6694_v61 = vld [vmem:[#allocation2 + $0x5c] sm:$0xff] }
 0x602   :  { %17994 = vmatmul.mubr.f32.vlgmr.msra.gmra.mrb[8].mxu1 %v6484_v62  ;;  %v11476_v62 = vld [vmem:[#allocation2 + $0x144] sm:$0xff] }
 0x603   :  { %19469 = vmatmul.mubr.f32.vlgmr.msra.gmra.mrb[72].mxu0 %v11282_v5  ;;  %20988 = vmatpush3.bf16.msra.mxu1 %v20985_v40  ;;  %v6696_v5 = vld [vmem:[#allocation2 + $0x6c] sm:$0xff] }
 0x604   :  { %21788 = vmatpush3.bf16.msra.mxu0 %v20985_v40  ;;  %17996 = vmatprep.mubr.f32.mxu1 %v6485_v10  ;;  %v6692_v40 = vld [vmem:[#allocation2 + $0x4c] sm:$0xff]  ;;  %v6698_v10 = vld [vmem:[#allocation2 + $0x7c] sm:$0xff] }
 0x605   :  { %19471 = vmatprep.mubr.f32.mxu0 %v11283_v51  ;;  %20990 = vmatprep.subr.bf16.mxu1 %v20989_v48  ;;  %v11479_v51 = vld [vmem:[#allocation2 + $0x15c] sm:$0xff] }
 0x606   :  { %21790 = vmatprep.subr.bf16.mxu0 %v20989_v48  ;;  %17997 = vmatmul.mubr.f32.gmra.mrb[10].mxu1 %v6486_v11  ;;  %v6699_v11 = vld [vmem:[#allocation2 + $0x84] sm:$0xff] }
 0x607   :  { %19472 = vmatmul.mubr.f32.gmra.mrb[74].mxu0 %v11284_v34  ;;  %17999 = vmatprep.mubr.f32.mxu1 %v6487_v54  ;;  %v11480_v34 = vld [vmem:[#allocation2 + $0x164] sm:$0xff]  ;;  %v11481_v54 = vld [vmem:[#allocation2 + $0x16c] sm:$0xff] }
 0x608   :  { %20992 = vmatpush3.bf16.msra.mxu1 %v20989_v48  ;;  %19474 = vmatprep.mubr.f32.mxu0 %v11285_v59  ;;  %v6702_v59 = vld [vmem:[#allocation2 + $0x9c] sm:$0xff] }
 0x609   :  { %21792 = vmatpush3.bf16.msra.mxu0 %v20989_v48  ;;  %20994 = vmatprep.subr.bf16.mxu1 %v20993_v3  ;;  %v11477_v48 = vld [vmem:[#allocation2 + $0x14c] sm:$0xff] }
 0x60a   :  { %21794 = vmatprep.subr.bf16.mxu0 %v20993_v3  ;;  %18000 = vmatmul.mubr.f32.gmra.mrb[12].mxu1 %v6488_v43  ;;  %v11483_v43 = vld [vmem:[#allocation2 + $0x17c] sm:$0xff] }
 0x60b   :  { %19475 = vmatmul.mubr.f32.gmra.mrb[76].mxu0 %v11286_v63  ;;  %18002 = vmatprep.mubr.f32.mxu1 %v6489_v50  ;;  %v6703_v63 = vld [vmem:[#allocation2 + $0xa4] sm:$0xff]  ;;  %v6705_v50 = vld [vmem:[#allocation2 + $0xb4] sm:$0xff] }
 0x60c   :  { %20996 = vmatpush3.bf16.msra.mxu1 %v20993_v3  ;;  %19477 = vmatprep.mubr.f32.mxu0 %v11287_v41  ;;  %v11485_v41 = vld [vmem:[#allocation2 + $0x18c] sm:$0xff] }
 0x60d   :  { %21796 = vmatpush3.bf16.msra.mxu0 %v20993_v3  ;;  %20998 = vmatprep.subr.bf16.mxu1 %v20997_v17  ;;  %v6700_v3 = vld [vmem:[#allocation2 + $0x8c] sm:$0xff] }
 0x60e   :  { %21798 = vmatprep.subr.bf16.mxu0 %v20997_v17  ;;  %18003 = vmatmul.mubr.f32.gmra.mrb[14].mxu1 %v6490_v20  ;;  %v6706_v20 = vld [vmem:[#allocation2 + $0xbc] sm:$0xff] }
 0x60f   :  { %19478 = vmatmul.mubr.f32.gmra.mrb[78].mxu0 %v11288_v12  ;;  %18005 = vmatprep.mubr.f32.mxu1 %v6491_v26  ;;  %v11487_v12 = vld [vmem:[#allocation2 + $0x19c] sm:$0xff]  ;;  %v6707_v26 = vld [vmem:[#allocation2 + $0xc4] sm:$0xff] }
 0x610   :  { %19480 = vmatprep.mubr.f32.mxu0 %v11289_v56  ;;  %21000 = vmatpush3.bf16.msra.mxu1 %v20997_v17  ;;  %v6708_v56 = vld [vmem:[#allocation2 + $0xcc] sm:$0xff] }
 0x611   :  { %21800 = vmatpush3.bf16.msra.mxu0 %v20997_v17  ;;  %21002 = vmatprep.subr.bf16.mxu1 %v21001_v19  ;;  %v11484_v17 = vld [vmem:[#allocation2 + $0x184] sm:$0xff] }
 0x612   :  { %21802 = vmatprep.subr.bf16.mxu0 %v21001_v19  ;;  %18006 = vmatmul.mubr.f32.gmra.mrb[16].mxu1 %v6492_v29  ;;  %v25864_v29 = vsel %vm27403_vm2, 1.0, %v25711_v53 }
 0x613   :  { %19481 = vmatmul.mubr.f32.gmra.mrb[80].mxu0 %v11290_v24  ;;  %18008 = vmatprep.mubr.f32.mxu1 %v6493_v60  ;;  %v25871_v24 = vld [vmem:[%s27164_s6] ss:$0 sm:$0xff] }
 0x614   :  { %19483 = vmatprep.mubr.f32.mxu0 %v11291_v58  ;;  %21004 = vmatpush3.bf16.msra.mxu1 %v21001_v19 }
 0x615   :  { %21804 = vmatpush3.bf16.msra.mxu0 %v21001_v19  ;;  %21006 = vmatprep.subr.bf16.mxu1 %v21005_v13  ;;  %v11488_v19 = vld [vmem:[#allocation2 + $0x1a4] sm:$0xff] }
 0x616   :  { %21806 = vmatprep.subr.bf16.mxu0 %v21005_v13  ;;  %18009 = vmatmul.mubr.f32.gmra.mrb[18].mxu1 %v6494_v37 }
 0x617   :  { %19484 = vmatmul.mubr.f32.gmra.mrb[82].mxu0 %v11292_v25  ;;  %18011 = vmatprep.mubr.f32.mxu1 %v6495_v7 }
 0x618   :  { %19486 = vmatprep.mubr.f32.mxu0 %v11293_v35  ;;  %21008 = vmatpush3.bf16.msra.mxu1 %v21005_v13 }
 0x619   :  { %21808 = vmatpush3.bf16.msra.mxu0 %v21005_v13  ;;  %21010 = vmatprep.subr.bf16.mxu1 %v21009_v52 }
 0x61a   :  { %21810 = vmatprep.subr.bf16.mxu0 %v21009_v52  ;;  %18012 = vmatmul.mubr.f32.gmra.mrb[20].mxu1 %v6496_v0 }
 0x61b   :  { %19487 = vmatmul.mubr.f32.gmra.mrb[84].mxu0 %v11294_v18  ;;  %18014 = vmatprep.mubr.f32.mxu1 %v6497_v23 }
 0x61c   :  { %19489 = vmatprep.mubr.f32.mxu0 %v11295_v33  ;;  %21012 = vmatpush3.bf16.msra.mxu1 %v21009_v52 }
 0x61d   :  { %21812 = vmatpush3.bf16.msra.mxu0 %v21009_v52  ;;  %21014 = vmatprep.subr.bf16.mxu1 %v21013_v57 }
 0x61e   :  { %21814 = vmatprep.subr.bf16.mxu0 %v21013_v57  ;;  %18015 = vmatmul.mubr.f32.gmra.mrb[22].mxu1 %v6498_v15 }
 0x61f   :  { %19490 = vmatmul.mubr.f32.gmra.mrb[86].mxu0 %v11296_v21  ;;  %18017 = vmatprep.mubr.f32.mxu1 %v6499_v30 }
 0x620   :  { %19492 = vmatprep.mubr.f32.mxu0 %v11297_v32  ;;  %21016 = vmatpush3.bf16.msra.mxu1 %v21013_v57 }
 0x621   :  { %21816 = vmatpush3.bf16.msra.mxu0 %v21013_v57  ;;  %21817 = vmatprep.subr.bf16.mxu1 %v27400_v27 }
 0x622   :  { %21871 = vmatprep.subr.bf16.mxu0 %v27400_v27  ;;  %18018 = vmatmul.mubr.f32.gmra.mrb[24].mxu1 %v6500_v6 }
 0x623   :  { %19493 = vmatmul.mubr.f32.gmra.mrb[88].mxu0 %v11298_v31  ;;  %18052 = vmatprep.mubr.f32.mxu1 %v6691_v42 }
 0x624   :  { %19527 = vmatprep.mubr.f32.mxu0 %v11472_v28 }
 0x626   :  { %18053 = vmatmul.mubr.f32.vlgmr.msra.gmra.mrb[8].mxu1 %v6692_v40 }
 0x627   :  { %19528 = vmatmul.mubr.f32.vlgmr.msra.gmra.mrb[72].mxu0 %v11473_v44  ;;  %18055 = vmatprep.mubr.f32.mxu1 %v6693_v47 }
 0x628   :  { %19530 = vmatprep.mubr.f32.mxu0 %v11474_v45 }
 0x62a   :  { %18056 = vmatmul.mubr.f32.gmra.mrb[10].mxu1 %v6694_v61 }
 0x62b   :  { %19531 = vmatmul.mubr.f32.gmra.mrb[74].mxu0 %v11475_v2  ;;  %18058 = vmatprep.mubr.f32.mxu1 %v6695_v8 }
 0x62c   :  { %19533 = vmatprep.mubr.f32.mxu0 %v11476_v62 }
 0x62e   :  { %18059 = vmatmul.mubr.f32.gmra.mrb[12].mxu1 %v6696_v5 }
 0x62f   :  { %19534 = vmatmul.mubr.f32.gmra.mrb[76].mxu0 %v11477_v48  ;;  %18061 = vmatprep.mubr.f32.mxu1 %v6697_v1 }
 0x630   :  { %19536 = vmatprep.mubr.f32.mxu0 %v11478_v49 }
 0x632   :  { %18062 = vmatmul.mubr.f32.gmra.mrb[14].mxu1 %v6698_v10 }
 0x633   :  { %19537 = vmatmul.mubr.f32.gmra.mrb[78].mxu0 %v11479_v51  ;;  %18064 = vmatprep.mubr.f32.mxu1 %v6699_v11 }
 0x634   :  { %19539 = vmatprep.mubr.f32.mxu0 %v11480_v34 }
 0x636   :  { %18065 = vmatmul.mubr.f32.gmra.mrb[16].mxu1 %v6700_v3 }
 0x637   :  { %19540 = vmatmul.mubr.f32.gmra.mrb[80].mxu0 %v11481_v54  ;;  %18067 = vmatprep.mubr.f32.mxu1 %v6701_v55 }
 0x638   :  { %19542 = vmatprep.mubr.f32.mxu0 %v11482_v14 }
 0x63a   :  { %18068 = vmatmul.mubr.f32.gmra.mrb[18].mxu1 %v6702_v59 }
 0x63b   :  { %19543 = vmatmul.mubr.f32.gmra.mrb[82].mxu0 %v11483_v43  ;;  %18070 = vmatprep.mubr.f32.mxu1 %v6703_v63 }
 0x63c   :  { %19545 = vmatprep.mubr.f32.mxu0 %v11484_v17 }
 0x63e   :  { %18071 = vmatmul.mubr.f32.gmra.mrb[20].mxu1 %v6704_v9 }
 0x63f   :  { %19546 = vmatmul.mubr.f32.gmra.mrb[84].mxu0 %v11485_v41  ;;  %18073 = vmatprep.mubr.f32.mxu1 %v6705_v50 }
 0x640   :  { %19548 = vmatprep.mubr.f32.mxu0 %v11486_v36 }
 0x642   :  { %18074 = vmatmul.mubr.f32.gmra.mrb[22].mxu1 %v6706_v20 }
 0x643   :  { %19549 = vmatmul.mubr.f32.gmra.mrb[86].mxu0 %v11487_v12  ;;  %18076 = vmatprep.mubr.f32.mxu1 %v6707_v26 }
 0x644   :  { %19551 = vmatprep.mubr.f32.mxu0 %v11488_v19 }
 0x646   :  { %18077 = vmatmul.mubr.f32.gmra.mrb[24].mxu1 %v6708_v56 }
 0x647   :  { %19552 = vmatmul.mubr.f32.gmra.mrb[88].mxu0 %v11489_v38  ;;  %14283 = vmatprep.mubr.msk.f32.mxu1 %vm27404_vm3, %v25864_v29 }
 0x648   :  { %19586 = vmatprep.mubr.msk.f32.mxu0 %vm27401_vm1, %v25711_v53 }
 0x6f9   :  { %v18054_v60 = vpop.f32.mrb[8].mxu1 }
 0x6fa   :  { %v19529_v13 = vpop.f32.mrb[72].mxu0  ;;  %v25874_v58 = vadd.f32 %v18054_v60, %v25871_v24  ;;  %v6792_v39 = vpop.f32.mrb[9].mxu1 }
 0x6fb   :  { %v25877_v16 = vadd.f32 %v19529_v13, %v25871_v24  ;;  %v11556_v37 = vpop.f32.mrb[73].mxu0  ;;  %v25880_v53 = vadd.f32 %v25871_v24, %v6792_v39 }
 0x6fc   :  { %v25883_v25 = vadd.f32 %v25871_v24, %v11556_v37 }
 0x6fd   :  { %v11700_v7 = vadd.f32 %v25877_v16, %v25874_v58  ;;  %v18057_v35 = vpop.f32.mrb[10].mxu1 }
 0x6fe   :  { %v11699_v52 = vadd.f32 %v25883_v25, %v25880_v53  ;;  %v19532_v4 = vpop.f32.mrb[74].mxu0  ;;  %v25890_v46 = vadd.f32 %v18057_v35, %v25871_v24  ;;  %v6802_v33 = vpop.f32.mrb[11].mxu1 }
 0x6ff   :  { %v25893_v23 = vadd.f32 %v19532_v4, %v25871_v24  ;;  %v11566_v0 = vpop.f32.mrb[75].mxu0  ;;  %v25896_v57 = vadd.f32 %v25871_v24, %v6802_v33 }
 0x700   :  { %v21818_v18 = vpack.c.bf16 %v11700_v7, %v11699_v52  ;;  %v25899_v15 = vadd.f32 %v25871_v24, %v11566_v0 }
 0x701   :  { %v11702_v21 = vadd.f32 %v25893_v23, %v25890_v46  ;;  %v18060_v32 = vpop.f32.mrb[12].mxu1 }
 0x702   :  { %v11701_v30 = vadd.f32 %v25899_v15, %v25896_v57  ;;  %v19535_v6 = vpop.f32.mrb[76].mxu0  ;;  %21819 = vmatpush1.bf16.msra.mxu1 %v21818_v18  ;;  %v25906_v31 = vadd.f32 %v18060_v32, %v25871_v24  ;;  %v6812_v28 = vpop.f32.mrb[13].mxu1 }
 0x703   :  { %v25909_v42 = vadd.f32 %v19535_v6, %v25871_v24  ;;  %v11576_v40 = vpop.f32.mrb[77].mxu0  ;;  %21820 = vmatprep.subr.bf16.mxu1 %v27400_v27  ;;  %v25913_v47 = vadd.f32 %v25871_v24, %v6812_v28 }
 0x704   :  { %v21821_v44 = vpack.c.bf16 %v11702_v21, %v11701_v30  ;;  %v25916_v45 = vadd.f32 %v25871_v24, %v11576_v40 }
 0x705   :  { %v11704_v61 = vadd.f32 %v25909_v42, %v25906_v31  ;;  %v18063_v8 = vpop.f32.mrb[14].mxu1 }
 0x706   :  { %v11703_v2 = vadd.f32 %v25916_v45, %v25913_v47  ;;  %v19538_v62 = vpop.f32.mrb[78].mxu0  ;;  %21822 = vmatpush1.bf16.msra.mxu1 %v21821_v44  ;;  %v25923_v5 = vadd.f32 %v18063_v8, %v25871_v24  ;;  %v6822_v1 = vpop.f32.mrb[15].mxu1 }
 0x707   :  { %v25926_v48 = vadd.f32 %v19538_v62, %v25871_v24  ;;  %v11586_v49 = vpop.f32.mrb[79].mxu0  ;;  %21823 = vmatprep.subr.bf16.mxu1 %v27400_v27  ;;  %v25930_v51 = vadd.f32 %v25871_v24, %v6822_v1 }
 0x708   :  { %v21824_v10 = vpack.c.bf16 %v11704_v61, %v11703_v2  ;;  %v25933_v11 = vadd.f32 %v25871_v24, %v11586_v49 }
 0x709   :  { %v11706_v34 = vadd.f32 %v25926_v48, %v25923_v5  ;;  %v18066_v54 = vpop.f32.mrb[16].mxu1 }
 0x70a   :  { %v11705_v3 = vadd.f32 %v25933_v11, %v25930_v51  ;;  %v19541_v55 = vpop.f32.mrb[80].mxu0  ;;  %21825 = vmatpush1.bf16.msra.mxu1 %v21824_v10  ;;  %v25940_v14 = vadd.f32 %v18066_v54, %v25871_v24  ;;  %v6832_v43 = vpop.f32.mrb[17].mxu1  ;;  %v11682_v10 = vmul.f32 %v25874_v58, %v25874_v58  ;;  %v11681_v54 = vmul.f32 %v25880_v53, %v25880_v53 }
 0x70b   :  { %v25943_v59 = vadd.f32 %v19541_v55, %v25871_v24  ;;  %v11596_v63 = vpop.f32.mrb[81].mxu0  ;;  %21826 = vmatprep.subr.bf16.mxu1 %v27400_v27  ;;  %v25947_v50 = vadd.f32 %v25871_v24, %v6832_v43  ;;  %v11717_v55 = vmul.f32 %v25883_v25, %v25883_v25 }
 0x70c   :  { %v21827_v17 = vpack.c.bf16 %v11706_v34, %v11705_v3  ;;  %v25950_v36 = vadd.f32 %v25871_v24, %v11596_v63  ;;  %v11718_v3 = vmul.f32 %v25877_v16, %v25877_v16 }
 0x70d   :  { %v11708_v9 = vadd.f32 %v25943_v59, %v25940_v14  ;;  %v18069_v20 = vpop.f32.mrb[18].mxu1 }
 0x70e   :  { %v11707_v41 = vadd.f32 %v25950_v36, %v25947_v50  ;;  %v19544_v12 = vpop.f32.mrb[82].mxu0  ;;  %21828 = vmatpush1.bf16.msra.mxu1 %v21827_v17  ;;  %v25957_v26 = vadd.f32 %v18069_v20, %v25871_v24  ;;  %v6842_v56 = vpop.f32.mrb[19].mxu1 }
 0x70f   :  { %v25960_v19 = vadd.f32 %v19544_v12, %v25871_v24  ;;  %v11606_v38 = vpop.f32.mrb[83].mxu0  ;;  %21829 = vmatprep.subr.bf16.mxu1 %v27400_v27  ;;  %v25964_v60 = vadd.f32 %v25871_v24, %v6842_v56 }
 0x710   :  { %v21830_v22 = vpack.c.bf16 %v11708_v9, %v11707_v41  ;;  %v25967_v13 = vadd.f32 %v25871_v24, %v11606_v38 }
 0x711   :  { %v11710_v39 = vadd.f32 %v25960_v19, %v25957_v26  ;;  %v18072_v7 = vpop.f32.mrb[20].mxu1 }
 0x712   :  { %v11709_v37 = vadd.f32 %v25967_v13, %v25964_v60  ;;  %v19547_v52 = vpop.f32.mrb[84].mxu0  ;;  %21831 = vmatpush1.bf16.msra.mxu1 %v21830_v22  ;;  %v25974_v35 = vadd.f32 %v18072_v7, %v25871_v24  ;;  %v6852_v33 = vpop.f32.mrb[21].mxu1  ;;  %v11736_v22 = vadd.f32 %v11718_v3, %v11682_v10  ;;  %v11684_v7 = vmul.f32 %v25890_v46, %v25890_v46 }
 0x713   :  { %v25977_v4 = vadd.f32 %v19547_v52, %v25871_v24  ;;  %v11616_v0 = vpop.f32.mrb[85].mxu0  ;;  %21832 = vmatprep.subr.bf16.mxu1 %v27400_v27  ;;  %v25981_v21 = vadd.f32 %v25871_v24, %v6852_v33  ;;  %v11720_v52 = vmul.f32 %v25893_v23, %v25893_v23  ;;  %v11683_v33 = vmul.f32 %v25896_v57, %v25896_v57 }
 0x714   :  { %v21833_v18 = vpack.c.bf16 %v11710_v39, %v11709_v37  ;;  %v25984_v30 = vadd.f32 %v25871_v24, %v11616_v0  ;;  %v11735_v39 = vadd.f32 %v11717_v55, %v11681_v54  ;;  %v11686_v46 = vmul.f32 %v25906_v31, %v25906_v31 }
 0x715   :  { %v11712_v32 = vadd.f32 %v25977_v4, %v25974_v35  ;;  %v18075_v28 = vpop.f32.mrb[22].mxu1  ;;  %v11722_v23 = vmul.f32 %v25909_v42, %v25909_v42  ;;  %v11724_v10 = vmul.f32 %v25926_v48, %v25926_v48  ;;  %v11687_v31 = vmul.f32 %v25930_v51, %v25930_v51 }
 0x716   :  { %v11711_v6 = vadd.f32 %v25984_v30, %v25981_v21  ;;  %v19550_v40 = vpop.f32.mrb[86].mxu0  ;;  %21834 = vmatpush1.bf16.msra.mxu1 %v21833_v18  ;;  %v25991_v44 = vadd.f32 %v18075_v28, %v25871_v24  ;;  %v6862_v2 = vpop.f32.mrb[23].mxu1  ;;  %v11738_v18 = vadd.f32 %v11720_v52, %v11684_v7  ;;  %v11685_v28 = vmul.f32 %v25913_v47, %v25913_v47 }
 0x717   :  { %v25994_v61 = vadd.f32 %v19550_v40, %v25871_v24  ;;  %v11626_v8 = vpop.f32.mrb[87].mxu0  ;;  %21835 = vmatprep.subr.bf16.mxu1 %v27400_v27  ;;  %v25998_v1 = vadd.f32 %v25871_v24, %v6862_v2  ;;  %v11721_v40 = vmul.f32 %v25916_v45, %v25916_v45  ;;  %v11688_v2 = vmul.f32 %v25923_v5, %v25923_v5 }
 0x718   :  { %v21836_v62 = vpack.c.bf16 %v11712_v32, %v11711_v6  ;;  %v26001_v49 = vadd.f32 %v25871_v24, %v11626_v8  ;;  %v21845_v6 = vpack.c.bf16 %v11736_v22, %v11735_v39  ;;  %v27405_v8 = vmov 1.0  }
 0x719   :  { %v11714_v34 = vadd.f32 %v25994_v61, %v25991_v44  ;;  %v18078_v63 = vpop.f32.mrb[24].mxu1  ;;  %v11723_v42 = vmul.f32 %v25933_v11, %v25933_v11  ;;  %v11740_v5 = vadd.f32 %v11722_v23, %v11686_v46  ;;  %v11742_v54 = vadd.f32 %v11724_v10, %v11688_v2 }
 0x71a   :  { %v11713_v43 = vadd.f32 %v26001_v49, %v25998_v1  ;;  %v19553_v17 = vpop.f32.mrb[88].mxu0  ;;  %21837 = vmatpush1.bf16.msra.mxu1 %v21836_v62  ;;  %v26016_v58 = vadd.f32 %v18078_v63, %v25871_v24  ;;  %v6872_v41 = vpop.f32.mrb[25].mxu1  ;;  %v27406_v62 = vld [vmem:[#allocation8_spill] sm:$0xff]  ;;  %v11690_v48 = vmul.f32 %v25940_v14, %v25940_v14  ;;  %v11689_v63 = vmul.f32 %v25947_v50, %v25947_v50 }
 0x71b   :  { %v26019_v9 = vadd.f32 %v19553_v17, %v25871_v24  ;;  %v11636_v16 = vpop.f32.mrb[89].mxu0  ;;  %21838 = vmatprep.subr.bf16.mxu1 %v27400_v27  ;;  %v26023_v12 = vadd.f32 %v25871_v24, %v6872_v41  ;;  %vm27407_vm6 = vnez %v27406_v62  ;;  %v11741_v55 = vadd.f32 %v11723_v42, %v11687_v31  ;;  %v14291_v62 = vld [vmem:[%s27167_s9 + $0x90] sm:$0xff] }
 0x71c   :  { %v21839_v20 = vpack.c.bf16 %v11714_v34, %v11713_v43  ;;  %v26026_v56 = vadd.f32 %v25871_v24, %v11636_v16  ;;  %v11719_v24 = vmul.f32 %v25899_v15, %v25899_v15  ;;  %v11739_v34 = vadd.f32 %v11721_v40, %v11685_v28 }
 0x71d   :  { %v11716_v38 = vadd.f32 %v26019_v9, %v26016_v58  ;;  %v11726_v43 = vmul.f32 %v25943_v59, %v25943_v59  ;;  %v11692_v14 = vmul.f32 %v25957_v26, %v25957_v26  ;;  %v11728_v59 = vmul.f32 %v25960_v19, %v25960_v19 }
 0x71e   :  { %v11715_v37 = vadd.f32 %v26026_v56, %v26023_v12  ;;  %21840 = vmatpush1.bf16.msra.mxu1 %v21839_v20  ;;  %v11737_v32 = vadd.f32 %v11719_v24, %v11683_v33  ;;  %v21851_v17 = vpack.c.bf16 %v11740_v5, %v11739_v34  ;;  %v21854_v20 = vpack.c.bf16 %v11742_v54, %v11741_v55  ;;  %v12134_v55 = vld [vmem:[%s27167_s9 + $0x10] sm:$0xff] }
 0x71f   :  { %21841 = vmatprep.subr.bf16.mxu1 %v27400_v27  ;;  %v11744_v41 = vadd.f32 %v11726_v43, %v11690_v48  ;;  %v11727_v22 = vmul.f32 %v25967_v13, %v25967_v13  ;;  %v11694_v39 = vmul.f32 %v25974_v35, %v25974_v35  ;;  %v11693_v7 = vmul.f32 %v25981_v21, %v25981_v21  ;;  %v12135_v48 = vld [vmem:[%s27167_s9 + $0x18] sm:$0xff] }
 0x720   :  { %v21842_v0 = vpack.c.bf16 %v11716_v38, %v11715_v37  ;;  %v21848_v3 = vpack.c.bf16 %v11738_v18, %v11737_v32  ;;  %v11691_v38 = vmul.f32 %v25964_v60, %v25964_v60  ;;  %v11730_v37 = vmul.f32 %v25977_v4, %v25977_v4 }
 0x721   :  { %v11729_v26 = vmul.f32 %v25984_v30, %v25984_v30  ;;  %v11746_v19 = vadd.f32 %v11728_v59, %v11692_v14  ;;  %v11696_v35 = vmul.f32 %v25991_v44, %v25991_v44  ;;  %v11732_v4 = vmul.f32 %v25994_v61, %v25994_v61  ;;  %v14295_v59 = vld [vmem:[%s27167_s9 + $0xb0] sm:$0xff] }
 0x722   :  { %21843 = vmatpush1.bf16.msra.mxu1 %v21842_v0  ;;  %v11745_v52 = vadd.f32 %v11727_v22, %v11691_v38  ;;  %v11748_v24 = vadd.f32 %v11730_v37, %v11694_v39  ;;  %v11695_v18 = vmul.f32 %v25998_v1, %v25998_v1  ;;  %v11731_v32 = vmul.f32 %v26001_v49, %v26001_v49  ;;  %v14296_v38 = vld [vmem:[%s27167_s9 + $0xb8] sm:$0xff]  ;;  %v12138_v22 = vld [vmem:[%s27167_s9 + $0x30] sm:$0xff] }
 0x723   :  { %21844 = vmatprep.subr.bf16.mxu1 %v27400_v27  ;;  %v11747_v0 = vadd.f32 %v11729_v26, %v11693_v7  ;;  %v11750_v46 = vadd.f32 %v11732_v4, %v11696_v35  ;;  %v11698_v44 = vmul.f32 %v26016_v58, %v26016_v58  ;;  %v11734_v61 = vmul.f32 %v26019_v9, %v26019_v9  ;;  %v26115_v58 = vld [vmem:[#allocation2] sm:$0xff]  ;;  %v14289_v9 = vld [vmem:[%s27167_s9 + $0x80] sm:$0xff]  ;;  %v12139_v39 = vld [vmem:[%s27167_s9 + $0x38] sm:$0xff] }
 0x724   :  { %v11749_v23 = vadd.f32 %v11731_v32, %v11695_v18  ;;  %v11697_v40 = vmul.f32 %v26023_v12, %v26023_v12  ;;  %v11733_v2 = vmul.f32 %v26026_v56, %v26026_v56  ;;  %v14290_v12 = vld [vmem:[%s27167_s9 + $0x88] sm:$0xff]  ;;  %v12132_v56 = vld [vmem:[%s27167_s9] sm:$0xff]  ;;  %v21881_v37 = vpack.c.bf16 %v14296_v38, %v14295_v59  ;;  %v14299_v35 = vld [vmem:[%s27167_s9 + $0xd0] sm:$0xff] }
 0x725   :  { %14284 = vmatmul.mubr.msk.f32.vlgmr.msra.gmra.mrb[26].mxu1 %vm27407_vm6, %v27405_v8  ;;  %v21863_v28 = vpack.c.bf16 %v11748_v24, %v11747_v0  ;;  %v11752_v10 = vadd.f32 %v11734_v61, %v11698_v44  ;;  %v21872_v34 = vpack.c.bf16 %v14290_v12, %v14289_v9  ;;  %v21905_v7 = vpack.c.bf16 %v12139_v39, %v12138_v22  ;;  %v14297_v26 = vld [vmem:[%s27167_s9 + $0xc0] sm:$0xff]  ;;  %v14300_v4 = vld [vmem:[%s27167_s9 + $0xd8] sm:$0xff]  ;;  %v12142_v18 = vld [vmem:[%s27167_s9 + $0x50] sm:$0xff] }
 0x726   :  { %21846 = vmatpush1.bf16.msra.mxu1 %v21845_v6  ;;  %14285 = vmatprep.mubr.msk.f32.mxu1 %vm27408_vm7, %v25864_v29  ;;  %v11725_v29 = vmul.f32 %v25950_v36, %v25950_v36  ;;  %v21860_v6 = vpack.c.bf16 %v11746_v19, %v11745_v52  ;;  %v11751_v31 = vadd.f32 %v11733_v2, %v11697_v40  ;;  %v14298_v19 = vld [vmem:[%s27167_s9 + $0xc8] sm:$0xff]  ;;  %v12140_v52 = vld [vmem:[%s27167_s9 + $0x40] sm:$0xff]  ;;  %v12143_v32 = vld [vmem:[%s27167_s9 + $0x58] sm:$0xff] }
 0x727   :  { %21847 = vmatprep.subr.bf16.mxu1 %v27400_v27  ;;  %v21866_v42 = vpack.c.bf16 %v11750_v46, %v11749_v23  ;;  %21873 = vmatpush3.bf16.msra.mxu0 %v21872_v34  ;;  %v21884_v24 = vpack.c.bf16 %v14298_v19, %v14297_v26  ;;  %v21911_v46 = vpack.c.bf16 %v12143_v32, %v12142_v18  ;;  %v14301_v23 = vld [vmem:[%s27167_s9 + $0xe0] sm:$0xff]  ;;  %v12145_v61 = vld [vmem:[%s27167_s9 + $0x68] sm:$0xff] }
 0x728   :  { %v11743_v16 = vadd.f32 %v11725_v29, %v11689_v63  ;;  %v21869_v5 = vpack.c.bf16 %v11752_v10, %v11751_v31  ;;  %21874 = vmatprep.subr.bf16.mxu0 %v27400_v27  ;;  %v21899_v63 = vpack.c.bf16 %v12135_v48, %v12134_v55  ;;  %v14293_v29 = vld [vmem:[%s27167_s9 + $0xa0] sm:$0xff]  ;;  %v14303_v10 = vld [vmem:[%s27167_s9 + $0xf0] sm:$0xff]  ;;  %v14304_v31 = vld [vmem:[%s27167_s9 + $0xf8] sm:$0xff] }
 0x729   :  { %v12144_v44 = vld [vmem:[%s27167_s9 + $0x60] sm:$0xff]  ;;  %v21893_v9 = vpack.c.bf16 %v14304_v31, %v14303_v10 }
 0x72a   :  { %21849 = vmatpush1.bf16.msra.mxu1 %v21848_v3  ;;  %v21857_v33 = vpack.c.bf16 %v11744_v41, %v11743_v16  ;;  %v14292_v3 = vld [vmem:[%s27167_s9 + $0x98] sm:$0xff]  ;;  %v12136_v41 = vld [vmem:[%s27167_s9 + $0x20] sm:$0xff]  ;;  %v12137_v16 = vld [vmem:[%s27167_s9 + $0x28] sm:$0xff]  ;;  %v21914_v2 = vpack.c.bf16 %v12145_v61, %v12144_v44 }
 0x72b   :  { %21850 = vmatprep.subr.bf16.mxu1 %v27400_v27  ;;  %v21875_v43 = vpack.c.bf16 %v14292_v3, %v14291_v62  ;;  %v21902_v14 = vpack.c.bf16 %v12137_v16, %v12136_v41  ;;  %v11896_v41 = vld [vmem:[%s27165_s7] sm:$0x1] }
 0x72c   :  { %v12012_v16 = vld [vmem:[%s27165_s7] sm:$0x1] }
 0x72d   :  { %21876 = vmatpush3.bf16.msra.mxu0 %v21875_v43 }
 0x72e   :  { %21852 = vmatpush1.bf16.msra.mxu1 %v21851_v17  ;;  %v14294_v17 = vld [vmem:[%s27167_s9 + $0xa8] sm:$0xff]  ;;  %21877 = vmatprep.subr.bf16.mxu0 %v27400_v27 }
 0x72f   :  { %21853 = vmatprep.subr.bf16.mxu1 %v27400_v27 }
 0x732   :  { %21855 = vmatpush1.bf16.msra.mxu1 %v21854_v20  ;;  %v21878_v20 = vpack.c.bf16 %v14294_v17, %v14293_v29  ;;  %v27409_v29 = vld [vmem:[#allocation11_spill] sm:$0xff] }
 0x733   :  { %21856 = vmatprep.subr.bf16.mxu1 %v27400_v27 }
 0x734   :  { %21879 = vmatpush3.bf16.msra.mxu0 %v21878_v20 }
 0x735   :  { %21880 = vmatprep.subr.bf16.mxu0 %v27400_v27 }
 0x736   :  { %21858 = vmatpush1.bf16.msra.mxu1 %v21857_v33  ;;  %v12141_v33 = vld [vmem:[%s27167_s9 + $0x48] sm:$0xff] }
 0x737   :  { %21859 = vmatprep.subr.bf16.mxu1 %v27400_v27  ;;  %v21908_v0 = vpack.c.bf16 %v12141_v33, %v12140_v52  ;;  %v26261_v33 = vld [vmem:[%s27166_s8] ss:$0 sm:$0xff] }
 0x738   :  { %21882 = vmatpush3.bf16.msra.mxu0 %v21881_v37 }
 0x739   :  { %21883 = vmatprep.subr.bf16.mxu0 %v27400_v27 }
 0x73a   :  { %21861 = vmatpush1.bf16.msra.mxu1 %v21860_v6  ;;  %v21887_v6 = vpack.c.bf16 %v14300_v4, %v14299_v35 }
 0x73b   :  { %21862 = vmatprep.subr.bf16.mxu1 %v27400_v27 }
 0x73c   :  { %21885 = vmatpush3.bf16.msra.mxu0 %v21884_v24 }
 0x73d   :  { %21886 = vmatprep.subr.bf16.mxu0 %v27400_v27 }
 0x73e   :  { %21864 = vmatpush1.bf16.msra.mxu1 %v21863_v28  ;;  %v14302_v28 = vld [vmem:[%s27167_s9 + $0xe8] sm:$0xff] }
 0x73f   :  { %21865 = vmatprep.subr.bf16.mxu1 %v27400_v27  ;;  %v21890_v40 = vpack.c.bf16 %v14302_v28, %v14301_v23 }
 0x740   :  { %21888 = vmatpush3.bf16.msra.mxu0 %v21887_v6 }
 0x741   :  { %21889 = vmatprep.subr.bf16.mxu0 %v27400_v27 }
 0x742   :  { %21867 = vmatpush1.bf16.msra.mxu1 %v21866_v42  ;;  %v12146_v42 = vld [vmem:[%s27167_s9 + $0x70] sm:$0xff] }
 0x743   :  { %21868 = vmatprep.subr.bf16.mxu1 %v27400_v27 }
 0x744   :  { %21891 = vmatpush3.bf16.msra.mxu0 %v21890_v40 }
 0x745   :  { %21892 = vmatprep.subr.bf16.mxu0 %v27400_v27 }
 0x746   :  { %21870 = vmatpush1.bf16.msra.mxu1 %v21869_v5  ;;  %v12147_v5 = vld [vmem:[%s27167_s9 + $0x78] sm:$0xff] }
 0x747   :  { %21895 = vmatprep.subr.bf16.mxu1 %v27400_v27  ;;  %v21917_v12 = vpack.c.bf16 %v12147_v5, %v12146_v42 }
 0x748   :  { %21894 = vmatpush3.bf16.msra.mxu0 %v21893_v9 }
 0x749   :  { %14286 = vmatmul.mubr.msk.f32.vlgmr.msra.gmra.mrb[28].mxu1 %vm27407_vm6, %v27405_v8  ;;  %v12133_v8 = vld [vmem:[%s27167_s9 + $0x8] sm:$0xff]  ;;  %21919 = vmatprep.subr.bf16.mxu0 %v27400_v27 }
 0x74a   :  { %19621 = vmatprep.mubr.msk.f32.mxu1 %vm27401_vm1, %v26115_v58  ;;  %v21896_v54 = vpack.c.bf16 %v12133_v8, %v12132_v56 }
 0x74c   :  { %21897 = vmatpush3.bf16.msra.mxu1 %v21896_v54 }
 0x74d   :  { %21898 = vmatprep.subr.bf16.mxu1 %v27400_v27 }
 0x750   :  { %21900 = vmatpush3.bf16.msra.mxu1 %v21899_v63 }
 0x751   :  { %21901 = vmatprep.subr.bf16.mxu1 %v27400_v27 }
 0x754   :  { %21903 = vmatpush3.bf16.msra.mxu1 %v21902_v14 }
 0x755   :  { %21904 = vmatprep.subr.bf16.mxu1 %v27400_v27 }
 0x758   :  { %21906 = vmatpush3.bf16.msra.mxu1 %v21905_v7 }
 0x759   :  { %21907 = vmatprep.subr.bf16.mxu1 %v27400_v27 }
 0x75c   :  { %21909 = vmatpush3.bf16.msra.mxu1 %v21908_v0 }
 0x75d   :  { %21910 = vmatprep.subr.bf16.mxu1 %v27400_v27 }
 0x760   :  { %21912 = vmatpush3.bf16.msra.mxu1 %v21911_v46 }
 0x761   :  { %21913 = vmatprep.subr.bf16.mxu1 %v27400_v27 }
 0x764   :  { %21915 = vmatpush3.bf16.msra.mxu1 %v21914_v2 }
 0x765   :  { %21916 = vmatprep.subr.bf16.mxu1 %v27400_v27 }
 0x768   :  { %21918 = vmatpush3.bf16.msra.mxu1 %v21917_v12 }
 0x769   :  { %21943 = vmatprep.subr.bf16.mxu1 %v27400_v27 }
 0x7f8   :  { %v11822_v56 = vpop.f32.mrb[26].mxu1 }
 0x7f9   :  { %v11824_v34 = vpop.f32.mrb[27].mxu1  ;;  %v11898_v8 = vmul.f32 0.0061728396, %v11822_v56 }
 0x7fb   :  { %v11900_v3 = vmul.f32 %v11898_v8, %v11898_v8  ;;  %v26232_v17 = vrot.slane %v11898_v8, %v27409_v29 }
 0x7fd   :  { %v11907_v39 = vsub.f32 %v25880_v53, %v26232_v17  ;;  %v11909_v37 = vsub.f32 %v25896_v57, %v26232_v17  ;;  %v12014_v7 = vsub.f32 %v25883_v25, %v26232_v17  ;;  %v12016_v26 = vsub.f32 %v25899_v15, %v26232_v17 }
 0x7fe   :  { %v11911_v19 = vsub.f32 %v25913_v47, %v26232_v17  ;;  %v11913_v52 = vsub.f32 %v25930_v51, %v26232_v17  ;;  %v12018_v23 = vsub.f32 %v25916_v45, %v26232_v17  ;;  %v12020_v28 = vsub.f32 %v25933_v11, %v26232_v17 }
 0x81c   :  { %v11892_v62 = vpop.f32.mrb[28].mxu1 }
 0x81d   :  { %v11899_v54 = vmul.f32 0.0061728396, %v11892_v62  ;;  %v11894_v55 = vpop.f32.mrb[29].mxu1 }
 0x81f   :  { %v11901_v48 = vsub.f32 %v11899_v54, %v11900_v3 }
 0x821   :  { %v11902_v43 = vmax.f32 %v11901_v48, 0.0 }
 0x823   :  { %v11925_v63 = vadd.f32 1e-05, %v11902_v43 }
 0x825   :  { %23126 = vrsqrt.f32 %v11925_v63 }
 0x82f   :  { %v23127_v20 = vpop.eup %23126 }
 0x830   :  { %v11927_v14 = vmul.f32 %v23127_v20, %v11896_v41  ;;  %v12032_v59 = vmul.f32 %v23127_v20, %v12012_v16 }
 0x832   :  { %v26241_v38 = vrot.slane %v11927_v14, %v27409_v29  ;;  %v26244_v22 = vrot.slane %v12032_v59, %v27409_v29 }
 0x834   :  { %v11934_v53 = vmul.f32 %v26241_v38, %v11907_v39  ;;  %v11936_v57 = vmul.f32 %v26241_v38, %v11909_v37  ;;  %v12039_v47 = vmul.f32 %v26244_v22, %v12014_v7  ;;  %v12041_v51 = vmul.f32 %v26244_v22, %v12016_v26 }
 0x835   :  { %v11938_v6 = vmul.f32 %v26241_v38, %v11911_v19  ;;  %v11940_v46 = vmul.f32 %v26241_v38, %v11913_v52  ;;  %v12043_v31 = vmul.f32 %v26244_v22, %v12018_v23  ;;  %v12045_v42 = vmul.f32 %v26244_v22, %v12020_v28  ;;  %v14305_v19 = vld [vmem:[%s27167_s9 + $0x100] sm:$0xff]  ;;  %v14306_v52 = vld [vmem:[%s27167_s9 + $0x108] sm:$0xff]  ;;  %v14323_v28 = vld [vmem:[%s27167_s9 + $0x190] sm:$0xff] }
 0x836   :  { %v11958_v25 = vadd.f32 %v26261_v33, %v11934_v53  ;;  %v11960_v24 = vadd.f32 %v26261_v33, %v11936_v57  ;;  %v12063_v35 = vadd.f32 %v26261_v33, %v12039_v47  ;;  %v12065_v4 = vadd.f32 %v26261_v33, %v12041_v51  ;;  %v14321_v57 = vld [vmem:[%s27167_s9 + $0x180] sm:$0xff] }
 0x837   :  { %v11962_v44 = vadd.f32 %v26261_v33, %v11938_v6  ;;  %v11964_v61 = vadd.f32 %v26261_v33, %v11940_v46  ;;  %v12067_v63 = vadd.f32 %v26261_v33, %v12043_v31  ;;  %v12069_v29 = vadd.f32 %v26261_v33, %v12045_v42  ;;  %v14307_v6 = vld [vmem:[%s27167_s9 + $0x110] sm:$0xff]  ;;  %v14308_v46 = vld [vmem:[%s27167_s9 + $0x118] sm:$0xff]  ;;  %v14309_v31 = vld [vmem:[%s27167_s9 + $0x120] sm:$0xff] }
 0x838   :  { %v11976_v15 = vmax.f32 %v11958_v25, 0.0  ;;  %v11978_v0 = vmax.f32 %v11960_v24, 0.0  ;;  %v12081_v18 = vmax.f32 %v12063_v35, 0.0  ;;  %v12083_v32 = vmax.f32 %v12065_v4, 0.0  ;;  %v14322_v25 = vld [vmem:[%s27167_s9 + $0x188] sm:$0xff] }
 0x839   :  { %v11980_v45 = vmax.f32 %v11962_v44, 0.0  ;;  %v11982_v8 = vmax.f32 %v11964_v61, 0.0  ;;  %v21920_v35 = vpack.c.bf16 %v14306_v52, %v14305_v19  ;;  %v14324_v44 = vld [vmem:[%s27167_s9 + $0x198] sm:$0xff] }
 0x83a   :  { %11994 = vst [vmem:[#allocation3] sm:$0xff] %v11976_v15  ;;  %11996 = vst [vmem:[#allocation3 + $0x10] sm:$0xff] %v11978_v0  ;;  %v12085_v15 = vmax.f32 %v12067_v63, 0.0  ;;  %v12087_v0 = vmax.f32 %v12069_v29, 0.0  ;;  %v21947_v42 = vpack.c.bf16 %v14324_v44, %v14323_v28  ;;  %v14318_v28 = vld [vmem:[%s27167_s9 + $0x168] sm:$0xff]  ;;  %v14333_v44 = vld [vmem:[%s27167_s9 + $0x1e0] sm:$0xff] }
 0x83b   :  { %12100 = vst [vmem:[#allocation3 + $0x90] sm:$0xff] %v12081_v18  ;;  %12102 = vst [vmem:[#allocation3 + $0xa0] sm:$0xff] %v12083_v32  ;;  %v21944_v32 = vpack.c.bf16 %v14322_v25, %v14321_v57  ;;  %v14316_v57 = vld [vmem:[%s27167_s9 + $0x158] sm:$0xff]  ;;  %v14331_v25 = vld [vmem:[%s27167_s9 + $0x1d0] sm:$0xff] }
 0x83c   :  { %11998 = vst [vmem:[#allocation3 + $0x20] sm:$0xff] %v11980_v45  ;;  %12000 = vst [vmem:[#allocation3 + $0x30] sm:$0xff] %v11982_v8  ;;  %v12024_v8 = vsub.f32 %v25967_v13, %v26232_v17  ;;  %v14327_v13 = vld [vmem:[%s27167_s9 + $0x1b0] sm:$0xff] }
 0x83d   :  { %12104 = vst [vmem:[#allocation3 + $0xb0] sm:$0xff] %v12085_v15  ;;  %12106 = vst [vmem:[#allocation3 + $0xc0] sm:$0xff] %v12087_v0 }
 0x841   :  { %v12148_v40 = vld [vmem:[#allocation3 + $0x2] sm:$0x1]  ;;  %v12150_v2 = vld [vmem:[#allocation3 + $0x3] sm:$0x1]  ;;  %v12154_v10 = vld [vmem:[#allocation3 + $0x12] sm:$0x1] }
 0x842   :  { %v12156_v5 = vld [vmem:[#allocation3 + $0x13] sm:$0x1]  ;;  %v12118_v9 = vld [vmem:[#allocation3] sm:$0x1]  ;;  %v12120_v12 = vld [vmem:[#allocation3 + $0x1] sm:$0x1]  ;;  %v12152_v41 = vmax.f32 %v12148_v40, %v12150_v2  ;;  %v11915_v40 = vsub.f32 %v25947_v50, %v26232_v17  ;;  %v11917_v2 = vsub.f32 %v25964_v60, %v26232_v17 }
 0x843   :  { %v12124_v56 = vld [vmem:[#allocation3 + $0x10] sm:$0x1]  ;;  %v12126_v34 = vld [vmem:[#allocation3 + $0x11] sm:$0x1]  ;;  %v12149_v62 = vld [vmem:[#allocation3 + $0x92] sm:$0x1]  ;;  %v12158_v16 = vmax.f32 %v12154_v10, %v12156_v5  ;;  %v12122_v37 = vmax.f32 %v12118_v9, %v12120_v12  ;;  %v21923_v10 = vpack.c.bf16 %v14308_v46, %v14307_v6 }
 0x844   :  { %v12151_v11 = vld [vmem:[#allocation3 + $0x93] sm:$0x1]  ;;  %v12155_v3 = vld [vmem:[#allocation3 + $0xa2] sm:$0x1]  ;;  %v12157_v55 = vld [vmem:[#allocation3 + $0xa3] sm:$0x1]  ;;  %v12128_v7 = vmax.f32 %v12124_v56, %v12126_v34  ;;  %v11942_v9 = vmul.f32 %v26241_v38, %v11915_v40  ;;  %v11944_v12 = vmul.f32 %v26241_v38, %v11917_v2  ;;  %v12022_v56 = vsub.f32 %v25950_v36, %v26232_v17 }
 0x845   :  { %v12153_v54 = vmax.f32 %v12149_v62, %v12151_v11  ;;  %v12119_v48 = vld [vmem:[#allocation3 + $0x90] sm:$0x1]  ;;  %v12121_v43 = vld [vmem:[#allocation3 + $0x91] sm:$0x1]  ;;  %v12159_v20 = vmax.f32 %v12155_v3, %v12157_v55  ;;  %v12125_v59 = vld [vmem:[#allocation3 + $0xa0] sm:$0x1]  ;;  %v12160_v47 = vmax.f32 %v12152_v41, %v12158_v16 }
 0x846   :  { %v12123_v14 = vmax.f32 %v12119_v48, %v12121_v43  ;;  %v12127_v39 = vld [vmem:[#allocation3 + $0xa1] sm:$0x1]  ;;  %v12130_v4 = vmax.f32 %v12122_v37, %v12128_v7  ;;  %v14310_v5 = vld [vmem:[%s27167_s9 + $0x128] sm:$0xff]  ;;  %v14325_v50 = vld [vmem:[%s27167_s9 + $0x1a0] sm:$0xff]  ;;  %v11966_v3 = vadd.f32 %v26261_v33, %v11942_v9  ;;  %v11968_v36 = vadd.f32 %v26261_v33, %v11944_v12 }
 0x847   :  { %v12129_v26 = vmax.f32 %v12125_v59, %v12127_v39  ;;  %v12161_v53 = vmax.f32 %v12153_v54, %v12159_v20  ;;  %v14326_v60 = vld [vmem:[%s27167_s9 + $0x1a8] sm:$0xff]  ;;  %v21926_v34 = vpack.c.bf16 %v14310_v5, %v14309_v31  ;;  %v14311_v62 = vld [vmem:[%s27167_s9 + $0x130] sm:$0xff]  ;;  %v14312_v11 = vld [vmem:[%s27167_s9 + $0x138] sm:$0xff]  ;;  %v12047_v54 = vmul.f32 %v26244_v22, %v12022_v56 }
 0x848   :  { %v21950_v45 = vpack.c.bf16 %v14326_v60, %v14325_v50  ;;  %v14328_v55 = vld [vmem:[%s27167_s9 + $0x1b8] sm:$0xff]  ;;  %v12049_v48 = vmul.f32 %v26244_v22, %v12024_v8  ;;  %v21929_v63 = vpack.c.bf16 %v14312_v11, %v14311_v62  ;;  %v14313_v16 = vld [vmem:[%s27167_s9 + $0x140] sm:$0xff]  ;;  %v14314_v20 = vld [vmem:[%s27167_s9 + $0x148] sm:$0xff]  ;;  %v11986_v59 = vmax.f32 %v11968_v36, 0.0 }
 0x849   :  { %v12131_v24 = vmax.f32 %v12123_v14, %v12129_v26  ;;  %v12181_v51 = vrot.slane %v12161_v53, 7  ;;  %v12071_v43 = vadd.f32 %v26261_v33, %v12047_v54  ;;  %v21953_v41 = vpack.c.bf16 %v14328_v55, %v14327_v13  ;;  %v14329_v39 = vld [vmem:[%s27167_s9 + $0x1c0] sm:$0xff]  ;;  %v14330_v37 = vld [vmem:[%s27167_s9 + $0x1c8] sm:$0xff]  ;;  %v14315_v53 = vld [vmem:[%s27167_s9 + $0x150] sm:$0xff] }
 0x84a   :  { %v12073_v29 = vadd.f32 %v26261_v33, %v12049_v48  ;;  %v11984_v14 = vmax.f32 %v11966_v3, 0.0  ;;  %12004 = vst [vmem:[#allocation3 + $0x50] sm:$0xff] %v11986_v59  ;;  %v21932_v19 = vpack.c.bf16 %v14314_v20, %v14313_v16  ;;  %v21956_v52 = vpack.c.bf16 %v14330_v37, %v14329_v39  ;;  %v12331_v15 = vld [vmem:[#allocation3 + $0x94] sm:$0x1]  ;;  %v12333_v0 = vld [vmem:[#allocation3 + $0x95] sm:$0x1] }
 0x84b   :  { %v12257_v18 = vrot.slane %v12131_v24, 7  ;;  %v12183_v23 = vsel %vm12182_vm8, %v12181_v51, %v12160_v47  ;;  %v12089_v7 = vmax.f32 %v12071_v43, 0.0  ;;  %v14332_v24 = vld [vmem:[%s27167_s9 + $0x1d8] sm:$0xff]  ;;  %v12337_v47 = vld [vmem:[#allocation3 + $0xa4] sm:$0x1]  ;;  %v12335_v40 = vmax.f32 %v12331_v15, %v12333_v0  ;;  %v14337_v16 = vld [vmem:[%s27167_s9 + $0x200] sm:$0xff] }
 0x84c   :  { %19587 = vmatmul.mubr.f32.vlgmr.msra.gmra.mrb[90].mxu0 %v12183_v23  ;;  %12002 = vst [vmem:[#allocation3 + $0x40] sm:$0xff] %v11984_v14  ;;  %v12091_v26 = vmax.f32 %v12073_v29, 0.0  ;;  %v12339_v51 = vld [vmem:[#allocation3 + $0xa5] sm:$0x1]  ;;  %v12446_v6 = vld [vmem:[#allocation3 + $0xa7] sm:$0x1]  ;;  %v21959_v46 = vpack.c.bf16 %v14332_v24, %v14331_v25 }
 0x84d   :  { %v12258_v61 = vsel %vm12182_vm8, %v12257_v18, %v12130_v4  ;;  %21921 = vmatpush3.bf16.msra.mxu0 %v21920_v35  ;;  %19656 = vmatprep.mubr.msk.f32.mxu0 %vm27401_vm1, %v26115_v58  ;;  %12108 = vst [vmem:[#allocation3 + $0xd0] sm:$0xff] %v12089_v7  ;;  %v12438_v35 = vld [vmem:[#allocation3 + $0x96] sm:$0x1]  ;;  %v21935_v4 = vpack.c.bf16 %v14316_v57, %v14315_v53  ;;  %v12440_v18 = vld [vmem:[#allocation3 + $0x97] sm:$0x1]  ;;  %v14320_v31 = vld [vmem:[%s27167_s9 + $0x178] sm:$0xff] }
 0x84e   :  { %19622 = vmatmul.mubr.f32.vlgmr.msra.gmra.mrb[30].mxu1 %v12258_v61  ;;  %21922 = vmatprep.subr.bf16.mxu0 %v27400_v27  ;;  %12110 = vst [vmem:[#allocation3 + $0xe0] sm:$0xff] %v12091_v26  ;;  %v14317_v23 = vld [vmem:[%s27167_s9 + $0x160] sm:$0xff]  ;;  %v14334_v61 = vld [vmem:[%s27167_s9 + $0x1e8] sm:$0xff]  ;;  %v12341_v2 = vmax.f32 %v12337_v47, %v12339_v51  ;;  %v14335_v60 = vld [vmem:[%s27167_s9 + $0x1f0] sm:$0xff] }
 0x84f   :  { %21945 = vmatpush3.bf16.msra.mxu1 %v21944_v32  ;;  %19691 = vmatprep.mubr.msk.f32.mxu1 %vm27401_vm1, %v26115_v58  ;;  %v12444_v32 = vld [vmem:[#allocation3 + $0xa6] sm:$0x1]  ;;  %v21938_v50 = vpack.c.bf16 %v14318_v28, %v14317_v23  ;;  %v14336_v9 = vld [vmem:[%s27167_s9 + $0x1f8] sm:$0xff]  ;;  %v12330_v12 = vld [vmem:[#allocation3 + $0x4] sm:$0x1] }
 0x850   :  { %21946 = vmatprep.subr.bf16.mxu1 %v27400_v27  ;;  %v12448_v5 = vmax.f32 %v12444_v32, %v12446_v6  ;;  %v12332_v56 = vld [vmem:[#allocation3 + $0x5] sm:$0x1]  ;;  %v12338_v8 = vld [vmem:[#allocation3 + $0x15] sm:$0x1]  ;;  %v12437_v62 = vld [vmem:[#allocation3 + $0x6] sm:$0x1]  ;;  %v12343_v11 = vmax.f32 %v12335_v40, %v12341_v2 }
 0x851   :  { %21924 = vmatpush3.bf16.msra.mxu0 %v21923_v10  ;;  %v14319_v10 = vld [vmem:[%s27167_s9 + $0x170] sm:$0xff]  ;;  %v12443_v36 = vld [vmem:[#allocation3 + $0x16] sm:$0x1]  ;;  %v12445_v54 = vld [vmem:[#allocation3 + $0x17] sm:$0x1]  ;;  %v12334_v48 = vmax.f32 %v12330_v12, %v12332_v56 }
 0x852   :  { %21925 = vmatprep.subr.bf16.mxu0 %v27400_v27  ;;  %v12439_v3 = vld [vmem:[#allocation3 + $0x7] sm:$0x1]  ;;  %v21941_v55 = vpack.c.bf16 %v14320_v31, %v14319_v10  ;;  %v14338_v20 = vld [vmem:[%s27167_s9 + $0x208] sm:$0xff]  ;;  %v12363_v14 = vrot.slane %v12343_v11, 7  ;;  %v14353_v59 = vld [vmem:[%s27167_s9 + $0x280] sm:$0xff] }
 0x853   :  { %21948 = vmatpush3.bf16.msra.mxu1 %v21947_v42  ;;  %v12442_v42 = vmax.f32 %v12438_v35, %v12440_v18  ;;  %v12441_v29 = vmax.f32 %v12437_v62, %v12439_v3  ;;  %v14354_v39 = vld [vmem:[%s27167_s9 + $0x288] sm:$0xff]  ;;  %v21968_v26 = vpack.c.bf16 %v14338_v20, %v14337_v16  ;;  %v14339_v53 = vld [vmem:[%s27167_s9 + $0x210] sm:$0xff]  ;;  %v14340_v57 = vld [vmem:[%s27167_s9 + $0x218] sm:$0xff] }
 0x854   :  { %21949 = vmatprep.subr.bf16.mxu1 %v27400_v27  ;;  %v14355_v24 = vld [vmem:[%s27167_s9 + $0x290] sm:$0xff]  ;;  %v14356_v15 = vld [vmem:[%s27167_s9 + $0x298] sm:$0xff]  ;;  %v21971_v47 = vpack.c.bf16 %v14340_v57, %v14339_v53  ;;  %v14341_v35 = vld [vmem:[%s27167_s9 + $0x220] sm:$0xff] }
 0x855   :  { %21927 = vmatpush3.bf16.msra.mxu0 %v21926_v34  ;;  %v21962_v34 = vpack.c.bf16 %v14334_v61, %v14333_v44  ;;  %v12450_v13 = vmax.f32 %v12442_v42, %v12448_v5  ;;  %v21995_v51 = vpack.c.bf16 %v14356_v15, %v14355_v24  ;;  %v14357_v18 = vld [vmem:[%s27167_s9 + $0x2a0] sm:$0xff]  ;;  %v14358_v32 = vld [vmem:[%s27167_s9 + $0x2a8] sm:$0xff]  ;;  %v14343_v23 = vld [vmem:[%s27167_s9 + $0x230] sm:$0xff] }
 0x856   :  { %21928 = vmatprep.subr.bf16.mxu0 %v27400_v27  ;;  %v14344_v28 = vld [vmem:[%s27167_s9 + $0x238] sm:$0xff]  ;;  %v14345_v2 = vld [vmem:[%s27167_s9 + $0x240] sm:$0xff]  ;;  %v14346_v10 = vld [vmem:[%s27167_s9 + $0x248] sm:$0xff] }
 0x857   :  { %21951 = vmatpush3.bf16.msra.mxu1 %v21950_v45  ;;  %v12336_v45 = vld [vmem:[#allocation3 + $0x14] sm:$0x1]  ;;  %v12470_v37 = vrot.slane %v12450_v13, 7  ;;  %v14360_v44 = vld [vmem:[%s27167_s9 + $0x2b8] sm:$0xff]  ;;  %v21977_v61 = vpack.c.bf16 %v14344_v28, %v14343_v23  ;;  %v14362_v42 = vld [vmem:[%s27167_s9 + $0x2c8] sm:$0xff]  ;;  %v21980_v5 = vpack.c.bf16 %v14346_v10, %v14345_v2 }
 0x858   :  { %21952 = vmatprep.subr.bf16.mxu1 %v27400_v27  ;;  %v12340_v43 = vmax.f32 %v12336_v45, %v12338_v8  ;;  %v14361_v31 = vld [vmem:[%s27167_s9 + $0x2c0] sm:$0xff]  ;;  %v14363_v12 = vld [vmem:[%s27167_s9 + $0x2d0] sm:$0xff]  ;;  %v14364_v56 = vld [vmem:[%s27167_s9 + $0x2d8] sm:$0xff] }
 0x859   :  { %21930 = vmatpush3.bf16.msra.mxu0 %v21929_v63  ;;  %v21965_v63 = vpack.c.bf16 %v14336_v9, %v14335_v60  ;;  %v14347_v60 = vld [vmem:[%s27167_s9 + $0x250] sm:$0xff]  ;;  %v14348_v9 = vld [vmem:[%s27167_s9 + $0x258] sm:$0xff]  ;;  %v12547_v45 = vld [vmem:[#allocation3 + $0xb1] sm:$0x1] }
 0x85a   :  { %21931 = vmatprep.subr.bf16.mxu0 %v27400_v27  ;;  %v12342_v7 = vmax.f32 %v12334_v48, %v12340_v43  ;;  %v12551_v8 = vld [vmem:[#allocation3 + $0xc0] sm:$0x1]  ;;  %v12553_v62 = vld [vmem:[#allocation3 + $0xc1] sm:$0x1]  ;;  %v12652_v11 = vld [vmem:[#allocation3 + $0xb2] sm:$0x1]  ;;  %v21983_v3 = vpack.c.bf16 %v14348_v9, %v14347_v60  ;;  %v11919_v9 = vsub.f32 %v25981_v21, %v26232_v17  ;;  %v12028_v21 = vsub.f32 %v26001_v49, %v26232_v17 }
 0x85b   :  { %21954 = vmatpush3.bf16.msra.mxu1 %v21953_v41  ;;  %v12447_v41 = vmax.f32 %v12443_v36, %v12445_v54  ;;  %v12654_v36 = vld [vmem:[#allocation3 + $0xb3] sm:$0x1]  ;;  %v12658_v54 = vld [vmem:[#allocation3 + $0xc2] sm:$0x1]  ;;  %v12660_v13 = vld [vmem:[#allocation3 + $0xc3] sm:$0x1]  ;;  %v12555_v16 = vmax.f32 %v12551_v8, %v12553_v62  ;;  %v12026_v8 = vsub.f32 %v25984_v30, %v26232_v17 }
 0x85c   :  { %21955 = vmatprep.subr.bf16.mxu1 %v27400_v27  ;;  %v12364_v25 = vsel %vm12182_vm8, %v12363_v14, %v12342_v7  ;;  %v14349_v48 = vld [vmem:[%s27167_s9 + $0x260] sm:$0xff]  ;;  %v14350_v43 = vld [vmem:[%s27167_s9 + $0x268] sm:$0xff]  ;;  %v14351_v20 = vld [vmem:[%s27167_s9 + $0x270] sm:$0xff]  ;;  %v11946_v62 = vmul.f32 %v26241_v38, %v11919_v9 }
 0x85d   :  { %21933 = vmatpush3.bf16.msra.mxu0 %v21932_v19  ;;  %v12449_v19 = vmax.f32 %v12441_v29, %v12447_v41  ;;  %v14366_v29 = vld [vmem:[%s27167_s9 + $0x2e8] sm:$0xff]  ;;  %v14352_v14 = vld [vmem:[%s27167_s9 + $0x278] sm:$0xff]  ;;  %v14367_v7 = vld [vmem:[%s27167_s9 + $0x2f0] sm:$0xff] }
 0x85e   :  { %21934 = vmatprep.subr.bf16.mxu0 %v27400_v27  ;;  %v12550_v57 = vld [vmem:[#allocation3 + $0x30] sm:$0x1]  ;;  %v12651_v24 = vld [vmem:[#allocation3 + $0x22] sm:$0x1]  ;;  %v14372_v60 = vld [vmem:[%s27167_s9 + $0x318] sm:$0xff] }
 0x85f   :  { %21957 = vmatpush3.bf16.msra.mxu1 %v21956_v52  ;;  %v21992_v52 = vpack.c.bf16 %v14354_v39, %v14353_v59  ;;  %v12471_v0 = vsel %vm12182_vm8, %v12470_v37, %v12449_v19  ;;  %v12656_v59 = vmax.f32 %v12652_v11, %v12654_v36  ;;  %v12662_v39 = vmax.f32 %v12658_v54, %v12660_v13  ;;  %v12544_v19 = vld [vmem:[#allocation3 + $0x20] sm:$0x1]  ;;  %v14373_v49 = vld [vmem:[%s27167_s9 + $0x320] sm:$0xff] }
 0x860   :  { %21958 = vmatprep.subr.bf16.mxu1 %v27400_v27  ;;  %v21986_v37 = vpack.c.bf16 %v14350_v43, %v14349_v48  ;;  %v12051_v36 = vmul.f32 %v26244_v22, %v12026_v8  ;;  %v12053_v54 = vmul.f32 %v26244_v22, %v12028_v21  ;;  %v14389_v22 = vld [vmem:[%s27167_s9 + $0x3a0] sm:$0xff]  ;;  %v26589_v48 = vld [vmem:[#allocation2] sm:$0xff] }
 0x861   :  { %21936 = vmatpush3.bf16.msra.mxu0 %v21935_v4  ;;  %v14342_v4 = vld [vmem:[%s27167_s9 + $0x228] sm:$0xff]  ;;  %v12758_v8 = vld [vmem:[#allocation3 + $0x24] sm:$0x1]  ;;  %v12760_v21 = vld [vmem:[#allocation3 + $0x25] sm:$0x1] }
 0x862   :  { %21937 = vmatprep.subr.bf16.mxu0 %v27400_v27  ;;  %v21974_v6 = vpack.c.bf16 %v14342_v4, %v14341_v35  ;;  %v12664_v35 = vmax.f32 %v12656_v59, %v12662_v39  ;;  %v21989_v4 = vpack.c.bf16 %v14352_v14, %v14351_v20  ;;  %v12075_v43 = vadd.f32 %v26261_v33, %v12051_v36  ;;  %v14375_v39 = vld [vmem:[%s27167_s9 + $0x330] sm:$0xff] }
 0x863   :  { %21960 = vmatpush3.bf16.msra.mxu1 %v21959_v46  ;;  %v21998_v46 = vpack.c.bf16 %v14358_v32, %v14357_v18 }
 0x864   :  { %21961 = vmatprep.subr.bf16.mxu1 %v27400_v27  ;;  %v12684_v2 = vrot.slane %v12664_v35, 7  ;;  %v12093_v20 = vmax.f32 %v12075_v43, 0.0  ;;  %v14396_v35 = vld [vmem:[%s27167_s9 + $0x3d8] sm:$0xff] }
 0x865   :  { %21939 = vmatpush3.bf16.msra.mxu0 %v21938_v50  ;;  %v22004_v50 = vpack.c.bf16 %v14362_v42, %v14361_v31 }
 0x866   :  { %21940 = vmatprep.subr.bf16.mxu0 %v27400_v27  ;;  %12112 = vst [vmem:[#allocation3 + $0xf0] sm:$0xff] %v12093_v20  ;;  %v14417_v20 = vld [vmem:[%s27167_s9 + $0x480] sm:$0xff] }
 0x867   :  { %21963 = vmatpush3.bf16.msra.mxu1 %v21962_v34  ;;  %v12545_v34 = vld [vmem:[#allocation3 + $0xb0] sm:$0x1] }
 0x868   :  { %21964 = vmatprep.subr.bf16.mxu1 %v27400_v27  ;;  %v12549_v41 = vmax.f32 %v12545_v34, %v12547_v45  ;;  %v14387_v34 = vld [vmem:[%s27167_s9 + $0x390] sm:$0xff]  ;;  %v14388_v45 = vld [vmem:[%s27167_s9 + $0x398] sm:$0xff] }
 0x869   :  { %21942 = vmatpush3.bf16.msra.mxu0 %v21941_v55  ;;  %v22007_v55 = vpack.c.bf16 %v14364_v56, %v14363_v12  ;;  %v11921_v12 = vsub.f32 %v25998_v1, %v26232_v17  ;;  %v22043_v30 = vpack.c.bf16 %v14388_v45, %v14387_v34  ;;  %v14374_v17 = vld [vmem:[%s27167_s9 + $0x328] sm:$0xff]  ;;  %v14399_v34 = vld [vmem:[%s27167_s9 + $0x3f0] sm:$0xff]  ;;  %v14400_v45 = vld [vmem:[%s27167_s9 + $0x3f8] sm:$0xff] }
 0x86a   :  { %21967 = vmatprep.subr.bf16.mxu0 %v27400_v27  ;;  %v12557_v15 = vmax.f32 %v12549_v41, %v12555_v16  ;;  %v22022_v16 = vpack.c.bf16 %v14374_v17, %v14373_v49  ;;  %v12873_v49 = vld [vmem:[#allocation3 + $0x37] sm:$0x1] }
 0x86b   :  { %21966 = vmatpush3.bf16.msra.mxu1 %v21965_v63  ;;  %v14365_v63 = vld [vmem:[%s27167_s9 + $0x2e0] sm:$0xff]  ;;  %v11948_v11 = vmul.f32 %v26241_v38, %v11921_v12  ;;  %v11970_v38 = vadd.f32 %v26261_v33, %v11946_v62 }
 0x86c   :  { %21991 = vmatprep.subr.bf16.mxu1 %v27400_v27  ;;  %19657 = vmatmul.mubr.f32.vlgmr.msra.gmra.mrb[92].mxu0 %v12364_v25  ;;  %v22010_v53 = vpack.c.bf16 %v14366_v29, %v14365_v63  ;;  %v12552_v25 = vld [vmem:[#allocation3 + $0x31] sm:$0x1]  ;;  %v12077_v63 = vadd.f32 %v26261_v33, %v12053_v54  ;;  %v12764_v62 = vld [vmem:[#allocation3 + $0x34] sm:$0x1]  ;;  %v12867_v54 = vld [vmem:[#allocation3 + $0x27] sm:$0x1] }
 0x86d   :  { %21969 = vmatpush3.bf16.msra.mxu0 %v21968_v26  ;;  %19726 = vmatprep.mubr.msk.f32.mxu0 %vm27401_vm1, %v26115_v58  ;;  %v14368_v26 = vld [vmem:[%s27167_s9 + $0x2f8] sm:$0xff]  ;;  %v12554_v32 = vmax.f32 %v12550_v57, %v12552_v25  ;;  %v11972_v13 = vadd.f32 %v26261_v33, %v11948_v11  ;;  %v11988_v29 = vmax.f32 %v11970_v38, 0.0  ;;  %v14393_v57 = vld [vmem:[%s27167_s9 + $0x3c0] sm:$0xff]  ;;  %v14394_v25 = vld [vmem:[%s27167_s9 + $0x3c8] sm:$0xff] }
 0x86e   :  { %19692 = vmatmul.mubr.f32.vlgmr.msra.gmra.mrb[32].mxu1 %v12471_v0  ;;  %21970 = vmatprep.subr.bf16.mxu0 %v27400_v27  ;;  %v12653_v0 = vld [vmem:[#allocation3 + $0x23] sm:$0x1]  ;;  %v12095_v14 = vmax.f32 %v12077_v63, 0.0  ;;  %v14376_v33 = vld [vmem:[%s27167_s9 + $0x338] sm:$0xff]  ;;  %v12766_v11 = vld [vmem:[#allocation3 + $0x35] sm:$0x1] }
 0x86f   :  { %21993 = vmatpush3.bf16.msra.mxu1 %v21992_v52  ;;  %19761 = vmatprep.mubr.msk.f32.mxu1 %vm27401_vm1, %v26115_v58  ;;  %v14359_v58 = vld [vmem:[%s27167_s9 + $0x2b0] sm:$0xff]  ;;  %v12655_v23 = vmax.f32 %v12651_v24, %v12653_v0  ;;  %v11990_v41 = vmax.f32 %v11972_v13, 0.0  ;;  %12006 = vst [vmem:[#allocation3 + $0x60] sm:$0xff] %v11988_v29  ;;  %v12762_v13 = vmax.f32 %v12758_v8, %v12760_v21  ;;  %v14401_v29 = vld [vmem:[%s27167_s9 + $0x400] sm:$0xff] }
 0x870   :  { %21994 = vmatprep.subr.bf16.mxu1 %v27400_v27  ;;  %v22001_v40 = vpack.c.bf16 %v14360_v44, %v14359_v58  ;;  %v12546_v52 = vld [vmem:[#allocation3 + $0x21] sm:$0x1]  ;;  %v14370_v58 = vld [vmem:[%s27167_s9 + $0x308] sm:$0xff]  ;;  %v14385_v44 = vld [vmem:[%s27167_s9 + $0x380] sm:$0xff]  ;;  %12114 = vst [vmem:[#allocation3 + $0x100] sm:$0xff] %v12095_v14 }
 0x871   :  { %21972 = vmatpush3.bf16.msra.mxu0 %v21971_v47  ;;  %v12657_v47 = vld [vmem:[#allocation3 + $0x32] sm:$0x1]  ;;  %v12548_v18 = vmax.f32 %v12544_v19, %v12546_v52  ;;  %12008 = vst [vmem:[#allocation3 + $0x70] sm:$0xff] %v11990_v41  ;;  %v14379_v0 = vld [vmem:[%s27167_s9 + $0x350] sm:$0xff]  ;;  %v14402_v41 = vld [vmem:[%s27167_s9 + $0x408] sm:$0xff] }
 0x872   :  { %21973 = vmatprep.subr.bf16.mxu0 %v27400_v27  ;;  %v14377_v52 = vld [vmem:[%s27167_s9 + $0x340] sm:$0xff]  ;;  %v14418_v14 = vld [vmem:[%s27167_s9 + $0x488] sm:$0xff] }
 0x873   :  { %21996 = vmatpush3.bf16.msra.mxu1 %v21995_v51  ;;  %v12659_v51 = vld [vmem:[#allocation3 + $0x33] sm:$0x1]  ;;  %v12556_v10 = vmax.f32 %v12548_v18, %v12554_v32  ;;  %v12761_v18 = vld [vmem:[#allocation3 + $0xb5] sm:$0x1]  ;;  %v12765_v32 = vld [vmem:[#allocation3 + $0xc4] sm:$0x1] }
 0x874   :  { %21997 = vmatprep.subr.bf16.mxu1 %v27400_v27  ;;  %v12661_v28 = vmax.f32 %v12657_v47, %v12659_v51  ;;  %v14380_v47 = vld [vmem:[%s27167_s9 + $0x358] sm:$0xff]  ;;  %v14395_v51 = vld [vmem:[%s27167_s9 + $0x3d0] sm:$0xff]  ;;  %v13082_v21 = vld [vmem:[#allocation3 + $0xd3] sm:$0x1] }
 0x875   :  { %21975 = vmatpush3.bf16.msra.mxu0 %v21974_v6  ;;  %v14369_v6 = vld [vmem:[%s27167_s9 + $0x300] sm:$0xff] }
 0x876   :  { %21976 = vmatprep.subr.bf16.mxu0 %v27400_v27  ;;  %v22016_v31 = vpack.c.bf16 %v14370_v58, %v14369_v6  ;;  %v12767_v6 = vld [vmem:[#allocation3 + $0xc5] sm:$0x1]  ;;  %v12872_v58 = vld [vmem:[#allocation3 + $0xc6] sm:$0x1] }
 0x877   :  { %21999 = vmatpush3.bf16.msra.mxu1 %v21998_v46  ;;  %v22013_v46 = vpack.c.bf16 %v14368_v26, %v14367_v7  ;;  %v14392_v7 = vld [vmem:[%s27167_s9 + $0x3b8] sm:$0xff]  ;;  %v22025_v26 = vpack.c.bf16 %v14376_v33, %v14375_v39  ;;  %v22064_v33 = vpack.c.bf16 %v14402_v41, %v14401_v29  ;;  %v12972_v41 = vld [vmem:[#allocation3 + $0x40] sm:$0x1] }
 0x878   :  { %22000 = vmatprep.subr.bf16.mxu1 %v27400_v27  ;;  %v14432_v29 = vld [vmem:[%s27167_s9 + $0x4f8] sm:$0xff] }
 0x879   :  { %21978 = vmatpush3.bf16.msra.mxu0 %v21977_v61  ;;  %v14386_v61 = vld [vmem:[%s27167_s9 + $0x388] sm:$0xff] }
 0x87a   :  { %21979 = vmatprep.subr.bf16.mxu0 %v27400_v27  ;;  %v22040_v42 = vpack.c.bf16 %v14386_v61, %v14385_v44  ;;  %v12874_v44 = vld [vmem:[#allocation3 + $0xc7] sm:$0x1]  ;;  %v22055_v61 = vpack.c.bf16 %v14396_v35, %v14395_v51  ;;  %v14421_v51 = vld [vmem:[%s27167_s9 + $0x4a0] sm:$0xff]  ;;  %v14422_v35 = vld [vmem:[%s27167_s9 + $0x4a8] sm:$0xff] }
 0x87b   :  { %22002 = vmatpush3.bf16.msra.mxu1 %v22001_v40  ;;  %v12577_v40 = vrot.slane %v12557_v15, 7  ;;  %v22052_v15 = vpack.c.bf16 %v14394_v25, %v14393_v57  ;;  %v12876_v12 = vmax.f32 %v12872_v58, %v12874_v44  ;;  %v14420_v57 = vld [vmem:[%s27167_s9 + $0x498] sm:$0xff]  ;;  %v14409_v44 = vld [vmem:[%s27167_s9 + $0x440] sm:$0xff] }
 0x87c   :  { %22003 = vmatprep.subr.bf16.mxu1 %v27400_v27 }
 0x87d   :  { %21981 = vmatpush3.bf16.msra.mxu0 %v21980_v5  ;;  %v12663_v5 = vmax.f32 %v12655_v23, %v12661_v28  ;;  %v12578_v56 = vsel %vm12182_vm8, %v12577_v40, %v12556_v10  ;;  %v22031_v23 = vpack.c.bf16 %v14380_v47, %v14379_v0  ;;  %v12868_v28 = vld [vmem:[#allocation3 + $0xb7] sm:$0x1]  ;;  %v14406_v47 = vld [vmem:[%s27167_s9 + $0x428] sm:$0xff] }
 0x87e   :  { %21982 = vmatprep.subr.bf16.mxu0 %v27400_v27  ;;  %v14381_v40 = vld [vmem:[%s27167_s9 + $0x360] sm:$0xff] }
 0x87f   :  { %22005 = vmatpush3.bf16.msra.mxu1 %v22004_v50  ;;  %v14371_v50 = vld [vmem:[%s27167_s9 + $0x310] sm:$0xff]  ;;  %v12685_v1 = vsel %vm12182_vm8, %v12684_v2, %v12663_v5  ;;  %v14382_v2 = vld [vmem:[%s27167_s9 + $0x368] sm:$0xff]  ;;  %v14397_v10 = vld [vmem:[%s27167_s9 + $0x3e0] sm:$0xff]  ;;  %v12769_v5 = vmax.f32 %v12765_v32, %v12767_v6 }
 0x880   :  { %22006 = vmatprep.subr.bf16.mxu1 %v27400_v27  ;;  %v14405_v0 = vld [vmem:[%s27167_s9 + $0x420] sm:$0xff]  ;;  %v14407_v32 = vld [vmem:[%s27167_s9 + $0x430] sm:$0xff]  ;;  %v14408_v6 = vld [vmem:[%s27167_s9 + $0x438] sm:$0xff] }
 0x881   :  { %21984 = vmatpush3.bf16.msra.mxu0 %v21983_v3  ;;  %v22019_v3 = vpack.c.bf16 %v14372_v60, %v14371_v50  ;;  %v14383_v50 = vld [vmem:[%s27167_s9 + $0x370] sm:$0xff]  ;;  %v14384_v60 = vld [vmem:[%s27167_s9 + $0x378] sm:$0xff] }
 0x882   :  { %21985 = vmatprep.subr.bf16.mxu0 %v27400_v27  ;;  %v22037_v38 = vpack.c.bf16 %v14384_v60, %v14383_v50  ;;  %v14427_v50 = vld [vmem:[%s27167_s9 + $0x4d0] sm:$0xff]  ;;  %v14428_v60 = vld [vmem:[%s27167_s9 + $0x4d8] sm:$0xff] }
 0x883   :  { %22008 = vmatpush3.bf16.msra.mxu1 %v22007_v55  ;;  %v14390_v55 = vld [vmem:[%s27167_s9 + $0x3a8] sm:$0xff] }
 0x884   :  { %22009 = vmatprep.subr.bf16.mxu1 %v27400_v27  ;;  %v22046_v59 = vpack.c.bf16 %v14390_v55, %v14389_v22  ;;  %v12768_v22 = vmax.f32 %v12764_v62, %v12766_v11  ;;  %v22061_v55 = vpack.c.bf16 %v14400_v45, %v14399_v34  ;;  %v12981_v34 = vld [vmem:[#allocation3 + $0xe1] sm:$0x1]  ;;  %v13080_v45 = vld [vmem:[#allocation3 + $0xd2] sm:$0x1]  ;;  %v13088_v62 = vld [vmem:[#allocation3 + $0xe3] sm:$0x1]  ;;  %v22103_v11 = vpack.c.bf16 %v14428_v60, %v14427_v50 }
 0x885   :  { %21987 = vmatpush3.bf16.msra.mxu0 %v21986_v37  ;;  %v14391_v37 = vld [vmem:[%s27167_s9 + $0x3b0] sm:$0xff]  ;;  %v14453_v50 = vld [vmem:[%s27167_s9 + $0x5a0] sm:$0xff]  ;;  %v14454_v60 = vld [vmem:[%s27167_s9 + $0x5a8] sm:$0xff] }
 0x886   :  { %21988 = vmatprep.subr.bf16.mxu0 %v27400_v27  ;;  %v22049_v19 = vpack.c.bf16 %v14392_v7, %v14391_v37  ;;  %v12770_v39 = vmax.f32 %v12762_v13, %v12768_v22  ;;  %v22088_v7 = vpack.c.bf16 %v14418_v14, %v14417_v20  ;;  %v14416_v13 = vld [vmem:[%s27167_s9 + $0x478] sm:$0xff]  ;;  %v13084_v22 = vmax.f32 %v13080_v45, %v13082_v21  ;;  %v12978_v14 = vld [vmem:[#allocation3 + $0x50] sm:$0x1]  ;;  %v14455_v45 = vld [vmem:[%s27167_s9 + $0x5b0] sm:$0xff] }
 0x887   :  { %22011 = vmatpush3.bf16.msra.mxu1 %v22010_v53  ;;  %v14378_v53 = vld [vmem:[%s27167_s9 + $0x348] sm:$0xff] }
 0x888   :  { %22012 = vmatprep.subr.bf16.mxu1 %v27400_v27  ;;  %v22028_v24 = vpack.c.bf16 %v14378_v53, %v14377_v52  ;;  %v14419_v53 = vld [vmem:[%s27167_s9 + $0x490] sm:$0xff] }
 0x889   :  { %21990 = vmatpush3.bf16.msra.mxu0 %v21989_v4  ;;  %v12759_v4 = vld [vmem:[#allocation3 + $0xb4] sm:$0x1] }
 0x88a   :  { %22015 = vmatprep.subr.bf16.mxu0 %v27400_v27 }
 0x88b   :  { %22014 = vmatpush3.bf16.msra.mxu1 %v22013_v46  ;;  %v12866_v46 = vld [vmem:[#allocation3 + $0xb6] sm:$0x1] }
 0x88c   :  { %22039 = vmatprep.subr.bf16.mxu1 %v27400_v27  ;;  %19727 = vmatmul.mubr.f32.vlgmr.msra.gmra.mrb[94].mxu0 %v12578_v56  ;;  %v12870_v9 = vmax.f32 %v12866_v46, %v12868_v28  ;;  %v22034_v56 = vpack.c.bf16 %v14382_v2, %v14381_v40  ;;  %v14423_v46 = vld [vmem:[%s27167_s9 + $0x4b0] sm:$0xff]  ;;  %v22073_v28 = vpack.c.bf16 %v14408_v6, %v14407_v32  ;;  %v14425_v40 = vld [vmem:[%s27167_s9 + $0x4c0] sm:$0xff]  ;;  %v14426_v2 = vld [vmem:[%s27167_s9 + $0x4c8] sm:$0xff] }
 0x88d   :  { %22017 = vmatpush3.bf16.msra.mxu0 %v22016_v31  ;;  %19796 = vmatprep.mubr.msk.f32.mxu0 %vm27401_vm1, %v26589_v48  ;;  %v14398_v31 = vld [vmem:[%s27167_s9 + $0x3e8] sm:$0xff] }
 0x88e   :  { %19762 = vmatmul.mubr.f32.vlgmr.msra.gmra.mrb[34].mxu1 %v12685_v1  ;;  %22018 = vmatprep.subr.bf16.mxu0 %v27400_v27  ;;  %v22058_v1 = vpack.c.bf16 %v14398_v31, %v14397_v10  ;;  %v12878_v17 = vmax.f32 %v12870_v9, %v12876_v12  ;;  %v22100_v31 = vpack.c.bf16 %v14426_v2, %v14425_v40  ;;  %v12973_v9 = vld [vmem:[#allocation3 + $0xd0] sm:$0x1]  ;;  %v12975_v12 = vld [vmem:[#allocation3 + $0xd1] sm:$0x1]  ;;  %v14452_v40 = vld [vmem:[%s27167_s9 + $0x598] sm:$0xff] }
 0x88f   :  { %22041 = vmatpush3.bf16.msra.mxu1 %v22040_v42  ;;  %19831 = vmatprep.mubr.msk.f32.mxu1 %vm27401_vm1, %v26589_v48  ;;  %v12763_v42 = vmax.f32 %v12759_v4, %v12761_v18  ;;  %v22070_v4 = vpack.c.bf16 %v14406_v47, %v14405_v0  ;;  %v22094_v18 = vpack.c.bf16 %v14422_v35, %v14421_v51  ;;  %v14433_v0 = vld [vmem:[%s27167_s9 + $0x500] sm:$0xff]  ;;  %v14434_v47 = vld [vmem:[%s27167_s9 + $0x508] sm:$0xff] }
 0x890   :  { %22042 = vmatprep.subr.bf16.mxu1 %v27400_v27  ;;  %v14449_v35 = vld [vmem:[%s27167_s9 + $0x580] sm:$0xff]  ;;  %v22112_v6 = vpack.c.bf16 %v14434_v47, %v14433_v0  ;;  %v14464_v0 = vld [vmem:[%s27167_s9 + $0x5f8] sm:$0xff]  ;;  %v13186_v47 = vld [vmem:[#allocation3 + $0x44] sm:$0x1] }
 0x891   :  { %22020 = vmatpush3.bf16.msra.mxu0 %v22019_v3  ;;  %v12865_v3 = vld [vmem:[#allocation3 + $0x26] sm:$0x1]  ;;  %v12771_v36 = vmax.f32 %v12763_v42, %v12769_v5  ;;  %v14412_v5 = vld [vmem:[%s27167_s9 + $0x458] sm:$0xff] }
 0x892   :  { %22021 = vmatprep.subr.bf16.mxu0 %v27400_v27  ;;  %v12869_v43 = vmax.f32 %v12865_v3, %v12867_v54  ;;  %v14411_v42 = vld [vmem:[%s27167_s9 + $0x450] sm:$0xff]  ;;  %v14413_v3 = vld [vmem:[%s27167_s9 + $0x460] sm:$0xff] }
 0x893   :  { %22044 = vmatpush3.bf16.msra.mxu1 %v22043_v30  ;;  %v12871_v30 = vld [vmem:[#allocation3 + $0x36] sm:$0x1]  ;;  %v22079_v8 = vpack.c.bf16 %v14412_v5, %v14411_v42  ;;  %v14438_v5 = vld [vmem:[%s27167_s9 + $0x528] sm:$0xff] }
 0x894   :  { %22045 = vmatprep.subr.bf16.mxu1 %v27400_v27  ;;  %v12875_v63 = vmax.f32 %v12871_v30, %v12873_v49  ;;  %v14429_v54 = vld [vmem:[%s27167_s9 + $0x4e0] sm:$0xff]  ;;  %v14430_v30 = vld [vmem:[%s27167_s9 + $0x4e8] sm:$0xff]  ;;  %v12977_v49 = vmax.f32 %v12973_v9, %v12975_v12  ;;  %v22142_v12 = vpack.c.bf16 %v14454_v60, %v14453_v50 }
 0x895   :  { %22023 = vmatpush3.bf16.msra.mxu0 %v22022_v16  ;;  %v12791_v16 = vrot.slane %v12771_v36, 7  ;;  %v14414_v36 = vld [vmem:[%s27167_s9 + $0x468] sm:$0xff]  ;;  %v22106_v20 = vpack.c.bf16 %v14430_v30, %v14429_v54  ;;  %v14437_v42 = vld [vmem:[%s27167_s9 + $0x520] sm:$0xff] }
 0x896   :  { %22024 = vmatprep.subr.bf16.mxu0 %v27400_v27  ;;  %v12877_v37 = vmax.f32 %v12869_v43, %v12875_v63  ;;  %v22082_v43 = vpack.c.bf16 %v14414_v36, %v14413_v3  ;;  %v14431_v63 = vld [vmem:[%s27167_s9 + $0x4f0] sm:$0xff]  ;;  %v22118_v9 = vpack.c.bf16 %v14438_v5, %v14437_v42  ;;  %v14457_v3 = vld [vmem:[%s27167_s9 + $0x5c0] sm:$0xff]  ;;  %v14458_v36 = vld [vmem:[%s27167_s9 + $0x5c8] sm:$0xff] }
 0x897   :  { %22047 = vmatpush3.bf16.msra.mxu1 %v22046_v59  ;;  %v12898_v59 = vrot.slane %v12878_v17, 7  ;;  %v12792_v52 = vsel %vm12182_vm8, %v12791_v16, %v12770_v39  ;;  %v12974_v16 = vld [vmem:[#allocation3 + $0x41] sm:$0x1]  ;;  %v13079_v39 = vld [vmem:[#allocation3 + $0x42] sm:$0x1]  ;;  %v22148_v30 = vpack.c.bf16 %v14458_v36, %v14457_v3  ;;  %v14465_v42 = vld [vmem:[%s27167_s9 + $0x600] sm:$0xff] }
 0x898   :  { %22048 = vmatprep.subr.bf16.mxu1 %v27400_v27  ;;  %v14466_v5 = vld [vmem:[%s27167_s9 + $0x608] sm:$0xff]  ;;  %v14481_v60 = vld [vmem:[%s27167_s9 + $0x680] sm:$0xff]  ;;  %v14484_v3 = vld [vmem:[%s27167_s9 + $0x698] sm:$0xff] }
 0x899   :  { %22026 = vmatpush3.bf16.msra.mxu0 %v22025_v26  ;;  %v14403_v26 = vld [vmem:[%s27167_s9 + $0x410] sm:$0xff]  ;;  %v12899_v25 = vsel %vm12182_vm8, %v12898_v59, %v12877_v37  ;;  %v12980_v59 = vld [vmem:[#allocation3 + $0x51] sm:$0x1] }
 0x89a   :  { %22027 = vmatprep.subr.bf16.mxu0 %v27400_v27  ;;  %v13081_v37 = vld [vmem:[#allocation3 + $0x43] sm:$0x1] }
 0x89b   :  { %22050 = vmatpush3.bf16.msra.mxu1 %v22049_v19  ;;  %v14404_v19 = vld [vmem:[%s27167_s9 + $0x418] sm:$0xff] }
 0x89c   :  { %22051 = vmatprep.subr.bf16.mxu1 %v27400_v27 }
 0x89d   :  { %22029 = vmatpush3.bf16.msra.mxu0 %v22028_v24  ;;  %v22067_v24 = vpack.c.bf16 %v14404_v19, %v14403_v26  ;;  %v13087_v26 = vld [vmem:[#allocation3 + $0x53] sm:$0x1] }
 0x89e   :  { %22030 = vmatprep.subr.bf16.mxu0 %v27400_v27 }
 0x89f   :  { %22053 = vmatpush3.bf16.msra.mxu1 %v22052_v15  ;;  %v22091_v15 = vpack.c.bf16 %v14420_v57, %v14419_v53  ;;  %v12976_v53 = vmax.f32 %v12972_v41, %v12974_v16  ;;  %v12982_v57 = vmax.f32 %v12978_v14, %v12980_v59  ;;  %v13296_v16 = vld [vmem:[#allocation3 + $0xd7] sm:$0x1]  ;;  %v13302_v14 = vld [vmem:[#allocation3 + $0xe7] sm:$0x1] }
 0x8a0   :  { %22054 = vmatprep.subr.bf16.mxu1 %v27400_v27 }
 0x8a1   :  { %22032 = vmatpush3.bf16.msra.mxu0 %v22031_v23  ;;  %v14424_v23 = vld [vmem:[%s27167_s9 + $0x4b8] sm:$0xff]  ;;  %v12984_v32 = vmax.f32 %v12976_v53, %v12982_v57 }
 0x8a2   :  { %22033 = vmatprep.subr.bf16.mxu0 %v27400_v27  ;;  %v22097_v58 = vpack.c.bf16 %v14424_v23, %v14423_v46  ;;  %v14448_v53 = vld [vmem:[%s27167_s9 + $0x578] sm:$0xff] }
 0x8a3   :  { %22056 = vmatpush3.bf16.msra.mxu1 %v22055_v61  ;;  %v14410_v61 = vld [vmem:[%s27167_s9 + $0x448] sm:$0xff] }
 0x8a4   :  { %22057 = vmatprep.subr.bf16.mxu1 %v27400_v27  ;;  %v22076_v10 = vpack.c.bf16 %v14410_v61, %v14409_v44  ;;  %v14451_v61 = vld [vmem:[%s27167_s9 + $0x590] sm:$0xff] }
 0x8a5   :  { %22035 = vmatpush3.bf16.msra.mxu0 %v22034_v56  ;;  %v12979_v56 = vld [vmem:[#allocation3 + $0xe0] sm:$0x1] }
 0x8a6   :  { %22036 = vmatprep.subr.bf16.mxu0 %v27400_v27  ;;  %v12983_v17 = vmax.f32 %v12979_v56, %v12981_v34  ;;  %v14439_v56 = vld [vmem:[%s27167_s9 + $0x530] sm:$0xff]  ;;  %v14440_v34 = vld [vmem:[%s27167_s9 + $0x538] sm:$0xff] }
 0x8a7   :  { %22059 = vmatpush3.bf16.msra.mxu1 %v22058_v1  ;;  %v13086_v1 = vld [vmem:[#allocation3 + $0xe2] sm:$0x1]  ;;  %v22121_v21 = vpack.c.bf16 %v14440_v34, %v14439_v56  ;;  %v22160_v34 = vpack.c.bf16 %v14466_v5, %v14465_v42  ;;  %v14496_v42 = vld [vmem:[%s27167_s9 + $0x6f8] sm:$0xff]  ;;  %v13400_v5 = vld [vmem:[#allocation3 + $0x60] sm:$0x1] }
 0x8a8   :  { %22060 = vmatprep.subr.bf16.mxu1 %v27400_v27 }
 0x8a9   :  { %22038 = vmatpush3.bf16.msra.mxu0 %v22037_v38  ;;  %v14415_v38 = vld [vmem:[%s27167_s9 + $0x470] sm:$0xff] }
 0x8aa   :  { %22063 = vmatprep.subr.bf16.mxu0 %v27400_v27 }
 0x8ab   :  { %22062 = vmatpush3.bf16.msra.mxu1 %v22061_v55  ;;  %v13090_v55 = vmax.f32 %v13086_v1, %v13088_v62  ;;  %v14441_v62 = vld [vmem:[%s27167_s9 + $0x540] sm:$0xff] }
 0x8ac   :  { %22087 = vmatprep.subr.bf16.mxu1 %v27400_v27  ;;  %19797 = vmatmul.mubr.f32.vlgmr.msra.gmra.mrb[96].mxu0 %v12792_v52  ;;  %v22085_v52 = vpack.c.bf16 %v14416_v13, %v14415_v38  ;;  %v14459_v38 = vld [vmem:[%s27167_s9 + $0x5d0] sm:$0xff]  ;;  %v14460_v13 = vld [vmem:[%s27167_s9 + $0x5d8] sm:$0xff] }
 0x8ad   :  { %22065 = vmatpush3.bf16.msra.mxu0 %v22064_v33  ;;  %19866 = vmatprep.mubr.msk.f32.mxu0 %vm27401_vm1, %v26589_v48  ;;  %v12985_v33 = vmax.f32 %v12977_v49, %v12983_v17  ;;  %v13092_v19 = vmax.f32 %v13084_v22, %v13090_v55  ;;  %v14443_v49 = vld [vmem:[%s27167_s9 + $0x550] sm:$0xff]  ;;  %v14444_v17 = vld [vmem:[%s27167_s9 + $0x558] sm:$0xff]  ;;  %v13187_v22 = vld [vmem:[#allocation3 + $0xd4] sm:$0x1]  ;;  %v22151_v59 = vpack.c.bf16 %v14460_v13, %v14459_v38 }
 0x8ae   :  { %19832 = vmatmul.mubr.f32.vlgmr.msra.gmra.mrb[36].mxu1 %v12899_v25  ;;  %22066 = vmatprep.subr.bf16.mxu0 %v27400_v27  ;;  %v22109_v25 = vpack.c.bf16 %v14432_v29, %v14431_v63  ;;  %v13189_v55 = vld [vmem:[#allocation3 + $0xd5] sm:$0x1]  ;;  %v13195_v63 = vld [vmem:[#allocation3 + $0xe5] sm:$0x1]  ;;  %v13294_v29 = vld [vmem:[#allocation3 + $0xd6] sm:$0x1]  ;;  %v22127_v41 = vpack.c.bf16 %v14444_v17, %v14443_v49 }
 0x8af   :  { %22089 = vmatpush3.bf16.msra.mxu1 %v22088_v7  ;;  %19901 = vmatprep.mubr.msk.f32.mxu1 %vm27401_vm1, %v26589_v48  ;;  %v13085_v7 = vld [vmem:[#allocation3 + $0x52] sm:$0x1]  ;;  %v13005_v51 = vrot.slane %v12985_v33, 7  ;;  %v14446_v33 = vld [vmem:[%s27167_s9 + $0x568] sm:$0xff]  ;;  %v13298_v57 = vmax.f32 %v13294_v29, %v13296_v16  ;;  %v14487_v29 = vld [vmem:[%s27167_s9 + $0x6b0] sm:$0xff] }
 0x8b0   :  { %22090 = vmatprep.subr.bf16.mxu1 %v27400_v27  ;;  %v14469_v49 = vld [vmem:[%s27167_s9 + $0x620] sm:$0xff]  ;;  %v14470_v17 = vld [vmem:[%s27167_s9 + $0x628] sm:$0xff] }
 0x8b1   :  { %22068 = vmatpush3.bf16.msra.mxu0 %v22067_v24  ;;  %v13083_v24 = vmax.f32 %v13079_v39, %v13081_v37  ;;  %v13006_v44 = vsel %vm12182_vm8, %v13005_v51, %v12984_v32  ;;  %v14445_v39 = vld [vmem:[%s27167_s9 + $0x560] sm:$0xff]  ;;  %v13188_v51 = vld [vmem:[#allocation3 + $0x45] sm:$0x1]  ;;  %v13293_v32 = vld [vmem:[#allocation3 + $0x46] sm:$0x1] }
 0x8b2   :  { %22069 = vmatprep.subr.bf16.mxu0 %v27400_v27  ;;  %v14461_v37 = vld [vmem:[%s27167_s9 + $0x5e0] sm:$0xff]  ;;  %v14486_v13 = vld [vmem:[%s27167_s9 + $0x6a8] sm:$0xff] }
 0x8b3   :  { %22092 = vmatpush3.bf16.msra.mxu1 %v22091_v15  ;;  %v13089_v15 = vmax.f32 %v13085_v7, %v13087_v26  ;;  %v14462_v7 = vld [vmem:[%s27167_s9 + $0x5e8] sm:$0xff]  ;;  %v13191_v26 = vmax.f32 %v13187_v22, %v13189_v55  ;;  %v14485_v38 = vld [vmem:[%s27167_s9 + $0x6a0] sm:$0xff]  ;;  %v22166_v22 = vpack.c.bf16 %v14470_v17, %v14469_v49 }
 0x8b4   :  { %22093 = vmatprep.subr.bf16.mxu1 %v27400_v27  ;;  %v22190_v55 = vpack.c.bf16 %v14486_v13, %v14485_v38  ;;  %v14497_v49 = vld [vmem:[%s27167_s9 + $0x700] sm:$0xff]  ;;  %v14498_v17 = vld [vmem:[%s27167_s9 + $0x708] sm:$0xff] }
 0x8b5   :  { %22071 = vmatpush3.bf16.msra.mxu0 %v22070_v4  ;;  %v14450_v4 = vld [vmem:[%s27167_s9 + $0x588] sm:$0xff]  ;;  %v13091_v46 = vmax.f32 %v13083_v24, %v13089_v15  ;;  %v22130_v24 = vpack.c.bf16 %v14446_v33, %v14445_v39  ;;  %v14463_v15 = vld [vmem:[%s27167_s9 + $0x5f0] sm:$0xff]  ;;  %v14489_v39 = vld [vmem:[%s27167_s9 + $0x6c0] sm:$0xff] }
 0x8b6   :  { %22072 = vmatprep.subr.bf16.mxu0 %v27400_v27  ;;  %v22136_v23 = vpack.c.bf16 %v14450_v4, %v14449_v35  ;;  %v22154_v35 = vpack.c.bf16 %v14462_v7, %v14461_v37  ;;  %v13192_v4 = vld [vmem:[#allocation3 + $0x54] sm:$0x1]  ;;  %v14490_v33 = vld [vmem:[%s27167_s9 + $0x6c8] sm:$0xff] }
 0x8b7   :  { %22095 = vmatpush3.bf16.msra.mxu1 %v22094_v18  ;;  %v13112_v18 = vrot.slane %v13092_v19, 7  ;;  %v22196_v7 = vpack.c.bf16 %v14490_v33, %v14489_v39  ;;  %v14513_v13 = vld [vmem:[%s27167_s9 + $0x780] sm:$0xff]  ;;  %v14516_v39 = vld [vmem:[%s27167_s9 + $0x798] sm:$0xff] }
 0x8b8   :  { %22096 = vmatprep.subr.bf16.mxu1 %v27400_v27 }
 0x8b9   :  { %22074 = vmatpush3.bf16.msra.mxu0 %v22073_v28  ;;  %v14435_v28 = vld [vmem:[%s27167_s9 + $0x510] sm:$0xff]  ;;  %v13113_v2 = vsel %vm12182_vm8, %v13112_v18, %v13091_v46  ;;  %v13194_v18 = vld [vmem:[#allocation3 + $0x55] sm:$0x1] }
 0x8ba   :  { %22075 = vmatprep.subr.bf16.mxu0 %v27400_v27  ;;  %v13295_v46 = vld [vmem:[#allocation3 + $0x47] sm:$0x1] }
 0x8bb   :  { %22098 = vmatpush3.bf16.msra.mxu1 %v22097_v58  ;;  %v14436_v58 = vld [vmem:[%s27167_s9 + $0x518] sm:$0xff] }
 0x8bc   :  { %22099 = vmatprep.subr.bf16.mxu1 %v27400_v27 }
 0x8bd   :  { %22077 = vmatpush3.bf16.msra.mxu0 %v22076_v10  ;;  %v22115_v10 = vpack.c.bf16 %v14436_v58, %v14435_v28  ;;  %v13301_v28 = vld [vmem:[#allocation3 + $0x57] sm:$0x1] }
 0x8be   :  { %22078 = vmatprep.subr.bf16.mxu0 %v27400_v27 }
 0x8bf   :  { %22101 = vmatpush3.bf16.msra.mxu1 %v22100_v31  ;;  %v22139_v31 = vpack.c.bf16 %v14452_v40, %v14451_v61  ;;  %v13190_v61 = vmax.f32 %v13186_v47, %v13188_v51  ;;  %v13196_v40 = vmax.f32 %v13192_v4, %v13194_v18  ;;  %v13510_v51 = vld [vmem:[#allocation3 + $0xf3] sm:$0x1]  ;;  %v13516_v4 = vld [vmem:[#allocation3 + $0x103] sm:$0x1] }
 0x8c0   :  { %22102 = vmatprep.subr.bf16.mxu1 %v27400_v27 }
 0x8c1   :  { %22080 = vmatpush3.bf16.msra.mxu0 %v22079_v8  ;;  %v14456_v8 = vld [vmem:[%s27167_s9 + $0x5b8] sm:$0xff]  ;;  %v13198_v56 = vmax.f32 %v13190_v61, %v13196_v40 }
 0x8c2   :  { %22081 = vmatprep.subr.bf16.mxu0 %v27400_v27  ;;  %v22145_v1 = vpack.c.bf16 %v14456_v8, %v14455_v45  ;;  %v14480_v61 = vld [vmem:[%s27167_s9 + $0x678] sm:$0xff] }
 0x8c3   :  { %22104 = vmatpush3.bf16.msra.mxu1 %v22103_v11  ;;  %v14442_v11 = vld [vmem:[%s27167_s9 + $0x548] sm:$0xff] }
 0x8c4   :  { %22105 = vmatprep.subr.bf16.mxu1 %v27400_v27  ;;  %v22124_v54 = vpack.c.bf16 %v14442_v11, %v14441_v62  ;;  %v14483_v11 = vld [vmem:[%s27167_s9 + $0x690] sm:$0xff] }
 0x8c5   :  { %22083 = vmatpush3.bf16.msra.mxu0 %v22082_v43  ;;  %v13193_v43 = vld [vmem:[#allocation3 + $0xe4] sm:$0x1] }
 0x8c6   :  { %22084 = vmatprep.subr.bf16.mxu0 %v27400_v27  ;;  %v13197_v19 = vmax.f32 %v13193_v43, %v13195_v63  ;;  %v14471_v43 = vld [vmem:[%s27167_s9 + $0x630] sm:$0xff]  ;;  %v14472_v63 = vld [vmem:[%s27167_s9 + $0x638] sm:$0xff] }
 0x8c7   :  { %22107 = vmatpush3.bf16.msra.mxu1 %v22106_v20  ;;  %v13300_v20 = vld [vmem:[#allocation3 + $0xe6] sm:$0x1]  ;;  %v22169_v16 = vpack.c.bf16 %v14472_v63, %v14471_v43  ;;  %v22208_v63 = vpack.c.bf16 %v14498_v17, %v14497_v49 }
 0x8c8   :  { %22108 = vmatprep.subr.bf16.mxu1 %v27400_v27 }
 0x8c9   :  { %22086 = vmatpush3.bf16.msra.mxu0 %v22085_v52  ;;  %v14447_v52 = vld [vmem:[%s27167_s9 + $0x570] sm:$0xff] }
 0x8ca   :  { %22111 = vmatprep.subr.bf16.mxu0 %v27400_v27 }
 0x8cb   :  { %22110 = vmatpush3.bf16.msra.mxu1 %v22109_v25  ;;  %v13304_v25 = vmax.f32 %v13300_v20, %v13302_v14  ;;  %v14473_v14 = vld [vmem:[%s27167_s9 + $0x640] sm:$0xff] }
 0x8cc   :  { %22135 = vmatprep.subr.bf16.mxu1 %v27400_v27  ;;  %19867 = vmatmul.mubr.f32.vlgmr.msra.gmra.mrb[98].mxu0 %v13006_v44  ;;  %v22133_v44 = vpack.c.bf16 %v14448_v53, %v14447_v52  ;;  %v14491_v52 = vld [vmem:[%s27167_s9 + $0x6d0] sm:$0xff]  ;;  %v14492_v53 = vld [vmem:[%s27167_s9 + $0x6d8] sm:$0xff] }
 0x8cd   :  { %22113 = vmatpush3.bf16.msra.mxu0 %v22112_v6  ;;  %19936 = vmatprep.mubr.msk.f32.mxu0 %vm27401_vm1, %v26589_v48  ;;  %v13199_v6 = vmax.f32 %v13191_v26, %v13197_v19  ;;  %v13306_v58 = vmax.f32 %v13298_v57, %v13304_v25  ;;  %v14475_v26 = vld [vmem:[%s27167_s9 + $0x650] sm:$0xff]  ;;  %v14476_v19 = vld [vmem:[%s27167_s9 + $0x658] sm:$0xff]  ;;  %v13401_v57 = vld [vmem:[#allocation3 + $0xf0] sm:$0x1]  ;;  %v22199_v18 = vpack.c.bf16 %v14492_v53, %v14491_v52 }
 0x8ce   :  { %19902 = vmatmul.mubr.f32.vlgmr.msra.gmra.mrb[38].mxu1 %v13113_v2  ;;  %22114 = vmatprep.subr.bf16.mxu0 %v27400_v27  ;;  %v22157_v2 = vpack.c.bf16 %v14464_v0, %v14463_v15  ;;  %v13403_v25 = vld [vmem:[#allocation3 + $0xf1] sm:$0x1]  ;;  %v13409_v15 = vld [vmem:[#allocation3 + $0x101] sm:$0x1]  ;;  %v13508_v0 = vld [vmem:[#allocation3 + $0xf2] sm:$0x1]  ;;  %v22175_v47 = vpack.c.bf16 %v14476_v19, %v14475_v26 }
 0x8cf   :  { %22137 = vmatpush3.bf16.msra.mxu1 %v22136_v23  ;;  %19971 = vmatprep.mubr.msk.f32.mxu1 %vm27401_vm1, %v26589_v48  ;;  %v13299_v23 = vld [vmem:[#allocation3 + $0x56] sm:$0x1]  ;;  %v13219_v50 = vrot.slane %v13199_v6, 7  ;;  %v14478_v6 = vld [vmem:[%s27167_s9 + $0x668] sm:$0xff]  ;;  %v13512_v40 = vmax.f32 %v13508_v0, %v13510_v51  ;;  %v14520_v0 = vld [vmem:[%s27167_s9 + $0x7b8] sm:$0xff] }
 0x8d0   :  { %22138 = vmatprep.subr.bf16.mxu1 %v27400_v27  ;;  %v14501_v26 = vld [vmem:[%s27167_s9 + $0x720] sm:$0xff]  ;;  %v14502_v19 = vld [vmem:[%s27167_s9 + $0x728] sm:$0xff] }
 0x8d1   :  { %22116 = vmatpush3.bf16.msra.mxu0 %v22115_v10  ;;  %v13297_v10 = vmax.f32 %v13293_v32, %v13295_v46  ;;  %v13220_v62 = vsel %vm12182_vm8, %v13219_v50, %v13198_v56  ;;  %v14477_v32 = vld [vmem:[%s27167_s9 + $0x660] sm:$0xff]  ;;  %v13402_v50 = vld [vmem:[#allocation3 + $0x61] sm:$0x1]  ;;  %v13507_v56 = vld [vmem:[#allocation3 + $0x62] sm:$0x1] }
 0x8d2   :  { %22117 = vmatprep.subr.bf16.mxu0 %v27400_v27  ;;  %v14493_v46 = vld [vmem:[%s27167_s9 + $0x6e0] sm:$0xff]  ;;  %v14518_v53 = vld [vmem:[%s27167_s9 + $0x7a8] sm:$0xff] }
 0x8d3   :  { %22140 = vmatpush3.bf16.msra.mxu1 %v22139_v31  ;;  %v13303_v31 = vmax.f32 %v13299_v23, %v13301_v28  ;;  %v14494_v23 = vld [vmem:[%s27167_s9 + $0x6e8] sm:$0xff]  ;;  %v13405_v28 = vmax.f32 %v13401_v57, %v13403_v25  ;;  %v14517_v52 = vld [vmem:[%s27167_s9 + $0x7a0] sm:$0xff]  ;;  %v22214_v57 = vpack.c.bf16 %v14502_v19, %v14501_v26 }
 0x8d4   :  { %22141 = vmatprep.subr.bf16.mxu1 %v27400_v27  ;;  %v22238_v25 = vpack.c.bf16 %v14518_v53, %v14517_v52 }
 0x8d5   :  { %22119 = vmatpush3.bf16.msra.mxu0 %v22118_v9  ;;  %v14482_v9 = vld [vmem:[%s27167_s9 + $0x688] sm:$0xff]  ;;  %v13305_v45 = vmax.f32 %v13297_v10, %v13303_v31  ;;  %v22178_v10 = vpack.c.bf16 %v14478_v6, %v14477_v32  ;;  %v14495_v31 = vld [vmem:[%s27167_s9 + $0x6f0] sm:$0xff] }
 0x8d6   :  { %22120 = vmatprep.subr.bf16.mxu0 %v27400_v27  ;;  %v22184_v8 = vpack.c.bf16 %v14482_v9, %v14481_v60  ;;  %v22202_v60 = vpack.c.bf16 %v14494_v23, %v14493_v46  ;;  %v13406_v9 = vld [vmem:[#allocation3 + $0x70] sm:$0x1]  ;;  %v14522_v32 = vld [vmem:[%s27167_s9 + $0x7c8] sm:$0xff]  ;;  %v14507_v23 = vld [vmem:[%s27167_s9 + $0x750] sm:$0xff] }
 0x8d7   :  { %22143 = vmatpush3.bf16.msra.mxu1 %v22142_v12  ;;  %v13326_v12 = vrot.slane %v13306_v58, 7 }
 0x8d8   :  { %22144 = vmatprep.subr.bf16.mxu1 %v27400_v27 }
 0x8d9   :  { %22122 = vmatpush3.bf16.msra.mxu0 %v22121_v21  ;;  %v14467_v21 = vld [vmem:[%s27167_s9 + $0x610] sm:$0xff]  ;;  %v13327_v36 = vsel %vm12182_vm8, %v13326_v12, %v13305_v45  ;;  %v13408_v12 = vld [vmem:[#allocation3 + $0x71] sm:$0x1] }
 0x8da   :  { %22123 = vmatprep.subr.bf16.mxu0 %v27400_v27  ;;  %v13509_v45 = vld [vmem:[#allocation3 + $0x63] sm:$0x1] }
 0x8db   :  { %22146 = vmatpush3.bf16.msra.mxu1 %v22145_v1  ;;  %v14468_v1 = vld [vmem:[%s27167_s9 + $0x618] sm:$0xff] }
 0x8dc   :  { %22147 = vmatprep.subr.bf16.mxu1 %v27400_v27 }
 0x8dd   :  { %22125 = vmatpush3.bf16.msra.mxu0 %v22124_v54  ;;  %v22163_v54 = vpack.c.bf16 %v14468_v1, %v14467_v21  ;;  %v13515_v21 = vld [vmem:[#allocation3 + $0x73] sm:$0x1] }
 0x8de   :  { %22126 = vmatprep.subr.bf16.mxu0 %v27400_v27 }
 0x8df   :  { %22149 = vmatpush3.bf16.msra.mxu1 %v22148_v30  ;;  %v22187_v30 = vpack.c.bf16 %v14484_v3, %v14483_v11  ;;  %v13404_v11 = vmax.f32 %v13400_v5, %v13402_v50  ;;  %v13410_v3 = vmax.f32 %v13406_v9, %v13408_v12  ;;  %v13724_v5 = vld [vmem:[#allocation3 + $0xf7] sm:$0x1]  ;;  %v13728_v50 = vld [vmem:[#allocation3 + $0x106] sm:$0x1] }
 0x8e0   :  { %22150 = vmatprep.subr.bf16.mxu1 %v27400_v27  ;;  %v14509_v12 = vld [vmem:[%s27167_s9 + $0x760] sm:$0xff] }
 0x8e1   :  { %22128 = vmatpush3.bf16.msra.mxu0 %v22127_v41  ;;  %v14488_v41 = vld [vmem:[%s27167_s9 + $0x6b8] sm:$0xff]  ;;  %v13412_v43 = vmax.f32 %v13404_v11, %v13410_v3  ;;  %v14511_v3 = vld [vmem:[%s27167_s9 + $0x770] sm:$0xff] }
 0x8e2   :  { %22129 = vmatprep.subr.bf16.mxu0 %v27400_v27  ;;  %v22193_v20 = vpack.c.bf16 %v14488_v41, %v14487_v29 }
 0x8e3   :  { %22152 = vmatpush3.bf16.msra.mxu1 %v22151_v59  ;;  %v14474_v59 = vld [vmem:[%s27167_s9 + $0x648] sm:$0xff] }
 0x8e4   :  { %22153 = vmatprep.subr.bf16.mxu1 %v27400_v27  ;;  %v22172_v37 = vpack.c.bf16 %v14474_v59, %v14473_v14  ;;  %v14515_v59 = vld [vmem:[%s27167_s9 + $0x790] sm:$0xff] }
 0x8e5   :  { %22131 = vmatpush3.bf16.msra.mxu0 %v22130_v24  ;;  %v13407_v24 = vld [vmem:[#allocation3 + $0x100] sm:$0x1] }
 0x8e6   :  { %22132 = vmatprep.subr.bf16.mxu0 %v27400_v27  ;;  %v13411_v58 = vmax.f32 %v13407_v24, %v13409_v15  ;;  %v14503_v24 = vld [vmem:[%s27167_s9 + $0x730] sm:$0xff]  ;;  %v14504_v15 = vld [vmem:[%s27167_s9 + $0x738] sm:$0xff] }
 0x8e7   :  { %22155 = vmatpush3.bf16.msra.mxu1 %v22154_v35  ;;  %v13514_v35 = vld [vmem:[#allocation3 + $0x102] sm:$0x1] }
 0x8e8   :  { %22156 = vmatprep.subr.bf16.mxu1 %v27400_v27 }
 0x8e9   :  { %22134 = vmatpush3.bf16.msra.mxu0 %v22133_v44  ;;  %v14479_v44 = vld [vmem:[%s27167_s9 + $0x670] sm:$0xff] }
 0x8ea   :  { %22159 = vmatprep.subr.bf16.mxu0 %v27400_v27 }
 0x8eb   :  { %22158 = vmatpush3.bf16.msra.mxu1 %v22157_v2  ;;  %v13518_v2 = vmax.f32 %v13514_v35, %v13516_v4  ;;  %v14505_v35 = vld [vmem:[%s27167_s9 + $0x740] sm:$0xff]  ;;  %v14506_v4 = vld [vmem:[%s27167_s9 + $0x748] sm:$0xff] }
 0x8ec   :  { %22183 = vmatprep.subr.bf16.mxu1 %v27400_v27  ;;  %19937 = vmatmul.mubr.f32.vlgmr.msra.gmra.mrb[100].mxu0 %v13220_v62  ;;  %v22181_v62 = vpack.c.bf16 %v14480_v61, %v14479_v44  ;;  %v22220_v6 = vpack.c.bf16 %v14506_v4, %v14505_v35  ;;  %v14524_v44 = vld [vmem:[%s27167_s9 + $0x7d8] sm:$0xff]  ;;  %v13615_v61 = vld [vmem:[#allocation3 + $0xf4] sm:$0x1] }
 0x8ed   :  { %22161 = vmatpush3.bf16.msra.mxu0 %v22160_v34  ;;  %20006 = vmatprep.mubr.msk.f32.mxu0 %vm27401_vm1, %v26589_v48  ;;  %v13413_v34 = vmax.f32 %v13405_v28, %v13411_v58  ;;  %v13520_v1 = vmax.f32 %v13512_v40, %v13518_v2  ;;  %v14508_v28 = vld [vmem:[%s27167_s9 + $0x758] sm:$0xff]  ;;  %v14523_v58 = vld [vmem:[%s27167_s9 + $0x7d0] sm:$0xff]  ;;  %v13617_v40 = vld [vmem:[#allocation3 + $0xf5] sm:$0x1] }
 0x8ee   :  { %19972 = vmatmul.mubr.f32.vlgmr.msra.gmra.mrb[40].mxu1 %v13327_v36  ;;  %22162 = vmatprep.subr.bf16.mxu0 %v27400_v27  ;;  %v22205_v36 = vpack.c.bf16 %v14496_v42, %v14495_v31  ;;  %v13621_v2 = vld [vmem:[#allocation3 + $0x104] sm:$0x1]  ;;  %v13722_v31 = vld [vmem:[#allocation3 + $0xf6] sm:$0x1]  ;;  %v22223_v42 = vpack.c.bf16 %v14508_v28, %v14507_v23  ;;  %v22247_v9 = vpack.c.bf16 %v14524_v44, %v14523_v58 }
 0x8ef   :  { %22185 = vmatpush3.bf16.msra.mxu1 %v22184_v8  ;;  %20041 = vmatprep.mubr.msk.f32.mxu1 %vm27401_vm1, %v26589_v48  ;;  %v13513_v8 = vld [vmem:[#allocation3 + $0x72] sm:$0x1]  ;;  %v13433_v38 = vrot.slane %v13413_v34, 7 }
 0x8f0   :  { %22186 = vmatprep.subr.bf16.mxu1 %v27400_v27 }
 0x8f1   :  { %22164 = vmatpush3.bf16.msra.mxu0 %v22163_v54  ;;  %v13511_v54 = vmax.f32 %v13507_v56, %v13509_v45  ;;  %v13434_v14 = vsel %vm12182_vm8, %v13433_v38, %v13412_v43  ;;  %v14510_v56 = vld [vmem:[%s27167_s9 + $0x768] sm:$0xff]  ;;  %v14525_v45 = vld [vmem:[%s27167_s9 + $0x7e0] sm:$0xff]  ;;  %v13616_v43 = vld [vmem:[#allocation3 + $0x65] sm:$0x1] }
 0x8f2   :  { %22165 = vmatprep.subr.bf16.mxu0 %v27400_v27  ;;  %v22226_v38 = vpack.c.bf16 %v14510_v56, %v14509_v12 }
 0x8f3   :  { %22188 = vmatpush3.bf16.msra.mxu1 %v22187_v30  ;;  %v13517_v30 = vmax.f32 %v13513_v8, %v13515_v21  ;;  %v14526_v8 = vld [vmem:[%s27167_s9 + $0x7e8] sm:$0xff]  ;;  %v13619_v21 = vmax.f32 %v13615_v61, %v13617_v40 }
 0x8f4   :  { %22189 = vmatprep.subr.bf16.mxu1 %v27400_v27 }
 0x8f5   :  { %22167 = vmatpush3.bf16.msra.mxu0 %v22166_v22  ;;  %v14514_v22 = vld [vmem:[%s27167_s9 + $0x788] sm:$0xff]  ;;  %v13519_v29 = vmax.f32 %v13511_v54, %v13517_v30  ;;  %v13726_v54 = vmax.f32 %v13722_v31, %v13724_v5 }
 0x8f6   :  { %22168 = vmatprep.subr.bf16.mxu0 %v27400_v27  ;;  %v22232_v41 = vpack.c.bf16 %v14514_v22, %v14513_v13  ;;  %v14527_v13 = vld [vmem:[%s27167_s9 + $0x7f0] sm:$0xff]  ;;  %v14528_v22 = vld [vmem:[%s27167_s9 + $0x7f8] sm:$0xff] }
 0x8f7   :  { %22191 = vmatpush3.bf16.msra.mxu1 %v22190_v55  ;;  %v13540_v55 = vrot.slane %v13520_v1, 7  ;;  %v22253_v19 = vpack.c.bf16 %v14528_v22, %v14527_v13 }
 0x8f8   :  { %22192 = vmatprep.subr.bf16.mxu1 %v27400_v27 }
 0x8f9   :  { %22170 = vmatpush3.bf16.msra.mxu0 %v22169_v16  ;;  %v14499_v16 = vld [vmem:[%s27167_s9 + $0x710] sm:$0xff]  ;;  %v13541_v33 = vsel %vm12182_vm8, %v13540_v55, %v13519_v29  ;;  %v13620_v29 = vld [vmem:[#allocation3 + $0x74] sm:$0x1] }
 0x8fa   :  { %22171 = vmatprep.subr.bf16.mxu0 %v27400_v27  ;;  %v13614_v55 = vld [vmem:[#allocation3 + $0x64] sm:$0x1] }
 0x8fb   :  { %22194 = vmatpush3.bf16.msra.mxu1 %v22193_v20  ;;  %v14500_v20 = vld [vmem:[%s27167_s9 + $0x718] sm:$0xff] }
 0x8fc   :  { %22195 = vmatprep.subr.bf16.mxu1 %v27400_v27 }
 0x8fd   :  { %22173 = vmatpush3.bf16.msra.mxu0 %v22172_v37  ;;  %v22211_v37 = vpack.c.bf16 %v14500_v20, %v14499_v16  ;;  %v13721_v16 = vld [vmem:[#allocation3 + $0x66] sm:$0x1] }
 0x8fe   :  { %22174 = vmatprep.subr.bf16.mxu0 %v27400_v27 }
 0x8ff   :  { %22197 = vmatpush3.bf16.msra.mxu1 %v22196_v7  ;;  %v22235_v7 = vpack.c.bf16 %v14516_v39, %v14515_v59  ;;  %v13727_v59 = vld [vmem:[#allocation3 + $0x76] sm:$0x1]  ;;  %v13729_v39 = vld [vmem:[#allocation3 + $0x77] sm:$0x1] }
 0x900   :  { %22198 = vmatprep.subr.bf16.mxu1 %v27400_v27  ;;  %v13731_v53 = vmax.f32 %v13727_v59, %v13729_v39 }
 0x901   :  { %22176 = vmatpush3.bf16.msra.mxu0 %v22175_v47  ;;  %v22217_v47 = vpack.c.bf16 %v14504_v15, %v14503_v24 }
 0x902   :  { %22177 = vmatprep.subr.bf16.mxu0 %v27400_v27 }
 0x903   :  { %22200 = vmatpush3.bf16.msra.mxu1 %v22199_v18  ;;  %v14521_v18 = vld [vmem:[%s27167_s9 + $0x7c0] sm:$0xff] }
 0x904   :  { %22201 = vmatprep.subr.bf16.mxu1 %v27400_v27  ;;  %v22244_v46 = vpack.c.bf16 %v14522_v32, %v14521_v18 }
 0x905   :  { %22179 = vmatpush3.bf16.msra.mxu0 %v22178_v10  ;;  %v13623_v10 = vld [vmem:[#allocation3 + $0x105] sm:$0x1] }
 0x906   :  { %22180 = vmatprep.subr.bf16.mxu0 %v27400_v27  ;;  %v13625_v1 = vmax.f32 %v13621_v2, %v13623_v10 }
 0x907   :  { %22203 = vmatpush3.bf16.msra.mxu1 %v22202_v60  ;;  %v13730_v60 = vld [vmem:[#allocation3 + $0x107] sm:$0x1] }
 0x908   :  { %22204 = vmatprep.subr.bf16.mxu1 %v27400_v27  ;;  %v13732_v30 = vmax.f32 %v13728_v50, %v13730_v60  ;;  %v13627_v20 = vmax.f32 %v13619_v21, %v13625_v1 }
 0x909   :  { %22182 = vmatpush3.bf16.msra.mxu0 %v22181_v62 }
 0x90a   :  { %22207 = vmatprep.subr.bf16.mxu0 %v27400_v27 }
 0x90b   :  { %22206 = vmatpush3.bf16.msra.mxu1 %v22205_v36  ;;  %v14512_v36 = vld [vmem:[%s27167_s9 + $0x778] sm:$0xff] }
 0x90c   :  { %22231 = vmatprep.subr.bf16.mxu1 %v27400_v27  ;;  %20007 = vmatmul.mubr.f32.vlgmr.msra.gmra.mrb[102].mxu0 %v13434_v14  ;;  %v13723_v14 = vld [vmem:[#allocation3 + $0x67] sm:$0x1] }
 0x90d   :  { %22209 = vmatpush3.bf16.msra.mxu0 %v22208_v63  ;;  %20076 = vmatprep.mubr.msk.f32.mxu0 %vm27401_vm1, %v26589_v48  ;;  %v22250_v63 = vpack.c.bf16 %v14526_v8, %v14525_v45  ;;  %v13725_v52 = vmax.f32 %v13721_v16, %v13723_v14 }
 0x90e   :  { %20042 = vmatmul.mubr.f32.vlgmr.msra.gmra.mrb[42].mxu1 %v13541_v33  ;;  %22210 = vmatprep.subr.bf16.mxu0 %v27400_v27  ;;  %v13734_v33 = vmax.f32 %v13726_v54, %v13732_v30 }
 0x90f   :  { %22233 = vmatpush3.bf16.msra.mxu1 %v22232_v41  ;;  %20111 = vmatprep.mubr.msk.f32.mxu1 %vm27401_vm1, %v26589_v48  ;;  %v14519_v48 = vld [vmem:[%s27167_s9 + $0x7b0] sm:$0xff]  ;;  %v13622_v41 = vld [vmem:[#allocation3 + $0x75] sm:$0x1]  ;;  %v13733_v15 = vmax.f32 %v13725_v52, %v13731_v53 }
 0x910   :  { %22234 = vmatprep.subr.bf16.mxu1 %v27400_v27  ;;  %v22241_v51 = vpack.c.bf16 %v14520_v0, %v14519_v48  ;;  %v13624_v26 = vmax.f32 %v13620_v29, %v13622_v41 }
 0x911   :  { %22212 = vmatpush3.bf16.msra.mxu0 %v22211_v37  ;;  %v22229_v37 = vpack.c.bf16 %v14512_v36, %v14511_v3 }
 0x912   :  { %22213 = vmatprep.subr.bf16.mxu0 %v27400_v27 }
 0x913   :  { %22236 = vmatpush3.bf16.msra.mxu1 %v22235_v7  ;;  %v13618_v7 = vmax.f32 %v13614_v55, %v13616_v43  ;;  %v14529_v55 = vld [vmem:[%s27168_s10] ss:$0 sm:$0xff] }
 0x914   :  { %22237 = vmatprep.subr.bf16.mxu1 %v27400_v27 }
 0x915   :  { %22215 = vmatpush3.bf16.msra.mxu0 %v22214_v57  ;;  %v13647_v57 = vrot.slane %v13627_v20, 7  ;;  %v13626_v24 = vmax.f32 %v13618_v7, %v13624_v26 }
 0x916   :  { %22216 = vmatprep.subr.bf16.mxu0 %v27400_v27 }
 0x917   :  { %22239 = vmatpush3.bf16.msra.mxu1 %v22238_v25  ;;  %v13754_v25 = vrot.slane %v13734_v33, 7  ;;  %v13648_v48 = vsel %vm12182_vm8, %v13647_v57, %v13626_v24 }
 0x918   :  { %22240 = vmatprep.subr.bf16.mxu1 %v27400_v27 }
 0x919   :  { %22218 = vmatpush3.bf16.msra.mxu0 %v22217_v47  ;;  %v13755_v0 = vsel %vm12182_vm8, %v13754_v25, %v13733_v15 }
 0x91a   :  { %22219 = vmatprep.subr.bf16.mxu0 %v27400_v27 }
 0x91b   :  { %22242 = vmatpush3.bf16.msra.mxu1 %v22241_v51 }
 0x91c   :  { %22243 = vmatprep.subr.bf16.mxu1 %v27400_v27 }
 0x91d   :  { %22221 = vmatpush3.bf16.msra.mxu0 %v22220_v6 }
 0x91e   :  { %22222 = vmatprep.subr.bf16.mxu0 %v27400_v27 }
 0x91f   :  { %22245 = vmatpush3.bf16.msra.mxu1 %v22244_v46  ;;  %v12251_v34 = vpop.f32.mrb[90].mxu0 }
 0x920   :  { %22246 = vmatprep.subr.bf16.mxu1 %v27400_v27  ;;  %v19588_v11 = vpop.f32.mrb[91].mxu0 }
 0x921   :  { %v12326_v62 = vpop.f32.mrb[30].mxu1  ;;  %22224 = vmatpush3.bf16.msra.mxu0 %v22223_v42 }
 0x922   :  { %v12327_v49 = vadd.f32 %v12326_v62, %v12251_v34  ;;  %v19623_v17 = vpop.f32.mrb[31].mxu1  ;;  %22225 = vmatprep.subr.bf16.mxu0 %v27400_v27 }
 0x923   :  { %22248 = vmatpush3.bf16.msra.mxu1 %v22247_v9 }
 0x924   :  { %22249 = vmatprep.subr.bf16.mxu1 %v27400_v27 }
 0x925   :  { %22227 = vmatpush3.bf16.msra.mxu0 %v22226_v38 }
 0x926   :  { %22228 = vmatprep.subr.bf16.mxu0 %v27400_v27 }
 0x927   :  { %22251 = vmatpush3.bf16.msra.mxu1 %v22250_v63 }
 0x928   :  { %22252 = vmatprep.subr.bf16.mxu1 %v27400_v27 }
 0x929   :  { %22230 = vmatpush3.bf16.msra.mxu0 %v22229_v37 }
 0x92b   :  { %22254 = vmatpush3.bf16.msra.mxu1 %v22253_v19 }
 0x92c   :  { %20077 = vmatmul.mubr.f32.vlgmr.msra.gmra.mrb[104].mxu0 %v13648_v48 }
 0x92e   :  { %20112 = vmatmul.mubr.f32.vlgmr.msra.gmra.mrb[44].mxu1 %v13755_v0 }
 0x93f   :  { %v12432_v47 = vpop.f32.mrb[92].mxu0 }
 0x940   :  { %v12436_v51 = vadd.f32 %v12432_v47, %v12327_v49  ;;  %v19658_v4 = vpop.f32.mrb[93].mxu0 }
 0x941   :  { %v12539_v35 = vpop.f32.mrb[32].mxu1 }
 0x942   :  { %v19693_v18 = vpop.f32.mrb[33].mxu1  ;;  %v12543_v32 = vadd.f32 %v12539_v35, %v12436_v51 }
 0x95f   :  { %v12646_v6 = vpop.f32.mrb[94].mxu0 }
 0x960   :  { %v12650_v27 = vadd.f32 %v12646_v6, %v12543_v32  ;;  %v19728_v23 = vpop.f32.mrb[95].mxu0 }
 0x961   :  { %v12753_v46 = vpop.f32.mrb[34].mxu1 }
 0x962   :  { %v19763_v28 = vpop.f32.mrb[35].mxu1  ;;  %v12757_v58 = vadd.f32 %v12753_v46, %v12650_v27 }
 0x97f   :  { %v12860_v44 = vpop.f32.mrb[96].mxu0 }
 0x980   :  { %v12864_v61 = vadd.f32 %v12860_v44, %v12757_v58  ;;  %v19798_v2 = vpop.f32.mrb[97].mxu0 }
 0x981   :  { %v12967_v40 = vpop.f32.mrb[36].mxu1 }
 0x982   :  { %v19833_v10 = vpop.f32.mrb[37].mxu1  ;;  %v12971_v31 = vadd.f32 %v12967_v40, %v12864_v61 }
 0x99f   :  { %v13074_v42 = vpop.f32.mrb[98].mxu0 }
 0x9a0   :  { %v13078_v5 = vadd.f32 %v13074_v42, %v12971_v31  ;;  %v19868_v60 = vpop.f32.mrb[99].mxu0 }
 0x9a1   :  { %v13181_v50 = vpop.f32.mrb[38].mxu1 }
 0x9a2   :  { %v19903_v9 = vpop.f32.mrb[39].mxu1  ;;  %v13185_v12 = vadd.f32 %v13181_v50, %v13078_v5 }
 0x9bf   :  { %v13288_v56 = vpop.f32.mrb[100].mxu0 }
 0x9c0   :  { %v13292_v34 = vadd.f32 %v13288_v56, %v13185_v12  ;;  %v19938_v8 = vpop.f32.mrb[101].mxu0 }
 0x9c1   :  { %v13395_v45 = vpop.f32.mrb[40].mxu1 }
 0x9c2   :  { %v19973_v21 = vpop.f32.mrb[41].mxu1  ;;  %v13399_v1 = vadd.f32 %v13395_v45, %v13292_v34 }
 0x9df   :  { %v13502_v62 = vpop.f32.mrb[102].mxu0 }
 0x9e0   :  { %v13506_v11 = vadd.f32 %v13502_v62, %v13399_v1  ;;  %v20008_v36 = vpop.f32.mrb[103].mxu0 }
 0x9e1   :  { %v13609_v3 = vpop.f32.mrb[42].mxu1 }
 0x9e2   :  { %v20043_v54 = vpop.f32.mrb[43].mxu1  ;;  %v13613_v30 = vadd.f32 %v13609_v3, %v13506_v11 }
 0x9ff   :  { %v13716_v49 = vpop.f32.mrb[104].mxu0 }
 0xa00   :  { %v13720_v17 = vadd.f32 %v13716_v49, %v13613_v30  ;;  %v20078_v13 = vpop.f32.mrb[105].mxu0 }
 0xa01   :  { %v13823_v38 = vpop.f32.mrb[44].mxu1 }
 0xa02   :  { %v20113_v22 = vpop.f32.mrb[45].mxu1  ;;  %v13827_v43 = vadd.f32 %v13823_v38, %v13720_v17 }
 0xa04   :  { %v13835_v63 = vadd.f32 %v14529_v55, %v13827_v43 }
 0xa06   :  { %13836 = vst [vmem:[#allocation4] sm:$0x3] %v13835_v63 }
 0xa07   :  { %23161 = shalt.err (!%p23158_p4)
}
 0xa08   :  { %s23162_s14 = scalar_lea.hbm %s27169_s11, 32 }
 0xa09   :  { %p23163_p5 = scmp.ne.s32.totalorder %s27169_s11, %s23162_s14  ;;  %p23166_p6 = scmp.lt.u32.totalorder %s23162_s14, %s27169_s11 }
 0xa0b   :  { %p23168_p7 = pnand %p23166_p6, %p23163_p5 }
 0xa0d   :  { %23171 = shalt.err (!%p23168_p7)
}
 0xa0e   :  { %13846 = dma.vmem_to_hbm [thread:$0]  %s13844_s29, 32, %s27169_s11, [#allocation5]  }
 0xa0f   :  { %23172 = dma.done.wait [#allocation5], 32  }
 0xa10   :  { %23173 = vsyncadd [#allocation5], 4294967264 }
 0xa11   :  { %13850 = vsyncpa [#allocation5], 1 }

</bundles_post_ra>
